<compile_context>
chip_gen: v7x
topology: tpu7x:2x2x1
jax: 0.10.0
libtpu: 0.0.40
codegen_flags: <defaults>
</compile_context>

<pallas_src>
import functools

import jax
import jax.numpy as jnp
from jax import lax
from jax.experimental import pallas as pl
from jax.experimental.pallas import tpu as pltpu

# ---------------- small config (shapes consistent with Rewriter.__init__) -------------
VOCAB = 16
EMB = 64              # emb_dim; must equal 2 * ATT_PROJ because cls.weight is tied to char_emb
ENC_LAYERS = 2
ENC_HID = 32          # bidirectional -> encoder output dim 2*ENC_HID = 64
ATT_PROJ = 32
ATT_HEADS = 4
HEAD_DIM = ATT_PROJ // ATT_HEADS
DEC_HID = 64
DEC_OUT = 32
PAD_IDX = 15
SOS_IDX = 0
MAX_STEPS = 6         # CHR_MAX_STEPS (kept small for the demo)
B = 2
T = 8


def _specs(*shapes):
    """Full-array BlockSpecs (no grid -> whole tensor resident in VMEM)."""
    return [pl.BlockSpec(s, lambda s=s: (0,) * len(s)) for s in shapes]


# --------------------------------- Pallas kernels -------------------------------------
def _bilstm_layer_kernel(xflat_ref, wih_ref, whhf_ref, whhb_ref, b_ref,
                         hf_ref, hb_ref, xg_ref):
    """One BiLSTM layer: fwd+bwd recurrences fused, input projection hoisted.

    xflat_ref: (T*B, Din)          wih_ref: (Din, 8H) = [Wih_fwd | Wih_bwd]
    whhf_ref / whhb_ref: (H, 4H)   b_ref: (1, 8H) = [b_fwd | b_bwd]
    outputs: hf_ref / hb_ref: (T, B, H)   scratch xg_ref: (T*B, 8H)
    """
    Tn, Bn, H = hf_ref.shape
    G = 4 * H

    # hoisted input projection for BOTH directions: one (T*B, Din) @ (Din, 8H) matmul
    xg_ref[...] = (jnp.dot(xflat_ref[...], wih_ref[...],
                           preferred_element_type=jnp.float32) + b_ref[...])

    whh_f = whhf_ref[...]
    whh_b = whhb_ref[...]

    def cell(gates, c):
        i = jax.nn.sigmoid(gates[:, 0:H])
        f = jax.nn.sigmoid(gates[:, H:2 * H])
        g = jnp.tanh(gates[:, 2 * H:3 * H])
        o = jax.nn.sigmoid(gates[:, 3 * H:4 * H])
        c_new = f * c + i * g
        return o * jnp.tanh(c_new), c_new

    def body(t, carry):
        h_f, c_f, h_b, c_b = carry
        rt = Tn - 1 - t
        xg_t = xg_ref[pl.ds(t * Bn, Bn), :]     # fwd input gates at time t
        xg_r = xg_ref[pl.ds(rt * Bn, Bn), :]    # bwd input gates at time T-1-t
        g_f = xg_t[:, 0:G] + jnp.dot(h_f, whh_f, preferred_element_type=jnp.float32)
        g_b = xg_r[:, G:2 * G] + jnp.dot(h_b, whh_b, preferred_element_type=jnp.float32)
        h_f, c_f = cell(g_f, c_f)
        h_b, c_b = cell(g_b, c_b)
        hf_ref[t] = h_f
        hb_ref[rt] = h_b
        return (h_f, c_f, h_b, c_b)

    z = jnp.zeros((Bn, H), jnp.float32)
    lax.fori_loop(0, Tn, body, (z, z, z, z), unroll=True)


def _linear_kernel(x_ref, w_ref, b_ref, o_ref):
    o_ref[...] = (jnp.dot(x_ref[...], w_ref[...], preferred_element_type=jnp.float32)
                  + b_ref[...])


def linear(x, w, b):
    out_shape = (x.shape[0], w.shape[1])
    return pl.pallas_call(
        _linear_kernel,
        out_shape=jax.ShapeDtypeStruct(out_shape, jnp.float32),
        in_specs=_specs(x.shape, w.shape, b.shape),
        out_specs=_specs(out_shape)[0],
    )(x, w, b)


def _decoder_kernel(kblk_ref, vblk_ref, maskx_ref, emb_ref, embt_ref, clsb_ref, wq_ref,
                    w1ih_ref, w1hh_ref, b1_ref, w2ih_ref, w2hh_ref, b2_ref,
                    initq_ref, h10_ref, c10_ref, h20_ref, c20_ref,
                    logits_ref, attmap_ref, *, heads, sos_idx):
    """Entire greedy decoder loop in one kernel (weights + K/V + emb stay in VMEM)."""
    max_steps, Bn, V = logits_ref.shape
    Tn = attmap_ref.shape[2]
    P = wq_ref.shape[1]
    H1 = w1hh_ref.shape[0]
    H2 = w2hh_ref.shape[0]
    E = emb_ref.shape[1]
    head_dim = P // heads
    scale = 1.0 / (float(head_dim) ** 0.5)

    Kblk = kblk_ref[...]           # (B, P, heads*T) block-diagonal (per-head) keys
    Vblk = vblk_ref[...]           # (B, heads*T, P) block-diagonal (per-head) values
    mask_x = maskx_ref[...]        # (B, heads*T) additive -1e9 mask, tiled per head
    emb = emb_ref[...]             # (V, E) embedding table (tied classifier weight)
    cls_w = embt_ref[...]          # (E, V) = emb.T
    cls_b = clsb_ref[...]
    wq = wq_ref[...]
    w1ih, w1hh, b1 = w1ih_ref[...], w1hh_ref[...], b1_ref[...]
    w2ih, w2hh, b2 = w2ih_ref[...], w2hh_ref[...], b2_ref[...]

    def attend(q):
        pq = jnp.dot(q, wq, preferred_element_type=jnp.float32)               # (B, P)
        # all heads with ONE batched matmul (block-diagonal keys)
        s = jnp.einsum('bqp,bpx->bqx', pq[:, None, :], Kblk,
                       preferred_element_type=jnp.float32)[:, 0, :]           # (B, heads*T)
        s = s * scale + mask_x
        w_parts = []
        for hh in range(heads):                                               # per-head softmax (VPU only)
            sl = s[:, hh * Tn:(hh + 1) * Tn]
            m = jnp.max(sl, axis=-1, keepdims=True)
            e = jnp.exp(sl - m)
            w_parts.append(e / jnp.sum(e, axis=-1, keepdims=True))
        w = jnp.concatenate(w_parts, axis=-1)                                 # (B, heads*T)
        # all-head context with ONE batched matmul (block-diagonal values)
        ctx = jnp.einsum('bqx,bxp->bqp', w[:, None, :], Vblk,
                         preferred_element_type=jnp.float32)[:, 0, :]         # (B, P)
        w_avg = sum(w_parts) * (1.0 / heads)                                  # (B, T) head-mean
        return ctx, w_avg, pq

    def lstm_cell(x, h, c, wih, whh, b, H):
        g = (jnp.dot(x, wih, preferred_element_type=jnp.float32)
             + jnp.dot(h, whh, preferred_element_type=jnp.float32) + b)
        i = jax.nn.sigmoid(g[:, 0:H])
        f = jax.nn.sigmoid(g[:, H:2 * H])
        gg = jnp.tanh(g[:, 2 * H:3 * H])
        o = jax.nn.sigmoid(g[:, 3 * H:4 * H])
        c_new = f * c + i * gg
        return o * jnp.tanh(c_new), c_new

    # initial attention with the learned init query
    q0 = jnp.broadcast_to(initq_ref[...], (Bn, H2))
    ctx, w_avg, _ = attend(q0)
    attmap_ref[0] = w_avg

    h1 = jnp.broadcast_to(h10_ref[...], (Bn, H1))
    c1 = jnp.broadcast_to(c10_ref[...], (Bn, H1))
    h2 = jnp.broadcast_to(h20_ref[...], (Bn, H2))
    c2 = jnp.broadcast_to(c20_ref[...], (Bn, H2))
    ce = jnp.broadcast_to(emb[sos_idx:sos_idx + 1, :], (Bn, E))               # SOS embedding

    col = lax.broadcasted_iota(jnp.int32, (Bn, V), 1)

    def body(t, carry):
        ce, h1, c1, h2, c2, ctx = carry
        x1 = jnp.concatenate([ce, ctx], axis=-1)                              # (B, E + P)
        h1, c1 = lstm_cell(x1, h1, c1, w1ih, w1hh, b1, H1)
        # TODO(synk): dec_mid_dropout between the two decoder cells is identity (eval mode)
        h2, c2 = lstm_cell(h1, h2, c2, w2ih, w2hh, b2, H2)
        ctx, w_avg, pq = attend(h2)                                           # query = hiddens[-1][0]
        dec_out = jnp.concatenate([pq, ctx], axis=-1)                         # (B, 2P = E)
        logits = jnp.dot(dec_out, cls_w, preferred_element_type=jnp.float32) + cls_b
        logits_ref[t] = logits
        attmap_ref[t + 1] = w_avg
        # greedy argmax (first-index tie-break) + one-hot embedding lookup, all on-chip
        maxv = jnp.max(logits, axis=-1, keepdims=True)
        idx = jnp.min(jnp.where(logits >= maxv, col, V), axis=-1, keepdims=True)
        onehot = (col == idx).astype(jnp.float32)                             # (B, V)
        ce = jnp.dot(onehot, emb, preferred_element_type=jnp.float32)         # (B, E)
        return (ce, h1, c1, h2, c2, ctx)

    lax.fori_loop(0, max_steps, body, (ce, h1, c1, h2, c2, ctx), unroll=True)


# --------------------------------- parameter init -------------------------------------
def init_params(key):
    keys = iter(jax.random.split(key, 32))

    def u(shape, scale=0.1):
        return jax.random.uniform(next(keys), shape, jnp.float32, -scale, scale)

    p = {}
    emb = u((VOCAB, EMB), 0.5)
    p['emb'] = emb.at[PAD_IDX].set(0.0)                 # padding_idx row = 0

    enc = []
    for l in range(ENC_LAYERS):
        din = EMB if l == 0 else 2 * ENC_HID
        wih_f = u((din, 4 * ENC_HID)); wih_b = u((din, 4 * ENC_HID))
        whh_f = u((ENC_HID, 4 * ENC_HID)); whh_b = u((ENC_HID, 4 * ENC_HID))
        b_f = u((1, 4 * ENC_HID)); b_b = u((1, 4 * ENC_HID))
        enc.append(dict(
            wih=jnp.concatenate([wih_f, wih_b], axis=1),   # fused fwd|bwd input proj (Din, 8H)
            whh_f=whh_f, whh_b=whh_b,
            b=jnp.concatenate([b_f, b_b], axis=1)))        # fused bias (1, 8H)
    p['enc'] = enc

    wk = u((2 * ENC_HID, ATT_PROJ)); bk = u((1, ATT_PROJ))
    wv = u((2 * ENC_HID, ATT_PROJ)); bv = u((1, ATT_PROJ))
    p['wkv'] = jnp.concatenate([wk, wv], axis=1)           # fused K|V projection (2H, 2P)
    p['bkv'] = jnp.concatenate([bk, bv], axis=1)
    p['wq'] = u((DEC_OUT, ATT_PROJ))

    p['dec1'] = dict(wih=u((EMB + ATT_PROJ, 4 * DEC_HID)),
                     whh=u((DEC_HID, 4 * DEC_HID)),
                     b=u((1, 4 * DEC_HID)))
    p['dec2'] = dict(wih=u((DEC_HID, 4 * DEC_OUT)),
                     whh=u((DEC_OUT, 4 * DEC_OUT)),
                     b=u((1, 4 * DEC_OUT)))

    p['cls_b'] = u((1, VOCAB))                             # cls bias (weight is tied to emb)
    p['init_query'] = jax.random.uniform(next(keys), (1, DEC_OUT), jnp.float32, 0.0, 1.0)
    p['init_h1'] = jnp.zeros((1, DEC_HID), jnp.float32)
    p['init_c1'] = jnp.zeros((1, DEC_HID), jnp.float32)
    p['init_h2'] = jnp.zeros((1, DEC_OUT), jnp.float32)
    p['init_c2'] = jnp.zeros((1, DEC_OUT), jnp.float32)
    return p


# --------------------------------- model forward --------------------------------------
def bilstm_layer(xs, layer):
    """xs: (T, B, Din) -> (T, B, 2*ENC_HID); one pallas_call per layer."""
    Tn, Bn, Din = xs.shape
    H = layer['whh_f'].shape[0]
    xflat = xs.reshape(Tn * Bn, Din)                       # flatten in XLA glue (layout-free)
    hf, hb = pl.pallas_call(
        _bilstm_layer_kernel,
        out_shape=(jax.ShapeDtypeStruct((Tn, Bn, H), jnp.float32),
                   jax.ShapeDtypeStruct((Tn, Bn, H), jnp.float32)),
        in_specs=_specs(xflat.shape, layer['wih'].shape, layer['whh_f'].shape,
                        layer['whh_b'].shape, layer['b'].shape),
        out_specs=tuple(_specs((Tn, Bn, H), (Tn, Bn, H))),
        scratch_shapes=[pltpu.VMEM((Tn * Bn, 8 * H), jnp.float32)],
    )(xflat, layer['wih'], layer['whh_f'], layer['whh_b'], layer['b'])
    return jnp.concatenate([hf, hb], axis=-1)


def rewriter_forward(params, x_tok, lx, max_steps=MAX_STEPS):
    emb = params['emb']
    Bn, Tn = x_tok.shape

    # ---- encoder ------------------------------------------------------------
    # TODO(synk): LockedLSTM packed-sequence + locked-dropout semantics approximated:
    # eval-mode dropout is identity and the BiLSTM runs over the full padded length;
    # padding is handled downstream via the attention mask only.
    x_emb = jnp.take(emb, x_tok, axis=0)                   # (B, T, E) embedding gather (glue)
    h = jnp.transpose(x_emb, (1, 0, 2))                    # (T, B, E)
    for layer in params['enc']:
        h = bilstm_layer(h, layer)                         # (T, B, 2*ENC_HID)
    enc_h = jnp.transpose(h, (1, 0, 2))                    # (B, T, 2*ENC_HID)

    # ---- mha.wrapup_encodings: fused K|V projection (one Pallas linear) -----
    flat = enc_h.reshape(Bn * Tn, 2 * ENC_HID)
    kv = linear(flat, params['wkv'], params['bkv'])        # (B*T, 2*ATT_PROJ)
    K3 = kv[:, :ATT_PROJ].reshape(Bn, Tn, ATT_PROJ)
    V3 = kv[:, ATT_PROJ:].reshape(Bn, Tn, ATT_PROJ)

    # Block-diagonal per-head K/V layouts (built once, in XLA glue) so the decoder
    # kernel computes ALL heads' scores and context with a single batched matmul each.
    X = ATT_HEADS * Tn
    t_of_x = jnp.arange(X) % Tn
    head_of_x = jnp.arange(X) // Tn
    head_of_p = jnp.arange(ATT_PROJ) // HEAD_DIM
    blk = head_of_p[:, None] == head_of_x[None, :]                           # (P, X)
    Kblk = jnp.where(blk[None], jnp.transpose(K3[:, t_of_x, :], (0, 2, 1)), 0.0)  # (B, P, X)
    Vblk = jnp.where(blk.T[None], V3[:, t_of_x, :], 0.0)                          # (B, X, P)
    neg_mask = jnp.where(jnp.arange(Tn)[None, :] < lx[:, None], 0.0, -1e9)
    neg_mask = neg_mask.astype(jnp.float32)
    mask_x = jnp.tile(neg_mask, (1, ATT_HEADS))                                   # (B, X)

    emb_t = jnp.transpose(emb)                             # tied classifier weight (E, V)

    # ---- fused decoder: the entire greedy loop in ONE pallas_call -----------
    logits_seq, attmap = pl.pallas_call(
        functools.partial(_decoder_kernel, heads=ATT_HEADS, sos_idx=SOS_IDX),
        out_shape=(jax.ShapeDtypeStruct((max_steps, Bn, VOCAB), jnp.float32),
                   jax.ShapeDtypeStruct((max_steps + 1, Bn, Tn), jnp.float32)),
        in_specs=_specs(Kblk.shape, Vblk.shape, mask_x.shape, emb.shape, emb_t.shape,
                        params['cls_b'].shape, params['wq'].shape,
                        params['dec1']['wih'].shape, params['dec1']['whh'].shape,
                        params['dec1']['b'].shape,
                        params['dec2']['wih'].shape, params['dec2']['whh'].shape,
                        params['dec2']['b'].shape,
                        params['init_query'].shape, params['init_h1'].shape,
                        params['init_c1'].shape, params['init_h2'].shape,
                        params['init_c2'].shape),
        out_specs=tuple(_specs((max_steps, Bn, VOCAB), (max_steps + 1, Bn, Tn))),
    )(Kblk, Vblk, mask_x, emb, emb_t, params['cls_b'], params['wq'],
      params['dec1']['wih'], params['dec1']['whh'], params['dec1']['b'],
      params['dec2']['wih'], params['dec2']['whh'], params['dec2']['b'],
      params['init_query'], params['init_h1'], params['init_c1'],
      params['init_h2'], params['init_c2'])

    pred_logits = jnp.transpose(logits_seq, (1, 0, 2))     # (B, STEPS, VOCAB)
    # Attention-weight bookkeeping: PyTorch collects att_wgts[0] per step (incl. the
    # initial query) -> head-averaged (STEPS+1, T) map for batch element 0.
    att_map = attmap[:, 0, :]                              # (STEPS+1, T)
    return pred_logits, att_map


# ------------------------------------- main --------------------------------------------
if __name__ == "__main__":
    key = jax.random.PRNGKey(0)
    pkey, xkey = jax.random.split(key)
    params = init_params(pkey)

    x_tok = jax.random.randint(xkey, (B, T), 0, VOCAB - 1, dtype=jnp.int32)
    lx = jnp.array([T, T - 2], dtype=jnp.int32)
    pos = jnp.arange(T)[None, :]
    x_tok = jnp.where(pos < lx[:, None], x_tok, PAD_IDX)

    fwd = jax.jit(functools.partial(rewriter_forward, params))
    pred_logits, att_map = fwd(x_tok, lx)
    jax.block_until_ready((pred_logits, att_map))

    assert pred_logits.shape == (B, MAX_STEPS, VOCAB)
    assert att_map.shape == (MAX_STEPS + 1, T)
    assert bool(jnp.all(jnp.isfinite(pred_logits)))
    assert bool(jnp.all(jnp.isfinite(att_map)))
    print("KERNEL_OK")
</pallas_src>

<mosaic_0001>
module attributes {stable_mosaic.version = 11 : i64} {
  func.func @_bilstm_layer_kernel(%arg0: memref<16x64xf32, #tpu.memory_space<vmem>>, %arg1: memref<64x256xf32, #tpu.memory_space<vmem>>, %arg2: memref<32x128xf32, #tpu.memory_space<vmem>>, %arg3: memref<32x128xf32, #tpu.memory_space<vmem>>, %arg4: memref<1x256xf32, #tpu.memory_space<vmem>>, %arg5: memref<8x2x32xf32, #tpu.memory_space<vmem>>, %arg6: memref<8x2x32xf32, #tpu.memory_space<vmem>>, %arg7: memref<16x256xf32, #tpu.memory_space<vmem>>) attributes {dimension_semantics = [], scalar_prefetch = 0 : i64, scratch_operands = 1 : i64, tpu.core_type = #tpu.core_type<tc>} {
    %c0 = arith.constant 0 : index
    %c0_0 = arith.constant 0 : index
    %0 = vector.load %arg0[%c0, %c0_0] : memref<16x64xf32, #tpu.memory_space<vmem>>, vector<16x64xf32>
    %c0_1 = arith.constant 0 : index
    %c0_2 = arith.constant 0 : index
    %1 = vector.load %arg1[%c0_1, %c0_2] : memref<64x256xf32, #tpu.memory_space<vmem>>, vector<64x256xf32>
    %cst = arith.constant dense<0.000000e+00> : vector<16x256xf32>
    %2 = tpu.matmul %0, %1, %cst {dimension_numbers = #tpu.dot_dimension_numbers<[1], [0], [0], [1], [0, 0, 1, 1], [], []>} : vector<16x64xf32>, vector<64x256xf32>, vector<16x256xf32> -> vector<16x256xf32>
    %c0_3 = arith.constant 0 : index
    %c0_4 = arith.constant 0 : index
    %3 = vector.load %arg4[%c0_3, %c0_4] : memref<1x256xf32, #tpu.memory_space<vmem>>, vector<1x256xf32>
    %4 = vector.broadcast %3 : vector<1x256xf32> to vector<16x256xf32>
    %5 = arith.addf %2, %4 : vector<16x256xf32>
    %c0_5 = arith.constant 0 : index
    %c0_6 = arith.constant 0 : index
    %6 = vector.load %arg7[%c0_5, %c0_6] : memref<16x256xf32, #tpu.memory_space<vmem>>, vector<16x256xf32>
    tpu.vector_store %arg7[%c0_5, %c0_6], %5 {strides = array<i32>} : memref<16x256xf32, #tpu.memory_space<vmem>>, vector<16x256xf32>,
    %c0_7 = arith.constant 0 : index
    %c0_8 = arith.constant 0 : index
    %7 = vector.load %arg2[%c0_7, %c0_8] : memref<32x128xf32, #tpu.memory_space<vmem>>, vector<32x128xf32>
    %c0_9 = arith.constant 0 : index
    %c0_10 = arith.constant 0 : index
    %8 = vector.load %arg3[%c0_9, %c0_10] : memref<32x128xf32, #tpu.memory_space<vmem>>, vector<32x128xf32>
    %cst_11 = arith.constant 0.000000e+00 : f32
    %9 = vector.broadcast %cst_11 : f32 to vector<2x32xf32>
    %c0_i32 = arith.constant 0 : i32
    %c7_i32 = arith.constant 7 : i32
    %10 = arith.subi %c7_i32, %c0_i32 : i32
    %c2_i32 = arith.constant 2 : i32
    %11 = arith.muli %c0_i32, %c2_i32 : i32
    %12 = arith.index_cast %11 : i32 to index
    %c0_12 = arith.constant 0 : index
    %13 = vector.load %arg7[%12, %c0_12] : memref<16x256xf32, #tpu.memory_space<vmem>>, vector<2x256xf32>
    %c2_i32_13 = arith.constant 2 : i32
    %14 = arith.muli %10, %c2_i32_13 : i32
    %15 = arith.index_cast %14 : i32 to index
    %c0_14 = arith.constant 0 : index
    %16 = vector.load %arg7[%15, %c0_14] : memref<16x256xf32, #tpu.memory_space<vmem>>, vector<2x256xf32>
    %17 = vector.extract_strided_slice %13 {offsets = [0, 0], sizes = [2, 128], strides = [1, 1]} : vector<2x256xf32> to vector<2x128xf32>
    %cst_15 = arith.constant dense<0.000000e+00> : vector<2x128xf32>
    %18 = tpu.matmul %9, %7, %cst_15 {dimension_numbers = #tpu.dot_dimension_numbers<[1], [0], [0], [1], [0, 0, 1, 1], [], []>} : vector<2x32xf32>, vector<32x128xf32>, vector<2x128xf32> -> vector<2x128xf32>
    %19 = arith.addf %17, %18 : vector<2x128xf32>
    %20 = vector.extract_strided_slice %16 {offsets = [0, 128], sizes = [2, 128], strides = [1, 1]} : vector<2x256xf32> to vector<2x128xf32>
    %cst_16 = arith.constant dense<0.000000e+00> : vector<2x128xf32>
    %21 = tpu.matmul %9, %8, %cst_16 {dimension_numbers = #tpu.dot_dimension_numbers<[1], [0], [0], [1], [0, 0, 1, 1], [], []>} : vector<2x32xf32>, vector<32x128xf32>, vector<2x128xf32> -> vector<2x128xf32>
    %22 = arith.addf %20, %21 : vector<2x128xf32>
    %23 = vector.extract_strided_slice %19 {offsets = [0, 0], sizes = [2, 32], strides = [1, 1]} : vector<2x128xf32> to vector<2x32xf32>
    %24 = arith.negf %23 : vector<2x32xf32>
    %25 = math.exp %24 : vector<2x32xf32>
    %cst_17 = arith.constant 1.000000e+00 : f32
    %26 = vector.broadcast %cst_17 : f32 to vector<2x32xf32>
    %27 = arith.addf %26, %25 : vector<2x32xf32>
    %28 = arith.divf %26, %27 : vector<2x32xf32>
    %29 = vector.extract_strided_slice %19 {offsets = [0, 32], sizes = [2, 32], strides = [1, 1]} : vector<2x128xf32> to vector<2x32xf32>
    %30 = arith.negf %29 : vector<2x32xf32>
    %31 = math.exp %30 : vector<2x32xf32>
    %cst_18 = arith.constant 1.000000e+00 : f32
    %32 = vector.broadcast %cst_18 : f32 to vector<2x32xf32>
    %33 = arith.addf %32, %31 : vector<2x32xf32>
    %34 = arith.divf %32, %33 : vector<2x32xf32>
    %35 = vector.extract_strided_slice %19 {offsets = [0, 64], sizes = [2, 32], strides = [1, 1]} : vector<2x128xf32> to vector<2x32xf32>
    %36 = math.tanh %35 : vector<2x32xf32>
    %37 = vector.extract_strided_slice %19 {offsets = [0, 96], sizes = [2, 32], strides = [1, 1]} : vector<2x128xf32> to vector<2x32xf32>
    %38 = arith.negf %37 : vector<2x32xf32>
    %39 = math.exp %38 : vector<2x32xf32>
    %cst_19 = arith.constant 1.000000e+00 : f32
    %40 = vector.broadcast %cst_19 : f32 to vector<2x32xf32>
    %41 = arith.addf %40, %39 : vector<2x32xf32>
    %42 = arith.divf %40, %41 : vector<2x32xf32>
    %43 = arith.mulf %34, %9 : vector<2x32xf32>
    %44 = arith.mulf %28, %36 : vector<2x32xf32>
    %45 = arith.addf %43, %44 : vector<2x32xf32>
    %46 = math.tanh %45 : vector<2x32xf32>
    %47 = arith.mulf %42, %46 : vector<2x32xf32>
    %48 = vector.extract_strided_slice %22 {offsets = [0, 0], sizes = [2, 32], strides = [1, 1]} : vector<2x128xf32> to vector<2x32xf32>
    %49 = arith.negf %48 : vector<2x32xf32>
    %50 = math.exp %49 : vector<2x32xf32>
    %cst_20 = arith.constant 1.000000e+00 : f32
    %51 = vector.broadcast %cst_20 : f32 to vector<2x32xf32>
    %52 = arith.addf %51, %50 : vector<2x32xf32>
    %53 = arith.divf %51, %52 : vector<2x32xf32>
    %54 = vector.extract_strided_slice %22 {offsets = [0, 32], sizes = [2, 32], strides = [1, 1]} : vector<2x128xf32> to vector<2x32xf32>
    %55 = arith.negf %54 : vector<2x32xf32>
    %56 = math.exp %55 : vector<2x32xf32>
    %cst_21 = arith.constant 1.000000e+00 : f32
    %57 = vector.broadcast %cst_21 : f32 to vector<2x32xf32>
    %58 = arith.addf %57, %56 : vector<2x32xf32>
    %59 = arith.divf %57, %58 : vector<2x32xf32>
    %60 = vector.extract_strided_slice %22 {offsets = [0, 64], sizes = [2, 32], strides = [1, 1]} : vector<2x128xf32> to vector<2x32xf32>
    %61 = math.tanh %60 : vector<2x32xf32>
    %62 = vector.extract_strided_slice %22 {offsets = [0, 96], sizes = [2, 32], strides = [1, 1]} : vector<2x128xf32> to vector<2x32xf32>
    %63 = arith.negf %62 : vector<2x32xf32>
    %64 = math.exp %63 : vector<2x32xf32>
    %cst_22 = arith.constant 1.000000e+00 : f32
    %65 = vector.broadcast %cst_22 : f32 to vector<2x32xf32>
    %66 = arith.addf %65, %64 : vector<2x32xf32>
    %67 = arith.divf %65, %66 : vector<2x32xf32>
    %68 = arith.mulf %59, %9 : vector<2x32xf32>
    %69 = arith.mulf %53, %61 : vector<2x32xf32>
    %70 = arith.addf %68, %69 : vector<2x32xf32>
    %71 = math.tanh %70 : vector<2x32xf32>
    %72 = arith.mulf %67, %71 : vector<2x32xf32>
    %73 = arith.index_cast %c0_i32 : i32 to index
    %c0_23 = arith.constant 0 : index
    %c0_24 = arith.constant 0 : index
    %74 = vector.load %arg5[%73, %c0_23, %c0_24] : memref<8x2x32xf32, #tpu.memory_space<vmem>>, vector<1x2x32xf32>
    %75 = vector.shape_cast %74 : vector<1x2x32xf32> to vector<2x32xf32>
    %76 = vector.shape_cast %47 : vector<2x32xf32> to vector<1x2x32xf32>
    tpu.vector_store %arg5[%73, %c0_23, %c0_24], %76 {strides = array<i32>} : memref<8x2x32xf32, #tpu.memory_space<vmem>>, vector<1x2x32xf32>,
    %77 = arith.index_cast %10 : i32 to index
    %c0_25 = arith.constant 0 : index
    %c0_26 = arith.constant 0 : index
    %78 = vector.load %arg6[%77, %c0_25, %c0_26] : memref<8x2x32xf32, #tpu.memory_space<vmem>>, vector<1x2x32xf32>
    %79 = vector.shape_cast %78 : vector<1x2x32xf32> to vector<2x32xf32>
    %80 = vector.shape_cast %72 : vector<2x32xf32> to vector<1x2x32xf32>
    tpu.vector_store %arg6[%77, %c0_25, %c0_26], %80 {strides = array<i32>} : memref<8x2x32xf32, #tpu.memory_space<vmem>>, vector<1x2x32xf32>,
    %c1_i32 = arith.constant 1 : i32
    %c7_i32_27 = arith.constant 7 : i32
    %81 = arith.subi %c7_i32_27, %c1_i32 : i32
    %c2_i32_28 = arith.constant 2 : i32
    %82 = arith.muli %c1_i32, %c2_i32_28 : i32
    %83 = arith.index_cast %82 : i32 to index
    %c0_29 = arith.constant 0 : index
    %84 = vector.load %arg7[%83, %c0_29] : memref<16x256xf32, #tpu.memory_space<vmem>>, vector<2x256xf32>
    %c2_i32_30 = arith.constant 2 : i32
    %85 = arith.muli %81, %c2_i32_30 : i32
    %86 = arith.index_cast %85 : i32 to index
    %c0_31 = arith.constant 0 : index
    %87 = vector.load %arg7[%86, %c0_31] : memref<16x256xf32, #tpu.memory_space<vmem>>, vector<2x256xf32>
    %88 = vector.extract_strided_slice %84 {offsets = [0, 0], sizes = [2, 128], strides = [1, 1]} : vector<2x256xf32> to vector<2x128xf32>
    %cst_32 = arith.constant dense<0.000000e+00> : vector<2x128xf32>
    %89 = tpu.matmul %47, %7, %cst_32 {dimension_numbers = #tpu.dot_dimension_numbers<[1], [0], [0], [1], [0, 0, 1, 1], [], []>} : vector<2x32xf32>, vector<32x128xf32>, vector<2x128xf32> -> vector<2x128xf32>
    %90 = arith.addf %88, %89 : vector<2x128xf32>
    %91 = vector.extract_strided_slice %87 {offsets = [0, 128], sizes = [2, 128], strides = [1, 1]} : vector<2x256xf32> to vector<2x128xf32>
    %cst_33 = arith.constant dense<0.000000e+00> : vector<2x128xf32>
    %92 = tpu.matmul %72, %8, %cst_33 {dimension_numbers = #tpu.dot_dimension_numbers<[1], [0], [0], [1], [0, 0, 1, 1], [], []>} : vector<2x32xf32>, vector<32x128xf32>, vector<2x128xf32> -> vector<2x128xf32>
    %93 = arith.addf %91, %92 : vector<2x128xf32>
    %94 = vector.extract_strided_slice %90 {offsets = [0, 0], sizes = [2, 32], strides = [1, 1]} : vector<2x128xf32> to vector<2x32xf32>
    %95 = arith.negf %94 : vector<2x32xf32>
    %96 = math.exp %95 : vector<2x32xf32>
    %cst_34 = arith.constant 1.000000e+00 : f32
    %97 = vector.broadcast %cst_34 : f32 to vector<2x32xf32>
    %98 = arith.addf %97, %96 : vector<2x32xf32>
    %99 = arith.divf %97, %98 : vector<2x32xf32>
    %100 = vector.extract_strided_slice %90 {offsets = [0, 32], sizes = [2, 32], strides = [1, 1]} : vector<2x128xf32> to vector<2x32xf32>
    %101 = arith.negf %100 : vector<2x32xf32>
    %102 = math.exp %101 : vector<2x32xf32>
    %cst_35 = arith.constant 1.000000e+00 : f32
    %103 = vector.broadcast %cst_35 : f32 to vector<2x32xf32>
    %104 = arith.addf %103, %102 : vector<2x32xf32>
    %105 = arith.divf %103, %104 : vector<2x32xf32>
    %106 = vector.extract_strided_slice %90 {offsets = [0, 64], sizes = [2, 32], strides = [1, 1]} : vector<2x128xf32> to vector<2x32xf32>
    %107 = math.tanh %106 : vector<2x32xf32>
    %108 = vector.extract_strided_slice %90 {offsets = [0, 96], sizes = [2, 32], strides = [1, 1]} : vector<2x128xf32> to vector<2x32xf32>
    %109 = arith.negf %108 : vector<2x32xf32>
    %110 = math.exp %109 : vector<2x32xf32>
    %cst_36 = arith.constant 1.000000e+00 : f32
    %111 = vector.broadcast %cst_36 : f32 to vector<2x32xf32>
    %112 = arith.addf %111, %110 : vector<2x32xf32>
    %113 = arith.divf %111, %112 : vector<2x32xf32>
    %114 = arith.mulf %105, %45 : vector<2x32xf32>
    %115 = arith.mulf %99, %107 : vector<2x32xf32>
    %116 = arith.addf %114, %115 : vector<2x32xf32>
    %117 = math.tanh %116 : vector<2x32xf32>
    %118 = arith.mulf %113, %117 : vector<2x32xf32>
    %119 = vector.extract_strided_slice %93 {offsets = [0, 0], sizes = [2, 32], strides = [1, 1]} : vector<2x128xf32> to vector<2x32xf32>
    %120 = arith.negf %119 : vector<2x32xf32>
    %121 = math.exp %120 : vector<2x32xf32>
    %cst_37 = arith.constant 1.000000e+00 : f32
    %122 = vector.broadcast %cst_37 : f32 to vector<2x32xf32>
    %123 = arith.addf %122, %121 : vector<2x32xf32>
    %124 = arith.divf %122, %123 : vector<2x32xf32>
    %125 = vector.extract_strided_slice %93 {offsets = [0, 32], sizes = [2, 32], strides = [1, 1]} : vector<2x128xf32> to vector<2x32xf32>
    %126 = arith.negf %125 : vector<2x32xf32>
    %127 = math.exp %126 : vector<2x32xf32>
    %cst_38 = arith.constant 1.000000e+00 : f32
    %128 = vector.broadcast %cst_38 : f32 to vector<2x32xf32>
    %129 = arith.addf %128, %127 : vector<2x32xf32>
    %130 = arith.divf %128, %129 : vector<2x32xf32>
    %131 = vector.extract_strided_slice %93 {offsets = [0, 64], sizes = [2, 32], strides = [1, 1]} : vector<2x128xf32> to vector<2x32xf32>
    %132 = math.tanh %131 : vector<2x32xf32>
    %133 = vector.extract_strided_slice %93 {offsets = [0, 96], sizes = [2, 32], strides = [1, 1]} : vector<2x128xf32> to vector<2x32xf32>
    %134 = arith.negf %133 : vector<2x32xf32>
    %135 = math.exp %134 : vector<2x32xf32>
    %cst_39 = arith.constant 1.000000e+00 : f32
    %136 = vector.broadcast %cst_39 : f32 to vector<2x32xf32>
    %137 = arith.addf %136, %135 : vector<2x32xf32>
    %138 = arith.divf %136, %137 : vector<2x32xf32>
    %139 = arith.mulf %130, %70 : vector<2x32xf32>
    %140 = arith.mulf %124, %132 : vector<2x32xf32>
    %141 = arith.addf %139, %140 : vector<2x32xf32>
    %142 = math.tanh %141 : vector<2x32xf32>
    %143 = arith.mulf %138, %142 : vector<2x32xf32>
    %144 = arith.index_cast %c1_i32 : i32 to index
    %c0_40 = arith.constant 0 : index
    %c0_41 = arith.constant 0 : index
    %145 = vector.load %arg5[%144, %c0_40, %c0_41] : memref<8x2x32xf32, #tpu.memory_space<vmem>>, vector<1x2x32xf32>
    %146 = vector.shape_cast %145 : vector<1x2x32xf32> to vector<2x32xf32>
    %147 = vector.shape_cast %118 : vector<2x32xf32> to vector<1x2x32xf32>
    tpu.vector_store %arg5[%144, %c0_40, %c0_41], %147 {strides = array<i32>} : memref<8x2x32xf32, #tpu.memory_space<vmem>>, vector<1x2x32xf32>,
    %148 = arith.index_cast %81 : i32 to index
    %c0_42 = arith.constant 0 : index
    %c0_43 = arith.constant 0 : index
    %149 = vector.load %arg6[%148, %c0_42, %c0_43] : memref<8x2x32xf32, #tpu.memory_space<vmem>>, vector<1x2x32xf32>
    %150 = vector.shape_cast %149 : vector<1x2x32xf32> to vector<2x32xf32>
    %151 = vector.shape_cast %143 : vector<2x32xf32> to vector<1x2x32xf32>
    tpu.vector_store %arg6[%148, %c0_42, %c0_43], %151 {strides = array<i32>} : memref<8x2x32xf32, #tpu.memory_space<vmem>>, vector<1x2x32xf32>,
    %c2_i32_44 = arith.constant 2 : i32
    %c7_i32_45 = arith.constant 7 : i32
    %152 = arith.subi %c7_i32_45, %c2_i32_44 : i32
    %c2_i32_46 = arith.constant 2 : i32
    %153 = arith.muli %c2_i32_44, %c2_i32_46 : i32
    %154 = arith.index_cast %153 : i32 to index
    %c0_47 = arith.constant 0 : index
    %155 = vector.load %arg7[%154, %c0_47] : memref<16x256xf32, #tpu.memory_space<vmem>>, vector<2x256xf32>
    %c2_i32_48 = arith.constant 2 : i32
    %156 = arith.muli %152, %c2_i32_48 : i32
    %157 = arith.index_cast %156 : i32 to index
    %c0_49 = arith.constant 0 : index
    %158 = vector.load %arg7[%157, %c0_49] : memref<16x256xf32, #tpu.memory_space<vmem>>, vector<2x256xf32>
    %159 = vector.extract_strided_slice %155 {offsets = [0, 0], sizes = [2, 128], strides = [1, 1]} : vector<2x256xf32> to vector<2x128xf32>
    %cst_50 = arith.constant dense<0.000000e+00> : vector<2x128xf32>
    %160 = tpu.matmul %118, %7, %cst_50 {dimension_numbers = #tpu.dot_dimension_numbers<[1], [0], [0], [1], [0, 0, 1, 1], [], []>} : vector<2x32xf32>, vector<32x128xf32>, vector<2x128xf32> -> vector<2x128xf32>
    %161 = arith.addf %159, %160 : vector<2x128xf32>
    %162 = vector.extract_strided_slice %158 {offsets = [0, 128], sizes = [2, 128], strides = [1, 1]} : vector<2x256xf32> to vector<2x128xf32>
    %cst_51 = arith.constant dense<0.000000e+00> : vector<2x128xf32>
    %163 = tpu.matmul %143, %8, %cst_51 {dimension_numbers = #tpu.dot_dimension_numbers<[1], [0], [0], [1], [0, 0, 1, 1], [], []>} : vector<2x32xf32>, vector<32x128xf32>, vector<2x128xf32> -> vector<2x128xf32>
    %164 = arith.addf %162, %163 : vector<2x128xf32>
    %165 = vector.extract_strided_slice %161 {offsets = [0, 0], sizes = [2, 32], strides = [1, 1]} : vector<2x128xf32> to vector<2x32xf32>
    %166 = arith.negf %165 : vector<2x32xf32>
    %167 = math.exp %166 : vector<2x32xf32>
    %cst_52 = arith.constant 1.000000e+00 : f32
    %168 = vector.broadcast %cst_52 : f32 to vector<2x32xf32>
    %169 = arith.addf %168, %167 : vector<2x32xf32>
    %170 = arith.divf %168, %169 : vector<2x32xf32>
    %171 = vector.extract_strided_slice %161 {offsets = [0, 32], sizes = [2, 32], strides = [1, 1]} : vector<2x128xf32> to vector<2x32xf32>
    %172 = arith.negf %171 : vector<2x32xf32>
    %173 = math.exp %172 : vector<2x32xf32>
    %cst_53 = arith.constant 1.000000e+00 : f32
    %174 = vector.broadcast %cst_53 : f32 to vector<2x32xf32>
    %175 = arith.addf %174, %173 : vector<2x32xf32>
    %176 = arith.divf %174, %175 : vector<2x32xf32>
    %177 = vector.extract_strided_slice %161 {offsets = [0, 64], sizes = [2, 32], strides = [1, 1]} : vector<2x128xf32> to vector<2x32xf32>
    %178 = math.tanh %177 : vector<2x32xf32>
    %179 = vector.extract_strided_slice %161 {offsets = [0, 96], sizes = [2, 32], strides = [1, 1]} : vector<2x128xf32> to vector<2x32xf32>
    %180 = arith.negf %179 : vector<2x32xf32>
    %181 = math.exp %180 : vector<2x32xf32>
    %cst_54 = arith.constant 1.000000e+00 : f32
    %182 = vector.broadcast %cst_54 : f32 to vector<2x32xf32>
    %183 = arith.addf %182, %181 : vector<2x32xf32>
    %184 = arith.divf %182, %183 : vector<2x32xf32>
    %185 = arith.mulf %176, %116 : vector<2x32xf32>
    %186 = arith.mulf %170, %178 : vector<2x32xf32>
    %187 = arith.addf %185, %186 : vector<2x32xf32>
    %188 = math.tanh %187 : vector<2x32xf32>
    %189 = arith.mulf %184, %188 : vector<2x32xf32>
    %190 = vector.extract_strided_slice %164 {offsets = [0, 0], sizes = [2, 32], strides = [1, 1]} : vector<2x128xf32> to vector<2x32xf32>
    %191 = arith.negf %190 : vector<2x32xf32>
    %192 = math.exp %191 : vector<2x32xf32>
    %cst_55 = arith.constant 1.000000e+00 : f32
    %193 = vector.broadcast %cst_55 : f32 to vector<2x32xf32>
    %194 = arith.addf %193, %192 : vector<2x32xf32>
    %195 = arith.divf %193, %194 : vector<2x32xf32>
    %196 = vector.extract_strided_slice %164 {offsets = [0, 32], sizes = [2, 32], strides = [1, 1]} : vector<2x128xf32> to vector<2x32xf32>
    %197 = arith.negf %196 : vector<2x32xf32>
    %198 = math.exp %197 : vector<2x32xf32>
    %cst_56 = arith.constant 1.000000e+00 : f32
    %199 = vector.broadcast %cst_56 : f32 to vector<2x32xf32>
    %200 = arith.addf %199, %198 : vector<2x32xf32>
    %201 = arith.divf %199, %200 : vector<2x32xf32>
    %202 = vector.extract_strided_slice %164 {offsets = [0, 64], sizes = [2, 32], strides = [1, 1]} : vector<2x128xf32> to vector<2x32xf32>
    %203 = math.tanh %202 : vector<2x32xf32>
    %204 = vector.extract_strided_slice %164 {offsets = [0, 96], sizes = [2, 32], strides = [1, 1]} : vector<2x128xf32> to vector<2x32xf32>
    %205 = arith.negf %204 : vector<2x32xf32>
    %206 = math.exp %205 : vector<2x32xf32>
    %cst_57 = arith.constant 1.000000e+00 : f32
    %207 = vector.broadcast %cst_57 : f32 to vector<2x32xf32>
    %208 = arith.addf %207, %206 : vector<2x32xf32>
    %209 = arith.divf %207, %208 : vector<2x32xf32>
    %210 = arith.mulf %201, %141 : vector<2x32xf32>
    %211 = arith.mulf %195, %203 : vector<2x32xf32>
    %212 = arith.addf %210, %211 : vector<2x32xf32>
    %213 = math.tanh %212 : vector<2x32xf32>
    %214 = arith.mulf %209, %213 : vector<2x32xf32>
    %215 = arith.index_cast %c2_i32_44 : i32 to index
    %c0_58 = arith.constant 0 : index
    %c0_59 = arith.constant 0 : index
    %216 = vector.load %arg5[%215, %c0_58, %c0_59] : memref<8x2x32xf32, #tpu.memory_space<vmem>>, vector<1x2x32xf32>
    %217 = vector.shape_cast %216 : vector<1x2x32xf32> to vector<2x32xf32>
    %218 = vector.shape_cast %189 : vector<2x32xf32> to vector<1x2x32xf32>
    tpu.vector_store %arg5[%215, %c0_58, %c0_59], %218 {strides = array<i32>} : memref<8x2x32xf32, #tpu.memory_space<vmem>>, vector<1x2x32xf32>,
    %219 = arith.index_cast %152 : i32 to index
    %c0_60 = arith.constant 0 : index
    %c0_61 = arith.constant 0 : index
    %220 = vector.load %arg6[%219, %c0_60, %c0_61] : memref<8x2x32xf32, #tpu.memory_space<vmem>>, vector<1x2x32xf32>
    %221 = vector.shape_cast %220 : vector<1x2x32xf32> to vector<2x32xf32>
    %222 = vector.shape_cast %214 : vector<2x32xf32> to vector<1x2x32xf32>
    tpu.vector_store %arg6[%219, %c0_60, %c0_61], %222 {strides = array<i32>} : memref<8x2x32xf32, #tpu.memory_space<vmem>>, vector<1x2x32xf32>,
    %c3_i32 = arith.constant 3 : i32
    %c7_i32_62 = arith.constant 7 : i32
    %223 = arith.subi %c7_i32_62, %c3_i32 : i32
    %c2_i32_63 = arith.constant 2 : i32
    %224 = arith.muli %c3_i32, %c2_i32_63 : i32
    %225 = arith.index_cast %224 : i32 to index
    %c0_64 = arith.constant 0 : index
    %226 = vector.load %arg7[%225, %c0_64] : memref<16x256xf32, #tpu.memory_space<vmem>>, vector<2x256xf32>
    %c2_i32_65 = arith.constant 2 : i32
    %227 = arith.muli %223, %c2_i32_65 : i32
    %228 = arith.index_cast %227 : i32 to index
    %c0_66 = arith.constant 0 : index
    %229 = vector.load %arg7[%228, %c0_66] : memref<16x256xf32, #tpu.memory_space<vmem>>, vector<2x256xf32>
    %230 = vector.extract_strided_slice %226 {offsets = [0, 0], sizes = [2, 128], strides = [1, 1]} : vector<2x256xf32> to vector<2x128xf32>
    %cst_67 = arith.constant dense<0.000000e+00> : vector<2x128xf32>
    %231 = tpu.matmul %189, %7, %cst_67 {dimension_numbers = #tpu.dot_dimension_numbers<[1], [0], [0], [1], [0, 0, 1, 1], [], []>} : vector<2x32xf32>, vector<32x128xf32>, vector<2x128xf32> -> vector<2x128xf32>
    %232 = arith.addf %230, %231 : vector<2x128xf32>
    %233 = vector.extract_strided_slice %229 {offsets = [0, 128], sizes = [2, 128], strides = [1, 1]} : vector<2x256xf32> to vector<2x128xf32>
    %cst_68 = arith.constant dense<0.000000e+00> : vector<2x128xf32>
    %234 = tpu.matmul %214, %8, %cst_68 {dimension_numbers = #tpu.dot_dimension_numbers<[1], [0], [0], [1], [0, 0, 1, 1], [], []>} : vector<2x32xf32>, vector<32x128xf32>, vector<2x128xf32> -> vector<2x128xf32>
    %235 = arith.addf %233, %234 : vector<2x128xf32>
    %236 = vector.extract_strided_slice %232 {offsets = [0, 0], sizes = [2, 32], strides = [1, 1]} : vector<2x128xf32> to vector<2x32xf32>
    %237 = arith.negf %236 : vector<2x32xf32>
    %238 = math.exp %237 : vector<2x32xf32>
    %cst_69 = arith.constant 1.000000e+00 : f32
    %239 = vector.broadcast %cst_69 : f32 to vector<2x32xf32>
    %240 = arith.addf %239, %238 : vector<2x32xf32>
    %241 = arith.divf %239, %240 : vector<2x32xf32>
    %242 = vector.extract_strided_slice %232 {offsets = [0, 32], sizes = [2, 32], strides = [1, 1]} : vector<2x128xf32> to vector<2x32xf32>
    %243 = arith.negf %242 : vector<2x32xf32>
    %244 = math.exp %243 : vector<2x32xf32>
    %cst_70 = arith.constant 1.000000e+00 : f32
    %245 = vector.broadcast %cst_70 : f32 to vector<2x32xf32>
    %246 = arith.addf %245, %244 : vector<2x32xf32>
    %247 = arith.divf %245, %246 : vector<2x32xf32>
    %248 = vector.extract_strided_slice %232 {offsets = [0, 64], sizes = [2, 32], strides = [1, 1]} : vector<2x128xf32> to vector<2x32xf32>
    %249 = math.tanh %248 : vector<2x32xf32>
    %250 = vector.extract_strided_slice %232 {offsets = [0, 96], sizes = [2, 32], strides = [1, 1]} : vector<2x128xf32> to vector<2x32xf32>
    %251 = arith.negf %250 : vector<2x32xf32>
    %252 = math.exp %251 : vector<2x32xf32>
    %cst_71 = arith.constant 1.000000e+00 : f32
    %253 = vector.broadcast %cst_71 : f32 to vector<2x32xf32>
    %254 = arith.addf %253, %252 : vector<2x32xf32>
    %255 = arith.divf %253, %254 : vector<2x32xf32>
    %256 = arith.mulf %247, %187 : vector<2x32xf32>
    %257 = arith.mulf %241, %249 : vector<2x32xf32>
    %258 = arith.addf %256, %257 : vector<2x32xf32>
    %259 = math.tanh %258 : vector<2x32xf32>
    %260 = arith.mulf %255, %259 : vector<2x32xf32>
    %261 = vector.extract_strided_slice %235 {offsets = [0, 0], sizes = [2, 32], strides = [1, 1]} : vector<2x128xf32> to vector<2x32xf32>
    %262 = arith.negf %261 : vector<2x32xf32>
    %263 = math.exp %262 : vector<2x32xf32>
    %cst_72 = arith.constant 1.000000e+00 : f32
    %264 = vector.broadcast %cst_72 : f32 to vector<2x32xf32>
    %265 = arith.addf %264, %263 : vector<2x32xf32>
    %266 = arith.divf %264, %265 : vector<2x32xf32>
    %267 = vector.extract_strided_slice %235 {offsets = [0, 32], sizes = [2, 32], strides = [1, 1]} : vector<2x128xf32> to vector<2x32xf32>
    %268 = arith.negf %267 : vector<2x32xf32>
    %269 = math.exp %268 : vector<2x32xf32>
    %cst_73 = arith.constant 1.000000e+00 : f32
    %270 = vector.broadcast %cst_73 : f32 to vector<2x32xf32>
    %271 = arith.addf %270, %269 : vector<2x32xf32>
    %272 = arith.divf %270, %271 : vector<2x32xf32>
    %273 = vector.extract_strided_slice %235 {offsets = [0, 64], sizes = [2, 32], strides = [1, 1]} : vector<2x128xf32> to vector<2x32xf32>
    %274 = math.tanh %273 : vector<2x32xf32>
    %275 = vector.extract_strided_slice %235 {offsets = [0, 96], sizes = [2, 32], strides = [1, 1]} : vector<2x128xf32> to vector<2x32xf32>
    %276 = arith.negf %275 : vector<2x32xf32>
    %277 = math.exp %276 : vector<2x32xf32>
    %cst_74 = arith.constant 1.000000e+00 : f32
    %278 = vector.broadcast %cst_74 : f32 to vector<2x32xf32>
    %279 = arith.addf %278, %277 : vector<2x32xf32>
    %280 = arith.divf %278, %279 : vector<2x32xf32>
    %281 = arith.mulf %272, %212 : vector<2x32xf32>
    %282 = arith.mulf %266, %274 : vector<2x32xf32>
    %283 = arith.addf %281, %282 : vector<2x32xf32>
    %284 = math.tanh %283 : vector<2x32xf32>
    %285 = arith.mulf %280, %284 : vector<2x32xf32>
    %286 = arith.index_cast %c3_i32 : i32 to index
    %c0_75 = arith.constant 0 : index
    %c0_76 = arith.constant 0 : index
    %287 = vector.load %arg5[%286, %c0_75, %c0_76] : memref<8x2x32xf32, #tpu.memory_space<vmem>>, vector<1x2x32xf32>
    %288 = vector.shape_cast %287 : vector<1x2x32xf32> to vector<2x32xf32>
    %289 = vector.shape_cast %260 : vector<2x32xf32> to vector<1x2x32xf32>
    tpu.vector_store %arg5[%286, %c0_75, %c0_76], %289 {strides = array<i32>} : memref<8x2x32xf32, #tpu.memory_space<vmem>>, vector<1x2x32xf32>,
    %290 = arith.index_cast %223 : i32 to index
    %c0_77 = arith.constant 0 : index
    %c0_78 = arith.constant 0 : index
    %291 = vector.load %arg6[%290, %c0_77, %c0_78] : memref<8x2x32xf32, #tpu.memory_space<vmem>>, vector<1x2x32xf32>
    %292 = vector.shape_cast %291 : vector<1x2x32xf32> to vector<2x32xf32>
    %293 = vector.shape_cast %285 : vector<2x32xf32> to vector<1x2x32xf32>
    tpu.vector_store %arg6[%290, %c0_77, %c0_78], %293 {strides = array<i32>} : memref<8x2x32xf32, #tpu.memory_space<vmem>>, vector<1x2x32xf32>,
    %c4_i32 = arith.constant 4 : i32
    %c7_i32_79 = arith.constant 7 : i32
    %294 = arith.subi %c7_i32_79, %c4_i32 : i32
    %c2_i32_80 = arith.constant 2 : i32
    %295 = arith.muli %c4_i32, %c2_i32_80 : i32
    %296 = arith.index_cast %295 : i32 to index
    %c0_81 = arith.constant 0 : index
    %297 = vector.load %arg7[%296, %c0_81] : memref<16x256xf32, #tpu.memory_space<vmem>>, vector<2x256xf32>
    %c2_i32_82 = arith.constant 2 : i32
    %298 = arith.muli %294, %c2_i32_82 : i32
    %299 = arith.index_cast %298 : i32 to index
    %c0_83 = arith.constant 0 : index
    %300 = vector.load %arg7[%299, %c0_83] : memref<16x256xf32, #tpu.memory_space<vmem>>, vector<2x256xf32>
    %301 = vector.extract_strided_slice %297 {offsets = [0, 0], sizes = [2, 128], strides = [1, 1]} : vector<2x256xf32> to vector<2x128xf32>
    %cst_84 = arith.constant dense<0.000000e+00> : vector<2x128xf32>
    %302 = tpu.matmul %260, %7, %cst_84 {dimension_numbers = #tpu.dot_dimension_numbers<[1], [0], [0], [1], [0, 0, 1, 1], [], []>} : vector<2x32xf32>, vector<32x128xf32>, vector<2x128xf32> -> vector<2x128xf32>
    %303 = arith.addf %301, %302 : vector<2x128xf32>
    %304 = vector.extract_strided_slice %300 {offsets = [0, 128], sizes = [2, 128], strides = [1, 1]} : vector<2x256xf32> to vector<2x128xf32>
    %cst_85 = arith.constant dense<0.000000e+00> : vector<2x128xf32>
    %305 = tpu.matmul %285, %8, %cst_85 {dimension_numbers = #tpu.dot_dimension_numbers<[1], [0], [0], [1], [0, 0, 1, 1], [], []>} : vector<2x32xf32>, vector<32x128xf32>, vector<2x128xf32> -> vector<2x128xf32>
    %306 = arith.addf %304, %305 : vector<2x128xf32>
    %307 = vector.extract_strided_slice %303 {offsets = [0, 0], sizes = [2, 32], strides = [1, 1]} : vector<2x128xf32> to vector<2x32xf32>
    %308 = arith.negf %307 : vector<2x32xf32>
    %309 = math.exp %308 : vector<2x32xf32>
    %cst_86 = arith.constant 1.000000e+00 : f32
    %310 = vector.broadcast %cst_86 : f32 to vector<2x32xf32>
    %311 = arith.addf %310, %309 : vector<2x32xf32>
    %312 = arith.divf %310, %311 : vector<2x32xf32>
    %313 = vector.extract_strided_slice %303 {offsets = [0, 32], sizes = [2, 32], strides = [1, 1]} : vector<2x128xf32> to vector<2x32xf32>
    %314 = arith.negf %313 : vector<2x32xf32>
    %315 = math.exp %314 : vector<2x32xf32>
    %cst_87 = arith.constant 1.000000e+00 : f32
    %316 = vector.broadcast %cst_87 : f32 to vector<2x32xf32>
    %317 = arith.addf %316, %315 : vector<2x32xf32>
    %318 = arith.divf %316, %317 : vector<2x32xf32>
    %319 = vector.extract_strided_slice %303 {offsets = [0, 64], sizes = [2, 32], strides = [1, 1]} : vector<2x128xf32> to vector<2x32xf32>
    %320 = math.tanh %319 : vector<2x32xf32>
    %321 = vector.extract_strided_slice %303 {offsets = [0, 96], sizes = [2, 32], strides = [1, 1]} : vector<2x128xf32> to vector<2x32xf32>
    %322 = arith.negf %321 : vector<2x32xf32>
    %323 = math.exp %322 : vector<2x32xf32>
    %cst_88 = arith.constant 1.000000e+00 : f32
    %324 = vector.broadcast %cst_88 : f32 to vector<2x32xf32>
    %325 = arith.addf %324, %323 : vector<2x32xf32>
    %326 = arith.divf %324, %325 : vector<2x32xf32>
    %327 = arith.mulf %318, %258 : vector<2x32xf32>
    %328 = arith.mulf %312, %320 : vector<2x32xf32>
    %329 = arith.addf %327, %328 : vector<2x32xf32>
    %330 = math.tanh %329 : vector<2x32xf32>
    %331 = arith.mulf %326, %330 : vector<2x32xf32>
    %332 = vector.extract_strided_slice %306 {offsets = [0, 0], sizes = [2, 32], strides = [1, 1]} : vector<2x128xf32> to vector<2x32xf32>
    %333 = arith.negf %332 : vector<2x32xf32>
    %334 = math.exp %333 : vector<2x32xf32>
    %cst_89 = arith.constant 1.000000e+00 : f32
    %335 = vector.broadcast %cst_89 : f32 to vector<2x32xf32>
    %336 = arith.addf %335, %334 : vector<2x32xf32>
    %337 = arith.divf %335, %336 : vector<2x32xf32>
    %338 = vector.extract_strided_slice %306 {offsets = [0, 32], sizes = [2, 32], strides = [1, 1]} : vector<2x128xf32> to vector<2x32xf32>
    %339 = arith.negf %338 : vector<2x32xf32>
    %340 = math.exp %339 : vector<2x32xf32>
    %cst_90 = arith.constant 1.000000e+00 : f32
    %341 = vector.broadcast %cst_90 : f32 to vector<2x32xf32>
    %342 = arith.addf %341, %340 : vector<2x32xf32>
    %343 = arith.divf %341, %342 : vector<2x32xf32>
    %344 = vector.extract_strided_slice %306 {offsets = [0, 64], sizes = [2, 32], strides = [1, 1]} : vector<2x128xf32> to vector<2x32xf32>
    %345 = math.tanh %344 : vector<2x32xf32>
    %346 = vector.extract_strided_slice %306 {offsets = [0, 96], sizes = [2, 32], strides = [1, 1]} : vector<2x128xf32> to vector<2x32xf32>
    %347 = arith.negf %346 : vector<2x32xf32>
    %348 = math.exp %347 : vector<2x32xf32>
    %cst_91 = arith.constant 1.000000e+00 : f32
    %349 = vector.broadcast %cst_91 : f32 to vector<2x32xf32>
    %350 = arith.addf %349, %348 : vector<2x32xf32>
    %351 = arith.divf %349, %350 : vector<2x32xf32>
    %352 = arith.mulf %343, %283 : vector<2x32xf32>
    %353 = arith.mulf %337, %345 : vector<2x32xf32>
    %354 = arith.addf %352, %353 : vector<2x32xf32>
    %355 = math.tanh %354 : vector<2x32xf32>
    %356 = arith.mulf %351, %355 : vector<2x32xf32>
    %357 = arith.index_cast %c4_i32 : i32 to index
    %c0_92 = arith.constant 0 : index
    %c0_93 = arith.constant 0 : index
    %358 = vector.load %arg5[%357, %c0_92, %c0_93] : memref<8x2x32xf32, #tpu.memory_space<vmem>>, vector<1x2x32xf32>
    %359 = vector.shape_cast %358 : vector<1x2x32xf32> to vector<2x32xf32>
    %360 = vector.shape_cast %331 : vector<2x32xf32> to vector<1x2x32xf32>
    tpu.vector_store %arg5[%357, %c0_92, %c0_93], %360 {strides = array<i32>} : memref<8x2x32xf32, #tpu.memory_space<vmem>>, vector<1x2x32xf32>,
    %361 = arith.index_cast %294 : i32 to index
    %c0_94 = arith.constant 0 : index
    %c0_95 = arith.constant 0 : index
    %362 = vector.load %arg6[%361, %c0_94, %c0_95] : memref<8x2x32xf32, #tpu.memory_space<vmem>>, vector<1x2x32xf32>
    %363 = vector.shape_cast %362 : vector<1x2x32xf32> to vector<2x32xf32>
    %364 = vector.shape_cast %356 : vector<2x32xf32> to vector<1x2x32xf32>
    tpu.vector_store %arg6[%361, %c0_94, %c0_95], %364 {strides = array<i32>} : memref<8x2x32xf32, #tpu.memory_space<vmem>>, vector<1x2x32xf32>,
    %c5_i32 = arith.constant 5 : i32
    %c7_i32_96 = arith.constant 7 : i32
    %365 = arith.subi %c7_i32_96, %c5_i32 : i32
    %c2_i32_97 = arith.constant 2 : i32
    %366 = arith.muli %c5_i32, %c2_i32_97 : i32
    %367 = arith.index_cast %366 : i32 to index
    %c0_98 = arith.constant 0 : index
    %368 = vector.load %arg7[%367, %c0_98] : memref<16x256xf32, #tpu.memory_space<vmem>>, vector<2x256xf32>
    %c2_i32_99 = arith.constant 2 : i32
    %369 = arith.muli %365, %c2_i32_99 : i32
    %370 = arith.index_cast %369 : i32 to index
    %c0_100 = arith.constant 0 : index
    %371 = vector.load %arg7[%370, %c0_100] : memref<16x256xf32, #tpu.memory_space<vmem>>, vector<2x256xf32>
    %372 = vector.extract_strided_slice %368 {offsets = [0, 0], sizes = [2, 128], strides = [1, 1]} : vector<2x256xf32> to vector<2x128xf32>
    %cst_101 = arith.constant dense<0.000000e+00> : vector<2x128xf32>
    %373 = tpu.matmul %331, %7, %cst_101 {dimension_numbers = #tpu.dot_dimension_numbers<[1], [0], [0], [1], [0, 0, 1, 1], [], []>} : vector<2x32xf32>, vector<32x128xf32>, vector<2x128xf32> -> vector<2x128xf32>
    %374 = arith.addf %372, %373 : vector<2x128xf32>
    %375 = vector.extract_strided_slice %371 {offsets = [0, 128], sizes = [2, 128], strides = [1, 1]} : vector<2x256xf32> to vector<2x128xf32>
    %cst_102 = arith.constant dense<0.000000e+00> : vector<2x128xf32>
    %376 = tpu.matmul %356, %8, %cst_102 {dimension_numbers = #tpu.dot_dimension_numbers<[1], [0], [0], [1], [0, 0, 1, 1], [], []>} : vector<2x32xf32>, vector<32x128xf32>, vector<2x128xf32> -> vector<2x128xf32>
    %377 = arith.addf %375, %376 : vector<2x128xf32>
    %378 = vector.extract_strided_slice %374 {offsets = [0, 0], sizes = [2, 32], strides = [1, 1]} : vector<2x128xf32> to vector<2x32xf32>
    %379 = arith.negf %378 : vector<2x32xf32>
    %380 = math.exp %379 : vector<2x32xf32>
    %cst_103 = arith.constant 1.000000e+00 : f32
    %381 = vector.broadcast %cst_103 : f32 to vector<2x32xf32>
    %382 = arith.addf %381, %380 : vector<2x32xf32>
    %383 = arith.divf %381, %382 : vector<2x32xf32>
    %384 = vector.extract_strided_slice %374 {offsets = [0, 32], sizes = [2, 32], strides = [1, 1]} : vector<2x128xf32> to vector<2x32xf32>
    %385 = arith.negf %384 : vector<2x32xf32>
    %386 = math.exp %385 : vector<2x32xf32>
    %cst_104 = arith.constant 1.000000e+00 : f32
    %387 = vector.broadcast %cst_104 : f32 to vector<2x32xf32>
    %388 = arith.addf %387, %386 : vector<2x32xf32>
    %389 = arith.divf %387, %388 : vector<2x32xf32>
    %390 = vector.extract_strided_slice %374 {offsets = [0, 64], sizes = [2, 32], strides = [1, 1]} : vector<2x128xf32> to vector<2x32xf32>
    %391 = math.tanh %390 : vector<2x32xf32>
    %392 = vector.extract_strided_slice %374 {offsets = [0, 96], sizes = [2, 32], strides = [1, 1]} : vector<2x128xf32> to vector<2x32xf32>
    %393 = arith.negf %392 : vector<2x32xf32>
    %394 = math.exp %393 : vector<2x32xf32>
    %cst_105 = arith.constant 1.000000e+00 : f32
    %395 = vector.broadcast %cst_105 : f32 to vector<2x32xf32>
    %396 = arith.addf %395, %394 : vector<2x32xf32>
    %397 = arith.divf %395, %396 : vector<2x32xf32>
    %398 = arith.mulf %389, %329 : vector<2x32xf32>
    %399 = arith.mulf %383, %391 : vector<2x32xf32>
    %400 = arith.addf %398, %399 : vector<2x32xf32>
    %401 = math.tanh %400 : vector<2x32xf32>
    %402 = arith.mulf %397, %401 : vector<2x32xf32>
    %403 = vector.extract_strided_slice %377 {offsets = [0, 0], sizes = [2, 32], strides = [1, 1]} : vector<2x128xf32> to vector<2x32xf32>
    %404 = arith.negf %403 : vector<2x32xf32>
    %405 = math.exp %404 : vector<2x32xf32>
    %cst_106 = arith.constant 1.000000e+00 : f32
    %406 = vector.broadcast %cst_106 : f32 to vector<2x32xf32>
    %407 = arith.addf %406, %405 : vector<2x32xf32>
    %408 = arith.divf %406, %407 : vector<2x32xf32>
    %409 = vector.extract_strided_slice %377 {offsets = [0, 32], sizes = [2, 32], strides = [1, 1]} : vector<2x128xf32> to vector<2x32xf32>
    %410 = arith.negf %409 : vector<2x32xf32>
    %411 = math.exp %410 : vector<2x32xf32>
    %cst_107 = arith.constant 1.000000e+00 : f32
    %412 = vector.broadcast %cst_107 : f32 to vector<2x32xf32>
    %413 = arith.addf %412, %411 : vector<2x32xf32>
    %414 = arith.divf %412, %413 : vector<2x32xf32>
    %415 = vector.extract_strided_slice %377 {offsets = [0, 64], sizes = [2, 32], strides = [1, 1]} : vector<2x128xf32> to vector<2x32xf32>
    %416 = math.tanh %415 : vector<2x32xf32>
    %417 = vector.extract_strided_slice %377 {offsets = [0, 96], sizes = [2, 32], strides = [1, 1]} : vector<2x128xf32> to vector<2x32xf32>
    %418 = arith.negf %417 : vector<2x32xf32>
    %419 = math.exp %418 : vector<2x32xf32>
    %cst_108 = arith.constant 1.000000e+00 : f32
    %420 = vector.broadcast %cst_108 : f32 to vector<2x32xf32>
    %421 = arith.addf %420, %419 : vector<2x32xf32>
    %422 = arith.divf %420, %421 : vector<2x32xf32>
    %423 = arith.mulf %414, %354 : vector<2x32xf32>
    %424 = arith.mulf %408, %416 : vector<2x32xf32>
    %425 = arith.addf %423, %424 : vector<2x32xf32>
    %426 = math.tanh %425 : vector<2x32xf32>
    %427 = arith.mulf %422, %426 : vector<2x32xf32>
    %428 = arith.index_cast %c5_i32 : i32 to index
    %c0_109 = arith.constant 0 : index
    %c0_110 = arith.constant 0 : index
    %429 = vector.load %arg5[%428, %c0_109, %c0_110] : memref<8x2x32xf32, #tpu.memory_space<vmem>>, vector<1x2x32xf32>
    %430 = vector.shape_cast %429 : vector<1x2x32xf32> to vector<2x32xf32>
    %431 = vector.shape_cast %402 : vector<2x32xf32> to vector<1x2x32xf32>
    tpu.vector_store %arg5[%428, %c0_109, %c0_110], %431 {strides = array<i32>} : memref<8x2x32xf32, #tpu.memory_space<vmem>>, vector<1x2x32xf32>,
    %432 = arith.index_cast %365 : i32 to index
    %c0_111 = arith.constant 0 : index
    %c0_112 = arith.constant 0 : index
    %433 = vector.load %arg6[%432, %c0_111, %c0_112] : memref<8x2x32xf32, #tpu.memory_space<vmem>>, vector<1x2x32xf32>
    %434 = vector.shape_cast %433 : vector<1x2x32xf32> to vector<2x32xf32>
    %435 = vector.shape_cast %427 : vector<2x32xf32> to vector<1x2x32xf32>
    tpu.vector_store %arg6[%432, %c0_111, %c0_112], %435 {strides = array<i32>} : memref<8x2x32xf32, #tpu.memory_space<vmem>>, vector<1x2x32xf32>,
    %c6_i32 = arith.constant 6 : i32
    %c7_i32_113 = arith.constant 7 : i32
    %436 = arith.subi %c7_i32_113, %c6_i32 : i32
    %c2_i32_114 = arith.constant 2 : i32
    %437 = arith.muli %c6_i32, %c2_i32_114 : i32
    %438 = arith.index_cast %437 : i32 to index
    %c0_115 = arith.constant 0 : index
    %439 = vector.load %arg7[%438, %c0_115] : memref<16x256xf32, #tpu.memory_space<vmem>>, vector<2x256xf32>
    %c2_i32_116 = arith.constant 2 : i32
    %440 = arith.muli %436, %c2_i32_116 : i32
    %441 = arith.index_cast %440 : i32 to index
    %c0_117 = arith.constant 0 : index
    %442 = vector.load %arg7[%441, %c0_117] : memref<16x256xf32, #tpu.memory_space<vmem>>, vector<2x256xf32>
    %443 = vector.extract_strided_slice %439 {offsets = [0, 0], sizes = [2, 128], strides = [1, 1]} : vector<2x256xf32> to vector<2x128xf32>
    %cst_118 = arith.constant dense<0.000000e+00> : vector<2x128xf32>
    %444 = tpu.matmul %402, %7, %cst_118 {dimension_numbers = #tpu.dot_dimension_numbers<[1], [0], [0], [1], [0, 0, 1, 1], [], []>} : vector<2x32xf32>, vector<32x128xf32>, vector<2x128xf32> -> vector<2x128xf32>
    %445 = arith.addf %443, %444 : vector<2x128xf32>
    %446 = vector.extract_strided_slice %442 {offsets = [0, 128], sizes = [2, 128], strides = [1, 1]} : vector<2x256xf32> to vector<2x128xf32>
    %cst_119 = arith.constant dense<0.000000e+00> : vector<2x128xf32>
    %447 = tpu.matmul %427, %8, %cst_119 {dimension_numbers = #tpu.dot_dimension_numbers<[1], [0], [0], [1], [0, 0, 1, 1], [], []>} : vector<2x32xf32>, vector<32x128xf32>, vector<2x128xf32> -> vector<2x128xf32>
    %448 = arith.addf %446, %447 : vector<2x128xf32>
    %449 = vector.extract_strided_slice %445 {offsets = [0, 0], sizes = [2, 32], strides = [1, 1]} : vector<2x128xf32> to vector<2x32xf32>
    %450 = arith.negf %449 : vector<2x32xf32>
    %451 = math.exp %450 : vector<2x32xf32>
    %cst_120 = arith.constant 1.000000e+00 : f32
    %452 = vector.broadcast %cst_120 : f32 to vector<2x32xf32>
    %453 = arith.addf %452, %451 : vector<2x32xf32>
    %454 = arith.divf %452, %453 : vector<2x32xf32>
    %455 = vector.extract_strided_slice %445 {offsets = [0, 32], sizes = [2, 32], strides = [1, 1]} : vector<2x128xf32> to vector<2x32xf32>
    %456 = arith.negf %455 : vector<2x32xf32>
    %457 = math.exp %456 : vector<2x32xf32>
    %cst_121 = arith.constant 1.000000e+00 : f32
    %458 = vector.broadcast %cst_121 : f32 to vector<2x32xf32>
    %459 = arith.addf %458, %457 : vector<2x32xf32>
    %460 = arith.divf %458, %459 : vector<2x32xf32>
    %461 = vector.extract_strided_slice %445 {offsets = [0, 64], sizes = [2, 32], strides = [1, 1]} : vector<2x128xf32> to vector<2x32xf32>
    %462 = math.tanh %461 : vector<2x32xf32>
    %463 = vector.extract_strided_slice %445 {offsets = [0, 96], sizes = [2, 32], strides = [1, 1]} : vector<2x128xf32> to vector<2x32xf32>
    %464 = arith.negf %463 : vector<2x32xf32>
    %465 = math.exp %464 : vector<2x32xf32>
    %cst_122 = arith.constant 1.000000e+00 : f32
    %466 = vector.broadcast %cst_122 : f32 to vector<2x32xf32>
    %467 = arith.addf %466, %465 : vector<2x32xf32>
    %468 = arith.divf %466, %467 : vector<2x32xf32>
    %469 = arith.mulf %460, %400 : vector<2x32xf32>
    %470 = arith.mulf %454, %462 : vector<2x32xf32>
    %471 = arith.addf %469, %470 : vector<2x32xf32>
    %472 = math.tanh %471 : vector<2x32xf32>
    %473 = arith.mulf %468, %472 : vector<2x32xf32>
    %474 = vector.extract_strided_slice %448 {offsets = [0, 0], sizes = [2, 32], strides = [1, 1]} : vector<2x128xf32> to vector<2x32xf32>
    %475 = arith.negf %474 : vector<2x32xf32>
    %476 = math.exp %475 : vector<2x32xf32>
    %cst_123 = arith.constant 1.000000e+00 : f32
    %477 = vector.broadcast %cst_123 : f32 to vector<2x32xf32>
    %478 = arith.addf %477, %476 : vector<2x32xf32>
    %479 = arith.divf %477, %478 : vector<2x32xf32>
    %480 = vector.extract_strided_slice %448 {offsets = [0, 32], sizes = [2, 32], strides = [1, 1]} : vector<2x128xf32> to vector<2x32xf32>
    %481 = arith.negf %480 : vector<2x32xf32>
    %482 = math.exp %481 : vector<2x32xf32>
    %cst_124 = arith.constant 1.000000e+00 : f32
    %483 = vector.broadcast %cst_124 : f32 to vector<2x32xf32>
    %484 = arith.addf %483, %482 : vector<2x32xf32>
    %485 = arith.divf %483, %484 : vector<2x32xf32>
    %486 = vector.extract_strided_slice %448 {offsets = [0, 64], sizes = [2, 32], strides = [1, 1]} : vector<2x128xf32> to vector<2x32xf32>
    %487 = math.tanh %486 : vector<2x32xf32>
    %488 = vector.extract_strided_slice %448 {offsets = [0, 96], sizes = [2, 32], strides = [1, 1]} : vector<2x128xf32> to vector<2x32xf32>
    %489 = arith.negf %488 : vector<2x32xf32>
    %490 = math.exp %489 : vector<2x32xf32>
    %cst_125 = arith.constant 1.000000e+00 : f32
    %491 = vector.broadcast %cst_125 : f32 to vector<2x32xf32>
    %492 = arith.addf %491, %490 : vector<2x32xf32>
    %493 = arith.divf %491, %492 : vector<2x32xf32>
    %494 = arith.mulf %485, %425 : vector<2x32xf32>
    %495 = arith.mulf %479, %487 : vector<2x32xf32>
    %496 = arith.addf %494, %495 : vector<2x32xf32>
    %497 = math.tanh %496 : vector<2x32xf32>
    %498 = arith.mulf %493, %497 : vector<2x32xf32>
    %499 = arith.index_cast %c6_i32 : i32 to index
    %c0_126 = arith.constant 0 : index
    %c0_127 = arith.constant 0 : index
    %500 = vector.load %arg5[%499, %c0_126, %c0_127] : memref<8x2x32xf32, #tpu.memory_space<vmem>>, vector<1x2x32xf32>
    %501 = vector.shape_cast %500 : vector<1x2x32xf32> to vector<2x32xf32>
    %502 = vector.shape_cast %473 : vector<2x32xf32> to vector<1x2x32xf32>
    tpu.vector_store %arg5[%499, %c0_126, %c0_127], %502 {strides = array<i32>} : memref<8x2x32xf32, #tpu.memory_space<vmem>>, vector<1x2x32xf32>,
    %503 = arith.index_cast %436 : i32 to index
    %c0_128 = arith.constant 0 : index
    %c0_129 = arith.constant 0 : index
    %504 = vector.load %arg6[%503, %c0_128, %c0_129] : memref<8x2x32xf32, #tpu.memory_space<vmem>>, vector<1x2x32xf32>
    %505 = vector.shape_cast %504 : vector<1x2x32xf32> to vector<2x32xf32>
    %506 = vector.shape_cast %498 : vector<2x32xf32> to vector<1x2x32xf32>
    tpu.vector_store %arg6[%503, %c0_128, %c0_129], %506 {strides = array<i32>} : memref<8x2x32xf32, #tpu.memory_space<vmem>>, vector<1x2x32xf32>,
    %c7_i32_130 = arith.constant 7 : i32
    %c7_i32_131 = arith.constant 7 : i32
    %507 = arith.subi %c7_i32_131, %c7_i32_130 : i32
    %c2_i32_132 = arith.constant 2 : i32
    %508 = arith.muli %c7_i32_130, %c2_i32_132 : i32
    %509 = arith.index_cast %508 : i32 to index
    %c0_133 = arith.constant 0 : index
    %510 = vector.load %arg7[%509, %c0_133] : memref<16x256xf32, #tpu.memory_space<vmem>>, vector<2x256xf32>
    %c2_i32_134 = arith.constant 2 : i32
    %511 = arith.muli %507, %c2_i32_134 : i32
    %512 = arith.index_cast %511 : i32 to index
    %c0_135 = arith.constant 0 : index
    %513 = vector.load %arg7[%512, %c0_135] : memref<16x256xf32, #tpu.memory_space<vmem>>, vector<2x256xf32>
    %514 = vector.extract_strided_slice %510 {offsets = [0, 0], sizes = [2, 128], strides = [1, 1]} : vector<2x256xf32> to vector<2x128xf32>
    %cst_136 = arith.constant dense<0.000000e+00> : vector<2x128xf32>
    %515 = tpu.matmul %473, %7, %cst_136 {dimension_numbers = #tpu.dot_dimension_numbers<[1], [0], [0], [1], [0, 0, 1, 1], [], []>} : vector<2x32xf32>, vector<32x128xf32>, vector<2x128xf32> -> vector<2x128xf32>
    %516 = arith.addf %514, %515 : vector<2x128xf32>
    %517 = vector.extract_strided_slice %513 {offsets = [0, 128], sizes = [2, 128], strides = [1, 1]} : vector<2x256xf32> to vector<2x128xf32>
    %cst_137 = arith.constant dense<0.000000e+00> : vector<2x128xf32>
    %518 = tpu.matmul %498, %8, %cst_137 {dimension_numbers = #tpu.dot_dimension_numbers<[1], [0], [0], [1], [0, 0, 1, 1], [], []>} : vector<2x32xf32>, vector<32x128xf32>, vector<2x128xf32> -> vector<2x128xf32>
    %519 = arith.addf %517, %518 : vector<2x128xf32>
    %520 = vector.extract_strided_slice %516 {offsets = [0, 0], sizes = [2, 32], strides = [1, 1]} : vector<2x128xf32> to vector<2x32xf32>
    %521 = arith.negf %520 : vector<2x32xf32>
    %522 = math.exp %521 : vector<2x32xf32>
    %cst_138 = arith.constant 1.000000e+00 : f32
    %523 = vector.broadcast %cst_138 : f32 to vector<2x32xf32>
    %524 = arith.addf %523, %522 : vector<2x32xf32>
    %525 = arith.divf %523, %524 : vector<2x32xf32>
    %526 = vector.extract_strided_slice %516 {offsets = [0, 32], sizes = [2, 32], strides = [1, 1]} : vector<2x128xf32> to vector<2x32xf32>
    %527 = arith.negf %526 : vector<2x32xf32>
    %528 = math.exp %527 : vector<2x32xf32>
    %cst_139 = arith.constant 1.000000e+00 : f32
    %529 = vector.broadcast %cst_139 : f32 to vector<2x32xf32>
    %530 = arith.addf %529, %528 : vector<2x32xf32>
    %531 = arith.divf %529, %530 : vector<2x32xf32>
    %532 = vector.extract_strided_slice %516 {offsets = [0, 64], sizes = [2, 32], strides = [1, 1]} : vector<2x128xf32> to vector<2x32xf32>
    %533 = math.tanh %532 : vector<2x32xf32>
    %534 = vector.extract_strided_slice %516 {offsets = [0, 96], sizes = [2, 32], strides = [1, 1]} : vector<2x128xf32> to vector<2x32xf32>
    %535 = arith.negf %534 : vector<2x32xf32>
    %536 = math.exp %535 : vector<2x32xf32>
    %cst_140 = arith.constant 1.000000e+00 : f32
    %537 = vector.broadcast %cst_140 : f32 to vector<2x32xf32>
    %538 = arith.addf %537, %536 : vector<2x32xf32>
    %539 = arith.divf %537, %538 : vector<2x32xf32>
    %540 = arith.mulf %531, %471 : vector<2x32xf32>
    %541 = arith.mulf %525, %533 : vector<2x32xf32>
    %542 = arith.addf %540, %541 : vector<2x32xf32>
    %543 = math.tanh %542 : vector<2x32xf32>
    %544 = arith.mulf %539, %543 : vector<2x32xf32>
    %545 = vector.extract_strided_slice %519 {offsets = [0, 0], sizes = [2, 32], strides = [1, 1]} : vector<2x128xf32> to vector<2x32xf32>
    %546 = arith.negf %545 : vector<2x32xf32>
    %547 = math.exp %546 : vector<2x32xf32>
    %cst_141 = arith.constant 1.000000e+00 : f32
    %548 = vector.broadcast %cst_141 : f32 to vector<2x32xf32>
    %549 = arith.addf %548, %547 : vector<2x32xf32>
    %550 = arith.divf %548, %549 : vector<2x32xf32>
    %551 = vector.extract_strided_slice %519 {offsets = [0, 32], sizes = [2, 32], strides = [1, 1]} : vector<2x128xf32> to vector<2x32xf32>
    %552 = arith.negf %551 : vector<2x32xf32>
    %553 = math.exp %552 : vector<2x32xf32>
    %cst_142 = arith.constant 1.000000e+00 : f32
    %554 = vector.broadcast %cst_142 : f32 to vector<2x32xf32>
    %555 = arith.addf %554, %553 : vector<2x32xf32>
    %556 = arith.divf %554, %555 : vector<2x32xf32>
    %557 = vector.extract_strided_slice %519 {offsets = [0, 64], sizes = [2, 32], strides = [1, 1]} : vector<2x128xf32> to vector<2x32xf32>
    %558 = math.tanh %557 : vector<2x32xf32>
    %559 = vector.extract_strided_slice %519 {offsets = [0, 96], sizes = [2, 32], strides = [1, 1]} : vector<2x128xf32> to vector<2x32xf32>
    %560 = arith.negf %559 : vector<2x32xf32>
    %561 = math.exp %560 : vector<2x32xf32>
    %cst_143 = arith.constant 1.000000e+00 : f32
    %562 = vector.broadcast %cst_143 : f32 to vector<2x32xf32>
    %563 = arith.addf %562, %561 : vector<2x32xf32>
    %564 = arith.divf %562, %563 : vector<2x32xf32>
    %565 = arith.mulf %556, %496 : vector<2x32xf32>
    %566 = arith.mulf %550, %558 : vector<2x32xf32>
    %567 = arith.addf %565, %566 : vector<2x32xf32>
    %568 = math.tanh %567 : vector<2x32xf32>
    %569 = arith.mulf %564, %568 : vector<2x32xf32>
    %570 = arith.index_cast %c7_i32_130 : i32 to index
    %c0_144 = arith.constant 0 : index
    %c0_145 = arith.constant 0 : index
    %571 = vector.load %arg5[%570, %c0_144, %c0_145] : memref<8x2x32xf32, #tpu.memory_space<vmem>>, vector<1x2x32xf32>
    %572 = vector.shape_cast %571 : vector<1x2x32xf32> to vector<2x32xf32>
    %573 = vector.shape_cast %544 : vector<2x32xf32> to vector<1x2x32xf32>
    tpu.vector_store %arg5[%570, %c0_144, %c0_145], %573 {strides = array<i32>} : memref<8x2x32xf32, #tpu.memory_space<vmem>>, vector<1x2x32xf32>,
    %574 = arith.index_cast %507 : i32 to index
    %c0_146 = arith.constant 0 : index
    %c0_147 = arith.constant 0 : index
    %575 = vector.load %arg6[%574, %c0_146, %c0_147] : memref<8x2x32xf32, #tpu.memory_space<vmem>>, vector<1x2x32xf32>
    %576 = vector.shape_cast %575 : vector<1x2x32xf32> to vector<2x32xf32>
    %577 = vector.shape_cast %569 : vector<2x32xf32> to vector<1x2x32xf32>
    tpu.vector_store %arg6[%574, %c0_146, %c0_147], %577 {strides = array<i32>} : memref<8x2x32xf32, #tpu.memory_space<vmem>>, vector<1x2x32xf32>,
    %c8_i32 = arith.constant 8 : i32
    return
  }
}

module attributes {stable_mosaic.version = 11 : i64} {
  func.func @_linear_kernel(%arg0: memref<16x64xf32, #tpu.memory_space<vmem>>, %arg1: memref<64x64xf32, #tpu.memory_space<vmem>>, %arg2: memref<1x64xf32, #tpu.memory_space<vmem>>, %arg3: memref<16x64xf32, #tpu.memory_space<vmem>>) attributes {dimension_semantics = [], scalar_prefetch = 0 : i64, scratch_operands = 0 : i64, tpu.core_type = #tpu.core_type<tc>} {
    %c0 = arith.constant 0 : index
    %c0_0 = arith.constant 0 : index
    %0 = vector.load %arg0[%c0, %c0_0] : memref<16x64xf32, #tpu.memory_space<vmem>>, vector<16x64xf32>
    %c0_1 = arith.constant 0 : index
    %c0_2 = arith.constant 0 : index
    %1 = vector.load %arg1[%c0_1, %c0_2] : memref<64x64xf32, #tpu.memory_space<vmem>>, vector<64x64xf32>
    %cst = arith.constant dense<0.000000e+00> : vector<16x64xf32>
    %2 = tpu.matmul %0, %1, %cst {dimension_numbers = #tpu.dot_dimension_numbers<[1], [0], [0], [1], [0, 0, 1, 1], [], []>} : vector<16x64xf32>, vector<64x64xf32>, vector<16x64xf32> -> vector<16x64xf32>
    %c0_3 = arith.constant 0 : index
    %c0_4 = arith.constant 0 : index
    %3 = vector.load %arg2[%c0_3, %c0_4] : memref<1x64xf32, #tpu.memory_space<vmem>>, vector<1x64xf32>
    %4 = vector.broadcast %3 : vector<1x64xf32> to vector<16x64xf32>
    %5 = arith.addf %2, %4 : vector<16x64xf32>
    %c0_5 = arith.constant 0 : index
    %c0_6 = arith.constant 0 : index
    %6 = vector.load %arg3[%c0_5, %c0_6] : memref<16x64xf32, #tpu.memory_space<vmem>>, vector<16x64xf32>
    tpu.vector_store %arg3[%c0_5, %c0_6], %5 {strides = array<i32>} : memref<16x64xf32, #tpu.memory_space<vmem>>, vector<16x64xf32>,
    return
  }
}

module attributes {stable_mosaic.version = 11 : i64} {
  func.func @_decoder_kernel(%arg0: memref<2x32x32xf32, #tpu.memory_space<vmem>>, %arg1: memref<2x32x32xf32, #tpu.memory_space<vmem>>, %arg2: memref<2x32xf32, #tpu.memory_space<vmem>>, %arg3: memref<16x64xf32, #tpu.memory_space<vmem>>, %arg4: memref<64x16xf32, #tpu.memory_space<vmem>>, %arg5: memref<1x16xf32, #tpu.memory_space<vmem>>, %arg6: memref<32x32xf32, #tpu.memory_space<vmem>>, %arg7: memref<96x256xf32, #tpu.memory_space<vmem>>, %arg8: memref<64x256xf32, #tpu.memory_space<vmem>>, %arg9: memref<1x256xf32, #tpu.memory_space<vmem>>, %arg10: memref<64x128xf32, #tpu.memory_space<vmem>>, %arg11: memref<32x128xf32, #tpu.memory_space<vmem>>, %arg12: memref<1x128xf32, #tpu.memory_space<vmem>>, %arg13: memref<1x32xf32, #tpu.memory_space<vmem>>, %arg14: memref<1x64xf32, #tpu.memory_space<vmem>>, %arg15: memref<1x64xf32, #tpu.memory_space<vmem>>, %arg16: memref<1x32xf32, #tpu.memory_space<vmem>>, %arg17: memref<1x32xf32, #tpu.memory_space<vmem>>, %arg18: memref<6x2x16xf32, #tpu.memory_space<vmem>>, %arg19: memref<7x2x8xf32, #tpu.memory_space<vmem>>) attributes {dimension_semantics = [], scalar_prefetch = 0 : i64, scratch_operands = 0 : i64, tpu.core_type = #tpu.core_type<tc>} {
    %c0 = arith.constant 0 : index
    %c0_0 = arith.constant 0 : index
    %c0_1 = arith.constant 0 : index
    %0 = vector.load %arg0[%c0, %c0_0, %c0_1] : memref<2x32x32xf32, #tpu.memory_space<vmem>>, vector<2x32x32xf32>
    %c0_2 = arith.constant 0 : index
    %c0_3 = arith.constant 0 : index
    %c0_4 = arith.constant 0 : index
    %1 = vector.load %arg1[%c0_2, %c0_3, %c0_4] : memref<2x32x32xf32, #tpu.memory_space<vmem>>, vector<2x32x32xf32>
    %c0_5 = arith.constant 0 : index
    %c0_6 = arith.constant 0 : index
    %2 = vector.load %arg2[%c0_5, %c0_6] : memref<2x32xf32, #tpu.memory_space<vmem>>, vector<2x32xf32>
    %c0_7 = arith.constant 0 : index
    %c0_8 = arith.constant 0 : index
    %3 = vector.load %arg3[%c0_7, %c0_8] : memref<16x64xf32, #tpu.memory_space<vmem>>, vector<16x64xf32>
    %c0_9 = arith.constant 0 : index
    %c0_10 = arith.constant 0 : index
    %4 = vector.load %arg4[%c0_9, %c0_10] : memref<64x16xf32, #tpu.memory_space<vmem>>, vector<64x16xf32>
    %c0_11 = arith.constant 0 : index
    %c0_12 = arith.constant 0 : index
    %5 = vector.load %arg5[%c0_11, %c0_12] : memref<1x16xf32, #tpu.memory_space<vmem>>, vector<1x16xf32>
    %c0_13 = arith.constant 0 : index
    %c0_14 = arith.constant 0 : index
    %6 = vector.load %arg6[%c0_13, %c0_14] : memref<32x32xf32, #tpu.memory_space<vmem>>, vector<32x32xf32>
    %c0_15 = arith.constant 0 : index
    %c0_16 = arith.constant 0 : index
    %7 = vector.load %arg7[%c0_15, %c0_16] : memref<96x256xf32, #tpu.memory_space<vmem>>, vector<96x256xf32>
    %c0_17 = arith.constant 0 : index
    %c0_18 = arith.constant 0 : index
    %8 = vector.load %arg8[%c0_17, %c0_18] : memref<64x256xf32, #tpu.memory_space<vmem>>, vector<64x256xf32>
    %c0_19 = arith.constant 0 : index
    %c0_20 = arith.constant 0 : index
    %9 = vector.load %arg9[%c0_19, %c0_20] : memref<1x256xf32, #tpu.memory_space<vmem>>, vector<1x256xf32>
    %c0_21 = arith.constant 0 : index
    %c0_22 = arith.constant 0 : index
    %10 = vector.load %arg10[%c0_21, %c0_22] : memref<64x128xf32, #tpu.memory_space<vmem>>, vector<64x128xf32>
    %c0_23 = arith.constant 0 : index
    %c0_24 = arith.constant 0 : index
    %11 = vector.load %arg11[%c0_23, %c0_24] : memref<32x128xf32, #tpu.memory_space<vmem>>, vector<32x128xf32>
    %c0_25 = arith.constant 0 : index
    %c0_26 = arith.constant 0 : index
    %12 = vector.load %arg12[%c0_25, %c0_26] : memref<1x128xf32, #tpu.memory_space<vmem>>, vector<1x128xf32>
    %c0_27 = arith.constant 0 : index
    %c0_28 = arith.constant 0 : index
    %13 = vector.load %arg13[%c0_27, %c0_28] : memref<1x32xf32, #tpu.memory_space<vmem>>, vector<1x32xf32>
    %14 = vector.shape_cast %13 : vector<1x32xf32> to vector<1x32xf32>
    %15 = vector.broadcast %14 : vector<1x32xf32> to vector<2x32xf32>
    %cst = arith.constant dense<0.000000e+00> : vector<2x32xf32>
    %16 = tpu.matmul %15, %6, %cst {dimension_numbers = #tpu.dot_dimension_numbers<[1], [0], [0], [1], [0, 0, 1, 1], [], []>} : vector<2x32xf32>, vector<32x32xf32>, vector<2x32xf32> -> vector<2x32xf32>
    %17 = vector.shape_cast %16 : vector<2x32xf32> to vector<2x1x32xf32>
    "tpu.trace_start"() <{level = 10 : i32, message = "bqp,bpx->bqx"}> : () -> ()
    %cst_29 = arith.constant dense<0.000000e+00> : vector<2x1x32xf32>
    %18 = tpu.matmul %17, %0, %cst_29 {dimension_numbers = #tpu.dot_dimension_numbers<[2], [1], [1], [2], [0, 0, 0, 1, 1, 2], [0], [0]>} : vector<2x1x32xf32>, vector<2x32x32xf32>, vector<2x1x32xf32> -> vector<2x1x32xf32>
    "tpu.trace_stop"() : () -> ()
    %19 = vector.shape_cast %18 : vector<2x1x32xf32> to vector<2x32xf32>
    %cst_30 = arith.constant 0.353553385 : f32
    %20 = vector.broadcast %cst_30 : f32 to vector<2x32xf32>
    %21 = arith.mulf %19, %20 : vector<2x32xf32>
    %22 = arith.addf %21, %2 : vector<2x32xf32>
    %23 = vector.extract_strided_slice %22 {offsets = [0, 0], sizes = [2, 8], strides = [1, 1]} : vector<2x32xf32> to vector<2x8xf32>
    %cst_31 = arith.constant dense<0xFF800000> : vector<2xf32>
    %24 = vector.multi_reduction <maximumf>, %23, %cst_31 [1] : vector<2x8xf32> to vector<2xf32>
    %25 = vector.shape_cast %24 : vector<2xf32> to vector<2x1xf32>
    %26 = vector.broadcast %25 : vector<2x1xf32> to vector<2x8xf32>
    %27 = arith.subf %23, %26 : vector<2x8xf32>
    %28 = math.exp %27 : vector<2x8xf32>
    %cst_32 = arith.constant dense<0.000000e+00> : vector<2xf32>
    %29 = vector.multi_reduction <add>, %28, %cst_32 [1] : vector<2x8xf32> to vector<2xf32>
    %30 = vector.shape_cast %29 : vector<2xf32> to vector<2x1xf32>
    %31 = vector.broadcast %30 : vector<2x1xf32> to vector<2x8xf32>
    %32 = arith.divf %28, %31 : vector<2x8xf32>
    %33 = vector.extract_strided_slice %22 {offsets = [0, 8], sizes = [2, 8], strides = [1, 1]} : vector<2x32xf32> to vector<2x8xf32>
    %cst_33 = arith.constant dense<0xFF800000> : vector<2xf32>
    %34 = vector.multi_reduction <maximumf>, %33, %cst_33 [1] : vector<2x8xf32> to vector<2xf32>
    %35 = vector.shape_cast %34 : vector<2xf32> to vector<2x1xf32>
    %36 = vector.broadcast %35 : vector<2x1xf32> to vector<2x8xf32>
    %37 = arith.subf %33, %36 : vector<2x8xf32>
    %38 = math.exp %37 : vector<2x8xf32>
    %cst_34 = arith.constant dense<0.000000e+00> : vector<2xf32>
    %39 = vector.multi_reduction <add>, %38, %cst_34 [1] : vector<2x8xf32> to vector<2xf32>
    %40 = vector.shape_cast %39 : vector<2xf32> to vector<2x1xf32>
    %41 = vector.broadcast %40 : vector<2x1xf32> to vector<2x8xf32>
    %42 = arith.divf %38, %41 : vector<2x8xf32>
    %43 = vector.extract_strided_slice %22 {offsets = [0, 16], sizes = [2, 8], strides = [1, 1]} : vector<2x32xf32> to vector<2x8xf32>
    %cst_35 = arith.constant dense<0xFF800000> : vector<2xf32>
    %44 = vector.multi_reduction <maximumf>, %43, %cst_35 [1] : vector<2x8xf32> to vector<2xf32>
    %45 = vector.shape_cast %44 : vector<2xf32> to vector<2x1xf32>
    %46 = vector.broadcast %45 : vector<2x1xf32> to vector<2x8xf32>
    %47 = arith.subf %43, %46 : vector<2x8xf32>
    %48 = math.exp %47 : vector<2x8xf32>
    %cst_36 = arith.constant dense<0.000000e+00> : vector<2xf32>
    %49 = vector.multi_reduction <add>, %48, %cst_36 [1] : vector<2x8xf32> to vector<2xf32>
    %50 = vector.shape_cast %49 : vector<2xf32> to vector<2x1xf32>
    %51 = vector.broadcast %50 : vector<2x1xf32> to vector<2x8xf32>
    %52 = arith.divf %48, %51 : vector<2x8xf32>
    %53 = vector.extract_strided_slice %22 {offsets = [0, 24], sizes = [2, 8], strides = [1, 1]} : vector<2x32xf32> to vector<2x8xf32>
    %cst_37 = arith.constant dense<0xFF800000> : vector<2xf32>
    %54 = vector.multi_reduction <maximumf>, %53, %cst_37 [1] : vector<2x8xf32> to vector<2xf32>
    %55 = vector.shape_cast %54 : vector<2xf32> to vector<2x1xf32>
    %56 = vector.broadcast %55 : vector<2x1xf32> to vector<2x8xf32>
    %57 = arith.subf %53, %56 : vector<2x8xf32>
    %58 = math.exp %57 : vector<2x8xf32>
    %cst_38 = arith.constant dense<0.000000e+00> : vector<2xf32>
    %59 = vector.multi_reduction <add>, %58, %cst_38 [1] : vector<2x8xf32> to vector<2xf32>
    %60 = vector.shape_cast %59 : vector<2xf32> to vector<2x1xf32>
    %61 = vector.broadcast %60 : vector<2x1xf32> to vector<2x8xf32>
    %62 = arith.divf %58, %61 : vector<2x8xf32>
    %63 = tpu.concatenate %32, %42, %52, %62 in 1 : vector<2x8xf32>, vector<2x8xf32>, vector<2x8xf32>, vector<2x8xf32> -> vector<2x32xf32>
    %64 = vector.shape_cast %63 : vector<2x32xf32> to vector<2x1x32xf32>
    "tpu.trace_start"() <{level = 10 : i32, message = "bqx,bxp->bqp"}> : () -> ()
    %cst_39 = arith.constant dense<0.000000e+00> : vector<2x1x32xf32>
    %65 = tpu.matmul %64, %1, %cst_39 {dimension_numbers = #tpu.dot_dimension_numbers<[2], [1], [1], [2], [0, 0, 0, 1, 1, 2], [0], [0]>} : vector<2x1x32xf32>, vector<2x32x32xf32>, vector<2x1x32xf32> -> vector<2x1x32xf32>
    "tpu.trace_stop"() : () -> ()
    %66 = vector.shape_cast %65 : vector<2x1x32xf32> to vector<2x32xf32>
    %cst_40 = arith.constant 0.000000e+00 : f32
    %67 = vector.broadcast %cst_40 : f32 to vector<2x8xf32>
    %68 = arith.addf %67, %32 : vector<2x8xf32>
    %69 = arith.addf %68, %42 : vector<2x8xf32>
    %70 = arith.addf %69, %52 : vector<2x8xf32>
    %71 = arith.addf %70, %62 : vector<2x8xf32>
    %cst_41 = arith.constant 2.500000e-01 : f32
    %72 = vector.broadcast %cst_41 : f32 to vector<2x8xf32>
    %73 = arith.mulf %71, %72 : vector<2x8xf32>
    %c0_42 = arith.constant 0 : index
    %c0_43 = arith.constant 0 : index
    %c0_44 = arith.constant 0 : index
    %74 = vector.load %arg19[%c0_42, %c0_43, %c0_44] : memref<7x2x8xf32, #tpu.memory_space<vmem>>, vector<1x2x8xf32>
    %75 = vector.shape_cast %74 : vector<1x2x8xf32> to vector<2x8xf32>
    %76 = vector.shape_cast %73 : vector<2x8xf32> to vector<1x2x8xf32>
    tpu.vector_store %arg19[%c0_42, %c0_43, %c0_44], %76 {strides = array<i32>} : memref<7x2x8xf32, #tpu.memory_space<vmem>>, vector<1x2x8xf32>,
    %c0_45 = arith.constant 0 : index
    %c0_46 = arith.constant 0 : index
    %77 = vector.load %arg14[%c0_45, %c0_46] : memref<1x64xf32, #tpu.memory_space<vmem>>, vector<1x64xf32>
    %78 = vector.shape_cast %77 : vector<1x64xf32> to vector<1x64xf32>
    %79 = vector.broadcast %78 : vector<1x64xf32> to vector<2x64xf32>
    %c0_47 = arith.constant 0 : index
    %c0_48 = arith.constant 0 : index
    %80 = vector.load %arg15[%c0_47, %c0_48] : memref<1x64xf32, #tpu.memory_space<vmem>>, vector<1x64xf32>
    %81 = vector.shape_cast %80 : vector<1x64xf32> to vector<1x64xf32>
    %82 = vector.broadcast %81 : vector<1x64xf32> to vector<2x64xf32>
    %c0_49 = arith.constant 0 : index
    %c0_50 = arith.constant 0 : index
    %83 = vector.load %arg16[%c0_49, %c0_50] : memref<1x32xf32, #tpu.memory_space<vmem>>, vector<1x32xf32>
    %84 = vector.shape_cast %83 : vector<1x32xf32> to vector<1x32xf32>
    %85 = vector.broadcast %84 : vector<1x32xf32> to vector<2x32xf32>
    %c0_51 = arith.constant 0 : index
    %c0_52 = arith.constant 0 : index
    %86 = vector.load %arg17[%c0_51, %c0_52] : memref<1x32xf32, #tpu.memory_space<vmem>>, vector<1x32xf32>
    %87 = vector.shape_cast %86 : vector<1x32xf32> to vector<1x32xf32>
    %88 = vector.broadcast %87 : vector<1x32xf32> to vector<2x32xf32>
    %89 = vector.extract_strided_slice %3 {offsets = [0, 0], sizes = [1, 64], strides = [1, 1]} : vector<16x64xf32> to vector<1x64xf32>
    %90 = vector.shape_cast %89 : vector<1x64xf32> to vector<1x64xf32>
    %91 = vector.broadcast %90 : vector<1x64xf32> to vector<2x64xf32>
    %92 = tpu.iota {dimensions = array<i32: 1>} : vector<2x16xi32>
    %c0_i32 = arith.constant 0 : i32
    %93 = tpu.concatenate %91, %66 in 1 : vector<2x64xf32>, vector<2x32xf32> -> vector<2x96xf32>
    %cst_53 = arith.constant dense<0.000000e+00> : vector<2x256xf32>
    %94 = tpu.matmul %93, %7, %cst_53 {dimension_numbers = #tpu.dot_dimension_numbers<[1], [0], [0], [1], [0, 0, 1, 1], [], []>} : vector<2x96xf32>, vector<96x256xf32>, vector<2x256xf32> -> vector<2x256xf32>
    %cst_54 = arith.constant dense<0.000000e+00> : vector<2x256xf32>
    %95 = tpu.matmul %79, %8, %cst_54 {dimension_numbers = #tpu.dot_dimension_numbers<[1], [0], [0], [1], [0, 0, 1, 1], [], []>} : vector<2x64xf32>, vector<64x256xf32>, vector<2x256xf32> -> vector<2x256xf32>
    %96 = arith.addf %94, %95 : vector<2x256xf32>
    %97 = vector.broadcast %9 : vector<1x256xf32> to vector<2x256xf32>
    %98 = arith.addf %96, %97 : vector<2x256xf32>
    %99 = vector.extract_strided_slice %98 {offsets = [0, 0], sizes = [2, 64], strides = [1, 1]} : vector<2x256xf32> to vector<2x64xf32>
    %100 = arith.negf %99 : vector<2x64xf32>
    %101 = math.exp %100 : vector<2x64xf32>
    %cst_55 = arith.constant 1.000000e+00 : f32
    %102 = vector.broadcast %cst_55 : f32 to vector<2x64xf32>
    %103 = arith.addf %102, %101 : vector<2x64xf32>
    %104 = arith.divf %102, %103 : vector<2x64xf32>
    %105 = vector.extract_strided_slice %98 {offsets = [0, 64], sizes = [2, 64], strides = [1, 1]} : vector<2x256xf32> to vector<2x64xf32>
    %106 = arith.negf %105 : vector<2x64xf32>
    %107 = math.exp %106 : vector<2x64xf32>
    %cst_56 = arith.constant 1.000000e+00 : f32
    %108 = vector.broadcast %cst_56 : f32 to vector<2x64xf32>
    %109 = arith.addf %108, %107 : vector<2x64xf32>
    %110 = arith.divf %108, %109 : vector<2x64xf32>
    %111 = vector.extract_strided_slice %98 {offsets = [0, 128], sizes = [2, 64], strides = [1, 1]} : vector<2x256xf32> to vector<2x64xf32>
    %112 = math.tanh %111 : vector<2x64xf32>
    %113 = vector.extract_strided_slice %98 {offsets = [0, 192], sizes = [2, 64], strides = [1, 1]} : vector<2x256xf32> to vector<2x64xf32>
    %114 = arith.negf %113 : vector<2x64xf32>
    %115 = math.exp %114 : vector<2x64xf32>
    %cst_57 = arith.constant 1.000000e+00 : f32
    %116 = vector.broadcast %cst_57 : f32 to vector<2x64xf32>
    %117 = arith.addf %116, %115 : vector<2x64xf32>
    %118 = arith.divf %116, %117 : vector<2x64xf32>
    %119 = arith.mulf %110, %82 : vector<2x64xf32>
    %120 = arith.mulf %104, %112 : vector<2x64xf32>
    %121 = arith.addf %119, %120 : vector<2x64xf32>
    %122 = math.tanh %121 : vector<2x64xf32>
    %123 = arith.mulf %118, %122 : vector<2x64xf32>
    %cst_58 = arith.constant dense<0.000000e+00> : vector<2x128xf32>
    %124 = tpu.matmul %123, %10, %cst_58 {dimension_numbers = #tpu.dot_dimension_numbers<[1], [0], [0], [1], [0, 0, 1, 1], [], []>} : vector<2x64xf32>, vector<64x128xf32>, vector<2x128xf32> -> vector<2x128xf32>
    %cst_59 = arith.constant dense<0.000000e+00> : vector<2x128xf32>
    %125 = tpu.matmul %85, %11, %cst_59 {dimension_numbers = #tpu.dot_dimension_numbers<[1], [0], [0], [1], [0, 0, 1, 1], [], []>} : vector<2x32xf32>, vector<32x128xf32>, vector<2x128xf32> -> vector<2x128xf32>
    %126 = arith.addf %124, %125 : vector<2x128xf32>
    %127 = vector.broadcast %12 : vector<1x128xf32> to vector<2x128xf32>
    %128 = arith.addf %126, %127 : vector<2x128xf32>
    %129 = vector.extract_strided_slice %128 {offsets = [0, 0], sizes = [2, 32], strides = [1, 1]} : vector<2x128xf32> to vector<2x32xf32>
    %130 = arith.negf %129 : vector<2x32xf32>
    %131 = math.exp %130 : vector<2x32xf32>
    %cst_60 = arith.constant 1.000000e+00 : f32
    %132 = vector.broadcast %cst_60 : f32 to vector<2x32xf32>
    %133 = arith.addf %132, %131 : vector<2x32xf32>
    %134 = arith.divf %132, %133 : vector<2x32xf32>
    %135 = vector.extract_strided_slice %128 {offsets = [0, 32], sizes = [2, 32], strides = [1, 1]} : vector<2x128xf32> to vector<2x32xf32>
    %136 = arith.negf %135 : vector<2x32xf32>
    %137 = math.exp %136 : vector<2x32xf32>
    %cst_61 = arith.constant 1.000000e+00 : f32
    %138 = vector.broadcast %cst_61 : f32 to vector<2x32xf32>
    %139 = arith.addf %138, %137 : vector<2x32xf32>
    %140 = arith.divf %138, %139 : vector<2x32xf32>
    %141 = vector.extract_strided_slice %128 {offsets = [0, 64], sizes = [2, 32], strides = [1, 1]} : vector<2x128xf32> to vector<2x32xf32>
    %142 = math.tanh %141 : vector<2x32xf32>
    %143 = vector.extract_strided_slice %128 {offsets = [0, 96], sizes = [2, 32], strides = [1, 1]} : vector<2x128xf32> to vector<2x32xf32>
    %144 = arith.negf %143 : vector<2x32xf32>
    %145 = math.exp %144 : vector<2x32xf32>
    %cst_62 = arith.constant 1.000000e+00 : f32
    %146 = vector.broadcast %cst_62 : f32 to vector<2x32xf32>
    %147 = arith.addf %146, %145 : vector<2x32xf32>
    %148 = arith.divf %146, %147 : vector<2x32xf32>
    %149 = arith.mulf %140, %88 : vector<2x32xf32>
    %150 = arith.mulf %134, %142 : vector<2x32xf32>
    %151 = arith.addf %149, %150 : vector<2x32xf32>
    %152 = math.tanh %151 : vector<2x32xf32>
    %153 = arith.mulf %148, %152 : vector<2x32xf32>
    %cst_63 = arith.constant dense<0.000000e+00> : vector<2x32xf32>
    %154 = tpu.matmul %153, %6, %cst_63 {dimension_numbers = #tpu.dot_dimension_numbers<[1], [0], [0], [1], [0, 0, 1, 1], [], []>} : vector<2x32xf32>, vector<32x32xf32>, vector<2x32xf32> -> vector<2x32xf32>
    %155 = vector.shape_cast %154 : vector<2x32xf32> to vector<2x1x32xf32>
    "tpu.trace_start"() <{level = 10 : i32, message = "bqp,bpx->bqx"}> : () -> ()
    %cst_64 = arith.constant dense<0.000000e+00> : vector<2x1x32xf32>
    %156 = tpu.matmul %155, %0, %cst_64 {dimension_numbers = #tpu.dot_dimension_numbers<[2], [1], [1], [2], [0, 0, 0, 1, 1, 2], [0], [0]>} : vector<2x1x32xf32>, vector<2x32x32xf32>, vector<2x1x32xf32> -> vector<2x1x32xf32>
    "tpu.trace_stop"() : () -> ()
    %157 = vector.shape_cast %156 : vector<2x1x32xf32> to vector<2x32xf32>
    %cst_65 = arith.constant 0.353553385 : f32
    %158 = vector.broadcast %cst_65 : f32 to vector<2x32xf32>
    %159 = arith.mulf %157, %158 : vector<2x32xf32>
    %160 = arith.addf %159, %2 : vector<2x32xf32>
    %161 = vector.extract_strided_slice %160 {offsets = [0, 0], sizes = [2, 8], strides = [1, 1]} : vector<2x32xf32> to vector<2x8xf32>
    %cst_66 = arith.constant dense<0xFF800000> : vector<2xf32>
    %162 = vector.multi_reduction <maximumf>, %161, %cst_66 [1] : vector<2x8xf32> to vector<2xf32>
    %163 = vector.shape_cast %162 : vector<2xf32> to vector<2x1xf32>
    %164 = vector.broadcast %163 : vector<2x1xf32> to vector<2x8xf32>
    %165 = arith.subf %161, %164 : vector<2x8xf32>
    %166 = math.exp %165 : vector<2x8xf32>
    %cst_67 = arith.constant dense<0.000000e+00> : vector<2xf32>
    %167 = vector.multi_reduction <add>, %166, %cst_67 [1] : vector<2x8xf32> to vector<2xf32>
    %168 = vector.shape_cast %167 : vector<2xf32> to vector<2x1xf32>
    %169 = vector.broadcast %168 : vector<2x1xf32> to vector<2x8xf32>
    %170 = arith.divf %166, %169 : vector<2x8xf32>
    %171 = vector.extract_strided_slice %160 {offsets = [0, 8], sizes = [2, 8], strides = [1, 1]} : vector<2x32xf32> to vector<2x8xf32>
    %cst_68 = arith.constant dense<0xFF800000> : vector<2xf32>
    %172 = vector.multi_reduction <maximumf>, %171, %cst_68 [1] : vector<2x8xf32> to vector<2xf32>
    %173 = vector.shape_cast %172 : vector<2xf32> to vector<2x1xf32>
    %174 = vector.broadcast %173 : vector<2x1xf32> to vector<2x8xf32>
    %175 = arith.subf %171, %174 : vector<2x8xf32>
    %176 = math.exp %175 : vector<2x8xf32>
    %cst_69 = arith.constant dense<0.000000e+00> : vector<2xf32>
    %177 = vector.multi_reduction <add>, %176, %cst_69 [1] : vector<2x8xf32> to vector<2xf32>
    %178 = vector.shape_cast %177 : vector<2xf32> to vector<2x1xf32>
    %179 = vector.broadcast %178 : vector<2x1xf32> to vector<2x8xf32>
    %180 = arith.divf %176, %179 : vector<2x8xf32>
    %181 = vector.extract_strided_slice %160 {offsets = [0, 16], sizes = [2, 8], strides = [1, 1]} : vector<2x32xf32> to vector<2x8xf32>
    %cst_70 = arith.constant dense<0xFF800000> : vector<2xf32>
    %182 = vector.multi_reduction <maximumf>, %181, %cst_70 [1] : vector<2x8xf32> to vector<2xf32>
    %183 = vector.shape_cast %182 : vector<2xf32> to vector<2x1xf32>
    %184 = vector.broadcast %183 : vector<2x1xf32> to vector<2x8xf32>
    %185 = arith.subf %181, %184 : vector<2x8xf32>
    %186 = math.exp %185 : vector<2x8xf32>
    %cst_71 = arith.constant dense<0.000000e+00> : vector<2xf32>
    %187 = vector.multi_reduction <add>, %186, %cst_71 [1] : vector<2x8xf32> to vector<2xf32>
    %188 = vector.shape_cast %187 : vector<2xf32> to vector<2x1xf32>
    %189 = vector.broadcast %188 : vector<2x1xf32> to vector<2x8xf32>
    %190 = arith.divf %186, %189 : vector<2x8xf32>
    %191 = vector.extract_strided_slice %160 {offsets = [0, 24], sizes = [2, 8], strides = [1, 1]} : vector<2x32xf32> to vector<2x8xf32>
    %cst_72 = arith.constant dense<0xFF800000> : vector<2xf32>
    %192 = vector.multi_reduction <maximumf>, %191, %cst_72 [1] : vector<2x8xf32> to vector<2xf32>
    %193 = vector.shape_cast %192 : vector<2xf32> to vector<2x1xf32>
    %194 = vector.broadcast %193 : vector<2x1xf32> to vector<2x8xf32>
    %195 = arith.subf %191, %194 : vector<2x8xf32>
    %196 = math.exp %195 : vector<2x8xf32>
    %cst_73 = arith.constant dense<0.000000e+00> : vector<2xf32>
    %197 = vector.multi_reduction <add>, %196, %cst_73 [1] : vector<2x8xf32> to vector<2xf32>
    %198 = vector.shape_cast %197 : vector<2xf32> to vector<2x1xf32>
    %199 = vector.broadcast %198 : vector<2x1xf32> to vector<2x8xf32>
    %200 = arith.divf %196, %199 : vector<2x8xf32>
    %201 = tpu.concatenate %170, %180, %190, %200 in 1 : vector<2x8xf32>, vector<2x8xf32>, vector<2x8xf32>, vector<2x8xf32> -> vector<2x32xf32>
    %202 = vector.shape_cast %201 : vector<2x32xf32> to vector<2x1x32xf32>
    "tpu.trace_start"() <{level = 10 : i32, message = "bqx,bxp->bqp"}> : () -> ()
    %cst_74 = arith.constant dense<0.000000e+00> : vector<2x1x32xf32>
    %203 = tpu.matmul %202, %1, %cst_74 {dimension_numbers = #tpu.dot_dimension_numbers<[2], [1], [1], [2], [0, 0, 0, 1, 1, 2], [0], [0]>} : vector<2x1x32xf32>, vector<2x32x32xf32>, vector<2x1x32xf32> -> vector<2x1x32xf32>
    "tpu.trace_stop"() : () -> ()
    %204 = vector.shape_cast %203 : vector<2x1x32xf32> to vector<2x32xf32>
    %cst_75 = arith.constant 0.000000e+00 : f32
    %205 = vector.broadcast %cst_75 : f32 to vector<2x8xf32>
    %206 = arith.addf %205, %170 : vector<2x8xf32>
    %207 = arith.addf %206, %180 : vector<2x8xf32>
    %208 = arith.addf %207, %190 : vector<2x8xf32>
    %209 = arith.addf %208, %200 : vector<2x8xf32>
    %cst_76 = arith.constant 2.500000e-01 : f32
    %210 = vector.broadcast %cst_76 : f32 to vector<2x8xf32>
    %211 = arith.mulf %209, %210 : vector<2x8xf32>
    %212 = tpu.concatenate %154, %204 in 1 : vector<2x32xf32>, vector<2x32xf32> -> vector<2x64xf32>
    %cst_77 = arith.constant dense<0.000000e+00> : vector<2x16xf32>
    %213 = tpu.matmul %212, %4, %cst_77 {dimension_numbers = #tpu.dot_dimension_numbers<[1], [0], [0], [1], [0, 0, 1, 1], [], []>} : vector<2x64xf32>, vector<64x16xf32>, vector<2x16xf32> -> vector<2x16xf32>
    %214 = vector.broadcast %5 : vector<1x16xf32> to vector<2x16xf32>
    %215 = arith.addf %213, %214 : vector<2x16xf32>
    %216 = arith.index_cast %c0_i32 : i32 to index
    %c0_78 = arith.constant 0 : index
    %c0_79 = arith.constant 0 : index
    %217 = vector.load %arg18[%216, %c0_78, %c0_79] : memref<6x2x16xf32, #tpu.memory_space<vmem>>, vector<1x2x16xf32>
    %218 = vector.shape_cast %217 : vector<1x2x16xf32> to vector<2x16xf32>
    %219 = vector.shape_cast %215 : vector<2x16xf32> to vector<1x2x16xf32>
    tpu.vector_store %arg18[%216, %c0_78, %c0_79], %219 {strides = array<i32>} : memref<6x2x16xf32, #tpu.memory_space<vmem>>, vector<1x2x16xf32>,
    %c1_i32 = arith.constant 1 : i32
    %220 = arith.addi %c0_i32, %c1_i32 : i32
    %221 = arith.index_cast %220 : i32 to index
    %c0_80 = arith.constant 0 : index
    %c0_81 = arith.constant 0 : index
    %222 = vector.load %arg19[%221, %c0_80, %c0_81] : memref<7x2x8xf32, #tpu.memory_space<vmem>>, vector<1x2x8xf32>
    %223 = vector.shape_cast %222 : vector<1x2x8xf32> to vector<2x8xf32>
    %224 = vector.shape_cast %211 : vector<2x8xf32> to vector<1x2x8xf32>
    tpu.vector_store %arg19[%221, %c0_80, %c0_81], %224 {strides = array<i32>} : memref<7x2x8xf32, #tpu.memory_space<vmem>>, vector<1x2x8xf32>,
    %cst_82 = arith.constant dense<0xFF800000> : vector<2xf32>
    %225 = vector.multi_reduction <maximumf>, %215, %cst_82 [1] : vector<2x16xf32> to vector<2xf32>
    %226 = vector.shape_cast %225 : vector<2xf32> to vector<2x1xf32>
    %227 = vector.broadcast %226 : vector<2x1xf32> to vector<2x16xf32>
    %228 = arith.cmpf oge, %215, %227 : vector<2x16xf32>
    %c16_i32 = arith.constant 16 : i32
    %229 = vector.broadcast %c16_i32 : i32 to vector<2x16xi32>
    %230 = arith.select %228, %92, %229 : vector<2x16xi1>, vector<2x16xi32>
    %cst_83 = arith.constant dense<2147483647> : vector<2xi32>
    %231 = vector.multi_reduction <minsi>, %230, %cst_83 [1] : vector<2x16xi32> to vector<2xi32>
    %232 = vector.shape_cast %231 : vector<2xi32> to vector<2x1xi32>
    %233 = vector.broadcast %232 : vector<2x1xi32> to vector<2x16xi32>
    %234 = arith.cmpi eq, %92, %233 : vector<2x16xi32>
    %235 = arith.extui %234 : vector<2x16xi1> to vector<2x16xi32>
    %236 = arith.sitofp %235 : vector<2x16xi32> to vector<2x16xf32>
    %cst_84 = arith.constant dense<0.000000e+00> : vector<2x64xf32>
    %237 = tpu.matmul %236, %3, %cst_84 {dimension_numbers = #tpu.dot_dimension_numbers<[1], [0], [0], [1], [0, 0, 1, 1], [], []>} : vector<2x16xf32>, vector<16x64xf32>, vector<2x64xf32> -> vector<2x64xf32>
    %c1_i32_85 = arith.constant 1 : i32
    %238 = tpu.concatenate %237, %204 in 1 : vector<2x64xf32>, vector<2x32xf32> -> vector<2x96xf32>
    %cst_86 = arith.constant dense<0.000000e+00> : vector<2x256xf32>
    %239 = tpu.matmul %238, %7, %cst_86 {dimension_numbers = #tpu.dot_dimension_numbers<[1], [0], [0], [1], [0, 0, 1, 1], [], []>} : vector<2x96xf32>, vector<96x256xf32>, vector<2x256xf32> -> vector<2x256xf32>
    %cst_87 = arith.constant dense<0.000000e+00> : vector<2x256xf32>
    %240 = tpu.matmul %123, %8, %cst_87 {dimension_numbers = #tpu.dot_dimension_numbers<[1], [0], [0], [1], [0, 0, 1, 1], [], []>} : vector<2x64xf32>, vector<64x256xf32>, vector<2x256xf32> -> vector<2x256xf32>
    %241 = arith.addf %239, %240 : vector<2x256xf32>
    %242 = vector.broadcast %9 : vector<1x256xf32> to vector<2x256xf32>
    %243 = arith.addf %241, %242 : vector<2x256xf32>
    %244 = vector.extract_strided_slice %243 {offsets = [0, 0], sizes = [2, 64], strides = [1, 1]} : vector<2x256xf32> to vector<2x64xf32>
    %245 = arith.negf %244 : vector<2x64xf32>
    %246 = math.exp %245 : vector<2x64xf32>
    %cst_88 = arith.constant 1.000000e+00 : f32
    %247 = vector.broadcast %cst_88 : f32 to vector<2x64xf32>
    %248 = arith.addf %247, %246 : vector<2x64xf32>
    %249 = arith.divf %247, %248 : vector<2x64xf32>
    %250 = vector.extract_strided_slice %243 {offsets = [0, 64], sizes = [2, 64], strides = [1, 1]} : vector<2x256xf32> to vector<2x64xf32>
    %251 = arith.negf %250 : vector<2x64xf32>
    %252 = math.exp %251 : vector<2x64xf32>
    %cst_89 = arith.constant 1.000000e+00 : f32
    %253 = vector.broadcast %cst_89 : f32 to vector<2x64xf32>
    %254 = arith.addf %253, %252 : vector<2x64xf32>
    %255 = arith.divf %253, %254 : vector<2x64xf32>
    %256 = vector.extract_strided_slice %243 {offsets = [0, 128], sizes = [2, 64], strides = [1, 1]} : vector<2x256xf32> to vector<2x64xf32>
    %257 = math.tanh %256 : vector<2x64xf32>
    %258 = vector.extract_strided_slice %243 {offsets = [0, 192], sizes = [2, 64], strides = [1, 1]} : vector<2x256xf32> to vector<2x64xf32>
    %259 = arith.negf %258 : vector<2x64xf32>
    %260 = math.exp %259 : vector<2x64xf32>
    %cst_90 = arith.constant 1.000000e+00 : f32
    %261 = vector.broadcast %cst_90 : f32 to vector<2x64xf32>
    %262 = arith.addf %261, %260 : vector<2x64xf32>
    %263 = arith.divf %261, %262 : vector<2x64xf32>
    %264 = arith.mulf %255, %121 : vector<2x64xf32>
    %265 = arith.mulf %249, %257 : vector<2x64xf32>
    %266 = arith.addf %264, %265 : vector<2x64xf32>
    %267 = math.tanh %266 : vector<2x64xf32>
    %268 = arith.mulf %263, %267 : vector<2x64xf32>
    %cst_91 = arith.constant dense<0.000000e+00> : vector<2x128xf32>
    %269 = tpu.matmul %268, %10, %cst_91 {dimension_numbers = #tpu.dot_dimension_numbers<[1], [0], [0], [1], [0, 0, 1, 1], [], []>} : vector<2x64xf32>, vector<64x128xf32>, vector<2x128xf32> -> vector<2x128xf32>
    %cst_92 = arith.constant dense<0.000000e+00> : vector<2x128xf32>
    %270 = tpu.matmul %153, %11, %cst_92 {dimension_numbers = #tpu.dot_dimension_numbers<[1], [0], [0], [1], [0, 0, 1, 1], [], []>} : vector<2x32xf32>, vector<32x128xf32>, vector<2x128xf32> -> vector<2x128xf32>
    %271 = arith.addf %269, %270 : vector<2x128xf32>
    %272 = vector.broadcast %12 : vector<1x128xf32> to vector<2x128xf32>
    %273 = arith.addf %271, %272 : vector<2x128xf32>
    %274 = vector.extract_strided_slice %273 {offsets = [0, 0], sizes = [2, 32], strides = [1, 1]} : vector<2x128xf32> to vector<2x32xf32>
    %275 = arith.negf %274 : vector<2x32xf32>
    %276 = math.exp %275 : vector<2x32xf32>
    %cst_93 = arith.constant 1.000000e+00 : f32
    %277 = vector.broadcast %cst_93 : f32 to vector<2x32xf32>
    %278 = arith.addf %277, %276 : vector<2x32xf32>
    %279 = arith.divf %277, %278 : vector<2x32xf32>
    %280 = vector.extract_strided_slice %273 {offsets = [0, 32], sizes = [2, 32], strides = [1, 1]} : vector<2x128xf32> to vector<2x32xf32>
    %281 = arith.negf %280 : vector<2x32xf32>
    %282 = math.exp %281 : vector<2x32xf32>
    %cst_94 = arith.constant 1.000000e+00 : f32
    %283 = vector.broadcast %cst_94 : f32 to vector<2x32xf32>
    %284 = arith.addf %283, %282 : vector<2x32xf32>
    %285 = arith.divf %283, %284 : vector<2x32xf32>
    %286 = vector.extract_strided_slice %273 {offsets = [0, 64], sizes = [2, 32], strides = [1, 1]} : vector<2x128xf32> to vector<2x32xf32>
    %287 = math.tanh %286 : vector<2x32xf32>
    %288 = vector.extract_strided_slice %273 {offsets = [0, 96], sizes = [2, 32], strides = [1, 1]} : vector<2x128xf32> to vector<2x32xf32>
    %289 = arith.negf %288 : vector<2x32xf32>
    %290 = math.exp %289 : vector<2x32xf32>
    %cst_95 = arith.constant 1.000000e+00 : f32
    %291 = vector.broadcast %cst_95 : f32 to vector<2x32xf32>
    %292 = arith.addf %291, %290 : vector<2x32xf32>
    %293 = arith.divf %291, %292 : vector<2x32xf32>
    %294 = arith.mulf %285, %151 : vector<2x32xf32>
    %295 = arith.mulf %279, %287 : vector<2x32xf32>
    %296 = arith.addf %294, %295 : vector<2x32xf32>
    %297 = math.tanh %296 : vector<2x32xf32>
    %298 = arith.mulf %293, %297 : vector<2x32xf32>
    %cst_96 = arith.constant dense<0.000000e+00> : vector<2x32xf32>
    %299 = tpu.matmul %298, %6, %cst_96 {dimension_numbers = #tpu.dot_dimension_numbers<[1], [0], [0], [1], [0, 0, 1, 1], [], []>} : vector<2x32xf32>, vector<32x32xf32>, vector<2x32xf32> -> vector<2x32xf32>
    %300 = vector.shape_cast %299 : vector<2x32xf32> to vector<2x1x32xf32>
    "tpu.trace_start"() <{level = 10 : i32, message = "bqp,bpx->bqx"}> : () -> ()
    %cst_97 = arith.constant dense<0.000000e+00> : vector<2x1x32xf32>
    %301 = tpu.matmul %300, %0, %cst_97 {dimension_numbers = #tpu.dot_dimension_numbers<[2], [1], [1], [2], [0, 0, 0, 1, 1, 2], [0], [0]>} : vector<2x1x32xf32>, vector<2x32x32xf32>, vector<2x1x32xf32> -> vector<2x1x32xf32>
    "tpu.trace_stop"() : () -> ()
    %302 = vector.shape_cast %301 : vector<2x1x32xf32> to vector<2x32xf32>
    %cst_98 = arith.constant 0.353553385 : f32
    %303 = vector.broadcast %cst_98 : f32 to vector<2x32xf32>
    %304 = arith.mulf %302, %303 : vector<2x32xf32>
    %305 = arith.addf %304, %2 : vector<2x32xf32>
    %306 = vector.extract_strided_slice %305 {offsets = [0, 0], sizes = [2, 8], strides = [1, 1]} : vector<2x32xf32> to vector<2x8xf32>
    %cst_99 = arith.constant dense<0xFF800000> : vector<2xf32>
    %307 = vector.multi_reduction <maximumf>, %306, %cst_99 [1] : vector<2x8xf32> to vector<2xf32>
    %308 = vector.shape_cast %307 : vector<2xf32> to vector<2x1xf32>
    %309 = vector.broadcast %308 : vector<2x1xf32> to vector<2x8xf32>
    %310 = arith.subf %306, %309 : vector<2x8xf32>
    %311 = math.exp %310 : vector<2x8xf32>
    %cst_100 = arith.constant dense<0.000000e+00> : vector<2xf32>
    %312 = vector.multi_reduction <add>, %311, %cst_100 [1] : vector<2x8xf32> to vector<2xf32>
    %313 = vector.shape_cast %312 : vector<2xf32> to vector<2x1xf32>
    %314 = vector.broadcast %313 : vector<2x1xf32> to vector<2x8xf32>
    %315 = arith.divf %311, %314 : vector<2x8xf32>
    %316 = vector.extract_strided_slice %305 {offsets = [0, 8], sizes = [2, 8], strides = [1, 1]} : vector<2x32xf32> to vector<2x8xf32>
    %cst_101 = arith.constant dense<0xFF800000> : vector<2xf32>
    %317 = vector.multi_reduction <maximumf>, %316, %cst_101 [1] : vector<2x8xf32> to vector<2xf32>
    %318 = vector.shape_cast %317 : vector<2xf32> to vector<2x1xf32>
    %319 = vector.broadcast %318 : vector<2x1xf32> to vector<2x8xf32>
    %320 = arith.subf %316, %319 : vector<2x8xf32>
    %321 = math.exp %320 : vector<2x8xf32>
    %cst_102 = arith.constant dense<0.000000e+00> : vector<2xf32>
    %322 = vector.multi_reduction <add>, %321, %cst_102 [1] : vector<2x8xf32> to vector<2xf32>
    %323 = vector.shape_cast %322 : vector<2xf32> to vector<2x1xf32>
    %324 = vector.broadcast %323 : vector<2x1xf32> to vector<2x8xf32>
    %325 = arith.divf %321, %324 : vector<2x8xf32>
    %326 = vector.extract_strided_slice %305 {offsets = [0, 16], sizes = [2, 8], strides = [1, 1]} : vector<2x32xf32> to vector<2x8xf32>
    %cst_103 = arith.constant dense<0xFF800000> : vector<2xf32>
    %327 = vector.multi_reduction <maximumf>, %326, %cst_103 [1] : vector<2x8xf32> to vector<2xf32>
    %328 = vector.shape_cast %327 : vector<2xf32> to vector<2x1xf32>
    %329 = vector.broadcast %328 : vector<2x1xf32> to vector<2x8xf32>
    %330 = arith.subf %326, %329 : vector<2x8xf32>
    %331 = math.exp %330 : vector<2x8xf32>
    %cst_104 = arith.constant dense<0.000000e+00> : vector<2xf32>
    %332 = vector.multi_reduction <add>, %331, %cst_104 [1] : vector<2x8xf32> to vector<2xf32>
    %333 = vector.shape_cast %332 : vector<2xf32> to vector<2x1xf32>
    %334 = vector.broadcast %333 : vector<2x1xf32> to vector<2x8xf32>
    %335 = arith.divf %331, %334 : vector<2x8xf32>
    %336 = vector.extract_strided_slice %305 {offsets = [0, 24], sizes = [2, 8], strides = [1, 1]} : vector<2x32xf32> to vector<2x8xf32>
    %cst_105 = arith.constant dense<0xFF800000> : vector<2xf32>
    %337 = vector.multi_reduction <maximumf>, %336, %cst_105 [1] : vector<2x8xf32> to vector<2xf32>
    %338 = vector.shape_cast %337 : vector<2xf32> to vector<2x1xf32>
    %339 = vector.broadcast %338 : vector<2x1xf32> to vector<2x8xf32>
    %340 = arith.subf %336, %339 : vector<2x8xf32>
    %341 = math.exp %340 : vector<2x8xf32>
    %cst_106 = arith.constant dense<0.000000e+00> : vector<2xf32>
    %342 = vector.multi_reduction <add>, %341, %cst_106 [1] : vector<2x8xf32> to vector<2xf32>
    %343 = vector.shape_cast %342 : vector<2xf32> to vector<2x1xf32>
    %344 = vector.broadcast %343 : vector<2x1xf32> to vector<2x8xf32>
    %345 = arith.divf %341, %344 : vector<2x8xf32>
    %346 = tpu.concatenate %315, %325, %335, %345 in 1 : vector<2x8xf32>, vector<2x8xf32>, vector<2x8xf32>, vector<2x8xf32> -> vector<2x32xf32>
    %347 = vector.shape_cast %346 : vector<2x32xf32> to vector<2x1x32xf32>
    "tpu.trace_start"() <{level = 10 : i32, message = "bqx,bxp->bqp"}> : () -> ()
    %cst_107 = arith.constant dense<0.000000e+00> : vector<2x1x32xf32>
    %348 = tpu.matmul %347, %1, %cst_107 {dimension_numbers = #tpu.dot_dimension_numbers<[2], [1], [1], [2], [0, 0, 0, 1, 1, 2], [0], [0]>} : vector<2x1x32xf32>, vector<2x32x32xf32>, vector<2x1x32xf32> -> vector<2x1x32xf32>
    "tpu.trace_stop"() : () -> ()
    %349 = vector.shape_cast %348 : vector<2x1x32xf32> to vector<2x32xf32>
    %cst_108 = arith.constant 0.000000e+00 : f32
    %350 = vector.broadcast %cst_108 : f32 to vector<2x8xf32>
    %351 = arith.addf %350, %315 : vector<2x8xf32>
    %352 = arith.addf %351, %325 : vector<2x8xf32>
    %353 = arith.addf %352, %335 : vector<2x8xf32>
    %354 = arith.addf %353, %345 : vector<2x8xf32>
    %cst_109 = arith.constant 2.500000e-01 : f32
    %355 = vector.broadcast %cst_109 : f32 to vector<2x8xf32>
    %356 = arith.mulf %354, %355 : vector<2x8xf32>
    %357 = tpu.concatenate %299, %349 in 1 : vector<2x32xf32>, vector<2x32xf32> -> vector<2x64xf32>
    %cst_110 = arith.constant dense<0.000000e+00> : vector<2x16xf32>
    %358 = tpu.matmul %357, %4, %cst_110 {dimension_numbers = #tpu.dot_dimension_numbers<[1], [0], [0], [1], [0, 0, 1, 1], [], []>} : vector<2x64xf32>, vector<64x16xf32>, vector<2x16xf32> -> vector<2x16xf32>
    %359 = vector.broadcast %5 : vector<1x16xf32> to vector<2x16xf32>
    %360 = arith.addf %358, %359 : vector<2x16xf32>
    %361 = arith.index_cast %c1_i32_85 : i32 to index
    %c0_111 = arith.constant 0 : index
    %c0_112 = arith.constant 0 : index
    %362 = vector.load %arg18[%361, %c0_111, %c0_112] : memref<6x2x16xf32, #tpu.memory_space<vmem>>, vector<1x2x16xf32>
    %363 = vector.shape_cast %362 : vector<1x2x16xf32> to vector<2x16xf32>
    %364 = vector.shape_cast %360 : vector<2x16xf32> to vector<1x2x16xf32>
    tpu.vector_store %arg18[%361, %c0_111, %c0_112], %364 {strides = array<i32>} : memref<6x2x16xf32, #tpu.memory_space<vmem>>, vector<1x2x16xf32>,
    %c1_i32_113 = arith.constant 1 : i32
    %365 = arith.addi %c1_i32_85, %c1_i32_113 : i32
    %366 = arith.index_cast %365 : i32 to index
    %c0_114 = arith.constant 0 : index
    %c0_115 = arith.constant 0 : index
    %367 = vector.load %arg19[%366, %c0_114, %c0_115] : memref<7x2x8xf32, #tpu.memory_space<vmem>>, vector<1x2x8xf32>
    %368 = vector.shape_cast %367 : vector<1x2x8xf32> to vector<2x8xf32>
    %369 = vector.shape_cast %356 : vector<2x8xf32> to vector<1x2x8xf32>
    tpu.vector_store %arg19[%366, %c0_114, %c0_115], %369 {strides = array<i32>} : memref<7x2x8xf32, #tpu.memory_space<vmem>>, vector<1x2x8xf32>,
    %cst_116 = arith.constant dense<0xFF800000> : vector<2xf32>
    %370 = vector.multi_reduction <maximumf>, %360, %cst_116 [1] : vector<2x16xf32> to vector<2xf32>
    %371 = vector.shape_cast %370 : vector<2xf32> to vector<2x1xf32>
    %372 = vector.broadcast %371 : vector<2x1xf32> to vector<2x16xf32>
    %373 = arith.cmpf oge, %360, %372 : vector<2x16xf32>
    %c16_i32_117 = arith.constant 16 : i32
    %374 = vector.broadcast %c16_i32_117 : i32 to vector<2x16xi32>
    %375 = arith.select %373, %92, %374 : vector<2x16xi1>, vector<2x16xi32>
    %cst_118 = arith.constant dense<2147483647> : vector<2xi32>
    %376 = vector.multi_reduction <minsi>, %375, %cst_118 [1] : vector<2x16xi32> to vector<2xi32>
    %377 = vector.shape_cast %376 : vector<2xi32> to vector<2x1xi32>
    %378 = vector.broadcast %377 : vector<2x1xi32> to vector<2x16xi32>
    %379 = arith.cmpi eq, %92, %378 : vector<2x16xi32>
    %380 = arith.extui %379 : vector<2x16xi1> to vector<2x16xi32>
    %381 = arith.sitofp %380 : vector<2x16xi32> to vector<2x16xf32>
    %cst_119 = arith.constant dense<0.000000e+00> : vector<2x64xf32>
    %382 = tpu.matmul %381, %3, %cst_119 {dimension_numbers = #tpu.dot_dimension_numbers<[1], [0], [0], [1], [0, 0, 1, 1], [], []>} : vector<2x16xf32>, vector<16x64xf32>, vector<2x64xf32> -> vector<2x64xf32>
    %c2_i32 = arith.constant 2 : i32
    %383 = tpu.concatenate %382, %349 in 1 : vector<2x64xf32>, vector<2x32xf32> -> vector<2x96xf32>
    %cst_120 = arith.constant dense<0.000000e+00> : vector<2x256xf32>
    %384 = tpu.matmul %383, %7, %cst_120 {dimension_numbers = #tpu.dot_dimension_numbers<[1], [0], [0], [1], [0, 0, 1, 1], [], []>} : vector<2x96xf32>, vector<96x256xf32>, vector<2x256xf32> -> vector<2x256xf32>
    %cst_121 = arith.constant dense<0.000000e+00> : vector<2x256xf32>
    %385 = tpu.matmul %268, %8, %cst_121 {dimension_numbers = #tpu.dot_dimension_numbers<[1], [0], [0], [1], [0, 0, 1, 1], [], []>} : vector<2x64xf32>, vector<64x256xf32>, vector<2x256xf32> -> vector<2x256xf32>
    %386 = arith.addf %384, %385 : vector<2x256xf32>
    %387 = vector.broadcast %9 : vector<1x256xf32> to vector<2x256xf32>
    %388 = arith.addf %386, %387 : vector<2x256xf32>
    %389 = vector.extract_strided_slice %388 {offsets = [0, 0], sizes = [2, 64], strides = [1, 1]} : vector<2x256xf32> to vector<2x64xf32>
    %390 = arith.negf %389 : vector<2x64xf32>
    %391 = math.exp %390 : vector<2x64xf32>
    %cst_122 = arith.constant 1.000000e+00 : f32
    %392 = vector.broadcast %cst_122 : f32 to vector<2x64xf32>
    %393 = arith.addf %392, %391 : vector<2x64xf32>
    %394 = arith.divf %392, %393 : vector<2x64xf32>
    %395 = vector.extract_strided_slice %388 {offsets = [0, 64], sizes = [2, 64], strides = [1, 1]} : vector<2x256xf32> to vector<2x64xf32>
    %396 = arith.negf %395 : vector<2x64xf32>
    %397 = math.exp %396 : vector<2x64xf32>
    %cst_123 = arith.constant 1.000000e+00 : f32
    %398 = vector.broadcast %cst_123 : f32 to vector<2x64xf32>
    %399 = arith.addf %398, %397 : vector<2x64xf32>
    %400 = arith.divf %398, %399 : vector<2x64xf32>
    %401 = vector.extract_strided_slice %388 {offsets = [0, 128], sizes = [2, 64], strides = [1, 1]} : vector<2x256xf32> to vector<2x64xf32>
    %402 = math.tanh %401 : vector<2x64xf32>
    %403 = vector.extract_strided_slice %388 {offsets = [0, 192], sizes = [2, 64], strides = [1, 1]} : vector<2x256xf32> to vector<2x64xf32>
    %404 = arith.negf %403 : vector<2x64xf32>
    %405 = math.exp %404 : vector<2x64xf32>
    %cst_124 = arith.constant 1.000000e+00 : f32
    %406 = vector.broadcast %cst_124 : f32 to vector<2x64xf32>
    %407 = arith.addf %406, %405 : vector<2x64xf32>
    %408 = arith.divf %406, %407 : vector<2x64xf32>
    %409 = arith.mulf %400, %266 : vector<2x64xf32>
    %410 = arith.mulf %394, %402 : vector<2x64xf32>
    %411 = arith.addf %409, %410 : vector<2x64xf32>
    %412 = math.tanh %411 : vector<2x64xf32>
    %413 = arith.mulf %408, %412 : vector<2x64xf32>
    %cst_125 = arith.constant dense<0.000000e+00> : vector<2x128xf32>
    %414 = tpu.matmul %413, %10, %cst_125 {dimension_numbers = #tpu.dot_dimension_numbers<[1], [0], [0], [1], [0, 0, 1, 1], [], []>} : vector<2x64xf32>, vector<64x128xf32>, vector<2x128xf32> -> vector<2x128xf32>
    %cst_126 = arith.constant dense<0.000000e+00> : vector<2x128xf32>
    %415 = tpu.matmul %298, %11, %cst_126 {dimension_numbers = #tpu.dot_dimension_numbers<[1], [0], [0], [1], [0, 0, 1, 1], [], []>} : vector<2x32xf32>, vector<32x128xf32>, vector<2x128xf32> -> vector<2x128xf32>
    %416 = arith.addf %414, %415 : vector<2x128xf32>
    %417 = vector.broadcast %12 : vector<1x128xf32> to vector<2x128xf32>
    %418 = arith.addf %416, %417 : vector<2x128xf32>
    %419 = vector.extract_strided_slice %418 {offsets = [0, 0], sizes = [2, 32], strides = [1, 1]} : vector<2x128xf32> to vector<2x32xf32>
    %420 = arith.negf %419 : vector<2x32xf32>
    %421 = math.exp %420 : vector<2x32xf32>
    %cst_127 = arith.constant 1.000000e+00 : f32
    %422 = vector.broadcast %cst_127 : f32 to vector<2x32xf32>
    %423 = arith.addf %422, %421 : vector<2x32xf32>
    %424 = arith.divf %422, %423 : vector<2x32xf32>
    %425 = vector.extract_strided_slice %418 {offsets = [0, 32], sizes = [2, 32], strides = [1, 1]} : vector<2x128xf32> to vector<2x32xf32>
    %426 = arith.negf %425 : vector<2x32xf32>
    %427 = math.exp %426 : vector<2x32xf32>
    %cst_128 = arith.constant 1.000000e+00 : f32
    %428 = vector.broadcast %cst_128 : f32 to vector<2x32xf32>
    %429 = arith.addf %428, %427 : vector<2x32xf32>
    %430 = arith.divf %428, %429 : vector<2x32xf32>
    %431 = vector.extract_strided_slice %418 {offsets = [0, 64], sizes = [2, 32], strides = [1, 1]} : vector<2x128xf32> to vector<2x32xf32>
    %432 = math.tanh %431 : vector<2x32xf32>
    %433 = vector.extract_strided_slice %418 {offsets = [0, 96], sizes = [2, 32], strides = [1, 1]} : vector<2x128xf32> to vector<2x32xf32>
    %434 = arith.negf %433 : vector<2x32xf32>
    %435 = math.exp %434 : vector<2x32xf32>
    %cst_129 = arith.constant 1.000000e+00 : f32
    %436 = vector.broadcast %cst_129 : f32 to vector<2x32xf32>
    %437 = arith.addf %436, %435 : vector<2x32xf32>
    %438 = arith.divf %436, %437 : vector<2x32xf32>
    %439 = arith.mulf %430, %296 : vector<2x32xf32>
    %440 = arith.mulf %424, %432 : vector<2x32xf32>
    %441 = arith.addf %439, %440 : vector<2x32xf32>
    %442 = math.tanh %441 : vector<2x32xf32>
    %443 = arith.mulf %438, %442 : vector<2x32xf32>
    %cst_130 = arith.constant dense<0.000000e+00> : vector<2x32xf32>
    %444 = tpu.matmul %443, %6, %cst_130 {dimension_numbers = #tpu.dot_dimension_numbers<[1], [0], [0], [1], [0, 0, 1, 1], [], []>} : vector<2x32xf32>, vector<32x32xf32>, vector<2x32xf32> -> vector<2x32xf32>
    %445 = vector.shape_cast %444 : vector<2x32xf32> to vector<2x1x32xf32>
    "tpu.trace_start"() <{level = 10 : i32, message = "bqp,bpx->bqx"}> : () -> ()
    %cst_131 = arith.constant dense<0.000000e+00> : vector<2x1x32xf32>
    %446 = tpu.matmul %445, %0, %cst_131 {dimension_numbers = #tpu.dot_dimension_numbers<[2], [1], [1], [2], [0, 0, 0, 1, 1, 2], [0], [0]>} : vector<2x1x32xf32>, vector<2x32x32xf32>, vector<2x1x32xf32> -> vector<2x1x32xf32>
    "tpu.trace_stop"() : () -> ()
    %447 = vector.shape_cast %446 : vector<2x1x32xf32> to vector<2x32xf32>
    %cst_132 = arith.constant 0.353553385 : f32
    %448 = vector.broadcast %cst_132 : f32 to vector<2x32xf32>
    %449 = arith.mulf %447, %448 : vector<2x32xf32>
    %450 = arith.addf %449, %2 : vector<2x32xf32>
    %451 = vector.extract_strided_slice %450 {offsets = [0, 0], sizes = [2, 8], strides = [1, 1]} : vector<2x32xf32> to vector<2x8xf32>
    %cst_133 = arith.constant dense<0xFF800000> : vector<2xf32>
    %452 = vector.multi_reduction <maximumf>, %451, %cst_133 [1] : vector<2x8xf32> to vector<2xf32>
    %453 = vector.shape_cast %452 : vector<2xf32> to vector<2x1xf32>
    %454 = vector.broadcast %453 : vector<2x1xf32> to vector<2x8xf32>
    %455 = arith.subf %451, %454 : vector<2x8xf32>
    %456 = math.exp %455 : vector<2x8xf32>
    %cst_134 = arith.constant dense<0.000000e+00> : vector<2xf32>
    %457 = vector.multi_reduction <add>, %456, %cst_134 [1] : vector<2x8xf32> to vector<2xf32>
    %458 = vector.shape_cast %457 : vector<2xf32> to vector<2x1xf32>
    %459 = vector.broadcast %458 : vector<2x1xf32> to vector<2x8xf32>
    %460 = arith.divf %456, %459 : vector<2x8xf32>
    %461 = vector.extract_strided_slice %450 {offsets = [0, 8], sizes = [2, 8], strides = [1, 1]} : vector<2x32xf32> to vector<2x8xf32>
    %cst_135 = arith.constant dense<0xFF800000> : vector<2xf32>
    %462 = vector.multi_reduction <maximumf>, %461, %cst_135 [1] : vector<2x8xf32> to vector<2xf32>
    %463 = vector.shape_cast %462 : vector<2xf32> to vector<2x1xf32>
    %464 = vector.broadcast %463 : vector<2x1xf32> to vector<2x8xf32>
    %465 = arith.subf %461, %464 : vector<2x8xf32>
    %466 = math.exp %465 : vector<2x8xf32>
    %cst_136 = arith.constant dense<0.000000e+00> : vector<2xf32>
    %467 = vector.multi_reduction <add>, %466, %cst_136 [1] : vector<2x8xf32> to vector<2xf32>
    %468 = vector.shape_cast %467 : vector<2xf32> to vector<2x1xf32>
    %469 = vector.broadcast %468 : vector<2x1xf32> to vector<2x8xf32>
    %470 = arith.divf %466, %469 : vector<2x8xf32>
    %471 = vector.extract_strided_slice %450 {offsets = [0, 16], sizes = [2, 8], strides = [1, 1]} : vector<2x32xf32> to vector<2x8xf32>
    %cst_137 = arith.constant dense<0xFF800000> : vector<2xf32>
    %472 = vector.multi_reduction <maximumf>, %471, %cst_137 [1] : vector<2x8xf32> to vector<2xf32>
    %473 = vector.shape_cast %472 : vector<2xf32> to vector<2x1xf32>
    %474 = vector.broadcast %473 : vector<2x1xf32> to vector<2x8xf32>
    %475 = arith.subf %471, %474 : vector<2x8xf32>
    %476 = math.exp %475 : vector<2x8xf32>
    %cst_138 = arith.constant dense<0.000000e+00> : vector<2xf32>
    %477 = vector.multi_reduction <add>, %476, %cst_138 [1] : vector<2x8xf32> to vector<2xf32>
    %478 = vector.shape_cast %477 : vector<2xf32> to vector<2x1xf32>
    %479 = vector.broadcast %478 : vector<2x1xf32> to vector<2x8xf32>
    %480 = arith.divf %476, %479 : vector<2x8xf32>
    %481 = vector.extract_strided_slice %450 {offsets = [0, 24], sizes = [2, 8], strides = [1, 1]} : vector<2x32xf32> to vector<2x8xf32>
    %cst_139 = arith.constant dense<0xFF800000> : vector<2xf32>
    %482 = vector.multi_reduction <maximumf>, %481, %cst_139 [1] : vector<2x8xf32> to vector<2xf32>
    %483 = vector.shape_cast %482 : vector<2xf32> to vector<2x1xf32>
    %484 = vector.broadcast %483 : vector<2x1xf32> to vector<2x8xf32>
    %485 = arith.subf %481, %484 : vector<2x8xf32>
    %486 = math.exp %485 : vector<2x8xf32>
    %cst_140 = arith.constant dense<0.000000e+00> : vector<2xf32>
    %487 = vector.multi_reduction <add>, %486, %cst_140 [1] : vector<2x8xf32> to vector<2xf32>
    %488 = vector.shape_cast %487 : vector<2xf32> to vector<2x1xf32>
    %489 = vector.broadcast %488 : vector<2x1xf32> to vector<2x8xf32>
    %490 = arith.divf %486, %489 : vector<2x8xf32>
    %491 = tpu.concatenate %460, %470, %480, %490 in 1 : vector<2x8xf32>, vector<2x8xf32>, vector<2x8xf32>, vector<2x8xf32> -> vector<2x32xf32>
    %492 = vector.shape_cast %491 : vector<2x32xf32> to vector<2x1x32xf32>
    "tpu.trace_start"() <{level = 10 : i32, message = "bqx,bxp->bqp"}> : () -> ()
    %cst_141 = arith.constant dense<0.000000e+00> : vector<2x1x32xf32>
    %493 = tpu.matmul %492, %1, %cst_141 {dimension_numbers = #tpu.dot_dimension_numbers<[2], [1], [1], [2], [0, 0, 0, 1, 1, 2], [0], [0]>} : vector<2x1x32xf32>, vector<2x32x32xf32>, vector<2x1x32xf32> -> vector<2x1x32xf32>
    "tpu.trace_stop"() : () -> ()
    %494 = vector.shape_cast %493 : vector<2x1x32xf32> to vector<2x32xf32>
    %cst_142 = arith.constant 0.000000e+00 : f32
    %495 = vector.broadcast %cst_142 : f32 to vector<2x8xf32>
    %496 = arith.addf %495, %460 : vector<2x8xf32>
    %497 = arith.addf %496, %470 : vector<2x8xf32>
    %498 = arith.addf %497, %480 : vector<2x8xf32>
    %499 = arith.addf %498, %490 : vector<2x8xf32>
    %cst_143 = arith.constant 2.500000e-01 : f32
    %500 = vector.broadcast %cst_143 : f32 to vector<2x8xf32>
    %501 = arith.mulf %499, %500 : vector<2x8xf32>
    %502 = tpu.concatenate %444, %494 in 1 : vector<2x32xf32>, vector<2x32xf32> -> vector<2x64xf32>
    %cst_144 = arith.constant dense<0.000000e+00> : vector<2x16xf32>
    %503 = tpu.matmul %502, %4, %cst_144 {dimension_numbers = #tpu.dot_dimension_numbers<[1], [0], [0], [1], [0, 0, 1, 1], [], []>} : vector<2x64xf32>, vector<64x16xf32>, vector<2x16xf32> -> vector<2x16xf32>
    %504 = vector.broadcast %5 : vector<1x16xf32> to vector<2x16xf32>
    %505 = arith.addf %503, %504 : vector<2x16xf32>
    %506 = arith.index_cast %c2_i32 : i32 to index
    %c0_145 = arith.constant 0 : index
    %c0_146 = arith.constant 0 : index
    %507 = vector.load %arg18[%506, %c0_145, %c0_146] : memref<6x2x16xf32, #tpu.memory_space<vmem>>, vector<1x2x16xf32>
    %508 = vector.shape_cast %507 : vector<1x2x16xf32> to vector<2x16xf32>
    %509 = vector.shape_cast %505 : vector<2x16xf32> to vector<1x2x16xf32>
    tpu.vector_store %arg18[%506, %c0_145, %c0_146], %509 {strides = array<i32>} : memref<6x2x16xf32, #tpu.memory_space<vmem>>, vector<1x2x16xf32>,
    %c1_i32_147 = arith.constant 1 : i32
    %510 = arith.addi %c2_i32, %c1_i32_147 : i32
    %511 = arith.index_cast %510 : i32 to index
    %c0_148 = arith.constant 0 : index
    %c0_149 = arith.constant 0 : index
    %512 = vector.load %arg19[%511, %c0_148, %c0_149] : memref<7x2x8xf32, #tpu.memory_space<vmem>>, vector<1x2x8xf32>
    %513 = vector.shape_cast %512 : vector<1x2x8xf32> to vector<2x8xf32>
    %514 = vector.shape_cast %501 : vector<2x8xf32> to vector<1x2x8xf32>
    tpu.vector_store %arg19[%511, %c0_148, %c0_149], %514 {strides = array<i32>} : memref<7x2x8xf32, #tpu.memory_space<vmem>>, vector<1x2x8xf32>,
    %cst_150 = arith.constant dense<0xFF800000> : vector<2xf32>
    %515 = vector.multi_reduction <maximumf>, %505, %cst_150 [1] : vector<2x16xf32> to vector<2xf32>
    %516 = vector.shape_cast %515 : vector<2xf32> to vector<2x1xf32>
    %517 = vector.broadcast %516 : vector<2x1xf32> to vector<2x16xf32>
    %518 = arith.cmpf oge, %505, %517 : vector<2x16xf32>
    %c16_i32_151 = arith.constant 16 : i32
    %519 = vector.broadcast %c16_i32_151 : i32 to vector<2x16xi32>
    %520 = arith.select %518, %92, %519 : vector<2x16xi1>, vector<2x16xi32>
    %cst_152 = arith.constant dense<2147483647> : vector<2xi32>
    %521 = vector.multi_reduction <minsi>, %520, %cst_152 [1] : vector<2x16xi32> to vector<2xi32>
    %522 = vector.shape_cast %521 : vector<2xi32> to vector<2x1xi32>
    %523 = vector.broadcast %522 : vector<2x1xi32> to vector<2x16xi32>
    %524 = arith.cmpi eq, %92, %523 : vector<2x16xi32>
    %525 = arith.extui %524 : vector<2x16xi1> to vector<2x16xi32>
    %526 = arith.sitofp %525 : vector<2x16xi32> to vector<2x16xf32>
    %cst_153 = arith.constant dense<0.000000e+00> : vector<2x64xf32>
    %527 = tpu.matmul %526, %3, %cst_153 {dimension_numbers = #tpu.dot_dimension_numbers<[1], [0], [0], [1], [0, 0, 1, 1], [], []>} : vector<2x16xf32>, vector<16x64xf32>, vector<2x64xf32> -> vector<2x64xf32>
    %c3_i32 = arith.constant 3 : i32
    %528 = tpu.concatenate %527, %494 in 1 : vector<2x64xf32>, vector<2x32xf32> -> vector<2x96xf32>
    %cst_154 = arith.constant dense<0.000000e+00> : vector<2x256xf32>
    %529 = tpu.matmul %528, %7, %cst_154 {dimension_numbers = #tpu.dot_dimension_numbers<[1], [0], [0], [1], [0, 0, 1, 1], [], []>} : vector<2x96xf32>, vector<96x256xf32>, vector<2x256xf32> -> vector<2x256xf32>
    %cst_155 = arith.constant dense<0.000000e+00> : vector<2x256xf32>
    %530 = tpu.matmul %413, %8, %cst_155 {dimension_numbers = #tpu.dot_dimension_numbers<[1], [0], [0], [1], [0, 0, 1, 1], [], []>} : vector<2x64xf32>, vector<64x256xf32>, vector<2x256xf32> -> vector<2x256xf32>
    %531 = arith.addf %529, %530 : vector<2x256xf32>
    %532 = vector.broadcast %9 : vector<1x256xf32> to vector<2x256xf32>
    %533 = arith.addf %531, %532 : vector<2x256xf32>
    %534 = vector.extract_strided_slice %533 {offsets = [0, 0], sizes = [2, 64], strides = [1, 1]} : vector<2x256xf32> to vector<2x64xf32>
    %535 = arith.negf %534 : vector<2x64xf32>
    %536 = math.exp %535 : vector<2x64xf32>
    %cst_156 = arith.constant 1.000000e+00 : f32
    %537 = vector.broadcast %cst_156 : f32 to vector<2x64xf32>
    %538 = arith.addf %537, %536 : vector<2x64xf32>
    %539 = arith.divf %537, %538 : vector<2x64xf32>
    %540 = vector.extract_strided_slice %533 {offsets = [0, 64], sizes = [2, 64], strides = [1, 1]} : vector<2x256xf32> to vector<2x64xf32>
    %541 = arith.negf %540 : vector<2x64xf32>
    %542 = math.exp %541 : vector<2x64xf32>
    %cst_157 = arith.constant 1.000000e+00 : f32
    %543 = vector.broadcast %cst_157 : f32 to vector<2x64xf32>
    %544 = arith.addf %543, %542 : vector<2x64xf32>
    %545 = arith.divf %543, %544 : vector<2x64xf32>
    %546 = vector.extract_strided_slice %533 {offsets = [0, 128], sizes = [2, 64], strides = [1, 1]} : vector<2x256xf32> to vector<2x64xf32>
    %547 = math.tanh %546 : vector<2x64xf32>
    %548 = vector.extract_strided_slice %533 {offsets = [0, 192], sizes = [2, 64], strides = [1, 1]} : vector<2x256xf32> to vector<2x64xf32>
    %549 = arith.negf %548 : vector<2x64xf32>
    %550 = math.exp %549 : vector<2x64xf32>
    %cst_158 = arith.constant 1.000000e+00 : f32
    %551 = vector.broadcast %cst_158 : f32 to vector<2x64xf32>
    %552 = arith.addf %551, %550 : vector<2x64xf32>
    %553 = arith.divf %551, %552 : vector<2x64xf32>
    %554 = arith.mulf %545, %411 : vector<2x64xf32>
    %555 = arith.mulf %539, %547 : vector<2x64xf32>
    %556 = arith.addf %554, %555 : vector<2x64xf32>
    %557 = math.tanh %556 : vector<2x64xf32>
    %558 = arith.mulf %553, %557 : vector<2x64xf32>
    %cst_159 = arith.constant dense<0.000000e+00> : vector<2x128xf32>
    %559 = tpu.matmul %558, %10, %cst_159 {dimension_numbers = #tpu.dot_dimension_numbers<[1], [0], [0], [1], [0, 0, 1, 1], [], []>} : vector<2x64xf32>, vector<64x128xf32>, vector<2x128xf32> -> vector<2x128xf32>
    %cst_160 = arith.constant dense<0.000000e+00> : vector<2x128xf32>
    %560 = tpu.matmul %443, %11, %cst_160 {dimension_numbers = #tpu.dot_dimension_numbers<[1], [0], [0], [1], [0, 0, 1, 1], [], []>} : vector<2x32xf32>, vector<32x128xf32>, vector<2x128xf32> -> vector<2x128xf32>
    %561 = arith.addf %559, %560 : vector<2x128xf32>
    %562 = vector.broadcast %12 : vector<1x128xf32> to vector<2x128xf32>
    %563 = arith.addf %561, %562 : vector<2x128xf32>
    %564 = vector.extract_strided_slice %563 {offsets = [0, 0], sizes = [2, 32], strides = [1, 1]} : vector<2x128xf32> to vector<2x32xf32>
    %565 = arith.negf %564 : vector<2x32xf32>
    %566 = math.exp %565 : vector<2x32xf32>
    %cst_161 = arith.constant 1.000000e+00 : f32
    %567 = vector.broadcast %cst_161 : f32 to vector<2x32xf32>
    %568 = arith.addf %567, %566 : vector<2x32xf32>
    %569 = arith.divf %567, %568 : vector<2x32xf32>
    %570 = vector.extract_strided_slice %563 {offsets = [0, 32], sizes = [2, 32], strides = [1, 1]} : vector<2x128xf32> to vector<2x32xf32>
    %571 = arith.negf %570 : vector<2x32xf32>
    %572 = math.exp %571 : vector<2x32xf32>
    %cst_162 = arith.constant 1.000000e+00 : f32
    %573 = vector.broadcast %cst_162 : f32 to vector<2x32xf32>
    %574 = arith.addf %573, %572 : vector<2x32xf32>
    %575 = arith.divf %573, %574 : vector<2x32xf32>
    %576 = vector.extract_strided_slice %563 {offsets = [0, 64], sizes = [2, 32], strides = [1, 1]} : vector<2x128xf32> to vector<2x32xf32>
    %577 = math.tanh %576 : vector<2x32xf32>
    %578 = vector.extract_strided_slice %563 {offsets = [0, 96], sizes = [2, 32], strides = [1, 1]} : vector<2x128xf32> to vector<2x32xf32>
    %579 = arith.negf %578 : vector<2x32xf32>
    %580 = math.exp %579 : vector<2x32xf32>
    %cst_163 = arith.constant 1.000000e+00 : f32
    %581 = vector.broadcast %cst_163 : f32 to vector<2x32xf32>
    %582 = arith.addf %581, %580 : vector<2x32xf32>
    %583 = arith.divf %581, %582 : vector<2x32xf32>
    %584 = arith.mulf %575, %441 : vector<2x32xf32>
    %585 = arith.mulf %569, %577 : vector<2x32xf32>
    %586 = arith.addf %584, %585 : vector<2x32xf32>
    %587 = math.tanh %586 : vector<2x32xf32>
    %588 = arith.mulf %583, %587 : vector<2x32xf32>
    %cst_164 = arith.constant dense<0.000000e+00> : vector<2x32xf32>
    %589 = tpu.matmul %588, %6, %cst_164 {dimension_numbers = #tpu.dot_dimension_numbers<[1], [0], [0], [1], [0, 0, 1, 1], [], []>} : vector<2x32xf32>, vector<32x32xf32>, vector<2x32xf32> -> vector<2x32xf32>
    %590 = vector.shape_cast %589 : vector<2x32xf32> to vector<2x1x32xf32>
    "tpu.trace_start"() <{level = 10 : i32, message = "bqp,bpx->bqx"}> : () -> ()
    %cst_165 = arith.constant dense<0.000000e+00> : vector<2x1x32xf32>
    %591 = tpu.matmul %590, %0, %cst_165 {dimension_numbers = #tpu.dot_dimension_numbers<[2], [1], [1], [2], [0, 0, 0, 1, 1, 2], [0], [0]>} : vector<2x1x32xf32>, vector<2x32x32xf32>, vector<2x1x32xf32> -> vector<2x1x32xf32>
    "tpu.trace_stop"() : () -> ()
    %592 = vector.shape_cast %591 : vector<2x1x32xf32> to vector<2x32xf32>
    %cst_166 = arith.constant 0.353553385 : f32
    %593 = vector.broadcast %cst_166 : f32 to vector<2x32xf32>
    %594 = arith.mulf %592, %593 : vector<2x32xf32>
    %595 = arith.addf %594, %2 : vector<2x32xf32>
    %596 = vector.extract_strided_slice %595 {offsets = [0, 0], sizes = [2, 8], strides = [1, 1]} : vector<2x32xf32> to vector<2x8xf32>
    %cst_167 = arith.constant dense<0xFF800000> : vector<2xf32>
    %597 = vector.multi_reduction <maximumf>, %596, %cst_167 [1] : vector<2x8xf32> to vector<2xf32>
    %598 = vector.shape_cast %597 : vector<2xf32> to vector<2x1xf32>
    %599 = vector.broadcast %598 : vector<2x1xf32> to vector<2x8xf32>
    %600 = arith.subf %596, %599 : vector<2x8xf32>
    %601 = math.exp %600 : vector<2x8xf32>
    %cst_168 = arith.constant dense<0.000000e+00> : vector<2xf32>
    %602 = vector.multi_reduction <add>, %601, %cst_168 [1] : vector<2x8xf32> to vector<2xf32>
    %603 = vector.shape_cast %602 : vector<2xf32> to vector<2x1xf32>
    %604 = vector.broadcast %603 : vector<2x1xf32> to vector<2x8xf32>
    %605 = arith.divf %601, %604 : vector<2x8xf32>
    %606 = vector.extract_strided_slice %595 {offsets = [0, 8], sizes = [2, 8], strides = [1, 1]} : vector<2x32xf32> to vector<2x8xf32>
    %cst_169 = arith.constant dense<0xFF800000> : vector<2xf32>
    %607 = vector.multi_reduction <maximumf>, %606, %cst_169 [1] : vector<2x8xf32> to vector<2xf32>
    %608 = vector.shape_cast %607 : vector<2xf32> to vector<2x1xf32>
    %609 = vector.broadcast %608 : vector<2x1xf32> to vector<2x8xf32>
    %610 = arith.subf %606, %609 : vector<2x8xf32>
    %611 = math.exp %610 : vector<2x8xf32>
    %cst_170 = arith.constant dense<0.000000e+00> : vector<2xf32>
    %612 = vector.multi_reduction <add>, %611, %cst_170 [1] : vector<2x8xf32> to vector<2xf32>
    %613 = vector.shape_cast %612 : vector<2xf32> to vector<2x1xf32>
    %614 = vector.broadcast %613 : vector<2x1xf32> to vector<2x8xf32>
    %615 = arith.divf %611, %614 : vector<2x8xf32>
    %616 = vector.extract_strided_slice %595 {offsets = [0, 16], sizes = [2, 8], strides = [1, 1]} : vector<2x32xf32> to vector<2x8xf32>
    %cst_171 = arith.constant dense<0xFF800000> : vector<2xf32>
    %617 = vector.multi_reduction <maximumf>, %616, %cst_171 [1] : vector<2x8xf32> to vector<2xf32>
    %618 = vector.shape_cast %617 : vector<2xf32> to vector<2x1xf32>
    %619 = vector.broadcast %618 : vector<2x1xf32> to vector<2x8xf32>
    %620 = arith.subf %616, %619 : vector<2x8xf32>
    %621 = math.exp %620 : vector<2x8xf32>
    %cst_172 = arith.constant dense<0.000000e+00> : vector<2xf32>
    %622 = vector.multi_reduction <add>, %621, %cst_172 [1] : vector<2x8xf32> to vector<2xf32>
    %623 = vector.shape_cast %622 : vector<2xf32> to vector<2x1xf32>
    %624 = vector.broadcast %623 : vector<2x1xf32> to vector<2x8xf32>
    %625 = arith.divf %621, %624 : vector<2x8xf32>
    %626 = vector.extract_strided_slice %595 {offsets = [0, 24], sizes = [2, 8], strides = [1, 1]} : vector<2x32xf32> to vector<2x8xf32>
    %cst_173 = arith.constant dense<0xFF800000> : vector<2xf32>
    %627 = vector.multi_reduction <maximumf>, %626, %cst_173 [1] : vector<2x8xf32> to vector<2xf32>
    %628 = vector.shape_cast %627 : vector<2xf32> to vector<2x1xf32>
    %629 = vector.broadcast %628 : vector<2x1xf32> to vector<2x8xf32>
    %630 = arith.subf %626, %629 : vector<2x8xf32>
    %631 = math.exp %630 : vector<2x8xf32>
    %cst_174 = arith.constant dense<0.000000e+00> : vector<2xf32>
    %632 = vector.multi_reduction <add>, %631, %cst_174 [1] : vector<2x8xf32> to vector<2xf32>
    %633 = vector.shape_cast %632 : vector<2xf32> to vector<2x1xf32>
    %634 = vector.broadcast %633 : vector<2x1xf32> to vector<2x8xf32>
    %635 = arith.divf %631, %634 : vector<2x8xf32>
    %636 = tpu.concatenate %605, %615, %625, %635 in 1 : vector<2x8xf32>, vector<2x8xf32>, vector<2x8xf32>, vector<2x8xf32> -> vector<2x32xf32>
    %637 = vector.shape_cast %636 : vector<2x32xf32> to vector<2x1x32xf32>
    "tpu.trace_start"() <{level = 10 : i32, message = "bqx,bxp->bqp"}> : () -> ()
    %cst_175 = arith.constant dense<0.000000e+00> : vector<2x1x32xf32>
    %638 = tpu.matmul %637, %1, %cst_175 {dimension_numbers = #tpu.dot_dimension_numbers<[2], [1], [1], [2], [0, 0, 0, 1, 1, 2], [0], [0]>} : vector<2x1x32xf32>, vector<2x32x32xf32>, vector<2x1x32xf32> -> vector<2x1x32xf32>
    "tpu.trace_stop"() : () -> ()
    %639 = vector.shape_cast %638 : vector<2x1x32xf32> to vector<2x32xf32>
    %cst_176 = arith.constant 0.000000e+00 : f32
    %640 = vector.broadcast %cst_176 : f32 to vector<2x8xf32>
    %641 = arith.addf %640, %605 : vector<2x8xf32>
    %642 = arith.addf %641, %615 : vector<2x8xf32>
    %643 = arith.addf %642, %625 : vector<2x8xf32>
    %644 = arith.addf %643, %635 : vector<2x8xf32>
    %cst_177 = arith.constant 2.500000e-01 : f32
    %645 = vector.broadcast %cst_177 : f32 to vector<2x8xf32>
    %646 = arith.mulf %644, %645 : vector<2x8xf32>
    %647 = tpu.concatenate %589, %639 in 1 : vector<2x32xf32>, vector<2x32xf32> -> vector<2x64xf32>
    %cst_178 = arith.constant dense<0.000000e+00> : vector<2x16xf32>
    %648 = tpu.matmul %647, %4, %cst_178 {dimension_numbers = #tpu.dot_dimension_numbers<[1], [0], [0], [1], [0, 0, 1, 1], [], []>} : vector<2x64xf32>, vector<64x16xf32>, vector<2x16xf32> -> vector<2x16xf32>
    %649 = vector.broadcast %5 : vector<1x16xf32> to vector<2x16xf32>
    %650 = arith.addf %648, %649 : vector<2x16xf32>
    %651 = arith.index_cast %c3_i32 : i32 to index
    %c0_179 = arith.constant 0 : index
    %c0_180 = arith.constant 0 : index
    %652 = vector.load %arg18[%651, %c0_179, %c0_180] : memref<6x2x16xf32, #tpu.memory_space<vmem>>, vector<1x2x16xf32>
    %653 = vector.shape_cast %652 : vector<1x2x16xf32> to vector<2x16xf32>
    %654 = vector.shape_cast %650 : vector<2x16xf32> to vector<1x2x16xf32>
    tpu.vector_store %arg18[%651, %c0_179, %c0_180], %654 {strides = array<i32>} : memref<6x2x16xf32, #tpu.memory_space<vmem>>, vector<1x2x16xf32>,
    %c1_i32_181 = arith.constant 1 : i32
    %655 = arith.addi %c3_i32, %c1_i32_181 : i32
    %656 = arith.index_cast %655 : i32 to index
    %c0_182 = arith.constant 0 : index
    %c0_183 = arith.constant 0 : index
    %657 = vector.load %arg19[%656, %c0_182, %c0_183] : memref<7x2x8xf32, #tpu.memory_space<vmem>>, vector<1x2x8xf32>
    %658 = vector.shape_cast %657 : vector<1x2x8xf32> to vector<2x8xf32>
    %659 = vector.shape_cast %646 : vector<2x8xf32> to vector<1x2x8xf32>
    tpu.vector_store %arg19[%656, %c0_182, %c0_183], %659 {strides = array<i32>} : memref<7x2x8xf32, #tpu.memory_space<vmem>>, vector<1x2x8xf32>,
    %cst_184 = arith.constant dense<0xFF800000> : vector<2xf32>
    %660 = vector.multi_reduction <maximumf>, %650, %cst_184 [1] : vector<2x16xf32> to vector<2xf32>
    %661 = vector.shape_cast %660 : vector<2xf32> to vector<2x1xf32>
    %662 = vector.broadcast %661 : vector<2x1xf32> to vector<2x16xf32>
    %663 = arith.cmpf oge, %650, %662 : vector<2x16xf32>
    %c16_i32_185 = arith.constant 16 : i32
    %664 = vector.broadcast %c16_i32_185 : i32 to vector<2x16xi32>
    %665 = arith.select %663, %92, %664 : vector<2x16xi1>, vector<2x16xi32>
    %cst_186 = arith.constant dense<2147483647> : vector<2xi32>
    %666 = vector.multi_reduction <minsi>, %665, %cst_186 [1] : vector<2x16xi32> to vector<2xi32>
    %667 = vector.shape_cast %666 : vector<2xi32> to vector<2x1xi32>
    %668 = vector.broadcast %667 : vector<2x1xi32> to vector<2x16xi32>
    %669 = arith.cmpi eq, %92, %668 : vector<2x16xi32>
    %670 = arith.extui %669 : vector<2x16xi1> to vector<2x16xi32>
    %671 = arith.sitofp %670 : vector<2x16xi32> to vector<2x16xf32>
    %cst_187 = arith.constant dense<0.000000e+00> : vector<2x64xf32>
    %672 = tpu.matmul %671, %3, %cst_187 {dimension_numbers = #tpu.dot_dimension_numbers<[1], [0], [0], [1], [0, 0, 1, 1], [], []>} : vector<2x16xf32>, vector<16x64xf32>, vector<2x64xf32> -> vector<2x64xf32>
    %c4_i32 = arith.constant 4 : i32
    %673 = tpu.concatenate %672, %639 in 1 : vector<2x64xf32>, vector<2x32xf32> -> vector<2x96xf32>
    %cst_188 = arith.constant dense<0.000000e+00> : vector<2x256xf32>
    %674 = tpu.matmul %673, %7, %cst_188 {dimension_numbers = #tpu.dot_dimension_numbers<[1], [0], [0], [1], [0, 0, 1, 1], [], []>} : vector<2x96xf32>, vector<96x256xf32>, vector<2x256xf32> -> vector<2x256xf32>
    %cst_189 = arith.constant dense<0.000000e+00> : vector<2x256xf32>
    %675 = tpu.matmul %558, %8, %cst_189 {dimension_numbers = #tpu.dot_dimension_numbers<[1], [0], [0], [1], [0, 0, 1, 1], [], []>} : vector<2x64xf32>, vector<64x256xf32>, vector<2x256xf32> -> vector<2x256xf32>
    %676 = arith.addf %674, %675 : vector<2x256xf32>
    %677 = vector.broadcast %9 : vector<1x256xf32> to vector<2x256xf32>
    %678 = arith.addf %676, %677 : vector<2x256xf32>
    %679 = vector.extract_strided_slice %678 {offsets = [0, 0], sizes = [2, 64], strides = [1, 1]} : vector<2x256xf32> to vector<2x64xf32>
    %680 = arith.negf %679 : vector<2x64xf32>
    %681 = math.exp %680 : vector<2x64xf32>
    %cst_190 = arith.constant 1.000000e+00 : f32
    %682 = vector.broadcast %cst_190 : f32 to vector<2x64xf32>
    %683 = arith.addf %682, %681 : vector<2x64xf32>
    %684 = arith.divf %682, %683 : vector<2x64xf32>
    %685 = vector.extract_strided_slice %678 {offsets = [0, 64], sizes = [2, 64], strides = [1, 1]} : vector<2x256xf32> to vector<2x64xf32>
    %686 = arith.negf %685 : vector<2x64xf32>
    %687 = math.exp %686 : vector<2x64xf32>
    %cst_191 = arith.constant 1.000000e+00 : f32
    %688 = vector.broadcast %cst_191 : f32 to vector<2x64xf32>
    %689 = arith.addf %688, %687 : vector<2x64xf32>
    %690 = arith.divf %688, %689 : vector<2x64xf32>
    %691 = vector.extract_strided_slice %678 {offsets = [0, 128], sizes = [2, 64], strides = [1, 1]} : vector<2x256xf32> to vector<2x64xf32>
    %692 = math.tanh %691 : vector<2x64xf32>
    %693 = vector.extract_strided_slice %678 {offsets = [0, 192], sizes = [2, 64], strides = [1, 1]} : vector<2x256xf32> to vector<2x64xf32>
    %694 = arith.negf %693 : vector<2x64xf32>
    %695 = math.exp %694 : vector<2x64xf32>
    %cst_192 = arith.constant 1.000000e+00 : f32
    %696 = vector.broadcast %cst_192 : f32 to vector<2x64xf32>
    %697 = arith.addf %696, %695 : vector<2x64xf32>
    %698 = arith.divf %696, %697 : vector<2x64xf32>
    %699 = arith.mulf %690, %556 : vector<2x64xf32>
    %700 = arith.mulf %684, %692 : vector<2x64xf32>
    %701 = arith.addf %699, %700 : vector<2x64xf32>
    %702 = math.tanh %701 : vector<2x64xf32>
    %703 = arith.mulf %698, %702 : vector<2x64xf32>
    %cst_193 = arith.constant dense<0.000000e+00> : vector<2x128xf32>
    %704 = tpu.matmul %703, %10, %cst_193 {dimension_numbers = #tpu.dot_dimension_numbers<[1], [0], [0], [1], [0, 0, 1, 1], [], []>} : vector<2x64xf32>, vector<64x128xf32>, vector<2x128xf32> -> vector<2x128xf32>
    %cst_194 = arith.constant dense<0.000000e+00> : vector<2x128xf32>
    %705 = tpu.matmul %588, %11, %cst_194 {dimension_numbers = #tpu.dot_dimension_numbers<[1], [0], [0], [1], [0, 0, 1, 1], [], []>} : vector<2x32xf32>, vector<32x128xf32>, vector<2x128xf32> -> vector<2x128xf32>
    %706 = arith.addf %704, %705 : vector<2x128xf32>
    %707 = vector.broadcast %12 : vector<1x128xf32> to vector<2x128xf32>
    %708 = arith.addf %706, %707 : vector<2x128xf32>
    %709 = vector.extract_strided_slice %708 {offsets = [0, 0], sizes = [2, 32], strides = [1, 1]} : vector<2x128xf32> to vector<2x32xf32>
    %710 = arith.negf %709 : vector<2x32xf32>
    %711 = math.exp %710 : vector<2x32xf32>
    %cst_195 = arith.constant 1.000000e+00 : f32
    %712 = vector.broadcast %cst_195 : f32 to vector<2x32xf32>
    %713 = arith.addf %712, %711 : vector<2x32xf32>
    %714 = arith.divf %712, %713 : vector<2x32xf32>
    %715 = vector.extract_strided_slice %708 {offsets = [0, 32], sizes = [2, 32], strides = [1, 1]} : vector<2x128xf32> to vector<2x32xf32>
    %716 = arith.negf %715 : vector<2x32xf32>
    %717 = math.exp %716 : vector<2x32xf32>
    %cst_196 = arith.constant 1.000000e+00 : f32
    %718 = vector.broadcast %cst_196 : f32 to vector<2x32xf32>
    %719 = arith.addf %718, %717 : vector<2x32xf32>
    %720 = arith.divf %718, %719 : vector<2x32xf32>
    %721 = vector.extract_strided_slice %708 {offsets = [0, 64], sizes = [2, 32], strides = [1, 1]} : vector<2x128xf32> to vector<2x32xf32>
    %722 = math.tanh %721 : vector<2x32xf32>
    %723 = vector.extract_strided_slice %708 {offsets = [0, 96], sizes = [2, 32], strides = [1, 1]} : vector<2x128xf32> to vector<2x32xf32>
    %724 = arith.negf %723 : vector<2x32xf32>
    %725 = math.exp %724 : vector<2x32xf32>
    %cst_197 = arith.constant 1.000000e+00 : f32
    %726 = vector.broadcast %cst_197 : f32 to vector<2x32xf32>
    %727 = arith.addf %726, %725 : vector<2x32xf32>
    %728 = arith.divf %726, %727 : vector<2x32xf32>
    %729 = arith.mulf %720, %586 : vector<2x32xf32>
    %730 = arith.mulf %714, %722 : vector<2x32xf32>
    %731 = arith.addf %729, %730 : vector<2x32xf32>
    %732 = math.tanh %731 : vector<2x32xf32>
    %733 = arith.mulf %728, %732 : vector<2x32xf32>
    %cst_198 = arith.constant dense<0.000000e+00> : vector<2x32xf32>
    %734 = tpu.matmul %733, %6, %cst_198 {dimension_numbers = #tpu.dot_dimension_numbers<[1], [0], [0], [1], [0, 0, 1, 1], [], []>} : vector<2x32xf32>, vector<32x32xf32>, vector<2x32xf32> -> vector<2x32xf32>
    %735 = vector.shape_cast %734 : vector<2x32xf32> to vector<2x1x32xf32>
    "tpu.trace_start"() <{level = 10 : i32, message = "bqp,bpx->bqx"}> : () -> ()
    %cst_199 = arith.constant dense<0.000000e+00> : vector<2x1x32xf32>
    %736 = tpu.matmul %735, %0, %cst_199 {dimension_numbers = #tpu.dot_dimension_numbers<[2], [1], [1], [2], [0, 0, 0, 1, 1, 2], [0], [0]>} : vector<2x1x32xf32>, vector<2x32x32xf32>, vector<2x1x32xf32> -> vector<2x1x32xf32>
    "tpu.trace_stop"() : () -> ()
    %737 = vector.shape_cast %736 : vector<2x1x32xf32> to vector<2x32xf32>
    %cst_200 = arith.constant 0.353553385 : f32
    %738 = vector.broadcast %cst_200 : f32 to vector<2x32xf32>
    %739 = arith.mulf %737, %738 : vector<2x32xf32>
    %740 = arith.addf %739, %2 : vector<2x32xf32>
    %741 = vector.extract_strided_slice %740 {offsets = [0, 0], sizes = [2, 8], strides = [1, 1]} : vector<2x32xf32> to vector<2x8xf32>
    %cst_201 = arith.constant dense<0xFF800000> : vector<2xf32>
    %742 = vector.multi_reduction <maximumf>, %741, %cst_201 [1] : vector<2x8xf32> to vector<2xf32>
    %743 = vector.shape_cast %742 : vector<2xf32> to vector<2x1xf32>
    %744 = vector.broadcast %743 : vector<2x1xf32> to vector<2x8xf32>
    %745 = arith.subf %741, %744 : vector<2x8xf32>
    %746 = math.exp %745 : vector<2x8xf32>
    %cst_202 = arith.constant dense<0.000000e+00> : vector<2xf32>
    %747 = vector.multi_reduction <add>, %746, %cst_202 [1] : vector<2x8xf32> to vector<2xf32>
    %748 = vector.shape_cast %747 : vector<2xf32> to vector<2x1xf32>
    %749 = vector.broadcast %748 : vector<2x1xf32> to vector<2x8xf32>
    %750 = arith.divf %746, %749 : vector<2x8xf32>
    %751 = vector.extract_strided_slice %740 {offsets = [0, 8], sizes = [2, 8], strides = [1, 1]} : vector<2x32xf32> to vector<2x8xf32>
    %cst_203 = arith.constant dense<0xFF800000> : vector<2xf32>
    %752 = vector.multi_reduction <maximumf>, %751, %cst_203 [1] : vector<2x8xf32> to vector<2xf32>
    %753 = vector.shape_cast %752 : vector<2xf32> to vector<2x1xf32>
    %754 = vector.broadcast %753 : vector<2x1xf32> to vector<2x8xf32>
    %755 = arith.subf %751, %754 : vector<2x8xf32>
    %756 = math.exp %755 : vector<2x8xf32>
    %cst_204 = arith.constant dense<0.000000e+00> : vector<2xf32>
    %757 = vector.multi_reduction <add>, %756, %cst_204 [1] : vector<2x8xf32> to vector<2xf32>
    %758 = vector.shape_cast %757 : vector<2xf32> to vector<2x1xf32>
    %759 = vector.broadcast %758 : vector<2x1xf32> to vector<2x8xf32>
    %760 = arith.divf %756, %759 : vector<2x8xf32>
    %761 = vector.extract_strided_slice %740 {offsets = [0, 16], sizes = [2, 8], strides = [1, 1]} : vector<2x32xf32> to vector<2x8xf32>
    %cst_205 = arith.constant dense<0xFF800000> : vector<2xf32>
    %762 = vector.multi_reduction <maximumf>, %761, %cst_205 [1] : vector<2x8xf32> to vector<2xf32>
    %763 = vector.shape_cast %762 : vector<2xf32> to vector<2x1xf32>
    %764 = vector.broadcast %763 : vector<2x1xf32> to vector<2x8xf32>
    %765 = arith.subf %761, %764 : vector<2x8xf32>
    %766 = math.exp %765 : vector<2x8xf32>
    %cst_206 = arith.constant dense<0.000000e+00> : vector<2xf32>
    %767 = vector.multi_reduction <add>, %766, %cst_206 [1] : vector<2x8xf32> to vector<2xf32>
    %768 = vector.shape_cast %767 : vector<2xf32> to vector<2x1xf32>
    %769 = vector.broadcast %768 : vector<2x1xf32> to vector<2x8xf32>
    %770 = arith.divf %766, %769 : vector<2x8xf32>
    %771 = vector.extract_strided_slice %740 {offsets = [0, 24], sizes = [2, 8], strides = [1, 1]} : vector<2x32xf32> to vector<2x8xf32>
    %cst_207 = arith.constant dense<0xFF800000> : vector<2xf32>
    %772 = vector.multi_reduction <maximumf>, %771, %cst_207 [1] : vector<2x8xf32> to vector<2xf32>
    %773 = vector.shape_cast %772 : vector<2xf32> to vector<2x1xf32>
    %774 = vector.broadcast %773 : vector<2x1xf32> to vector<2x8xf32>
    %775 = arith.subf %771, %774 : vector<2x8xf32>
    %776 = math.exp %775 : vector<2x8xf32>
    %cst_208 = arith.constant dense<0.000000e+00> : vector<2xf32>
    %777 = vector.multi_reduction <add>, %776, %cst_208 [1] : vector<2x8xf32> to vector<2xf32>
    %778 = vector.shape_cast %777 : vector<2xf32> to vector<2x1xf32>
    %779 = vector.broadcast %778 : vector<2x1xf32> to vector<2x8xf32>
    %780 = arith.divf %776, %779 : vector<2x8xf32>
    %781 = tpu.concatenate %750, %760, %770, %780 in 1 : vector<2x8xf32>, vector<2x8xf32>, vector<2x8xf32>, vector<2x8xf32> -> vector<2x32xf32>
    %782 = vector.shape_cast %781 : vector<2x32xf32> to vector<2x1x32xf32>
    "tpu.trace_start"() <{level = 10 : i32, message = "bqx,bxp->bqp"}> : () -> ()
    %cst_209 = arith.constant dense<0.000000e+00> : vector<2x1x32xf32>
    %783 = tpu.matmul %782, %1, %cst_209 {dimension_numbers = #tpu.dot_dimension_numbers<[2], [1], [1], [2], [0, 0, 0, 1, 1, 2], [0], [0]>} : vector<2x1x32xf32>, vector<2x32x32xf32>, vector<2x1x32xf32> -> vector<2x1x32xf32>
    "tpu.trace_stop"() : () -> ()
    %784 = vector.shape_cast %783 : vector<2x1x32xf32> to vector<2x32xf32>
    %cst_210 = arith.constant 0.000000e+00 : f32
    %785 = vector.broadcast %cst_210 : f32 to vector<2x8xf32>
    %786 = arith.addf %785, %750 : vector<2x8xf32>
    %787 = arith.addf %786, %760 : vector<2x8xf32>
    %788 = arith.addf %787, %770 : vector<2x8xf32>
    %789 = arith.addf %788, %780 : vector<2x8xf32>
    %cst_211 = arith.constant 2.500000e-01 : f32
    %790 = vector.broadcast %cst_211 : f32 to vector<2x8xf32>
    %791 = arith.mulf %789, %790 : vector<2x8xf32>
    %792 = tpu.concatenate %734, %784 in 1 : vector<2x32xf32>, vector<2x32xf32> -> vector<2x64xf32>
    %cst_212 = arith.constant dense<0.000000e+00> : vector<2x16xf32>
    %793 = tpu.matmul %792, %4, %cst_212 {dimension_numbers = #tpu.dot_dimension_numbers<[1], [0], [0], [1], [0, 0, 1, 1], [], []>} : vector<2x64xf32>, vector<64x16xf32>, vector<2x16xf32> -> vector<2x16xf32>
    %794 = vector.broadcast %5 : vector<1x16xf32> to vector<2x16xf32>
    %795 = arith.addf %793, %794 : vector<2x16xf32>
    %796 = arith.index_cast %c4_i32 : i32 to index
    %c0_213 = arith.constant 0 : index
    %c0_214 = arith.constant 0 : index
    %797 = vector.load %arg18[%796, %c0_213, %c0_214] : memref<6x2x16xf32, #tpu.memory_space<vmem>>, vector<1x2x16xf32>
    %798 = vector.shape_cast %797 : vector<1x2x16xf32> to vector<2x16xf32>
    %799 = vector.shape_cast %795 : vector<2x16xf32> to vector<1x2x16xf32>
    tpu.vector_store %arg18[%796, %c0_213, %c0_214], %799 {strides = array<i32>} : memref<6x2x16xf32, #tpu.memory_space<vmem>>, vector<1x2x16xf32>,
    %c1_i32_215 = arith.constant 1 : i32
    %800 = arith.addi %c4_i32, %c1_i32_215 : i32
    %801 = arith.index_cast %800 : i32 to index
    %c0_216 = arith.constant 0 : index
    %c0_217 = arith.constant 0 : index
    %802 = vector.load %arg19[%801, %c0_216, %c0_217] : memref<7x2x8xf32, #tpu.memory_space<vmem>>, vector<1x2x8xf32>
    %803 = vector.shape_cast %802 : vector<1x2x8xf32> to vector<2x8xf32>
    %804 = vector.shape_cast %791 : vector<2x8xf32> to vector<1x2x8xf32>
    tpu.vector_store %arg19[%801, %c0_216, %c0_217], %804 {strides = array<i32>} : memref<7x2x8xf32, #tpu.memory_space<vmem>>, vector<1x2x8xf32>,
    %cst_218 = arith.constant dense<0xFF800000> : vector<2xf32>
    %805 = vector.multi_reduction <maximumf>, %795, %cst_218 [1] : vector<2x16xf32> to vector<2xf32>
    %806 = vector.shape_cast %805 : vector<2xf32> to vector<2x1xf32>
    %807 = vector.broadcast %806 : vector<2x1xf32> to vector<2x16xf32>
    %808 = arith.cmpf oge, %795, %807 : vector<2x16xf32>
    %c16_i32_219 = arith.constant 16 : i32
    %809 = vector.broadcast %c16_i32_219 : i32 to vector<2x16xi32>
    %810 = arith.select %808, %92, %809 : vector<2x16xi1>, vector<2x16xi32>
    %cst_220 = arith.constant dense<2147483647> : vector<2xi32>
    %811 = vector.multi_reduction <minsi>, %810, %cst_220 [1] : vector<2x16xi32> to vector<2xi32>
    %812 = vector.shape_cast %811 : vector<2xi32> to vector<2x1xi32>
    %813 = vector.broadcast %812 : vector<2x1xi32> to vector<2x16xi32>
    %814 = arith.cmpi eq, %92, %813 : vector<2x16xi32>
    %815 = arith.extui %814 : vector<2x16xi1> to vector<2x16xi32>
    %816 = arith.sitofp %815 : vector<2x16xi32> to vector<2x16xf32>
    %cst_221 = arith.constant dense<0.000000e+00> : vector<2x64xf32>
    %817 = tpu.matmul %816, %3, %cst_221 {dimension_numbers = #tpu.dot_dimension_numbers<[1], [0], [0], [1], [0, 0, 1, 1], [], []>} : vector<2x16xf32>, vector<16x64xf32>, vector<2x64xf32> -> vector<2x64xf32>
    %c5_i32 = arith.constant 5 : i32
    %818 = tpu.concatenate %817, %784 in 1 : vector<2x64xf32>, vector<2x32xf32> -> vector<2x96xf32>
    %cst_222 = arith.constant dense<0.000000e+00> : vector<2x256xf32>
    %819 = tpu.matmul %818, %7, %cst_222 {dimension_numbers = #tpu.dot_dimension_numbers<[1], [0], [0], [1], [0, 0, 1, 1], [], []>} : vector<2x96xf32>, vector<96x256xf32>, vector<2x256xf32> -> vector<2x256xf32>
    %cst_223 = arith.constant dense<0.000000e+00> : vector<2x256xf32>
    %820 = tpu.matmul %703, %8, %cst_223 {dimension_numbers = #tpu.dot_dimension_numbers<[1], [0], [0], [1], [0, 0, 1, 1], [], []>} : vector<2x64xf32>, vector<64x256xf32>, vector<2x256xf32> -> vector<2x256xf32>
    %821 = arith.addf %819, %820 : vector<2x256xf32>
    %822 = vector.broadcast %9 : vector<1x256xf32> to vector<2x256xf32>
    %823 = arith.addf %821, %822 : vector<2x256xf32>
    %824 = vector.extract_strided_slice %823 {offsets = [0, 0], sizes = [2, 64], strides = [1, 1]} : vector<2x256xf32> to vector<2x64xf32>
    %825 = arith.negf %824 : vector<2x64xf32>
    %826 = math.exp %825 : vector<2x64xf32>
    %cst_224 = arith.constant 1.000000e+00 : f32
    %827 = vector.broadcast %cst_224 : f32 to vector<2x64xf32>
    %828 = arith.addf %827, %826 : vector<2x64xf32>
    %829 = arith.divf %827, %828 : vector<2x64xf32>
    %830 = vector.extract_strided_slice %823 {offsets = [0, 64], sizes = [2, 64], strides = [1, 1]} : vector<2x256xf32> to vector<2x64xf32>
    %831 = arith.negf %830 : vector<2x64xf32>
    %832 = math.exp %831 : vector<2x64xf32>
    %cst_225 = arith.constant 1.000000e+00 : f32
    %833 = vector.broadcast %cst_225 : f32 to vector<2x64xf32>
    %834 = arith.addf %833, %832 : vector<2x64xf32>
    %835 = arith.divf %833, %834 : vector<2x64xf32>
    %836 = vector.extract_strided_slice %823 {offsets = [0, 128], sizes = [2, 64], strides = [1, 1]} : vector<2x256xf32> to vector<2x64xf32>
    %837 = math.tanh %836 : vector<2x64xf32>
    %838 = vector.extract_strided_slice %823 {offsets = [0, 192], sizes = [2, 64], strides = [1, 1]} : vector<2x256xf32> to vector<2x64xf32>
    %839 = arith.negf %838 : vector<2x64xf32>
    %840 = math.exp %839 : vector<2x64xf32>
    %cst_226 = arith.constant 1.000000e+00 : f32
    %841 = vector.broadcast %cst_226 : f32 to vector<2x64xf32>
    %842 = arith.addf %841, %840 : vector<2x64xf32>
    %843 = arith.divf %841, %842 : vector<2x64xf32>
    %844 = arith.mulf %835, %701 : vector<2x64xf32>
    %845 = arith.mulf %829, %837 : vector<2x64xf32>
    %846 = arith.addf %844, %845 : vector<2x64xf32>
    %847 = math.tanh %846 : vector<2x64xf32>
    %848 = arith.mulf %843, %847 : vector<2x64xf32>
    %cst_227 = arith.constant dense<0.000000e+00> : vector<2x128xf32>
    %849 = tpu.matmul %848, %10, %cst_227 {dimension_numbers = #tpu.dot_dimension_numbers<[1], [0], [0], [1], [0, 0, 1, 1], [], []>} : vector<2x64xf32>, vector<64x128xf32>, vector<2x128xf32> -> vector<2x128xf32>
    %cst_228 = arith.constant dense<0.000000e+00> : vector<2x128xf32>
    %850 = tpu.matmul %733, %11, %cst_228 {dimension_numbers = #tpu.dot_dimension_numbers<[1], [0], [0], [1], [0, 0, 1, 1], [], []>} : vector<2x32xf32>, vector<32x128xf32>, vector<2x128xf32> -> vector<2x128xf32>
    %851 = arith.addf %849, %850 : vector<2x128xf32>
    %852 = vector.broadcast %12 : vector<1x128xf32> to vector<2x128xf32>
    %853 = arith.addf %851, %852 : vector<2x128xf32>
    %854 = vector.extract_strided_slice %853 {offsets = [0, 0], sizes = [2, 32], strides = [1, 1]} : vector<2x128xf32> to vector<2x32xf32>
    %855 = arith.negf %854 : vector<2x32xf32>
    %856 = math.exp %855 : vector<2x32xf32>
    %cst_229 = arith.constant 1.000000e+00 : f32
    %857 = vector.broadcast %cst_229 : f32 to vector<2x32xf32>
    %858 = arith.addf %857, %856 : vector<2x32xf32>
    %859 = arith.divf %857, %858 : vector<2x32xf32>
    %860 = vector.extract_strided_slice %853 {offsets = [0, 32], sizes = [2, 32], strides = [1, 1]} : vector<2x128xf32> to vector<2x32xf32>
    %861 = arith.negf %860 : vector<2x32xf32>
    %862 = math.exp %861 : vector<2x32xf32>
    %cst_230 = arith.constant 1.000000e+00 : f32
    %863 = vector.broadcast %cst_230 : f32 to vector<2x32xf32>
    %864 = arith.addf %863, %862 : vector<2x32xf32>
    %865 = arith.divf %863, %864 : vector<2x32xf32>
    %866 = vector.extract_strided_slice %853 {offsets = [0, 64], sizes = [2, 32], strides = [1, 1]} : vector<2x128xf32> to vector<2x32xf32>
    %867 = math.tanh %866 : vector<2x32xf32>
    %868 = vector.extract_strided_slice %853 {offsets = [0, 96], sizes = [2, 32], strides = [1, 1]} : vector<2x128xf32> to vector<2x32xf32>
    %869 = arith.negf %868 : vector<2x32xf32>
    %870 = math.exp %869 : vector<2x32xf32>
    %cst_231 = arith.constant 1.000000e+00 : f32
    %871 = vector.broadcast %cst_231 : f32 to vector<2x32xf32>
    %872 = arith.addf %871, %870 : vector<2x32xf32>
    %873 = arith.divf %871, %872 : vector<2x32xf32>
    %874 = arith.mulf %865, %731 : vector<2x32xf32>
    %875 = arith.mulf %859, %867 : vector<2x32xf32>
    %876 = arith.addf %874, %875 : vector<2x32xf32>
    %877 = math.tanh %876 : vector<2x32xf32>
    %878 = arith.mulf %873, %877 : vector<2x32xf32>
    %cst_232 = arith.constant dense<0.000000e+00> : vector<2x32xf32>
    %879 = tpu.matmul %878, %6, %cst_232 {dimension_numbers = #tpu.dot_dimension_numbers<[1], [0], [0], [1], [0, 0, 1, 1], [], []>} : vector<2x32xf32>, vector<32x32xf32>, vector<2x32xf32> -> vector<2x32xf32>
    %880 = vector.shape_cast %879 : vector<2x32xf32> to vector<2x1x32xf32>
    "tpu.trace_start"() <{level = 10 : i32, message = "bqp,bpx->bqx"}> : () -> ()
    %cst_233 = arith.constant dense<0.000000e+00> : vector<2x1x32xf32>
    %881 = tpu.matmul %880, %0, %cst_233 {dimension_numbers = #tpu.dot_dimension_numbers<[2], [1], [1], [2], [0, 0, 0, 1, 1, 2], [0], [0]>} : vector<2x1x32xf32>, vector<2x32x32xf32>, vector<2x1x32xf32> -> vector<2x1x32xf32>
    "tpu.trace_stop"() : () -> ()
    %882 = vector.shape_cast %881 : vector<2x1x32xf32> to vector<2x32xf32>
    %cst_234 = arith.constant 0.353553385 : f32
    %883 = vector.broadcast %cst_234 : f32 to vector<2x32xf32>
    %884 = arith.mulf %882, %883 : vector<2x32xf32>
    %885 = arith.addf %884, %2 : vector<2x32xf32>
    %886 = vector.extract_strided_slice %885 {offsets = [0, 0], sizes = [2, 8], strides = [1, 1]} : vector<2x32xf32> to vector<2x8xf32>
    %cst_235 = arith.constant dense<0xFF800000> : vector<2xf32>
    %887 = vector.multi_reduction <maximumf>, %886, %cst_235 [1] : vector<2x8xf32> to vector<2xf32>
    %888 = vector.shape_cast %887 : vector<2xf32> to vector<2x1xf32>
    %889 = vector.broadcast %888 : vector<2x1xf32> to vector<2x8xf32>
    %890 = arith.subf %886, %889 : vector<2x8xf32>
    %891 = math.exp %890 : vector<2x8xf32>
    %cst_236 = arith.constant dense<0.000000e+00> : vector<2xf32>
    %892 = vector.multi_reduction <add>, %891, %cst_236 [1] : vector<2x8xf32> to vector<2xf32>
    %893 = vector.shape_cast %892 : vector<2xf32> to vector<2x1xf32>
    %894 = vector.broadcast %893 : vector<2x1xf32> to vector<2x8xf32>
    %895 = arith.divf %891, %894 : vector<2x8xf32>
    %896 = vector.extract_strided_slice %885 {offsets = [0, 8], sizes = [2, 8], strides = [1, 1]} : vector<2x32xf32> to vector<2x8xf32>
    %cst_237 = arith.constant dense<0xFF800000> : vector<2xf32>
    %897 = vector.multi_reduction <maximumf>, %896, %cst_237 [1] : vector<2x8xf32> to vector<2xf32>
    %898 = vector.shape_cast %897 : vector<2xf32> to vector<2x1xf32>
    %899 = vector.broadcast %898 : vector<2x1xf32> to vector<2x8xf32>
    %900 = arith.subf %896, %899 : vector<2x8xf32>
    %901 = math.exp %900 : vector<2x8xf32>
    %cst_238 = arith.constant dense<0.000000e+00> : vector<2xf32>
    %902 = vector.multi_reduction <add>, %901, %cst_238 [1] : vector<2x8xf32> to vector<2xf32>
    %903 = vector.shape_cast %902 : vector<2xf32> to vector<2x1xf32>
    %904 = vector.broadcast %903 : vector<2x1xf32> to vector<2x8xf32>
    %905 = arith.divf %901, %904 : vector<2x8xf32>
    %906 = vector.extract_strided_slice %885 {offsets = [0, 16], sizes = [2, 8], strides = [1, 1]} : vector<2x32xf32> to vector<2x8xf32>
    %cst_239 = arith.constant dense<0xFF800000> : vector<2xf32>
    %907 = vector.multi_reduction <maximumf>, %906, %cst_239 [1] : vector<2x8xf32> to vector<2xf32>
    %908 = vector.shape_cast %907 : vector<2xf32> to vector<2x1xf32>
    %909 = vector.broadcast %908 : vector<2x1xf32> to vector<2x8xf32>
    %910 = arith.subf %906, %909 : vector<2x8xf32>
    %911 = math.exp %910 : vector<2x8xf32>
    %cst_240 = arith.constant dense<0.000000e+00> : vector<2xf32>
    %912 = vector.multi_reduction <add>, %911, %cst_240 [1] : vector<2x8xf32> to vector<2xf32>
    %913 = vector.shape_cast %912 : vector<2xf32> to vector<2x1xf32>
    %914 = vector.broadcast %913 : vector<2x1xf32> to vector<2x8xf32>
    %915 = arith.divf %911, %914 : vector<2x8xf32>
    %916 = vector.extract_strided_slice %885 {offsets = [0, 24], sizes = [2, 8], strides = [1, 1]} : vector<2x32xf32> to vector<2x8xf32>
    %cst_241 = arith.constant dense<0xFF800000> : vector<2xf32>
    %917 = vector.multi_reduction <maximumf>, %916, %cst_241 [1] : vector<2x8xf32> to vector<2xf32>
    %918 = vector.shape_cast %917 : vector<2xf32> to vector<2x1xf32>
    %919 = vector.broadcast %918 : vector<2x1xf32> to vector<2x8xf32>
    %920 = arith.subf %916, %919 : vector<2x8xf32>
    %921 = math.exp %920 : vector<2x8xf32>
    %cst_242 = arith.constant dense<0.000000e+00> : vector<2xf32>
    %922 = vector.multi_reduction <add>, %921, %cst_242 [1] : vector<2x8xf32> to vector<2xf32>
    %923 = vector.shape_cast %922 : vector<2xf32> to vector<2x1xf32>
    %924 = vector.broadcast %923 : vector<2x1xf32> to vector<2x8xf32>
    %925 = arith.divf %921, %924 : vector<2x8xf32>
    %926 = tpu.concatenate %895, %905, %915, %925 in 1 : vector<2x8xf32>, vector<2x8xf32>, vector<2x8xf32>, vector<2x8xf32> -> vector<2x32xf32>
    %927 = vector.shape_cast %926 : vector<2x32xf32> to vector<2x1x32xf32>
    "tpu.trace_start"() <{level = 10 : i32, message = "bqx,bxp->bqp"}> : () -> ()
    %cst_243 = arith.constant dense<0.000000e+00> : vector<2x1x32xf32>
    %928 = tpu.matmul %927, %1, %cst_243 {dimension_numbers = #tpu.dot_dimension_numbers<[2], [1], [1], [2], [0, 0, 0, 1, 1, 2], [0], [0]>} : vector<2x1x32xf32>, vector<2x32x32xf32>, vector<2x1x32xf32> -> vector<2x1x32xf32>
    "tpu.trace_stop"() : () -> ()
    %929 = vector.shape_cast %928 : vector<2x1x32xf32> to vector<2x32xf32>
    %cst_244 = arith.constant 0.000000e+00 : f32
    %930 = vector.broadcast %cst_244 : f32 to vector<2x8xf32>
    %931 = arith.addf %930, %895 : vector<2x8xf32>
    %932 = arith.addf %931, %905 : vector<2x8xf32>
    %933 = arith.addf %932, %915 : vector<2x8xf32>
    %934 = arith.addf %933, %925 : vector<2x8xf32>
    %cst_245 = arith.constant 2.500000e-01 : f32
    %935 = vector.broadcast %cst_245 : f32 to vector<2x8xf32>
    %936 = arith.mulf %934, %935 : vector<2x8xf32>
    %937 = tpu.concatenate %879, %929 in 1 : vector<2x32xf32>, vector<2x32xf32> -> vector<2x64xf32>
    %cst_246 = arith.constant dense<0.000000e+00> : vector<2x16xf32>
    %938 = tpu.matmul %937, %4, %cst_246 {dimension_numbers = #tpu.dot_dimension_numbers<[1], [0], [0], [1], [0, 0, 1, 1], [], []>} : vector<2x64xf32>, vector<64x16xf32>, vector<2x16xf32> -> vector<2x16xf32>
    %939 = vector.broadcast %5 : vector<1x16xf32> to vector<2x16xf32>
    %940 = arith.addf %938, %939 : vector<2x16xf32>
    %941 = arith.index_cast %c5_i32 : i32 to index
    %c0_247 = arith.constant 0 : index
    %c0_248 = arith.constant 0 : index
    %942 = vector.load %arg18[%941, %c0_247, %c0_248] : memref<6x2x16xf32, #tpu.memory_space<vmem>>, vector<1x2x16xf32>
    %943 = vector.shape_cast %942 : vector<1x2x16xf32> to vector<2x16xf32>
    %944 = vector.shape_cast %940 : vector<2x16xf32> to vector<1x2x16xf32>
    tpu.vector_store %arg18[%941, %c0_247, %c0_248], %944 {strides = array<i32>} : memref<6x2x16xf32, #tpu.memory_space<vmem>>, vector<1x2x16xf32>,
    %c1_i32_249 = arith.constant 1 : i32
    %945 = arith.addi %c5_i32, %c1_i32_249 : i32
    %946 = arith.index_cast %945 : i32 to index
    %c0_250 = arith.constant 0 : index
    %c0_251 = arith.constant 0 : index
    %947 = vector.load %arg19[%946, %c0_250, %c0_251] : memref<7x2x8xf32, #tpu.memory_space<vmem>>, vector<1x2x8xf32>
    %948 = vector.shape_cast %947 : vector<1x2x8xf32> to vector<2x8xf32>
    %949 = vector.shape_cast %936 : vector<2x8xf32> to vector<1x2x8xf32>
    tpu.vector_store %arg19[%946, %c0_250, %c0_251], %949 {strides = array<i32>} : memref<7x2x8xf32, #tpu.memory_space<vmem>>, vector<1x2x8xf32>,
    %cst_252 = arith.constant dense<0xFF800000> : vector<2xf32>
    %950 = vector.multi_reduction <maximumf>, %940, %cst_252 [1] : vector<2x16xf32> to vector<2xf32>
    %951 = vector.shape_cast %950 : vector<2xf32> to vector<2x1xf32>
    %952 = vector.broadcast %951 : vector<2x1xf32> to vector<2x16xf32>
    %953 = arith.cmpf oge, %940, %952 : vector<2x16xf32>
    %c16_i32_253 = arith.constant 16 : i32
    %954 = vector.broadcast %c16_i32_253 : i32 to vector<2x16xi32>
    %955 = arith.select %953, %92, %954 : vector<2x16xi1>, vector<2x16xi32>
    %cst_254 = arith.constant dense<2147483647> : vector<2xi32>
    %956 = vector.multi_reduction <minsi>, %955, %cst_254 [1] : vector<2x16xi32> to vector<2xi32>
    %957 = vector.shape_cast %956 : vector<2xi32> to vector<2x1xi32>
    %958 = vector.broadcast %957 : vector<2x1xi32> to vector<2x16xi32>
    %959 = arith.cmpi eq, %92, %958 : vector<2x16xi32>
    %960 = arith.extui %959 : vector<2x16xi1> to vector<2x16xi32>
    %961 = arith.sitofp %960 : vector<2x16xi32> to vector<2x16xf32>
    %cst_255 = arith.constant dense<0.000000e+00> : vector<2x64xf32>
    %962 = tpu.matmul %961, %3, %cst_255 {dimension_numbers = #tpu.dot_dimension_numbers<[1], [0], [0], [1], [0, 0, 1, 1], [], []>} : vector<2x16xf32>, vector<16x64xf32>, vector<2x64xf32> -> vector<2x64xf32>
    %c6_i32 = arith.constant 6 : i32
    return
  }
}

</mosaic_0001>

<bundles_post_ra>
// kernel: tile.9
= control target key start
LH: loop header
LB: loop body
LE: loop exit
PB: predicated region body
PF: predicated region fallthrough
CT: control target
= control target key end

     0   :  { %s29_s10 = smov 3  ;;  %s10_s11 = smov 3  ;;  %vm12_vm0 = vcmask 64512   ;;  %vm19_vm1 = vcmask 261312   ;;  %vm26_vm2 = vcmask 195712   ;;  %vm33_vm3 = vcmask 130112   ;;  %s67_s0 = inlined_call_operand.vmem [shape: f32[2,4,8], index: 0, kind: input, shape index: {}]   ;;  %s68_s1 = inlined_call_operand.vmem [shape: f32[2,32], index: 1, kind: output, shape index: {}]  }
   0x1   :  { %v41_v0 = vld [vmem:[%s67_s0 + $0x4] sm:$0xf]  ;;  %v8_v1 = vld [vmem:[%s67_s0] sm:$0xf]  ;;  %s15_s0 = smov 3  ;;  %s22_s12 = smov 3 }
   0x2   :  { %7 = vst [vmem:[#allocation1 + $0x8] sm:$0xf] %v41_v0  ;;  %9 = vst [vmem:[#allocation1] sm:$0xf] %v8_v1  ;;  %s45_s13 = smov 24   ;;  %s46_s14 = smov 8  }
   0x3   :  { %s47_s15 = smov 16  }
   0x9   :  { %v16_v2 = vld [vmem:[#allocation1 + $0x3] ss:$8 sm:%s15_s0]   ;;  %v30_v3 = vld [vmem:[#allocation1 + $0x1] ss:$8 sm:%s29_s10]   ;;  %v11_v4 = vld [vmem:[#allocation1] ss:$8 sm:%s10_s11]  }
   0xa   :  { %17 = vrot.lane.b32.xlu0 %v16_v2, %s45_s13  ;;  %31 = vrot.lane.b32.xlu1 %v30_v3, %s46_s14  ;;  %v23_v5 = vld [vmem:[#allocation1 + $0x2] ss:$8 sm:%s22_s12]   ;;  %13 = vst.msk [vmem:[#allocation0] sm:$0x3] %vm12_vm0, %v11_v4  }
   0xe   :  { %24 = vrot.lane.b32.xlu0 %v23_v5, %s47_s15 }
  0x7c   :  { %v18_v6 = vpop.permute.xlu0 %17   ;;  %v32_v7 = vpop.permute.xlu1 %31  }
  0x7d   :  { %20 = vst.msk [vmem:[#allocation0] sm:$0x3] %vm19_vm1, %v18_v6  }
  0x80   :  { %v25_v8 = vpop.permute.xlu0 %24  }
  0x81   :  { %27 = vst.msk [vmem:[#allocation0] sm:$0x3] %vm26_vm2, %v25_v8  }
  0x82   :  { %34 = vst.msk [vmem:[#allocation0] sm:$0x3] %vm33_vm3, %v32_v7  }
  0x89   :  { %v38_v9 = vld [vmem:[#allocation0] sm:$0x3] }
  0x8a   :  { %40 = vst [vmem:[%s68_s1] sm:$0x3] %v38_v9 }

// kernel: rewriter_forward.6
= control target key start
LH: loop header
LB: loop body
LE: loop exit
PB: predicated region body
PF: predicated region fallthrough
CT: control target
= control target key end

     0   :  { %vm31_vm0 = vcmask 523264   ;;  %s230_s1 = inlined_call_operand.vmem [shape: f32[64,64], index: 1, kind: input, shape index: {}]   ;;  %s231_s0 = inlined_call_operand.vmem [shape: f32[16,64], index: 0, kind: input, shape index: {}]   ;;  %s232_s2 = inlined_call_operand.vmem [shape: f32[1,64], index: 2, kind: input, shape index: {}]   ;;  %s233_s3 = inlined_call_operand.vmem [shape: f32[16,64], index: 3, kind: output, shape index: {}]  }
   0x1   :  { %v16_v0 = vld [vmem:[%s230_s1] sm:$0xff]  ;;  %v17_v1 = vld [vmem:[%s230_s1 + $0x8] sm:$0xff]  ;;  %v18_v2 = vld [vmem:[%s230_s1 + $0x10] sm:$0xff] }
   0x2   :  { %v151_v3 = vpack.c.bf16 %v17_v1, %v16_v0  ;;  %v19_v4 = vld [vmem:[%s230_s1 + $0x18] sm:$0xff]  ;;  %v20_v6 = vld [vmem:[%s230_s1 + $0x20] sm:$0xff]  ;;  %v21_v7 = vld [vmem:[%s230_s1 + $0x28] sm:$0xff] }
   0x3   :  { %v155_v5 = vpack.c.bf16 %v19_v4, %v18_v2  ;;  %v14_v8 = vld [vmem:[%s231_s0] sm:$0xff]  ;;  %v159_v9 = vpack.c.bf16 %v21_v7, %v20_v6  ;;  %v22_v10 = vld [vmem:[%s230_s1 + $0x30] sm:$0xff]  ;;  %v23_v11 = vld [vmem:[%s230_s1 + $0x38] sm:$0xff] }
   0x4   :  { %152 = vmatprep.subr.bf16.mxu0 %v151_v3  ;;  %148 = vmatprep.mubr.msk.f32.mxu0 %vm31_vm0, %v14_v8  ;;  %v163_v12 = vpack.c.bf16 %v23_v11, %v22_v10  ;;  %v15_v13 = vld [vmem:[%s231_s0 + $0x8] sm:$0xff]  ;;  %v119_v14 = vld [vmem:[%s232_s2] ss:$0 sm:$0xff] }
   0x5   :  { %154 = vmatpush3.bf16.msra.mxu0 %v151_v3 }
   0x6   :  { %156 = vmatprep.subr.bf16.mxu0 %v155_v5 }
   0x9   :  { %158 = vmatpush3.bf16.msra.mxu0 %v155_v5 }
   0xa   :  { %160 = vmatprep.subr.bf16.mxu0 %v159_v9 }
   0xd   :  { %162 = vmatpush3.bf16.msra.mxu0 %v159_v9 }
   0xe   :  { %164 = vmatprep.subr.bf16.mxu0 %v163_v12 }
  0x11   :  { %166 = vmatpush3.bf16.msra.mxu0 %v163_v12 }
  0x14   :  { %149 = vmatmul.mubr.msk.f32.vlgmr.msra.gmra.mrb[0].mxu0 %vm31_vm0, %v15_v13 }
  0xe7   :  { %v150_v15 = vpop.f32.mrb[0].mxu0 }
  0xe8   :  { %v110_v16 = vadd.f32 %v150_v15, %v119_v14  ;;  %v104_v17 = vpop.f32.mrb[1].mxu0 }
  0xe9   :  { %v105_v18 = vadd.f32 %v119_v14, %v104_v17 }
  0xea   :  { %114 = vst.msk [vmem:[%s233_s3 + $0x8] sm:$0xff] %vm31_vm0, %v110_v16 }
  0xeb   :  { %113 = vst.msk [vmem:[%s233_s3] sm:$0xff] %vm31_vm0, %v105_v18 }

// kernel: rewriter_forward.4
= control target key start
LH: loop header
LB: loop body
LE: loop exit
PB: predicated region body
PF: predicated region fallthrough
CT: control target
= control target key end

     0   :  { %v2480_v3 = vmov 0.0|0.0   ;;  %v2481_v4 = vmov 0.0   ;;  %vm2482_vm0 = vmmov 0   ;;  %vm52_vm1 = vcmask 523264   ;;  %s2484_s23 = smov 32   ;;  %s2950_s1 = inlined_call_operand.vmem [shape: f32[64,256], index: 1, kind: input, shape index: {}]   ;;  %s2951_s2 = inlined_call_operand.vmem [shape: f32[32,128], index: 2, kind: input, shape index: {}]   ;;  %s2952_s3 = inlined_call_operand.vmem [shape: f32[32,128], index: 3, kind: input, shape index: {}]   ;;  %s2953_s0 = inlined_call_operand.vmem [shape: f32[16,64], index: 0, kind: input, shape index: {}]   ;;  %s2954_s4 = inlined_call_operand.vmem [shape: f32[1,256], index: 4, kind: input, shape index: {}]   ;;  %s2955_s5 = inlined_call_operand.vmem [shape: f32[8,2,32], index: 5, kind: output, shape index: {0}]   ;;  %s2956_s6 = inlined_call_operand.vmem [shape: f32[8,2,32], index: 6, kind: output, shape index: {1}]  }
   0x1   :  { %v25_v0 = vld [vmem:[%s2950_s1 + $0x8] sm:$0xff]  ;;  %v27_v1 = vld [vmem:[%s2950_s1 + $0x18] sm:$0xff]  ;;  %v24_v2 = vld [vmem:[%s2950_s1] sm:$0xff]  ;;  %2251 = vmatprep.subr.bf16.mxu1 %v2480_v3  ;;  %123 = vmatprep.mubr.f32.mxu0 %v2481_v4  ;;  %v42_v40 = vlaneseq  ;;  %vm351_vm2 = vcmask 254976   ;;  %vm150_vm3 = vcmask 261120   ;;  %vm358_vm4 = vcmask 261126  }
   0x2   :  { %v2235_v5 = vpack.c.bf16 %v27_v1, %v25_v0  ;;  %v26_v6 = vld [vmem:[%s2950_s1 + $0x10] sm:$0xff]  ;;  %v29_v7 = vld [vmem:[%s2950_s1 + $0x28] sm:$0xff]  ;;  %v31_v8 = vld [vmem:[%s2950_s1 + $0x38] sm:$0xff]  ;;  %2067 = vmatprep.mubr.msk.f32.mxu1 %vm2482_vm0, %v2481_v4  ;;  %vm583_vm5 = vcmask 259076   ;;  %vm576_vm6 = vcmask 257026  }
   0x3   :  { %v2237_v9 = vpack.c.bf16 %v26_v6, %v24_v2  ;;  %v2239_v10 = vpack.c.bf16 %v31_v8, %v29_v7  ;;  %v28_v11 = vld [vmem:[%s2950_s1 + $0x20] sm:$0xff]  ;;  %v30_v12 = vld [vmem:[%s2950_s1 + $0x30] sm:$0xff]  ;;  %v33_v13 = vld [vmem:[%s2950_s1 + $0x48] sm:$0xff]  ;;  %v43_v41 = vshrl.u32 %v42_v40, 7 }
   0x4   :  { %2236 = vmatprep.subr.bf16.mxu0 %v2235_v5  ;;  %v35_v14 = vld [vmem:[%s2950_s1 + $0x58] sm:$0xff]  ;;  %v2241_v15 = vpack.c.bf16 %v30_v12, %v28_v11  ;;  %v32_v16 = vld [vmem:[%s2950_s1 + $0x40] sm:$0xff]  ;;  %v34_v17 = vld [vmem:[%s2950_s1 + $0x50] sm:$0xff] }
   0x5   :  { %2238 = vmatpush1.bf16.msra.mxu0 %v2237_v9  ;;  %v2243_v18 = vpack.c.bf16 %v35_v14, %v33_v13  ;;  %v37_v19 = vld [vmem:[%s2950_s1 + $0x68] sm:$0xff]  ;;  %v140_v20 = vld [vmem:[%s2951_s2] sm:$0xff]  ;;  %v39_v22 = vld [vmem:[%s2950_s1 + $0x78] sm:$0xff]  ;;  %v2245_v26 = vpack.c.bf16 %v34_v17, %v32_v16  ;;  %v44_v42 = vsub.s32 0, %v43_v41  ;;  %v48_v44 = vsub.s32 1, %v43_v41 }
   0x6   :  { %2240 = vmatprep.subr.bf16.mxu0 %v2239_v10  ;;  %v141_v21 = vld [vmem:[%s2951_s2 + $0x8] sm:$0xff]  ;;  %v142_v24 = vld [vmem:[%s2951_s2 + $0x10] sm:$0xff]  ;;  %v143_v25 = vld [vmem:[%s2951_s2 + $0x18] sm:$0xff]  ;;  %v2247_v29 = vpack.c.bf16 %v39_v22, %v37_v19 }
   0x7   :  { %v2572_v23 = vpack.c.bf16 %v141_v21, %v140_v20  ;;  %v36_v27 = vld [vmem:[%s2950_s1 + $0x60] sm:$0xff]  ;;  %v2584_v28 = vpack.c.bf16 %v143_v25, %v142_v24  ;;  %v38_v30 = vld [vmem:[%s2950_s1 + $0x70] sm:$0xff]  ;;  %v145_v32 = vld [vmem:[%s2952_s3 + $0x8] sm:$0xff] }
   0x8   :  { %v144_v31 = vld [vmem:[%s2952_s3] sm:$0xff]  ;;  %v2249_v33 = vpack.c.bf16 %v38_v30, %v36_v27  ;;  %v146_v35 = vld [vmem:[%s2952_s3 + $0x10] sm:$0xff]  ;;  %v147_v36 = vld [vmem:[%s2952_s3 + $0x18] sm:$0xff] }
   0x9   :  { %2242 = vmatpush1.bf16.msra.mxu0 %v2241_v15  ;;  %2253 = vmatpush3.bf16.msra.mxu1 %v2572_v23  ;;  %v2597_v34 = vpack.c.bf16 %v145_v32, %v144_v31  ;;  %v22_v37 = vld [vmem:[%s2953_s0] sm:$0xff]  ;;  %v2611_v38 = vpack.c.bf16 %v147_v36, %v146_v35  ;;  %v23_v39 = vld [vmem:[%s2953_s0 + $0x8] sm:$0xff] }
   0xa   :  { %2244 = vmatprep.subr.bf16.mxu0 %v2243_v18  ;;  %2254 = vmatprep.subr.bf16.mxu1 %v2480_v3  ;;  %v40_v43 = vld [vmem:[%s2954_s4] sm:$0x3]  ;;  %s2483_s4 = smov 64  }
   0xb   :  { %v45_v46 = vrot.slane %v40_v43, %v44_v42  ;;  %v49_v48 = vrot.slane %v40_v43, %v48_v44 }
   0xd   :  { %2246 = vmatpush1.bf16.msra.mxu0 %v2245_v26  ;;  %2256 = vmatpush3.bf16.msra.mxu1 %v2584_v28 }
   0xe   :  { %2248 = vmatprep.subr.bf16.mxu0 %v2247_v29  ;;  %2257 = vmatprep.subr.bf16.mxu1 %v2480_v3 }
  0x10   :  { %2068 = vmatmul.mubr.f32.vlgmr.msra.gmra.mrb[0].mxu1 %v2481_v4 }
  0x11   :  { %2250 = vmatpush1.bf16.msra.mxu0 %v2249_v33  ;;  %2259 = vmatpush3.bf16.msra.mxu1 %v2597_v34 }
  0x12   :  { %2260 = vmatprep.subr.bf16.mxu1 %v2480_v3  ;;  %2078 = vmatprep.mubr.msk.f32.mxu1 %vm2482_vm0, %v2481_v4 }
  0x13   :  { %2263 = vmatprep.subr.bf16.mxu0 %v2480_v3 }
  0x14   :  { %1933 = vmatmul.mubr.msk.f32.vlgmr.msra.gmra.mrb[0].mxu0 %vm52_vm1, %v22_v37 }
  0x15   :  { %129 = vmatprep.mubr.f32.mxu0 %v2481_v4  ;;  %2262 = vmatpush3.bf16.msra.mxu1 %v2611_v38 }
  0x16   :  { %2265 = vmatpush3.bf16.msra.mxu0 %v2572_v23  ;;  %2269 = vmatprep.subr.bf16.mxu1 %v2480_v3 }
  0x17   :  { %2266 = vmatprep.subr.bf16.mxu0 %v2480_v3 }
  0x18   :  { %1934 = vmatmul.mubr.msk.f32.gmra.mrb[2].mxu0 %vm52_vm1, %v23_v39  ;;  %2079 = vmatmul.mubr.f32.vlgmr.msra.gmra.mrb[2].mxu1 %v2481_v4 }
  0x19   :  { %2089 = vmatprep.mubr.msk.f32.mxu0 %vm2482_vm0, %v2481_v4  ;;  %2271 = vmatpush3.bf16.msra.mxu1 %v2597_v34 }
  0x1a   :  { %2268 = vmatpush3.bf16.msra.mxu0 %v2584_v28  ;;  %2272 = vmatprep.subr.bf16.mxu1 %v2480_v3 }
  0x1b   :  { %2100 = vmatprep.mubr.msk.f32.mxu1 %vm2482_vm0, %v2481_v4  ;;  %2275 = vmatprep.subr.bf16.mxu0 %v2480_v3 }
  0x1d   :  { %2274 = vmatpush3.bf16.msra.mxu1 %v2611_v38 }
  0x1e   :  { %2281 = vmatprep.subr.bf16.mxu1 %v2480_v3 }
  0xe3   :  { %v220_v45 = vpop.f32.mrb[0].mxu1 }
  0xe4   :  { %v2069_v47 = vpop.f32.mrb[1].mxu1 }
  0xe7   :  { %v125_v49 = vpop.f32.mrb[0].mxu0 }
  0xe8   :  { %v126_v50 = vadd.f32 %v125_v49, %v45_v46  ;;  %v127_v51 = vpop.f32.mrb[1].mxu0 }
  0xe9   :  { %v128_v52 = vadd.f32 %v127_v51, %v49_v48 }
  0xea   :  { %136 = vst [vmem:[#allocation2] sm:$0xff] %v126_v50 }
  0xeb   :  { %137 = vst [vmem:[#allocation2 + $0x8] sm:$0xff] %v128_v52  ;;  %v131_v53 = vpop.f32.mrb[2].mxu0  ;;  %v291_v54 = vpop.f32.mrb[2].mxu1 }
  0xec   :  { %v132_v55 = vadd.f32 %v131_v53, %v45_v46  ;;  %v133_v56 = vpop.f32.mrb[3].mxu0  ;;  %v2080_v57 = vpop.f32.mrb[3].mxu1  ;;  %v296_v61 = vrot.slane %v291_v54, 2 }
  0xed   :  { %v134_v58 = vadd.f32 %v133_v56, %v49_v48 }
  0xee   :  { %138 = vst [vmem:[#allocation2 + $0x10] sm:$0xff] %v132_v55 }
  0xef   :  { %139 = vst [vmem:[#allocation2 + $0x18] sm:$0xff] %v134_v58 }
  0xf1   :  { %v148_v59 = vld [vmem:[#allocation2] sm:$0x3]  ;;  %v360_v37 = vld [vmem:[#allocation2] sm:$0xc] }
  0xf2   :  { %v224_v60 = vadd.f32 %v220_v45, %v148_v59 }
  0xf4   :  { %2352 = vtanh.f32 %v224_v60  ;;  %v1935_v2 = vmul.f32 -1.442695, %v224_v60 }
  0xf6   :  { %v149_v62 = vld [vmem:[#allocation2 + $0x18] sm:$0xc0]  ;;  %v361_v43 = vld [vmem:[#allocation2 + $0x18] sm:$0x30] }
  0xf7   :  { %v298_v63 = vadd.f32 %v296_v61, %v149_v62 }
  0xf9   :  { %2354 = vtanh.f32 %v298_v63  ;;  %v1936_v5 = vmul.f32 -1.442695, %v298_v63 }
  0xfa   :  { %2356 = vpow2.f32 %v1935_v2 }
  0xfb   :  { %2358 = vpow2.f32 %v1936_v5 }
  0xfe   :  { %v2353_v0 = vpop.eup %2352 }
  0xff   :  { %308 = vrot.lane.b32.xlu0 %v2353_v0, %s2483_s4 }
 0x103   :  { %v2355_v1 = vpop.eup %2354 }
 0x104   :  { %332 = vrot.lane.b32.xlu0 %v2355_v1, %s2483_s4  ;;  %v2357_v6 = vpop.eup %2356 }
 0x105   :  { %v302_v7 = vadd.f32 1.0, %v2357_v6  ;;  %v2359_v8 = vpop.eup %2358 }
 0x106   :  { %v326_v9 = vadd.f32 1.0, %v2359_v8 }
 0x107   :  { %2360 = vrcp.f32 %v302_v7 }
 0x108   :  { %2362 = vrcp.f32 %v326_v9 }
 0x111   :  { %v2361_v10 = vpop.eup %2360 }
 0x112   :  { %v2363_v13 = vpop.eup %2362  ;;  %v306_v16 = vmul.f32 0.0, %v2361_v10 }
 0x113   :  { %v330_v19 = vmul.f32 0.0, %v2363_v13 }
 0x171   :  { %v309_v11 = vpop.permute.xlu0 %308 }
 0x172   :  { %v311_v12 = vmul.f32 %v2361_v10, %v309_v11 }
 0x174   :  { %313 = vrot.lane.b32.xlu1 %v311_v12, %s2484_s23 }
 0x176   :  { %v333_v14 = vpop.permute.xlu0 %332 }
 0x177   :  { %v335_v15 = vmul.f32 %v2363_v13, %v333_v14 }
 0x179   :  { %337 = vrot.lane.b32.xlu1 %v335_v15, %s2484_s23 }
 0x1e6   :  { %v314_v17 = vpop.permute.xlu1 %313 }
 0x1e7   :  { %v2643_v18 = vadd.f32 %v314_v17, %v306_v16 }
 0x1e9   :  { %2364 = vtanh.f32 %v2643_v18  ;;  %v525_v59 = vrot.slane %v2643_v18, 6  ;;  %v585_v18 = vld [vmem:[#allocation2] sm:$0x30] }
 0x1eb   :  { %v338_v20 = vpop.permute.xlu1 %337 }
 0x1ec   :  { %v2646_v21 = vadd.f32 %v338_v20, %v330_v19 }
 0x1ee   :  { %2366 = vtanh.f32 %v2646_v21  ;;  %v552_v63 = vrot.slane %v2646_v21, 2 }
 0x1f3   :  { %v2365_v22 = vpop.eup %2364 }
 0x1f4   :  { %319 = vrot.lane.b32.xlu0 %v2365_v22, %s2483_s4 }
 0x1f8   :  { %v2367_v24 = vpop.eup %2366 }
 0x1f9   :  { %343 = vrot.lane.b32.xlu1 %v2367_v24, %s2483_s4  ;;  %v586_v24 = vld [vmem:[#allocation2 + $0x18] sm:$0xc] }
 0x266   :  { %v320_v25 = vpop.permute.xlu0 %319 }
 0x267   :  { %v322_v26 = vmul.f32 %v2361_v10, %v320_v25 }
 0x269   :  { %348 = vrot.lane.b32.xlu0 %v322_v26, %s2484_s23 }
 0x26b   :  { %v344_v27 = vpop.permute.xlu1 %343 }
 0x26c   :  { %v2652_v29 = vmul.f32 %v2363_v13, %v344_v27 }
 0x26e   :  { %v438_v30 = vrot.slane %v2652_v29, 6 }
 0x270   :  { %439 = vrot.lane.b32.xlu1 %v438_v30, %s2484_s23 }
 0x2db   :  { %v349_v31 = vpop.permute.xlu0 %348 }
 0x2dc   :  { %352 = vst.msk [vmem:[%s2955_s5] sm:$0x3] %vm351_vm2, %v349_v31  ;;  %2090 = vmatmul.mubr.msk.f32.vlgmr.msra.gmra.mrb[4].mxu0 %vm150_vm3, %v349_v31 }
 0x2dd   :  { %2277 = vmatpush3.bf16.msra.mxu0 %v2572_v23  ;;  %2111 = vmatprep.mubr.msk.f32.mxu0 %vm2482_vm0, %v2481_v4 }
 0x2de   :  { %2278 = vmatprep.subr.bf16.mxu0 %v2480_v3 }
 0x2e1   :  { %2280 = vmatpush3.bf16.msra.mxu0 %v2584_v28 }
 0x2e2   :  { %v440_v32 = vpop.permute.xlu1 %439  ;;  %2287 = vmatprep.subr.bf16.mxu0 %v2480_v3 }
 0x2e3   :  { %2101 = vmatmul.mubr.msk.f32.vlgmr.msra.gmra.mrb[4].mxu1 %vm150_vm3, %v440_v32 }
 0x2e4   :  { %2283 = vmatpush3.bf16.msra.mxu1 %v2597_v34  ;;  %2122 = vmatprep.mubr.msk.f32.mxu1 %vm2482_vm0, %v2481_v4 }
 0x2e5   :  { %2284 = vmatprep.subr.bf16.mxu1 %v2480_v3 }
 0x2e8   :  { %2286 = vmatpush3.bf16.msra.mxu1 %v2611_v38 }
 0x2e9   :  { %2293 = vmatprep.subr.bf16.mxu1 %v2480_v3 }
 0x3af   :  { %v430_v33 = vpop.f32.mrb[4].mxu0 }
 0x3b0   :  { %v435_v35 = vrot.slane %v430_v33, 6  ;;  %v2091_v36 = vpop.f32.mrb[5].mxu0 }
 0x3b2   :  { %v437_v39 = vadd.f32 %v435_v35, %v360_v37 }
 0x3b4   :  { %2368 = vtanh.f32 %v437_v39  ;;  %v1940_v47 = vmul.f32 -1.442695, %v437_v39 }
 0x3b6   :  { %v509_v40 = vpop.f32.mrb[4].mxu1 }
 0x3b7   :  { %v514_v41 = vrot.slane %v509_v40, 4  ;;  %v2102_v42 = vpop.f32.mrb[5].mxu1 }
 0x3b9   :  { %v516_v44 = vadd.f32 %v514_v41, %v361_v43 }
 0x3bb   :  { %2370 = vtanh.f32 %v516_v44  ;;  %v1941_v48 = vmul.f32 -1.442695, %v516_v44 }
 0x3bc   :  { %2372 = vpow2.f32 %v1940_v47 }
 0x3bd   :  { %2374 = vpow2.f32 %v1941_v48 }
 0x3be   :  { %v2369_v45 = vpop.eup %2368 }
 0x3bf   :  { %529 = vrot.lane.b32.xlu0 %v2369_v45, %s2483_s4 }
 0x3c5   :  { %v2371_v46 = vpop.eup %2370 }
 0x3c6   :  { %556 = vrot.lane.b32.xlu1 %v2371_v46, %s2483_s4  ;;  %v2373_v49 = vpop.eup %2372 }
 0x3c7   :  { %v520_v50 = vadd.f32 1.0, %v2373_v49  ;;  %v2375_v51 = vpop.eup %2374 }
 0x3c8   :  { %v547_v52 = vadd.f32 1.0, %v2375_v51 }
 0x3c9   :  { %2376 = vrcp.f32 %v520_v50 }
 0x3ca   :  { %2378 = vrcp.f32 %v547_v52 }
 0x3d3   :  { %v2377_v53 = vpop.eup %2376 }
 0x3d4   :  { %v2379_v56 = vpop.eup %2378  ;;  %v527_v60 = vmul.f32 %v2377_v53, %v525_v59 }
 0x3d5   :  { %v554_v0 = vmul.f32 %v2379_v56, %v552_v63 }
 0x431   :  { %v530_v54 = vpop.permute.xlu0 %529 }
 0x432   :  { %v532_v55 = vmul.f32 %v2377_v53, %v530_v54 }
 0x434   :  { %534 = vrot.lane.b32.xlu0 %v532_v55, %s2484_s23 }
 0x438   :  { %v557_v57 = vpop.permute.xlu1 %556 }
 0x439   :  { %v559_v58 = vmul.f32 %v2379_v56, %v557_v57 }
 0x43b   :  { %561 = vrot.lane.b32.xlu1 %v559_v58, %s2484_s23 }
 0x4a6   :  { %v535_v61 = vpop.permute.xlu0 %534 }
 0x4a7   :  { %v2679_v62 = vadd.f32 %v535_v61, %v527_v60 }
 0x4a9   :  { %2380 = vtanh.f32 %v2679_v62  ;;  %v753_v44 = vrot.slane %v2679_v62, 6 }
 0x4ad   :  { %v562_v1 = vpop.permute.xlu1 %561 }
 0x4ae   :  { %v2683_v2 = vadd.f32 %v562_v1, %v554_v0  ;;  %v811_v1 = vld [vmem:[#allocation2] sm:$0xc0] }
 0x4b0   :  { %2382 = vtanh.f32 %v2683_v2  ;;  %v780_v48 = vrot.slane %v2683_v2, 2 }
 0x4b3   :  { %v2381_v5 = vpop.eup %2380 }
 0x4b4   :  { %540 = vrot.lane.b32.xlu0 %v2381_v5, %s2483_s4  ;;  %v812_v5 = vld [vmem:[#allocation2 + $0x18] sm:$0x3] }
 0x4ba   :  { %v2383_v6 = vpop.eup %2382 }
 0x4bb   :  { %567 = vrot.lane.b32.xlu1 %v2383_v6, %s2483_s4 }
 0x526   :  { %v541_v7 = vpop.permute.xlu0 %540 }
 0x527   :  { %v2688_v8 = vmul.f32 %v2377_v53, %v541_v7 }
 0x529   :  { %v587_v9 = vrot.slane %v2688_v8, 2 }
 0x52b   :  { %588 = vrot.lane.b32.xlu0 %v587_v9, %s2484_s23 }
 0x52d   :  { %v568_v10 = vpop.permute.xlu1 %567 }
 0x52e   :  { %v2692_v11 = vmul.f32 %v2379_v56, %v568_v10 }
 0x530   :  { %v666_v12 = vrot.slane %v2692_v11, 4 }
 0x532   :  { %667 = vrot.lane.b32.xlu1 %v666_v12, %s2484_s23 }
 0x59d   :  { %v589_v13 = vpop.permute.xlu0 %588 }
 0x59e   :  { %2112 = vmatmul.mubr.msk.f32.vlgmr.msra.gmra.mrb[6].mxu0 %vm150_vm3, %v589_v13 }
 0x59f   :  { %2289 = vmatpush3.bf16.msra.mxu0 %v2572_v23  ;;  %2133 = vmatprep.mubr.msk.f32.mxu0 %vm2482_vm0, %v2481_v4 }
 0x5a0   :  { %2290 = vmatprep.subr.bf16.mxu0 %v2480_v3 }
 0x5a3   :  { %2292 = vmatpush3.bf16.msra.mxu0 %v2584_v28 }
 0x5a4   :  { %v668_v14 = vpop.permute.xlu1 %667  ;;  %2299 = vmatprep.subr.bf16.mxu0 %v2480_v3 }
 0x5a5   :  { %2123 = vmatmul.mubr.msk.f32.vlgmr.msra.gmra.mrb[6].mxu1 %vm150_vm3, %v668_v14 }
 0x5a6   :  { %2295 = vmatpush3.bf16.msra.mxu1 %v2597_v34  ;;  %2144 = vmatprep.mubr.msk.f32.mxu1 %vm2482_vm0, %v2481_v4 }
 0x5a7   :  { %2296 = vmatprep.subr.bf16.mxu1 %v2480_v3 }
 0x5aa   :  { %2298 = vmatpush3.bf16.msra.mxu1 %v2611_v38 }
 0x5ab   :  { %2305 = vmatprep.subr.bf16.mxu1 %v2480_v3 }
 0x671   :  { %v658_v15 = vpop.f32.mrb[6].mxu0 }
 0x672   :  { %v663_v16 = vrot.slane %v658_v15, 4  ;;  %v2113_v17 = vpop.f32.mrb[7].mxu0 }
 0x674   :  { %v665_v19 = vadd.f32 %v663_v16, %v585_v18 }
 0x676   :  { %2384 = vtanh.f32 %v665_v19  ;;  %v1946_v30 = vmul.f32 -1.442695, %v665_v19 }
 0x678   :  { %v737_v20 = vpop.f32.mrb[6].mxu1 }
 0x679   :  { %v742_v21 = vrot.slane %v737_v20, 6  ;;  %v2124_v22 = vpop.f32.mrb[7].mxu1 }
 0x67b   :  { %v744_v25 = vadd.f32 %v742_v21, %v586_v24 }
 0x67d   :  { %2386 = vtanh.f32 %v744_v25  ;;  %v1947_v31 = vmul.f32 -1.442695, %v744_v25 }
 0x67e   :  { %2388 = vpow2.f32 %v1946_v30 }
 0x67f   :  { %2390 = vpow2.f32 %v1947_v31 }
 0x680   :  { %v2385_v26 = vpop.eup %2384 }
 0x681   :  { %757 = vrot.lane.b32.xlu0 %v2385_v26, %s2483_s4 }
 0x687   :  { %v2387_v27 = vpop.eup %2386 }
 0x688   :  { %784 = vrot.lane.b32.xlu1 %v2387_v27, %s2483_s4  ;;  %v2389_v32 = vpop.eup %2388 }
 0x689   :  { %v748_v33 = vadd.f32 1.0, %v2389_v32  ;;  %v2391_v35 = vpop.eup %2390 }
 0x68a   :  { %v775_v36 = vadd.f32 1.0, %v2391_v35 }
 0x68b   :  { %2392 = vrcp.f32 %v748_v33 }
 0x68c   :  { %2394 = vrcp.f32 %v775_v36 }
 0x695   :  { %v2393_v37 = vpop.eup %2392 }
 0x696   :  { %v2395_v41 = vpop.eup %2394  ;;  %v755_v45 = vmul.f32 %v2393_v37, %v753_v44 }
 0x697   :  { %v782_v49 = vmul.f32 %v2395_v41, %v780_v48 }
 0x6f3   :  { %v758_v39 = vpop.permute.xlu0 %757 }
 0x6f4   :  { %v760_v40 = vmul.f32 %v2393_v37, %v758_v39 }
 0x6f6   :  { %762 = vrot.lane.b32.xlu0 %v760_v40, %s2484_s23 }
 0x6fa   :  { %v785_v42 = vpop.permute.xlu1 %784 }
 0x6fb   :  { %v787_v43 = vmul.f32 %v2395_v41, %v785_v42 }
 0x6fd   :  { %789 = vrot.lane.b32.xlu1 %v787_v43, %s2484_s23 }
 0x768   :  { %v763_v46 = vpop.permute.xlu0 %762 }
 0x769   :  { %v2715_v47 = vadd.f32 %v763_v46, %v755_v45 }
 0x76b   :  { %2396 = vtanh.f32 %v2715_v47  ;;  %v976_v26 = vrot.slane %v2715_v47, 6  ;;  %v1034_v47 = vld [vmem:[#allocation2 + $0x10] sm:$0x3] }
 0x76f   :  { %v790_v50 = vpop.permute.xlu1 %789 }
 0x770   :  { %v2719_v51 = vadd.f32 %v790_v50, %v782_v49 }
 0x772   :  { %2398 = vtanh.f32 %v2719_v51  ;;  %v1003_v32 = vrot.slane %v2719_v51, 2 }
 0x775   :  { %v2397_v52 = vpop.eup %2396 }
 0x776   :  { %768 = vrot.lane.b32.xlu0 %v2397_v52, %s2483_s4 }
 0x77c   :  { %v2399_v53 = vpop.eup %2398 }
 0x77d   :  { %795 = vrot.lane.b32.xlu1 %v2399_v53, %s2483_s4 }
 0x7e8   :  { %v769_v54 = vpop.permute.xlu0 %768 }
 0x7e9   :  { %v2724_v55 = vmul.f32 %v2393_v37, %v769_v54  ;;  %v1035_v54 = vld [vmem:[#allocation2 + $0x8] sm:$0xc0] }
 0x7eb   :  { %v813_v56 = vrot.slane %v2724_v55, 4 }
 0x7ed   :  { %814 = vrot.lane.b32.xlu0 %v813_v56, %s2484_s23 }
 0x7ef   :  { %v796_v57 = vpop.permute.xlu1 %795 }
 0x7f0   :  { %v2728_v58 = vmul.f32 %v2395_v41, %v796_v57 }
 0x7f2   :  { %v892_v59 = vrot.slane %v2728_v58, 2 }
 0x7f4   :  { %893 = vrot.lane.b32.xlu1 %v892_v59, %s2484_s23 }
 0x85f   :  { %v815_v60 = vpop.permute.xlu0 %814 }
 0x860   :  { %2134 = vmatmul.mubr.msk.f32.vlgmr.msra.gmra.mrb[8].mxu0 %vm150_vm3, %v815_v60 }
 0x861   :  { %2301 = vmatpush3.bf16.msra.mxu0 %v2572_v23  ;;  %2155 = vmatprep.mubr.msk.f32.mxu0 %vm2482_vm0, %v2481_v4 }
 0x862   :  { %2302 = vmatprep.subr.bf16.mxu0 %v2480_v3 }
 0x865   :  { %2304 = vmatpush3.bf16.msra.mxu0 %v2584_v28 }
 0x866   :  { %v894_v61 = vpop.permute.xlu1 %893  ;;  %2311 = vmatprep.subr.bf16.mxu0 %v2480_v3 }
 0x867   :  { %2145 = vmatmul.mubr.msk.f32.vlgmr.msra.gmra.mrb[8].mxu1 %vm150_vm3, %v894_v61 }
 0x868   :  { %2307 = vmatpush3.bf16.msra.mxu1 %v2597_v34  ;;  %2166 = vmatprep.mubr.msk.f32.mxu1 %vm2482_vm0, %v2481_v4 }
 0x869   :  { %2308 = vmatprep.subr.bf16.mxu1 %v2480_v3 }
 0x86c   :  { %2310 = vmatpush3.bf16.msra.mxu1 %v2611_v38 }
 0x86d   :  { %2317 = vmatprep.subr.bf16.mxu1 %v2480_v3 }
 0x933   :  { %v884_v62 = vpop.f32.mrb[8].mxu0 }
 0x934   :  { %v889_v63 = vrot.slane %v884_v62, 2  ;;  %v2135_v0 = vpop.f32.mrb[9].mxu0 }
 0x936   :  { %v891_v2 = vadd.f32 %v889_v63, %v811_v1 }
 0x938   :  { %2400 = vtanh.f32 %v891_v2  ;;  %v1952_v13 = vmul.f32 -1.442695, %v891_v2 }
 0x93a   :  { %v963_v6 = vpop.f32.mrb[8].mxu1 }
 0x93b   :  { %v967_v7 = vadd.f32 %v963_v6, %v812_v5  ;;  %v2146_v9 = vpop.f32.mrb[9].mxu1 }
 0x93d   :  { %2402 = vtanh.f32 %v967_v7  ;;  %v1953_v14 = vmul.f32 -1.442695, %v967_v7 }
 0x93e   :  { %2404 = vpow2.f32 %v1952_v13 }
 0x93f   :  { %2406 = vpow2.f32 %v1953_v14 }
 0x942   :  { %v2401_v10 = vpop.eup %2400 }
 0x943   :  { %980 = vrot.lane.b32.xlu0 %v2401_v10, %s2483_s4 }
 0x947   :  { %v2403_v12 = vpop.eup %2402 }
 0x948   :  { %1007 = vrot.lane.b32.xlu1 %v2403_v12, %s2483_s4  ;;  %v2405_v15 = vpop.eup %2404 }
 0x949   :  { %v971_v16 = vadd.f32 1.0, %v2405_v15  ;;  %v2407_v17 = vpop.eup %2406 }
 0x94a   :  { %v998_v18 = vadd.f32 1.0, %v2407_v17 }
 0x94b   :  { %2408 = vrcp.f32 %v971_v16 }
 0x94c   :  { %2410 = vrcp.f32 %v998_v18 }
 0x955   :  { %v2409_v19 = vpop.eup %2408 }
 0x956   :  { %v2411_v22 = vpop.eup %2410  ;;  %v978_v27 = vmul.f32 %v2409_v19, %v976_v26 }
 0x957   :  { %v1005_v33 = vmul.f32 %v2411_v22, %v1003_v32 }
 0x9b5   :  { %v981_v20 = vpop.permute.xlu0 %980 }
 0x9b6   :  { %v983_v21 = vmul.f32 %v2409_v19, %v981_v20 }
 0x9b8   :  { %985 = vrot.lane.b32.xlu0 %v983_v21, %s2484_s23 }
 0x9ba   :  { %v1008_v24 = vpop.permute.xlu1 %1007 }
 0x9bb   :  { %v1010_v25 = vmul.f32 %v2411_v22, %v1008_v24 }
 0x9bd   :  { %1012 = vrot.lane.b32.xlu1 %v1010_v25, %s2484_s23 }
 0xa2a   :  { %v986_v30 = vpop.permute.xlu0 %985 }
 0xa2b   :  { %v2751_v31 = vadd.f32 %v986_v30, %v978_v27 }
 0xa2d   :  { %2412 = vtanh.f32 %v2751_v31  ;;  %v1196_v12 = vrot.slane %v2751_v31, 6 }
 0xa2f   :  { %v1013_v35 = vpop.permute.xlu1 %1012 }
 0xa30   :  { %v2755_v36 = vadd.f32 %v1013_v35, %v1005_v33 }
 0xa32   :  { %2414 = vtanh.f32 %v2755_v36  ;;  %v1223_v16 = vrot.slane %v2755_v36, 2  ;;  %v1254_v36 = vld [vmem:[#allocation2 + $0x10] sm:$0xc] }
 0xa37   :  { %v2413_v37 = vpop.eup %2412 }
 0xa38   :  { %991 = vrot.lane.b32.xlu0 %v2413_v37, %s2483_s4 }
 0xa3c   :  { %v2415_v39 = vpop.eup %2414 }
 0xa3d   :  { %1018 = vrot.lane.b32.xlu1 %v2415_v39, %s2483_s4 }
 0xaaa   :  { %v992_v40 = vpop.permute.xlu0 %991 }
 0xaab   :  { %v2760_v41 = vmul.f32 %v2409_v19, %v992_v40 }
 0xaad   :  { %v1036_v42 = vrot.slane %v2760_v41, 6 }
 0xaaf   :  { %v1019_v43 = vpop.permute.xlu1 %1018  ;;  %1037 = vrot.lane.b32.xlu1 %v1036_v42, %s2484_s23 }
 0xab0   :  { %v1021_v44 = vmul.f32 %v2411_v22, %v1019_v43  ;;  %v1255_v43 = vld [vmem:[#allocation2 + $0x8] sm:$0x30] }
 0xab2   :  { %1029 = vrot.lane.b32.xlu0 %v1021_v44, %s2484_s23 }
 0xb21   :  { %v1038_v45 = vpop.permute.xlu1 %1037 }
 0xb22   :  { %2156 = vmatmul.mubr.msk.f32.vlgmr.msra.gmra.mrb[10].mxu0 %vm150_vm3, %v1038_v45 }
 0xb23   :  { %2313 = vmatpush3.bf16.msra.mxu0 %v2572_v23  ;;  %2177 = vmatprep.mubr.msk.f32.mxu0 %vm2482_vm0, %v2481_v4 }
 0xb24   :  { %v1030_v46 = vpop.permute.xlu0 %1029  ;;  %2314 = vmatprep.subr.bf16.mxu0 %v2480_v3 }
 0xb25   :  { %1955 = vst.msk [vmem:[%s2956_s6 + $0x8] sm:$0x3] %vm351_vm2, %v1030_v46  ;;  %2167 = vmatmul.mubr.msk.f32.vlgmr.msra.gmra.mrb[10].mxu1 %vm150_vm3, %v1030_v46 }
 0xb26   :  { %2319 = vmatpush3.bf16.msra.mxu1 %v2597_v34  ;;  %2188 = vmatprep.mubr.msk.f32.mxu1 %vm2482_vm0, %v2481_v4 }
 0xb27   :  { %2316 = vmatpush3.bf16.msra.mxu0 %v2584_v28  ;;  %2320 = vmatprep.subr.bf16.mxu1 %v2480_v3 }
 0xb28   :  { %2323 = vmatprep.subr.bf16.mxu0 %v2480_v3 }
 0xb2a   :  { %2322 = vmatpush3.bf16.msra.mxu1 %v2611_v38 }
 0xb2b   :  { %2329 = vmatprep.subr.bf16.mxu1 %v2480_v3 }
 0xbf5   :  { %v1107_v48 = vpop.f32.mrb[10].mxu0 }
 0xbf6   :  { %v1111_v49 = vadd.f32 %v1107_v48, %v1034_v47  ;;  %v2157_v50 = vpop.f32.mrb[11].mxu0 }
 0xbf8   :  { %2416 = vtanh.f32 %v1111_v49  ;;  %v1180_v51 = vpop.f32.mrb[10].mxu1  ;;  %v1958_v60 = vmul.f32 -1.442695, %v1111_v49 }
 0xbf9   :  { %v1185_v52 = vrot.slane %v1180_v51, 2  ;;  %v2168_v53 = vpop.f32.mrb[11].mxu1 }
 0xbfb   :  { %v1187_v56 = vadd.f32 %v1185_v52, %v1035_v54 }
 0xbfd   :  { %2418 = vtanh.f32 %v1187_v56  ;;  %v1959_v61 = vmul.f32 -1.442695, %v1187_v56 }
 0xbfe   :  { %2420 = vpow2.f32 %v1958_v60 }
 0xbff   :  { %2422 = vpow2.f32 %v1959_v61 }
 0xc02   :  { %v2417_v57 = vpop.eup %2416 }
 0xc03   :  { %1200 = vrot.lane.b32.xlu0 %v2417_v57, %s2483_s4 }
 0xc07   :  { %v2419_v59 = vpop.eup %2418 }
 0xc08   :  { %1227 = vrot.lane.b32.xlu1 %v2419_v59, %s2483_s4  ;;  %v2421_v62 = vpop.eup %2420 }
 0xc09   :  { %v1191_v63 = vadd.f32 1.0, %v2421_v62  ;;  %v2423_v0 = vpop.eup %2422 }
 0xc0a   :  { %v1218_v1 = vadd.f32 1.0, %v2423_v0 }
 0xc0b   :  { %2424 = vrcp.f32 %v1191_v63 }
 0xc0c   :  { %2426 = vrcp.f32 %v1218_v1 }
 0xc15   :  { %v2425_v2 = vpop.eup %2424 }
 0xc16   :  { %v2427_v7 = vpop.eup %2426  ;;  %v1198_v13 = vmul.f32 %v2425_v2, %v1196_v12 }
 0xc17   :  { %v1225_v17 = vmul.f32 %v2427_v7, %v1223_v16 }
 0xc75   :  { %v1201_v5 = vpop.permute.xlu0 %1200 }
 0xc76   :  { %v1203_v6 = vmul.f32 %v2425_v2, %v1201_v5 }
 0xc78   :  { %1205 = vrot.lane.b32.xlu0 %v1203_v6, %s2484_s23 }
 0xc7a   :  { %v1228_v9 = vpop.permute.xlu1 %1227 }
 0xc7b   :  { %v1230_v10 = vmul.f32 %v2427_v7, %v1228_v9 }
 0xc7d   :  { %1232 = vrot.lane.b32.xlu1 %v1230_v10, %s2484_s23 }
 0xcea   :  { %v1206_v14 = vpop.permute.xlu0 %1205 }
 0xceb   :  { %v2788_v15 = vadd.f32 %v1206_v14, %v1198_v13 }
 0xced   :  { %2428 = vtanh.f32 %v2788_v15  ;;  %v1419_v61 = vrot.slane %v2788_v15, 6 }
 0xcef   :  { %v1233_v18 = vpop.permute.xlu1 %1232 }
 0xcf0   :  { %v2792_v19 = vadd.f32 %v1233_v18, %v1225_v17 }
 0xcf2   :  { %2430 = vtanh.f32 %v2792_v19  ;;  %v1446_v1 = vrot.slane %v2792_v19, 2 }
 0xcf7   :  { %v2429_v20 = vpop.eup %2428 }
 0xcf8   :  { %1211 = vrot.lane.b32.xlu0 %v2429_v20, %s2483_s4 }
 0xcfc   :  { %v2431_v21 = vpop.eup %2430 }
 0xcfd   :  { %1238 = vrot.lane.b32.xlu1 %v2431_v21, %s2483_s4  ;;  %v1477_v21 = vld [vmem:[#allocation2 + $0x10] sm:$0x30] }
 0xd6a   :  { %v1212_v22 = vpop.permute.xlu0 %1211 }
 0xd6b   :  { %v1214_v24 = vmul.f32 %v2425_v2, %v1212_v22 }
 0xd6d   :  { %1243 = vrot.lane.b32.xlu0 %v1214_v24, %s2484_s23 }
 0xd6f   :  { %v1239_v25 = vpop.permute.xlu1 %1238 }
 0xd70   :  { %v2798_v26 = vmul.f32 %v2427_v7, %v1239_v25 }
 0xd72   :  { %v1332_v27 = vrot.slane %v2798_v26, 6 }
 0xd74   :  { %1333 = vrot.lane.b32.xlu1 %v1332_v27, %s2484_s23  ;;  %v1478_v27 = vld [vmem:[#allocation2 + $0x8] sm:$0xc] }
 0xddf   :  { %v1244_v30 = vpop.permute.xlu0 %1243 }
 0xde0   :  { %1960 = vst.msk [vmem:[%s2955_s5 + $0x8] sm:$0x3] %vm351_vm2, %v1244_v30  ;;  %2178 = vmatmul.mubr.msk.f32.vlgmr.msra.gmra.mrb[12].mxu0 %vm150_vm3, %v1244_v30 }
 0xde1   :  { %2325 = vmatpush3.bf16.msra.mxu0 %v2572_v23  ;;  %2199 = vmatprep.mubr.msk.f32.mxu0 %vm2482_vm0, %v2481_v4 }
 0xde2   :  { %2326 = vmatprep.subr.bf16.mxu0 %v2480_v3 }
 0xde5   :  { %2328 = vmatpush3.bf16.msra.mxu0 %v2584_v28 }
 0xde6   :  { %v1334_v31 = vpop.permute.xlu1 %1333  ;;  %2335 = vmatprep.subr.bf16.mxu0 %v2480_v3 }
 0xde7   :  { %2189 = vmatmul.mubr.msk.f32.vlgmr.msra.gmra.mrb[12].mxu1 %vm150_vm3, %v1334_v31 }
 0xde8   :  { %2331 = vmatpush3.bf16.msra.mxu1 %v2597_v34  ;;  %2210 = vmatprep.mubr.msk.f32.mxu1 %vm2482_vm0, %v2481_v4 }
 0xde9   :  { %2332 = vmatprep.subr.bf16.mxu1 %v2480_v3 }
 0xdec   :  { %2334 = vmatpush3.bf16.msra.mxu1 %v2611_v38 }
 0xded   :  { %2341 = vmatprep.subr.bf16.mxu1 %v2480_v3 }
 0xeb3   :  { %v1324_v32 = vpop.f32.mrb[12].mxu0 }
 0xeb4   :  { %v1329_v33 = vrot.slane %v1324_v32, 6  ;;  %v2179_v35 = vpop.f32.mrb[13].mxu0 }
 0xeb6   :  { %v1331_v37 = vadd.f32 %v1329_v33, %v1254_v36 }
 0xeb8   :  { %2432 = vtanh.f32 %v1331_v37  ;;  %v1964_v47 = vmul.f32 -1.442695, %v1331_v37 }
 0xeba   :  { %v1403_v39 = vpop.f32.mrb[12].mxu1 }
 0xebb   :  { %v1408_v40 = vrot.slane %v1403_v39, 4  ;;  %v2190_v42 = vpop.f32.mrb[13].mxu1 }
 0xebd   :  { %v1410_v44 = vadd.f32 %v1408_v40, %v1255_v43 }
 0xebf   :  { %2434 = vtanh.f32 %v1410_v44  ;;  %v1965_v48 = vmul.f32 -1.442695, %v1410_v44 }
 0xec0   :  { %2436 = vpow2.f32 %v1964_v47 }
 0xec1   :  { %2438 = vpow2.f32 %v1965_v48 }
 0xec2   :  { %v2433_v45 = vpop.eup %2432 }
 0xec3   :  { %1423 = vrot.lane.b32.xlu0 %v2433_v45, %s2483_s4 }
 0xec9   :  { %v2435_v46 = vpop.eup %2434 }
 0xeca   :  { %1450 = vrot.lane.b32.xlu1 %v2435_v46, %s2483_s4  ;;  %v2437_v49 = vpop.eup %2436 }
 0xecb   :  { %v1414_v50 = vadd.f32 1.0, %v2437_v49  ;;  %v2439_v51 = vpop.eup %2438 }
 0xecc   :  { %v1441_v52 = vadd.f32 1.0, %v2439_v51 }
 0xecd   :  { %2440 = vrcp.f32 %v1414_v50 }
 0xece   :  { %2442 = vrcp.f32 %v1441_v52 }
 0xed7   :  { %v2441_v53 = vpop.eup %2440 }
 0xed8   :  { %v2443_v57 = vpop.eup %2442  ;;  %v1421_v62 = vmul.f32 %v2441_v53, %v1419_v61 }
 0xed9   :  { %v1448_v2 = vmul.f32 %v2443_v57, %v1446_v1 }
 0xf35   :  { %v1424_v54 = vpop.permute.xlu0 %1423 }
 0xf36   :  { %v1426_v56 = vmul.f32 %v2441_v53, %v1424_v54 }
 0xf38   :  { %1428 = vrot.lane.b32.xlu0 %v1426_v56, %s2484_s23 }
 0xf3c   :  { %v1451_v59 = vpop.permute.xlu1 %1450 }
 0xf3d   :  { %v1453_v60 = vmul.f32 %v2443_v57, %v1451_v59 }
 0xf3f   :  { %1455 = vrot.lane.b32.xlu1 %v1453_v60, %s2484_s23 }
 0xfaa   :  { %v1429_v63 = vpop.permute.xlu0 %1428 }
 0xfab   :  { %v2825_v0 = vadd.f32 %v1429_v63, %v1421_v62 }
 0xfad   :  { %2444 = vtanh.f32 %v2825_v0  ;;  %v1645_v44 = vrot.slane %v2825_v0, 6 }
 0xfb1   :  { %v1456_v5 = vpop.permute.xlu1 %1455 }
 0xfb2   :  { %v2829_v6 = vadd.f32 %v1456_v5, %v1448_v2  ;;  %v1703_v5 = vld [vmem:[#allocation2 + $0x10] sm:$0xc0] }
 0xfb4   :  { %2446 = vtanh.f32 %v2829_v6  ;;  %v1672_v48 = vrot.slane %v2829_v6, 2 }
 0xfb7   :  { %v2445_v7 = vpop.eup %2444 }
 0xfb8   :  { %1434 = vrot.lane.b32.xlu0 %v2445_v7, %s2483_s4  ;;  %v1704_v7 = vld [vmem:[#allocation2 + $0x8] sm:$0x3] }
 0xfbe   :  { %v2447_v9 = vpop.eup %2446 }
 0xfbf   :  { %1461 = vrot.lane.b32.xlu1 %v2447_v9, %s2483_s4 }
0x102a   :  { %v1435_v10 = vpop.permute.xlu0 %1434 }
0x102b   :  { %v2834_v12 = vmul.f32 %v2441_v53, %v1435_v10 }
0x102d   :  { %v1479_v13 = vrot.slane %v2834_v12, 2 }
0x102f   :  { %1480 = vrot.lane.b32.xlu0 %v1479_v13, %s2484_s23 }
0x1031   :  { %v1462_v14 = vpop.permute.xlu1 %1461 }
0x1032   :  { %v2838_v15 = vmul.f32 %v2443_v57, %v1462_v14 }
0x1034   :  { %v1558_v16 = vrot.slane %v2838_v15, 4 }
0x1036   :  { %1559 = vrot.lane.b32.xlu1 %v1558_v16, %s2484_s23 }
0x10a1   :  { %v1481_v17 = vpop.permute.xlu0 %1480 }
0x10a2   :  { %2200 = vmatmul.mubr.msk.f32.vlgmr.msra.gmra.mrb[14].mxu0 %vm150_vm3, %v1481_v17 }
0x10a3   :  { %2337 = vmatpush3.bf16.msra.mxu0 %v2572_v23  ;;  %2221 = vmatprep.mubr.msk.f32.mxu0 %vm2482_vm0, %v2481_v4 }
0x10a4   :  { %2338 = vmatprep.subr.bf16.mxu0 %v2480_v3 }
0x10a7   :  { %2340 = vmatpush3.bf16.msra.mxu0 %v2584_v28 }
0x10a8   :  { %v1560_v18 = vpop.permute.xlu1 %1559 }
0x10a9   :  { %2211 = vmatmul.mubr.msk.f32.vlgmr.msra.gmra.mrb[14].mxu1 %vm150_vm3, %v1560_v18 }
0x10aa   :  { %2343 = vmatpush3.bf16.msra.mxu1 %v2597_v34  ;;  %2232 = vmatprep.mubr.msk.f32.mxu1 %vm2482_vm0, %v2481_v4 }
0x10ab   :  { %2344 = vmatprep.subr.bf16.mxu1 %v2480_v3 }
0x10ae   :  { %2346 = vmatpush3.bf16.msra.mxu1 %v2611_v38 }
0x1175   :  { %v1550_v23 = vpop.f32.mrb[14].mxu0 }
0x1176   :  { %v1555_v19 = vrot.slane %v1550_v23, 4  ;;  %v2201_v20 = vpop.f32.mrb[15].mxu0 }
0x1178   :  { %v1557_v22 = vadd.f32 %v1555_v19, %v1477_v21 }
0x117a   :  { %2448 = vtanh.f32 %v1557_v22  ;;  %v1970_v3 = vmul.f32 -1.442695, %v1557_v22 }
0x117c   :  { %v1629_v24 = vpop.f32.mrb[14].mxu1 }
0x117d   :  { %v1634_v28 = vrot.slane %v1629_v24, 6  ;;  %v2212_v25 = vpop.f32.mrb[15].mxu1 }
0x117f   :  { %v1636_v30 = vadd.f32 %v1634_v28, %v1478_v27 }
0x1181   :  { %2450 = vtanh.f32 %v1636_v30  ;;  %v1971_v38 = vmul.f32 -1.442695, %v1636_v30 }
0x1182   :  { %2452 = vpow2.f32 %v1970_v3 }
0x1183   :  { %2454 = vpow2.f32 %v1971_v38 }
0x1184   :  { %v2449_v34 = vpop.eup %2448 }
0x1185   :  { %1649 = vrot.lane.b32.xlu0 %v2449_v34, %s2483_s4 }
0x118b   :  { %v2451_v4 = vpop.eup %2450 }
0x118c   :  { %1676 = vrot.lane.b32.xlu1 %v2451_v4, %s2483_s4  ;;  %v2453_v31 = vpop.eup %2452 }
0x118d   :  { %v1640_v32 = vadd.f32 1.0, %v2453_v31  ;;  %v2455_v33 = vpop.eup %2454 }
0x118e   :  { %v1667_v35 = vadd.f32 1.0, %v2455_v33 }
0x118f   :  { %2456 = vrcp.f32 %v1640_v32 }
0x1190   :  { %2458 = vrcp.f32 %v1667_v35 }
0x1199   :  { %v2457_v36 = vpop.eup %2456 }
0x119a   :  { %v2459_v40 = vpop.eup %2458  ;;  %v1647_v45 = vmul.f32 %v2457_v36, %v1645_v44 }
0x119b   :  { %v1674_v49 = vmul.f32 %v2459_v40, %v1672_v48 }
0x11f7   :  { %v1650_v37 = vpop.permute.xlu0 %1649 }
0x11f8   :  { %v1652_v39 = vmul.f32 %v2457_v36, %v1650_v37 }
0x11fa   :  { %1654 = vrot.lane.b32.xlu0 %v1652_v39, %s2484_s23 }
0x11fe   :  { %v1677_v42 = vpop.permute.xlu1 %1676 }
0x11ff   :  { %v1679_v43 = vmul.f32 %v2459_v40, %v1677_v42 }
0x1201   :  { %1681 = vrot.lane.b32.xlu1 %v1679_v43, %s2484_s23 }
0x126c   :  { %v1655_v46 = vpop.permute.xlu0 %1654 }
0x126d   :  { %v1657_v47 = vadd.f32 %v1655_v46, %v1647_v45 }
0x126f   :  { %2460 = vtanh.f32 %v1657_v47  ;;  %v1868_v34 = vrot.slane %v1657_v47, 6 }
0x1273   :  { %v1682_v50 = vpop.permute.xlu1 %1681 }
0x1274   :  { %v1684_v51 = vadd.f32 %v1682_v50, %v1674_v49 }
0x1276   :  { %2462 = vtanh.f32 %v1684_v51  ;;  %v1895_v31 = vrot.slane %v1684_v51, 2 }
0x1279   :  { %v2461_v52 = vpop.eup %2460 }
0x127a   :  { %1660 = vrot.lane.b32.xlu0 %v2461_v52, %s2483_s4 }
0x1280   :  { %v2463_v53 = vpop.eup %2462 }
0x1281   :  { %1687 = vrot.lane.b32.xlu1 %v2463_v53, %s2483_s4 }
0x12ec   :  { %v1661_v54 = vpop.permute.xlu0 %1660 }
0x12ed   :  { %v2862_v56 = vmul.f32 %v2457_v36, %v1661_v54 }
0x12ef   :  { %v1705_v57 = vrot.slane %v2862_v56, 4 }
0x12f1   :  { %1706 = vrot.lane.b32.xlu0 %v1705_v57, %s2484_s23 }
0x12f3   :  { %v1688_v59 = vpop.permute.xlu1 %1687 }
0x12f4   :  { %v1690_v60 = vmul.f32 %v2459_v40, %v1688_v59 }
0x12f6   :  { %v1784_v61 = vrot.slane %v1690_v60, 2 }
0x12f8   :  { %1785 = vrot.lane.b32.xlu1 %v1784_v61, %s2484_s23 }
0x1363   :  { %v1707_v62 = vpop.permute.xlu0 %1706 }
0x1364   :  { %2222 = vmatmul.mubr.msk.f32.vlgmr.msra.gmra.mrb[16].mxu0 %vm150_vm3, %v1707_v62 }
0x136a   :  { %v1786_v63 = vpop.permute.xlu1 %1785 }
0x136b   :  { %2233 = vmatmul.mubr.msk.f32.vlgmr.msra.gmra.mrb[16].mxu1 %vm150_vm3, %v1786_v63 }
0x1437   :  { %v1776_v0 = vpop.f32.mrb[16].mxu0 }
0x1438   :  { %v1781_v1 = vrot.slane %v1776_v0, 2  ;;  %v2223_v2 = vpop.f32.mrb[17].mxu0 }
0x143a   :  { %v1783_v6 = vadd.f32 %v1781_v1, %v1703_v5 }
0x143c   :  { %2464 = vtanh.f32 %v1783_v6  ;;  %v1976_v17 = vmul.f32 -1.442695, %v1783_v6 }
0x143e   :  { %v1855_v9 = vpop.f32.mrb[16].mxu1 }
0x143f   :  { %v1859_v10 = vadd.f32 %v1855_v9, %v1704_v7  ;;  %v2234_v13 = vpop.f32.mrb[17].mxu1 }
0x1441   :  { %2466 = vtanh.f32 %v1859_v10  ;;  %v1977_v18 = vmul.f32 -1.442695, %v1859_v10 }
0x1442   :  { %2468 = vpow2.f32 %v1976_v17 }
0x1443   :  { %2470 = vpow2.f32 %v1977_v18 }
0x1446   :  { %v2465_v14 = vpop.eup %2464 }
0x1447   :  { %1872 = vrot.lane.b32.xlu0 %v2465_v14, %s2483_s4 }
0x144b   :  { %v2467_v16 = vpop.eup %2466 }
0x144c   :  { %1899 = vrot.lane.b32.xlu1 %v2467_v16, %s2483_s4  ;;  %v2469_v23 = vpop.eup %2468 }
0x144d   :  { %v1863_v19 = vadd.f32 1.0, %v2469_v23  ;;  %v2471_v20 = vpop.eup %2470 }
0x144e   :  { %v1890_v21 = vadd.f32 1.0, %v2471_v20 }
0x144f   :  { %2472 = vrcp.f32 %v1863_v19 }
0x1450   :  { %2474 = vrcp.f32 %v1890_v21 }
0x1459   :  { %v2473_v22 = vpop.eup %2472 }
0x145a   :  { %v2475_v25 = vpop.eup %2474  ;;  %v1870_v4 = vmul.f32 %v2473_v22, %v1868_v34 }
0x145b   :  { %v1897_v32 = vmul.f32 %v2475_v25, %v1895_v31 }
0x14b9   :  { %v1873_v24 = vpop.permute.xlu0 %1872 }
0x14ba   :  { %v1875_v28 = vmul.f32 %v2473_v22, %v1873_v24 }
0x14bc   :  { %1877 = vrot.lane.b32.xlu0 %v1875_v28, %s2484_s23 }
0x14be   :  { %v1900_v27 = vpop.permute.xlu1 %1899 }
0x14bf   :  { %v1902_v30 = vmul.f32 %v2475_v25, %v1900_v27 }
0x14c1   :  { %1904 = vrot.lane.b32.xlu1 %v1902_v30, %s2484_s23 }
0x152e   :  { %v1878_v3 = vpop.permute.xlu0 %1877 }
0x152f   :  { %v1880_v38 = vadd.f32 %v1878_v3, %v1870_v4 }
0x1531   :  { %2476 = vtanh.f32 %v1880_v38 }
0x1533   :  { %v1905_v33 = vpop.permute.xlu1 %1904 }
0x1534   :  { %v1907_v35 = vadd.f32 %v1905_v33, %v1897_v32 }
0x1536   :  { %2478 = vtanh.f32 %v1907_v35 }
0x153b   :  { %v2477_v36 = vpop.eup %2476 }
0x153c   :  { %1883 = vrot.lane.b32.xlu0 %v2477_v36, %s2483_s4 }
0x1540   :  { %v2479_v37 = vpop.eup %2478  ;;  %354 = vrot.lane.b32.xlu0 %v2652_v29, %s2484_s23 }
0x1541   :  { %1910 = vrot.lane.b32.xlu1 %v2479_v37, %s2483_s4 }
0x1544   :  { %579 = vrot.lane.b32.xlu0 %v2692_v11, %s2484_s23 }
0x1545   :  { %572 = vrot.lane.b32.xlu1 %v2688_v8, %s2484_s23 }
0x1548   :  { %806 = vrot.lane.b32.xlu0 %v2728_v58, %s2484_s23 }
0x1549   :  { %800 = vrot.lane.b32.xlu1 %v2724_v55, %s2484_s23 }
0x154c   :  { %1249 = vrot.lane.b32.xlu0 %v2798_v26, %s2484_s23 }
0x154d   :  { %1023 = vrot.lane.b32.xlu1 %v2760_v41, %s2484_s23 }
0x1550   :  { %1472 = vrot.lane.b32.xlu0 %v2838_v15, %s2484_s23 }
0x1551   :  { %1466 = vrot.lane.b32.xlu1 %v2834_v12, %s2484_s23 }
0x1554   :  { %1698 = vrot.lane.b32.xlu0 %v1690_v60, %s2484_s23 }
0x1555   :  { %1692 = vrot.lane.b32.xlu1 %v2862_v56, %s2484_s23 }
0x15ae   :  { %v1884_v29 = vpop.permute.xlu0 %1883 }
0x15af   :  { %v1886_v8 = vmul.f32 %v2473_v22, %v1884_v29 }
0x15b1   :  { %1915 = vrot.lane.b32.xlu1 %v1886_v8, %s2484_s23 }
0x15b2   :  { %v355_v11 = vpop.permute.xlu0 %354 }
0x15b3   :  { %1937 = vst.msk [vmem:[%s2956_s6 + $0x8] sm:$0xc0] %vm358_vm4, %v355_v11  ;;  %v1911_v55 = vpop.permute.xlu1 %1910 }
0x15b4   :  { %v1913_v58 = vmul.f32 %v2475_v25, %v1911_v55 }
0x15b6   :  { %1921 = vrot.lane.b32.xlu0 %v1913_v58, %s2484_s23  ;;  %v580_v41 = vpop.permute.xlu0 %579 }
0x15b7   :  { %1943 = vst.msk [vmem:[%s2956_s6 + $0x8] sm:$0x30] %vm583_vm5, %v580_v41  ;;  %v573_v26 = vpop.permute.xlu1 %572 }
0x15b8   :  { %1942 = vst.msk [vmem:[%s2955_s5] sm:$0xc] %vm576_vm6, %v573_v26 }
0x15ba   :  { %v807_v12 = vpop.permute.xlu0 %806 }
0x15bb   :  { %1949 = vst.msk [vmem:[%s2956_s6 + $0x8] sm:$0xc] %vm576_vm6, %v807_v12  ;;  %v801_v15 = vpop.permute.xlu1 %800 }
0x15bc   :  { %1948 = vst.msk [vmem:[%s2955_s5] sm:$0x30] %vm583_vm5, %v801_v15 }
0x15be   :  { %v1250_v39 = vpop.permute.xlu0 %1249 }
0x15bf   :  { %1961 = vst.msk [vmem:[%s2956_s6] sm:$0xc0] %vm358_vm4, %v1250_v39  ;;  %v1024_v40 = vpop.permute.xlu1 %1023 }
0x15c0   :  { %1954 = vst.msk [vmem:[%s2955_s5] sm:$0xc0] %vm358_vm4, %v1024_v40 }
0x15c2   :  { %v1473_v42 = vpop.permute.xlu0 %1472 }
0x15c3   :  { %1967 = vst.msk [vmem:[%s2956_s6] sm:$0x30] %vm583_vm5, %v1473_v42  ;;  %v1467_v43 = vpop.permute.xlu1 %1466 }
0x15c4   :  { %1966 = vst.msk [vmem:[%s2955_s5 + $0x8] sm:$0xc] %vm576_vm6, %v1467_v43 }
0x15c6   :  { %v1699_v44 = vpop.permute.xlu0 %1698 }
0x15c7   :  { %1973 = vst.msk [vmem:[%s2956_s6] sm:$0xc] %vm576_vm6, %v1699_v44  ;;  %v1693_v45 = vpop.permute.xlu1 %1692 }
0x15c8   :  { %1972 = vst.msk [vmem:[%s2955_s5 + $0x8] sm:$0x30] %vm583_vm5, %v1693_v45 }
0x1623   :  { %v1916_v46 = vpop.permute.xlu1 %1915 }
0x1624   :  { %1978 = vst.msk [vmem:[%s2955_s5 + $0x8] sm:$0xc0] %vm358_vm4, %v1916_v46 }
0x1628   :  { %v1922_v47 = vpop.permute.xlu0 %1921 }
0x1629   :  { %1924 = vst.msk [vmem:[%s2956_s6] sm:$0x3] %vm351_vm2, %v1922_v47 }

// kernel: rewriter_forward.7
= control target key start
LH: loop header
LB: loop body
LE: loop exit
PB: predicated region body
PF: predicated region fallthrough
CT: control target
= control target key end

     0   :  { %s11672_s0 = inlined_call_operand.vmem [shape: f32[2,32,32], index: 0, kind: input, shape index: {}]   ;;  %s11673_s1 = inlined_call_operand.vmem [shape: f32[2,32,32], index: 1, kind: input, shape index: {}]   ;;  %s11674_s2 = inlined_call_operand.vmem [shape: f32[2,32], index: 2, kind: input, shape index: {}]   ;;  %s11675_s3 = inlined_call_operand.vmem [shape: f32[16,64], index: 3, kind: input, shape index: {}]   ;;  %s11676_s4 = inlined_call_operand.vmem [shape: f32[64,16], index: 4, kind: input, shape index: {}]   ;;  %s11677_s5 = inlined_call_operand.vmem [shape: f32[1,16], index: 5, kind: input, shape index: {}]   ;;  %s11678_s6 = inlined_call_operand.vmem [shape: f32[32,32], index: 6, kind: input, shape index: {}]   ;;  %s11679_s7 = inlined_call_operand.vmem [shape: f32[96,256], index: 7, kind: input, shape index: {}]   ;;  %s11680_s8 = inlined_call_operand.vmem [shape: f32[64,256], index: 8, kind: input, shape index: {}]   ;;  %s11681_s9 = inlined_call_operand.vmem [shape: f32[1,256], index: 9, kind: input, shape index: {}]   ;;  %s11682_s10 = inlined_call_operand.vmem [shape: f32[64,128], index: 10, kind: input, shape index: {}]   ;;  %s11683_s11 = inlined_call_operand.vmem [shape: f32[32,128], index: 11, kind: input, shape index: {}]   ;;  %s11684_s12 = inlined_call_operand.vmem [shape: f32[1,128], index: 12, kind: input, shape index: {}]   ;;  %s11685_s13 = inlined_call_operand.vmem [shape: f32[1,32], index: 13, kind: input, shape index: {}]   ;;  %s11686_s14 = inlined_call_operand.vmem [shape: f32[1,64], index: 14, kind: input, shape index: {}, may-alias: {14,15}]   ;;  %s11687_s15 = inlined_call_operand.vmem [shape: f32[1,64], index: 15, kind: input, shape index: {}, may-alias: {14,15}]   ;;  %s11688_s16 = inlined_call_operand.vmem [shape: f32[1,32], index: 16, kind: input, shape index: {}, may-alias: {16,17}]   ;;  %s11689_s17 = inlined_call_operand.vmem [shape: f32[1,32], index: 17, kind: input, shape index: {}, may-alias: {16,17}]   ;;  %s11690_s18 = inlined_call_operand.hbm [shape: f32[6,2,16], index: 18, kind: output, shape index: {0}]   ;;  %s11691_s19 = inlined_call_operand.vmem [shape: f32[7,2,8], index: 19, kind: output, shape index: {1}]  }
   0x1   :  { %11777 = sst [smem:[#allocation59_spill]] %s11672_s0 }
   0x2   :  { %11778 = sst [smem:[#allocation60_spill]] %s11673_s1 }
   0x3   :  { %11779 = sst [smem:[#allocation61_spill]] %s11674_s2 }
   0x4   :  { %11780 = sst [smem:[#allocation62_spill]] %s11675_s3 }
   0x5   :  { %v90_v0 = vld [vmem:[%s11678_s6] sm:$0xff]  ;;  %v91_v1 = vld [vmem:[%s11678_s6 + $0x8] sm:$0xff]  ;;  %v92_v2 = vld [vmem:[%s11678_s6 + $0x10] sm:$0xff]  ;;  %v11697_v3 = vmov 0.0|0.0   ;;  %vm9666_vm0 = vmmov 0   ;;  %v11699_v6 = vmov 0.0  }
   0x6   :  { %8622 = vmatprep.subr.bf16.mxu0 %v11697_v3  ;;  %v9786_v4 = vpack.c.bf16 %v91_v1, %v90_v0  ;;  %v93_v5 = vld [vmem:[%s11678_s6 + $0x18] sm:$0xff]  ;;  %7916 = vmatprep.mubr.msk.f32.mxu0 %vm9666_vm0, %v11699_v6 }
   0x7   :  { %8640 = vmatprep.subr.bf16.mxu1 %v11697_v3  ;;  %7949 = vmatprep.mubr.msk.f32.mxu1 %vm9666_vm0, %v11699_v6 }
   0x8   :  { %11781 = vst [vmem:[#allocation5_spill] sm:$0xff] %v9786_v4 }
   0x9   :  { %25 = vsyncpa [#allocation3], 0  ;;  %8624 = vmatpush3.bf16.msra.mxu0 %v9786_v4  ;;  %v9797_v7 = vpack.c.bf16 %v93_v5, %v92_v2  ;;  %s11783_s6 = sld [smem:[#allocation59_spill]]  ;;  %v7474_v10 = vld [vmem:[%s11685_s13] ss:$0 sm:$0xff]  ;;  %vm154_vm1 = vcmask 261120   ;;  %v11696_v17 = vlaneseq }
   0xa   :  { %8625 = vmatprep.subr.bf16.mxu0 %v11697_v3  ;;  %v9668_v15 = vmov 1966171168   ;;  %s11786_s26 = sld [smem:[#allocation61_spill]]  ;;  %vm405_vm2 = vcmask 1041409   ;;  %vm502_vm3 = vcmask 255168   ;;  %vm438_vm4 = vcmask 123968  }
   0xb   :  { %11782 = vst [vmem:[#allocation6_spill] sm:$0xff] %v9797_v7  ;;  %v229_v16 = vunpack.c.l.s4 %v9668_v15  ;;  %v9829_v19 = vshrl.u32 %v11696_v17, 7  ;;  %vm470_vm5 = vcmask 189568   ;;  %vm408_vm6 = vcmask 58368   ;;  %s9669_s27 = smov 120   ;;  %s9670_s28 = smov 112  }
   0xc   :  { %s9671_s29 = smov 104   ;;  %s11788_s13 = sld [smem:[#allocation60_spill]]  ;;  %vm554_vm7 = vcmask 64512   ;;  %vm556_vm8 = vcmask 130048   ;;  %vm558_vm9 = vcmask 195584   ;;  %vm798_vm10 = vcmask 523264  }
   0xd   :  { %8627 = vmatpush3.bf16.msra.mxu0 %v9797_v7  ;;  %v230_v18 = vunpack.c.0.s8 %v229_v16  ;;  %s9672_s21 = smov 64   ;;  %s11801_s1 = sld [smem:[#allocation62_spill]]  ;;  %vm873_vm11 = vcmask 785408   ;;  %vm1845_vm12 = vcmask 123904  }
   0xe   :  { %8628 = vmatprep.subr.bf16.mxu0 %v11697_v3  ;;  %s9673_s20 = smov 32  }
   0xf   :  { %v62_v8 = vld [vmem:[%s11783_s6] sm:$0xff]  ;;  %v63_v9 = vld [vmem:[%s11783_s6 + $0x8] sm:$0xff]  ;;  %v64_v12 = vld [vmem:[%s11783_s6 + $0x10] sm:$0xff]  ;;  %v9832_v20 = vsub.s32 %v230_v18, %v9829_v19 }
  0x10   :  { %v9810_v11 = vpack.c.bf16 %v63_v9, %v62_v8  ;;  %7917 = vmatmul.mubr.msk.f32.vlgmr.msra.gmra.mrb[0].mxu0 %vm154_vm1, %v7474_v10  ;;  %v65_v13 = vld [vmem:[%s11783_s6 + $0x18] sm:$0xff]  ;;  %v66_v21 = vld [vmem:[%s11783_s6 + $0x20] sm:$0xff]  ;;  %v67_v22 = vld [vmem:[%s11783_s6 + $0x28] sm:$0xff] }
  0x11   :  { %7927 = vmatprep.mubr.msk.f32.mxu0 %vm9666_vm0, %v11699_v6  ;;  %v9824_v14 = vpack.c.bf16 %v65_v13, %v64_v12  ;;  %v9841_v26 = vpack.c.bf16 %v67_v22, %v66_v21  ;;  %v68_v28 = vld [vmem:[%s11783_s6 + $0x30] sm:$0xff]  ;;  %v69_v29 = vld [vmem:[%s11783_s6 + $0x38] sm:$0xff]  ;;  %v9866_v35 = vld [vmem:[%s11786_s26] sm:$0x3] }
  0x12   :  { %8630 = vmatpush3.bf16.msra.mxu0 %v9810_v11  ;;  %v9852_v30 = vpack.c.bf16 %v69_v29, %v68_v28  ;;  %v9869_v36 = vrot.slane %v9866_v35, 1 }
  0x13   :  { %8631 = vmatprep.subr.bf16.mxu0 %v11697_v3  ;;  %11784 = vst [vmem:[#allocation7_spill] sm:$0xff] %v9841_v26 }
  0x14   :  { %11785 = vst [vmem:[#allocation8_spill] sm:$0xff] %v9852_v30  ;;  %11787 = vst [vmem:[#allocation9_spill] sm:$0xff] %v9869_v36 }
  0x16   :  { %8633 = vmatpush3.bf16.msra.mxu0 %v9824_v14 }
  0x17   :  { %8634 = vmatprep.subr.bf16.mxu0 %v11697_v3 }
  0xe3   :  { %v223_v23 = vpop.f32.mrb[0].mxu0 }
  0xe4   :  { %v234_v24 = vrot.slane %v223_v23, %v9832_v20  ;;  %v7918_v25 = vpop.f32.mrb[1].mxu0 }
  0xe6   :  { %v242_v27 = vrot.slane %v234_v24, %v9832_v20  ;;  %v235_v31 = vcombine.high %v234_v24, %v234_v24 }
  0xe8   :  { %7928 = vmatmul.mubr.msk.f32.vlgmr.msra.gmra.mrb[2].mxu0 %vm154_vm1, %v242_v27  ;;  %v249_v32 = vrot.slane %v235_v31, %v9832_v20 }
  0xe9   :  { %8636 = vmatpush3.bf16.msra.mxu0 %v9841_v26  ;;  %7938 = vmatprep.mubr.msk.f32.mxu0 %vm9666_vm0, %v11699_v6 }
  0xea   :  { %8637 = vmatprep.subr.bf16.mxu0 %v11697_v3 }
  0xed   :  { %8639 = vmatpush3.bf16.msra.mxu0 %v9852_v30 }
  0xee   :  { %8646 = vmatprep.subr.bf16.mxu0 %v11697_v3 }
  0xf0   :  { %7939 = vmatmul.mubr.msk.f32.vlgmr.msra.gmra.mrb[4].mxu0 %vm154_vm1, %v249_v32 }
  0xf1   :  { %7960 = vmatprep.mubr.msk.f32.mxu0 %vm9666_vm0, %v11699_v6 }
 0x1bb   :  { %v318_v33 = vpop.f32.mrb[2].mxu0 }
 0x1bc   :  { %v7929_v34 = vpop.f32.mrb[3].mxu0  ;;  %v394_v38 = vmul.f32 0.35355338, %v318_v33 }
 0x1be   :  { %v9873_v42 = vadd.f32 %v394_v38, %v9866_v35 }
 0x1c3   :  { %v390_v37 = vpop.f32.mrb[4].mxu0 }
 0x1c4   :  { %v395_v39 = vmul.f32 0.35355338, %v390_v37  ;;  %v7940_v40 = vpop.f32.mrb[5].mxu0 }
 0x1c6   :  { %v401_v41 = vadd.f32 %v9869_v36, %v395_v39 }
 0x1c8   :  { %v404_v43 = vrot.slane %v401_v41, 7 }
 0x1ca   :  { %v406_v44 = vsel %vm405_vm2, %v404_v43, %v9873_v42 }
 0x1cb   :  { %v503_v45 = vsel %vm502_vm3, %v406_v44, -inf  ;;  %v439_v46 = vsel %vm438_vm4, %v406_v44, -inf  ;;  %v471_v47 = vsel %vm470_vm5, %v406_v44, -inf  ;;  %v409_v48 = vsel %vm408_vm6, %v406_v44, -inf }
 0x1cc   :  { %504 = vmax.xlane.f32.xlu1 %v503_v45  ;;  %440 = vmax.xlane.f32.xlu0 %v439_v46  ;;  %v70_v45 = vld [vmem:[%s11788_s13] sm:$0xff]  ;;  %v71_v46 = vld [vmem:[%s11788_s13 + $0x8] sm:$0xff] }
 0x1d0   :  { %472 = vmax.xlane.f32.xlu0 %v471_v47  ;;  %410 = vmax.xlane.f32.xlu1 %v409_v48  ;;  %v74_v47 = vld [vmem:[%s11788_s13 + $0x20] sm:$0xff]  ;;  %v9926_v48 = vpack.c.bf16 %v71_v46, %v70_v45  ;;  %v119_v45 = vld [vmem:[%s11680_s8 + $0x8] sm:$0xff]  ;;  %v121_v46 = vld [vmem:[%s11680_s8 + $0x18] sm:$0xff] }
 0x1d2   :  { %11789 = vst [vmem:[#allocation10_spill] sm:$0xff] %v9926_v48  ;;  %8642 = vmatpush3.bf16.msra.mxu1 %v9926_v48 }
 0x1d3   :  { %8643 = vmatprep.subr.bf16.mxu1 %v11697_v3 }
 0x259   :  { %v505_v49 = vpop.xlane.xlu1 %504  ;;  %v441_v50 = vpop.xlane.xlu0 %440 }
 0x25a   :  { %v507_v51 = vrot.slane %v505_v49, 1  ;;  %v443_v52 = vrot.slane %v441_v50, 1  ;;  %v446_v53 = vsub.f32 %v9873_v42, %v441_v50  ;;  %v510_v63 = vsub.f32 %v9873_v42, %v505_v49  ;;  %v75_v49 = vld [vmem:[%s11788_s13 + $0x28] sm:$0xff]  ;;  %v72_v50 = vld [vmem:[%s11788_s13 + $0x10] sm:$0xff] }
 0x25c   :  { %v511_v54 = vsub.f32 %v401_v41, %v507_v51  ;;  %v447_v55 = vsub.f32 %v401_v41, %v443_v52  ;;  %v448_v57 = vmul.f32 1.442695, %v446_v53  ;;  %v512_v2 = vmul.f32 1.442695, %v510_v63  ;;  %v73_v51 = vld [vmem:[%s11788_s13 + $0x18] sm:$0xff]  ;;  %v76_v53 = vld [vmem:[%s11788_s13 + $0x30] sm:$0xff] }
 0x25d   :  { %v473_v56 = vpop.xlane.xlu0 %472  ;;  %v411_v24 = vpop.xlane.xlu1 %410  ;;  %v9937_v52 = vpack.c.bf16 %v75_v49, %v74_v47  ;;  %v118_v47 = vld [vmem:[%s11680_s8] sm:$0xff]  ;;  %v10011_v49 = vpack.c.bf16 %v121_v46, %v119_v45 }
 0x25e   :  { %v450_v58 = vmul.f32 1.442695, %v447_v55  ;;  %v475_v59 = vrot.slane %v473_v56, 1  ;;  %v514_v60 = vmul.f32 1.442695, %v511_v54  ;;  %v478_v61 = vsub.f32 %v9873_v42, %v473_v56  ;;  %v77_v54 = vld [vmem:[%s11788_s13 + $0x38] sm:$0xff] }
 0x25f   :  { %v413_v25 = vrot.slane %v411_v24, 1  ;;  %v416_v29 = vsub.f32 %v9873_v42, %v411_v24  ;;  %11790 = vst [vmem:[#allocation11_spill] sm:$0xff] %v9937_v52  ;;  %v9946_v55 = vpack.c.bf16 %v73_v51, %v72_v50  ;;  %8648 = vmatpush3.bf16.msra.mxu0 %v9937_v52  ;;  %v9950_v56 = vpack.c.bf16 %v77_v54, %v76_v53  ;;  %v120_v50 = vld [vmem:[%s11680_s8 + $0x10] sm:$0xff]  ;;  %v123_v51 = vld [vmem:[%s11680_s8 + $0x28] sm:$0xff]  ;;  %v125_v53 = vld [vmem:[%s11680_s8 + $0x38] sm:$0xff] }
 0x260   :  { %v479_v62 = vsub.f32 %v401_v41, %v475_v59  ;;  %9290 = vpow2.f32 %v450_v58  ;;  %v480_v0 = vmul.f32 1.442695, %v478_v61  ;;  %8649 = vmatprep.subr.bf16.mxu0 %v11697_v3  ;;  %v10022_v54 = vpack.c.bf16 %v120_v50, %v118_v47  ;;  %v102_v46 = vld [vmem:[%s11679_s7 + $0x40] sm:$0xff]  ;;  %v104_v47 = vld [vmem:[%s11679_s7 + $0x50] sm:$0xff]  ;;  %v107_v50 = vld [vmem:[%s11679_s7 + $0x68] sm:$0xff] }
 0x261   :  { %9292 = vpow2.f32 %v448_v57  ;;  %v417_v27 = vsub.f32 %v401_v41, %v413_v25  ;;  %v418_v31 = vmul.f32 1.442695, %v416_v29  ;;  %11791 = vst [vmem:[#allocation12_spill] sm:$0xff] %v9946_v55  ;;  %11792 = vst [vmem:[#allocation13_spill] sm:$0xff] %v9950_v56  ;;  %8645 = vmatpush3.bf16.msra.mxu1 %v9946_v55 }
 0x262   :  { %v482_v1 = vmul.f32 1.442695, %v479_v62  ;;  %9294 = vpow2.f32 %v514_v60  ;;  %8653 = vmatprep.subr.bf16.mxu1 %v10011_v49 }
 0x263   :  { %v420_v28 = vmul.f32 1.442695, %v417_v27  ;;  %8651 = vmatpush3.bf16.msra.mxu0 %v9950_v56 }
 0x264   :  { %9296 = vpow2.f32 %v482_v1  ;;  %8692 = vmatprep.subr.bf16.mxu0 %v11697_v3 }
 0x265   :  { %9298 = vpow2.f32 %v480_v0 }
 0x266   :  { %9300 = vpow2.f32 %v512_v2 }
 0x267   :  { %9302 = vpow2.f32 %v420_v28 }
 0x268   :  { %9304 = vpow2.f32 %v418_v31 }
 0x26a   :  { %v9884_v5 = vpop.eup %9290 }
 0x26b   :  { %v9886_v8 = vpop.eup %9292  ;;  %v454_v9 = vrot.slane %v9884_v5, 7 }
 0x26c   :  { %v9889_v10 = vpop.eup %9294 }
 0x26d   :  { %v455_v13 = vsel %vm405_vm2, %v454_v9, %v9886_v8  ;;  %v518_v21 = vrot.slane %v9889_v10, 7 }
 0x26e   :  { %v9891_v12 = vpop.eup %9296  ;;  %456 = vrot.lane.b32.xlu0 %v455_v13, %s9669_s27 }
 0x26f   :  { %v486_v15 = vrot.slane %v9891_v12, 7  ;;  %v9897_v16 = vpop.eup %9298 }
 0x270   :  { %v9903_v22 = vpop.eup %9300 }
 0x271   :  { %v487_v18 = vsel %vm405_vm2, %v486_v15, %v9897_v16  ;;  %v519_v23 = vsel %vm405_vm2, %v518_v21, %v9903_v22  ;;  %v9303_v32 = vpop.eup %9302 }
 0x272   :  { %488 = vrot.lane.b32.xlu1 %v487_v18, %s9670_s28  ;;  %v424_v33 = vrot.slane %v9303_v32, 7  ;;  %v9909_v34 = vpop.eup %9304 }
 0x274   :  { %v425_v37 = vsel %vm405_vm2, %v424_v33, %v9909_v34 }
 0x275   :  { %v427_v38 = vsel %vm408_vm6, %v425_v37, 0.0 }
 0x276   :  { %520 = vrot.lane.b32.xlu1 %v519_v23, %s9671_s29 }
 0x29a   :  { %428 = vadd.xlane.f32.xlu1 %v427_v38 }
 0x2e0   :  { %v457_v39 = vpop.permute.xlu0 %456 }
 0x2e1   :  { %v459_v40 = vsel %vm408_vm6, %v457_v39, 0.0 }
 0x2e2   :  { %460 = vadd.xlane.f32.xlu0 %v459_v40 }
 0x2e4   :  { %v489_v41 = vpop.permute.xlu1 %488 }
 0x2e5   :  { %v491_v42 = vsel %vm408_vm6, %v489_v41, 0.0 }
 0x2e6   :  { %492 = vadd.xlane.f32.xlu0 %v491_v42 }
 0x2e8   :  { %v521_v43 = vpop.permute.xlu1 %520 }
 0x2e9   :  { %v523_v44 = vsel %vm408_vm6, %v521_v43, 0.0 }
 0x2ea   :  { %524 = vadd.xlane.f32.xlu0 %v523_v44 }
 0x327   :  { %v429_v57 = vpop.xlane.xlu1 %428 }
 0x328   :  { %v431_v58 = vrot.slane %v429_v57, 1 }
 0x32a   :  { %9306 = vrcp.f32 %v431_v58  ;;  %v122_v58 = vld [vmem:[%s11680_s8 + $0x20] sm:$0xff] }
 0x334   :  { %v9307_v1 = vpop.eup %9306 }
 0x335   :  { %v9959_v15 = vmul.f32 %v9307_v1, %v9303_v32  ;;  %v128_v1 = vld [vmem:[%s11680_s8 + $0x50] sm:$0xff] }
 0x337   :  { %11794 = vst [vmem:[#allocation15_spill] sm:$0xff] %v9959_v15  ;;  %v536_v28 = vrot.slane %v9959_v15, 7 }
 0x36f   :  { %v461_v59 = vpop.xlane.xlu0 %460 }
 0x370   :  { %v463_v60 = vrot.slane %v461_v59, 1 }
 0x372   :  { %9308 = vrcp.f32 %v463_v60  ;;  %v127_v60 = vld [vmem:[%s11680_s8 + $0x48] sm:$0xff] }
 0x373   :  { %v493_v61 = vpop.xlane.xlu0 %492  ;;  %9310 = vrcp.f32 %v461_v59  ;;  %v124_v59 = vld [vmem:[%s11680_s8 + $0x30] sm:$0xff] }
 0x374   :  { %v495_v62 = vrot.slane %v493_v61, 1 }
 0x376   :  { %9312 = vrcp.f32 %v495_v62  ;;  %v10040_v62 = vpack.c.bf16 %v124_v59, %v122_v58  ;;  %v106_v59 = vld [vmem:[%s11679_s7 + $0x60] sm:$0xff] }
 0x377   :  { %9314 = vrcp.f32 %v493_v61  ;;  %v525_v63 = vpop.xlane.xlu0 %524  ;;  %v129_v61 = vld [vmem:[%s11680_s8 + $0x58] sm:$0xff] }
 0x378   :  { %9316 = vrcp.f32 %v429_v57  ;;  %v527_v0 = vrot.slane %v525_v63, 1  ;;  %v10024_v57 = vpack.c.bf16 %v125_v53, %v123_v51  ;;  %v109_v51 = vld [vmem:[%s11679_s7 + $0x78] sm:$0xff]  ;;  %v10135_v53 = vpack.c.bf16 %v104_v47, %v102_v46 }
 0x379   :  { %9318 = vrcp.f32 %v525_v63  ;;  %v10043_v63 = vpack.c.bf16 %v129_v61, %v127_v60  ;;  %v10138_v58 = vpack.c.bf16 %v109_v51, %v107_v50  ;;  %v108_v60 = vld [vmem:[%s11679_s7 + $0x70] sm:$0xff]  ;;  %v111_v61 = vld [vmem:[%s11679_s7 + $0x88] sm:$0xff]  ;;  %v787_v50 = vsub.s32 0, %v9829_v19  ;;  %v10198_v51 = vld [vmem:[%s11801_s1] sm:$0xff] }
 0x37a   :  { %9320 = vrcp.f32 %v527_v0  ;;  %v126_v0 = vld [vmem:[%s11680_s8 + $0x40] sm:$0xff] }
 0x37c   :  { %v9309_v2 = vpop.eup %9308 }
 0x37d   :  { %v9957_v9 = vmul.f32 %v9309_v2, %v9884_v5  ;;  %v9311_v13 = vpop.eup %9310  ;;  %v131_v2 = vld [vmem:[%s11680_s8 + $0x68] sm:$0xff] }
 0x37e   :  { %v9967_v29 = vmul.f32 %v9311_v13, %v9886_v8  ;;  %v133_v13 = vld [vmem:[%s11680_s8 + $0x78] sm:$0xff] }
 0x37f   :  { %11793 = vst [vmem:[#allocation14_spill] sm:$0xff] %v9957_v9  ;;  %v541_v23 = vrot.slane %v9957_v9, 7 }
 0x380   :  { %v9313_v18 = vpop.eup %9312  ;;  %11796 = vst [vmem:[#allocation17_spill] sm:$0xff] %v9967_v29 }
 0x381   :  { %v9315_v21 = vpop.eup %9314  ;;  %v9963_v24 = vmul.f32 %v9313_v18, %v9891_v12  ;;  %v542_v12 = vsel %vm405_vm2, %v541_v23, %v9967_v29  ;;  %v10058_v18 = vpack.c.bf16 %v128_v1, %v126_v0  ;;  %v130_v23 = vld [vmem:[%s11680_s8 + $0x60] sm:$0xff]  ;;  %v113_v0 = vld [vmem:[%s11679_s7 + $0x98] sm:$0xff]  ;;  %v10153_v1 = vpack.c.bf16 %v108_v60, %v106_v59 }
 0x382   :  { %v9317_v25 = vpop.eup %9316  ;;  %v9971_v32 = vmul.f32 %v9315_v21, %v9897_v16  ;;  %v10061_v21 = vpack.c.bf16 %v133_v13, %v131_v2  ;;  %v10156_v2 = vpack.c.bf16 %v113_v0, %v111_v61  ;;  %v110_v13 = vld [vmem:[%s11679_s7 + $0x80] sm:$0xff]  ;;  %v788_v59 = vrot.slane %v10198_v51, %v787_v50 }
 0x383   :  { %11795 = vst [vmem:[#allocation16_spill] sm:$0xff] %v9963_v24  ;;  %v9319_v27 = vpop.eup %9318  ;;  %v546_v5 = vrot.slane %v9963_v24, 7  ;;  %v9974_v33 = vmul.f32 %v9317_v25, %v9909_v34  ;;  %v132_v25 = vld [vmem:[%s11680_s8 + $0x70] sm:$0xff]  ;;  %v134_v0 = vld [vmem:[%s11681_s9] sm:$0x3] }
 0x384   :  { %v9321_v31 = vpop.eup %9320  ;;  %11797 = vst [vmem:[#allocation18_spill] sm:$0xff] %v9971_v32  ;;  %v9984_v38 = vmul.f32 %v9319_v27, %v9903_v22  ;;  %v95_v27 = vld [vmem:[%s11679_s7 + $0x8] sm:$0xff] }
 0x385   :  { %11798 = vst [vmem:[#allocation19_spill] sm:$0xff] %v9974_v33  ;;  %v9977_v37 = vmul.f32 %v9321_v31, %v9889_v10  ;;  %v547_v8 = vsel %vm405_vm2, %v546_v5, %v9971_v32  ;;  %v537_v34 = vsel %vm405_vm2, %v536_v28, %v9974_v33  ;;  %v97_v28 = vld [vmem:[%s11679_s7 + $0x18] sm:$0xff]  ;;  %v10076_v5 = vpack.c.bf16 %v132_v25, %v130_v23  ;;  %v112_v23 = vld [vmem:[%s11679_s7 + $0x90] sm:$0xff]  ;;  %v115_v25 = vld [vmem:[%s11679_s7 + $0xa8] sm:$0xff] }
 0x386   :  { %11800 = vst [vmem:[#allocation21_spill] sm:$0xff] %v9984_v38  ;;  %v555_v10 = vsel %vm554_vm7, %v537_v34, %v542_v12  ;;  %v10079_v31 = vpack.c.bf16 %v97_v28, %v95_v27  ;;  %v94_v12 = vld [vmem:[%s11679_s7] sm:$0xff]  ;;  %v101_v34 = vld [vmem:[%s11679_s7 + $0x38] sm:$0xff]  ;;  %v10171_v28 = vpack.c.bf16 %v112_v23, %v110_v13  ;;  %v10212_v13 = vrot.slane %v134_v0, %v787_v50 }
 0x387   :  { %11799 = vst [vmem:[#allocation20_spill] sm:$0xff] %v9977_v37  ;;  %v551_v16 = vrot.slane %v9977_v37, 7  ;;  %v557_v40 = vsel %vm556_vm8, %v555_v10, %v547_v8  ;;  %v96_v8 = vld [vmem:[%s11679_s7 + $0x10] sm:$0xff]  ;;  %v7480_v10 = vld [vmem:[%s11686_s14] ss:$0 sm:$0xff]  ;;  %v117_v27 = vld [vmem:[%s11679_s7 + $0xb8] sm:$0xff] }
 0x388   :  { %11802 = vst [vmem:[#allocation22_spill] sm:$0xff] %v10212_v13  ;;  %v143_v50 = vld [vmem:[%s11683_s11] sm:$0xff]  ;;  %s9674_s14 = smov [#allocation2]  }
 0x389   :  { %v552_v39 = vsel %vm405_vm2, %v551_v16, %v9984_v38  ;;  %v99_v16 = vld [vmem:[%s11679_s7 + $0x28] sm:$0xff]  ;;  %s7459_s8 = sshll.u32 %s9674_s14, 4  ;;  %s7460_s8 = int_to_ptr.vmem [resolvable:$true] %s7459_s8 }
 0x38a   :  { %v559_v41 = vsel %vm558_vm9, %v557_v40, %v552_v39  ;;  %v10097_v39 = vpack.c.bf16 %v96_v8, %v94_v12  ;;  %v10100_v40 = vpack.c.bf16 %v101_v34, %v99_v16  ;;  %v10174_v12 = vpack.c.bf16 %v117_v27, %v115_v25  ;;  %v114_v8 = vld [vmem:[%s11679_s7 + $0xa0] sm:$0xff]  ;;  %v116_v16 = vld [vmem:[%s11679_s7 + $0xb0] sm:$0xff]  ;;  %p9646_p1 = scmp.lt.s32.totalorder %s7460_s8, %s7460_s8 }
 0x38b   :  { %v567_v42 = vrot.slane %v559_v41, %v9832_v20  ;;  %v98_v41 = vld [vmem:[%s11679_s7 + $0x20] sm:$0xff]  ;;  %v10183_v34 = vpack.c.bf16 %v116_v16, %v114_v8  ;;  %v955_v16 = vsub.s32 1, %v9829_v19  ;;  %v144_v19 = vld [vmem:[%s11683_s11 + $0x8] sm:$0xff] }
 0x38d   :  { %v568_v43 = vcombine.high %v567_v42, %v567_v42  ;;  %v575_v22 = vrot.slane %v567_v42, %v9832_v20  ;;  %v100_v42 = vld [vmem:[%s11679_s7 + $0x30] sm:$0xff] }
 0x38f   :  { %7950 = vmatmul.mubr.msk.f32.vlgmr.msra.gmra.mrb[0].mxu1 %vm154_vm1, %v575_v22  ;;  %v582_v44 = vrot.slane %v568_v43, %v9832_v20  ;;  %v103_v43 = vld [vmem:[%s11679_s7 + $0x48] sm:$0xff]  ;;  %v105_v22 = vld [vmem:[%s11679_s7 + $0x58] sm:$0xff] }
 0x390   :  { %866 = vmatprep.mubr.f32.mxu1 %v11699_v6  ;;  %8655 = vmatpush1.bf16.msra.mxu1 %v10022_v54  ;;  %v10120_v45 = vpack.c.bf16 %v105_v22, %v103_v43 }
 0x391   :  { %7961 = vmatmul.mubr.msk.f32.vlgmr.msra.gmra.mrb[6].mxu0 %vm154_vm1, %v582_v44  ;;  %8657 = vmatprep.subr.bf16.mxu1 %v10024_v57  ;;  %v10116_v44 = vpack.c.bf16 %v100_v42, %v98_v41 }
 0x392   :  { %7971 = vmatprep.mubr.msk.f32.mxu0 %vm9666_vm0, %v11699_v6 }
 0x394   :  { %8659 = vmatpush1.bf16.msra.mxu1 %v10040_v62 }
 0x395   :  { %8661 = vmatprep.subr.bf16.mxu1 %v10043_v63 }
 0x398   :  { %8663 = vmatpush1.bf16.msra.mxu1 %v10058_v18 }
 0x399   :  { %8665 = vmatprep.subr.bf16.mxu1 %v10061_v21 }
 0x39c   :  { %8667 = vmatpush1.bf16.msra.mxu1 %v10076_v5 }
 0x39d   :  { %8669 = vmatprep.subr.bf16.mxu1 %v10079_v31 }
 0x39f   :  { %7484 = vmatmul.mubr.msk.f32.vlgmr.msra.gmra.mrb[2].mxu1 %vm798_vm10, %v7480_v10  ;;  %v7481_v10 = vld [vmem:[%s11687_s15] ss:$0 sm:$0xff] }
 0x3a0   :  { %8671 = vmatpush1.bf16.msra.mxu1 %v10097_v39  ;;  %941 = vmatprep.mubr.f32.mxu1 %v11699_v6 }
 0x3a1   :  { %8673 = vmatprep.subr.bf16.mxu1 %v10100_v40  ;;  %974 = vrot.lane.b32.xlu0 %v7481_v10, %s9672_s21  ;;  %v10216_v10 = vrot.slane %v134_v0, %v955_v16  ;;  %v137_v16 = vld [vmem:[%s11682_s10 + $0x10] sm:$0xff] }
 0x3a3   :  { %11803 = vst [vmem:[#allocation23_spill] sm:$0xff] %v10216_v10 }
 0x3a4   :  { %8675 = vmatpush1.bf16.msra.mxu1 %v10116_v44 }
 0x3a5   :  { %8677 = vmatprep.subr.bf16.mxu1 %v10120_v45 }
 0x3a8   :  { %8679 = vmatpush1.bf16.msra.mxu1 %v10135_v53 }
 0x3a9   :  { %8681 = vmatprep.subr.bf16.mxu1 %v10138_v58 }
 0x3ac   :  { %8683 = vmatpush1.bf16.msra.mxu1 %v10153_v1 }
 0x3ad   :  { %8685 = vmatprep.subr.bf16.mxu1 %v10156_v2 }
 0x3b0   :  { %8687 = vmatpush1.bf16.msra.mxu1 %v10171_v28 }
 0x3b1   :  { %8689 = vmatprep.subr.bf16.mxu1 %v10174_v12 }
 0x3b4   :  { %8691 = vmatpush1.bf16.msra.mxu1 %v10183_v34 }
 0x3b5   :  { %8722 = vmatprep.subr.bf16.mxu1 %v11697_v3 }
 0x462   :  { %v651_v41 = vpop.f32.mrb[0].mxu1 }
 0x463   :  { %v7951_v42 = vpop.f32.mrb[1].mxu1 }
 0x464   :  { %v723_v43 = vpop.f32.mrb[6].mxu0 }
 0x465   :  { %v793_v22 = vrot.slane %v723_v43, 7  ;;  %v7962_v46 = vpop.f32.mrb[7].mxu0 }
 0x467   :  { %v794_v47 = vsel %vm405_vm2, %v793_v22, %v651_v41 }
 0x468   :  { %795 = vrot.lane.b32.xlu1 %v794_v47, %s9672_s21 }
 0x4da   :  { %v796_v60 = vpop.permute.xlu1 %795 }
 0x4db   :  { %v799_v61 = vsel %vm798_vm10, %v788_v59, %v796_v60  ;;  %v145_v59 = vld [vmem:[%s11683_s11 + $0x10] sm:$0xff]  ;;  %v10229_v60 = vpack.c.bf16 %v144_v19, %v143_v50 }
 0x4dc   :  { %7485 = vmatmul.mubr.msk.f32.vlgmr.msra.gmra.mrb[2].mxu1 %vm873_vm11, %v799_v61  ;;  %v146_v61 = vld [vmem:[%s11683_s11 + $0x18] sm:$0xff]  ;;  %v141_v19 = vld [vmem:[%s11682_s10 + $0x30] sm:$0xff] }
 0x4dd   :  { %8724 = vmatpush3.bf16.msra.mxu1 %v9841_v26  ;;  %8023 = vmatprep.mubr.msk.f32.mxu1 %vm9666_vm0, %v11699_v6  ;;  %v10235_v0 = vpack.c.bf16 %v146_v61, %v145_v59  ;;  %v142_v59 = vld [vmem:[%s11682_s10 + $0x38] sm:$0xff] }
 0x4de   :  { %8725 = vmatprep.subr.bf16.mxu1 %v11697_v3  ;;  %8694 = vmatpush3.bf16.msra.mxu0 %v10229_v60  ;;  %v10281_v61 = vpack.c.bf16 %v142_v59, %v141_v19  ;;  %v7483_v19 = vld [vmem:[%s11689_s17] ss:$0 sm:$0xff] }
 0x4df   :  { %8695 = vmatprep.subr.bf16.mxu0 %v11697_v3  ;;  %1147 = vrot.lane.b32.xlu0 %v7483_v19, %s9673_s20 }
 0x4e1   :  { %8727 = vmatpush3.bf16.msra.mxu1 %v9852_v30 }
 0x4e2   :  { %8734 = vmatprep.subr.bf16.mxu1 %v11697_v3  ;;  %8697 = vmatpush3.bf16.msra.mxu0 %v10235_v0 }
 0x4e3   :  { %8698 = vmatprep.subr.bf16.mxu0 %v11697_v3 }
 0x5af   :  { %v943_v23 = vpop.f32.mrb[2].mxu1 }
 0x5b0   :  { %v959_v25 = vadd.f32 %v10212_v13, %v943_v23  ;;  %v945_v27 = vpop.f32.mrb[3].mxu1  ;;  %v135_v23 = vld [vmem:[%s11682_s10] sm:$0xff] }
 0x5b1   :  { %v960_v41 = vadd.f32 %v10216_v10, %v945_v27  ;;  %v7482_v27 = vld [vmem:[%s11688_s16] ss:$0 sm:$0xff] }
 0x5b2   :  { %v7486_v8 = vmul.f32 -1.442695, %v959_v25  ;;  %v136_v25 = vld [vmem:[%s11682_s10 + $0x8] sm:$0xff]  ;;  %7972 = vmatmul.mubr.msk.f32.vlgmr.msra.gmra.mrb[8].mxu0 %vm154_vm1, %v7482_v27  ;;  %v975_v27 = vpop.permute.xlu0 %974 }
 0x5b3   :  { %7990 = vmatprep.mubr.msk.f32.mxu0 %vm9666_vm0, %v11699_v6 }
 0x5b4   :  { %9322 = vpow2.f32 %v7486_v8  ;;  %v10248_v8 = vpack.c.bf16 %v136_v25, %v135_v23  ;;  %v7487_v23 = vmul.f32 -1.442695, %v960_v41 }
 0x5b5   :  { %9324 = vtanh.f32 %v960_v41 }
 0x5b6   :  { %8700 = vmatpush3.bf16.msra.mxu0 %v10248_v8  ;;  %v1148_v33 = vpop.permute.xlu0 %1147 }
 0x5b7   :  { %8701 = vmatprep.subr.bf16.mxu0 %v11697_v3 }
 0x5be   :  { %v9323_v42 = vpop.eup %9322 }
 0x5bf   :  { %v964_v43 = vadd.f32 1.0, %v9323_v42  ;;  %v9325_v22 = vpop.eup %9324  ;;  %v138_v42 = vld [vmem:[%s11682_s10 + $0x18] sm:$0xff] }
 0x5c1   :  { %9326 = vrcp.f32 %v964_v43  ;;  %v10259_v43 = vpack.c.bf16 %v138_v42, %v137_v16 }
 0x5c2   :  { %9328 = vpow2.f32 %v7487_v23 }
 0x5c3   :  { %8703 = vmatpush3.bf16.msra.mxu0 %v10259_v43 }
 0x5c4   :  { %8704 = vmatprep.subr.bf16.mxu0 %v11697_v3 }
 0x5cb   :  { %v9327_v46 = vpop.eup %9326 }
 0x5cc   :  { %v978_v47 = vmul.f32 %v9327_v46, %v9325_v22  ;;  %v139_v22 = vld [vmem:[%s11682_s10 + $0x20] sm:$0xff]  ;;  %v9329_v25 = vpop.eup %9328  ;;  %v977_v42 = vmul.f32 %v9327_v46, %v975_v27 }
 0x5cd   :  { %v971_v16 = vadd.f32 1.0, %v9329_v25 }
 0x5ce   :  { %980 = vrot.lane.b32.xlu1 %v978_v47, %s9672_s21  ;;  %v140_v47 = vld [vmem:[%s11682_s10 + $0x28] sm:$0xff] }
 0x5cf   :  { %v10271_v50 = vpack.c.bf16 %v140_v47, %v139_v22  ;;  %9330 = vrcp.f32 %v971_v16  ;;  %v10307_v16 = vld [vmem:[%s11684_s12] ss:$0 sm:$0xff] }
 0x5d1   :  { %8706 = vmatpush3.bf16.msra.mxu0 %v10271_v50 }
 0x5d2   :  { %8707 = vmatprep.subr.bf16.mxu0 %v11697_v3 }
 0x5d5   :  { %8709 = vmatpush3.bf16.msra.mxu0 %v10281_v61 }
 0x5d6   :  { %8710 = vmatprep.subr.bf16.mxu0 %v11697_v3 }
 0x5d9   :  { %v9331_v59 = vpop.eup %9330 }
 0x640   :  { %v981_v22 = vpop.permute.xlu1 %980 }
 0x641   :  { %v10286_v47 = vadd.f32 %v981_v22, %v977_v42 }
 0x643   :  { %9332 = vtanh.f32 %v10286_v47 }
 0x64d   :  { %v9333_v41 = vpop.eup %9332 }
 0x64e   :  { %v985_v23 = vmul.f32 %v9333_v41, %v9331_v59 }
 0x650   :  { %1059 = vrot.lane.b32.xlu1 %v985_v23, %s9672_s21 }
 0x685   :  { %v1054_v25 = vpop.f32.mrb[8].mxu0 }
 0x686   :  { %v7973_v46 = vpop.f32.mrb[9].mxu0 }
 0x6c2   :  { %v10294_v27 = vpop.permute.xlu1 %1059 }
 0x6c3   :  { %7991 = vmatmul.mubr.msk.f32.vlgmr.msra.gmra.mrb[10].mxu0 %vm798_vm10, %v10294_v27 }
 0x6c4   :  { %8712 = vmatpush3.bf16.msra.mxu0 %v9786_v4  ;;  %8001 = vmatprep.mubr.msk.f32.mxu0 %vm9666_vm0, %v11699_v6 }
 0x6c5   :  { %8713 = vmatprep.subr.bf16.mxu0 %v11697_v3 }
 0x6c8   :  { %8715 = vmatpush3.bf16.msra.mxu0 %v9797_v7 }
 0x6c9   :  { %8716 = vmatprep.subr.bf16.mxu0 %v11697_v3 }
 0x796   :  { %v1129_v42 = vpop.f32.mrb[10].mxu0 }
 0x797   :  { %v1130_v22 = vadd.f32 %v1129_v42, %v1054_v25  ;;  %v7992_v19 = vpop.f32.mrb[11].mxu0 }
 0x799   :  { %v1139_v59 = vadd.f32 %v10307_v16, %v1130_v22 }
 0x79b   :  { %9334 = vtanh.f32 %v1139_v59  ;;  %v7491_v23 = vmul.f32 -1.442695, %v1139_v59 }
 0x79d   :  { %9336 = vpow2.f32 %v7491_v23 }
 0x7a5   :  { %v9335_v41 = vpop.eup %9334 }
 0x7a6   :  { %1152 = vrot.lane.b32.xlu1 %v9335_v41, %s9672_s21 }
 0x7a7   :  { %v9337_v46 = vpop.eup %9336 }
 0x7a8   :  { %v1143_v17 = vadd.f32 1.0, %v9337_v46 }
 0x7aa   :  { %9338 = vrcp.f32 %v1143_v17 }
 0x7b4   :  { %v9339_v3 = vpop.eup %9338 }
 0x7b5   :  { %v1150_v37 = vmul.f32 %v9339_v3, %v1148_v33 }
 0x818   :  { %v1153_v6 = vpop.permute.xlu1 %1152 }
 0x819   :  { %v1155_v15 = vmul.f32 %v9339_v3, %v1153_v6  ;;  %v11805_v6 = vmov 0.0  }
 0x81b   :  { %1157 = vrot.lane.b32.xlu1 %v1155_v15, %s9673_s20  ;;  %v11806_v15 = vmov 0.0|0.0  }
 0x88d   :  { %v1158_v25 = vpop.permute.xlu1 %1157 }
 0x88e   :  { %v10312_v42 = vadd.f32 %v1158_v25, %v1150_v37 }
 0x890   :  { %11804 = vst [vmem:[#allocation24_spill] sm:$0xff] %v10312_v42  ;;  %9340 = vtanh.f32 %v10312_v42 }
 0x89a   :  { %v9341_v22 = vpop.eup %9340 }
 0x89b   :  { %1163 = vrot.lane.b32.xlu0 %v9341_v22, %s9672_s21 }
 0x90d   :  { %v1164_v19 = vpop.permute.xlu0 %1163 }
 0x90e   :  { %v1166_v59 = vmul.f32 %v9339_v3, %v1164_v19 }
 0x910   :  { %1168 = vrot.lane.b32.xlu1 %v1166_v59, %s9673_s20 }
 0x982   :  { %v10317_v17 = vpop.permute.xlu1 %1168 }
 0x983   :  { %8002 = vmatmul.mubr.msk.f32.vlgmr.msra.gmra.mrb[12].mxu0 %vm154_vm1, %v10317_v17 }
 0x984   :  { %8718 = vmatpush3.bf16.msra.mxu0 %v9810_v11  ;;  %8012 = vmatprep.mubr.msk.f32.mxu0 %vm9666_vm0, %v11805_v6 }
 0x985   :  { %8719 = vmatprep.subr.bf16.mxu0 %v11806_v15 }
 0x988   :  { %8721 = vmatpush3.bf16.msra.mxu0 %v9824_v14 }
 0x989   :  { %8728 = vmatprep.subr.bf16.mxu0 %v11806_v15 }
 0xa56   :  { %v10327_v33 = vpop.f32.mrb[12].mxu0 }
 0xa57   :  { %v1249_v3 = vrot.slane %v10327_v33, %v9832_v20  ;;  %v8003_v37 = vpop.f32.mrb[13].mxu0 }
 0xa59   :  { %v1250_v41 = vcombine.high %v1249_v3, %v1249_v3  ;;  %v1257_v23 = vrot.slane %v1249_v3, %v9832_v20 }
 0xa5b   :  { %v1264_v46 = vrot.slane %v1250_v41, %v9832_v20  ;;  %8013 = vmatmul.mubr.msk.f32.vlgmr.msra.gmra.mrb[14].mxu0 %vm154_vm1, %v1257_v23 }
 0xa5c   :  { %8730 = vmatpush3.bf16.msra.mxu0 %v9926_v48  ;;  %8034 = vmatprep.mubr.msk.f32.mxu0 %vm9666_vm0, %v11805_v6 }
 0xa5d   :  { %8024 = vmatmul.mubr.msk.f32.vlgmr.msra.gmra.mrb[4].mxu1 %vm154_vm1, %v1264_v46  ;;  %8731 = vmatprep.subr.bf16.mxu0 %v11806_v15 }
 0xa5e   :  { %8736 = vmatpush3.bf16.msra.mxu1 %v9937_v52  ;;  %8045 = vmatprep.mubr.msk.f32.mxu1 %vm9666_vm0, %v11805_v6 }
 0xa5f   :  { %8737 = vmatprep.subr.bf16.mxu1 %v11806_v15 }
 0xa60   :  { %8733 = vmatpush3.bf16.msra.mxu0 %v9946_v55 }
 0xa61   :  { %8740 = vmatprep.subr.bf16.mxu0 %v11806_v15 }
 0xa62   :  { %8739 = vmatpush3.bf16.msra.mxu1 %v9950_v56 }
 0xa63   :  { %8752 = vmatprep.subr.bf16.mxu1 %v11806_v15 }
 0xb2e   :  { %v1333_v25 = vpop.f32.mrb[14].mxu0 }
 0xb2f   :  { %v8014_v22 = vpop.f32.mrb[15].mxu0  ;;  %v1409_v59 = vmul.f32 0.35355338, %v1333_v25 }
 0xb30   :  { %v1405_v19 = vpop.f32.mrb[4].mxu1 }
 0xb31   :  { %v1410_v3 = vmul.f32 0.35355338, %v1405_v19  ;;  %v8025_v37 = vpop.f32.mrb[5].mxu1  ;;  %v1411_v23 = vadd.f32 %v1409_v59, %v9866_v35 }
 0xb33   :  { %v1412_v41 = vadd.f32 %v1410_v3, %v9869_v36 }
 0xb35   :  { %v1415_v46 = vrot.slane %v1412_v41, 7 }
 0xb37   :  { %v1416_v9 = vsel %vm405_vm2, %v1415_v46, %v1411_v23 }
 0xb38   :  { %v1478_v38 = vsel %vm470_vm5, %v1416_v9, -inf  ;;  %v1447_v24 = vsel %vm438_vm4, %v1416_v9, -inf  ;;  %v1509_v32 = vsel %vm502_vm3, %v1416_v9, -inf  ;;  %v1418_v25 = vsel %vm408_vm6, %v1416_v9, -inf }
 0xb39   :  { %1479 = vmax.xlane.f32.xlu1 %v1478_v38  ;;  %1448 = vmax.xlane.f32.xlu0 %v1447_v24 }
 0xb3d   :  { %1510 = vmax.xlane.f32.xlu0 %v1509_v32 }
 0xb41   :  { %1419 = vmax.xlane.f32.xlu0 %v1418_v25 }
 0xbc6   :  { %v1480_v22 = vpop.xlane.xlu1 %1479  ;;  %v1449_v19 = vpop.xlane.xlu0 %1448 }
 0xbc7   :  { %v1482_v3 = vrot.slane %v1480_v22, 1  ;;  %v1485_v37 = vsub.f32 %v1411_v23, %v1480_v22  ;;  %v1451_v35 = vrot.slane %v1449_v19, 1  ;;  %v1454_v59 = vsub.f32 %v1411_v23, %v1449_v19 }
 0xbc9   :  { %v1486_v29 = vsub.f32 %v1412_v41, %v1482_v3  ;;  %v1455_v46 = vsub.f32 %v1412_v41, %v1451_v35  ;;  %v1487_v36 = vmul.f32 1.442695, %v1485_v37  ;;  %v1456_v24 = vmul.f32 1.442695, %v1454_v59 }
 0xbca   :  { %v1511_v56 = vpop.xlane.xlu0 %1510 }
 0xbcb   :  { %v1489_v55 = vmul.f32 1.442695, %v1486_v29  ;;  %v1458_v52 = vmul.f32 1.442695, %v1455_v46  ;;  %v1513_v38 = vrot.slane %v1511_v56, 1  ;;  %v1516_v48 = vsub.f32 %v1411_v23, %v1511_v56 }
 0xbcd   :  { %9342 = vpow2.f32 %v1489_v55  ;;  %v1517_v32 = vsub.f32 %v1412_v41, %v1513_v38  ;;  %v1518_v9 = vmul.f32 1.442695, %v1516_v48 }
 0xbce   :  { %9344 = vpow2.f32 %v1458_v52  ;;  %v1420_v46 = vpop.xlane.xlu0 %1419 }
 0xbcf   :  { %9346 = vpow2.f32 %v1487_v36  ;;  %v1520_v25 = vmul.f32 1.442695, %v1517_v32  ;;  %v1422_v38 = vrot.slane %v1420_v46, 1 }
 0xbd0   :  { %9348 = vpow2.f32 %v1456_v24 }
 0xbd1   :  { %9350 = vpow2.f32 %v1520_v25  ;;  %v1426_v24 = vsub.f32 %v1412_v41, %v1422_v38 }
 0xbd2   :  { %9352 = vpow2.f32 %v1518_v9  ;;  %v1425_v9 = vsub.f32 %v1411_v23, %v1420_v46 }
 0xbd3   :  { %v1429_v32 = vmul.f32 1.442695, %v1426_v24 }
 0xbd4   :  { %v1427_v25 = vmul.f32 1.442695, %v1425_v9 }
 0xbd5   :  { %9354 = vpow2.f32 %v1429_v32 }
 0xbd6   :  { %9356 = vpow2.f32 %v1427_v25 }
 0xbd7   :  { %v9343_v22 = vpop.eup %9342 }
 0xbd8   :  { %v9345_v19 = vpop.eup %9344  ;;  %v1493_v3 = vrot.slane %v9343_v22, 7 }
 0xbd9   :  { %v10354_v35 = vpop.eup %9346  ;;  %v1462_v37 = vrot.slane %v9345_v19, 7 }
 0xbda   :  { %v9349_v29 = vpop.eup %9348  ;;  %v1494_v59 = vsel %vm405_vm2, %v1493_v3, %v10354_v35 }
 0xbdb   :  { %v10358_v56 = vpop.eup %9350  ;;  %1495 = vrot.lane.b32.xlu1 %v1494_v59, %s9670_s28  ;;  %v1463_v36 = vsel %vm405_vm2, %v1462_v37, %v9349_v29 }
 0xbdc   :  { %1464 = vrot.lane.b32.xlu0 %v1463_v36, %s9669_s27  ;;  %v1524_v48 = vrot.slane %v10358_v56, 7  ;;  %v10364_v52 = vpop.eup %9352 }
 0xbde   :  { %v1525_v55 = vsel %vm405_vm2, %v1524_v48, %v10364_v52 }
 0xbdf   :  { %1526 = vrot.lane.b32.xlu1 %v1525_v55, %s9671_s29  ;;  %v9355_v3 = vpop.eup %9354 }
 0xbe0   :  { %v1433_v37 = vrot.slane %v9355_v3, 7  ;;  %v9357_v59 = vpop.eup %9356 }
 0xbe2   :  { %v1434_v36 = vsel %vm405_vm2, %v1433_v37, %v9357_v59 }
 0xbe3   :  { %v1436_v30 = vsel %vm408_vm6, %v1434_v36, 0.0 }
 0xc03   :  { %1437 = vadd.xlane.f32.xlu1 %v1436_v30 }
 0xc4d   :  { %v1496_v26 = vpop.permute.xlu1 %1495 }
 0xc4e   :  { %v1465_v48 = vpop.permute.xlu0 %1464  ;;  %v1498_v41 = vsel %vm408_vm6, %v1496_v26, 0.0 }
 0xc4f   :  { %v1467_v42 = vsel %vm408_vm6, %v1465_v48, 0.0 }
 0xc50   :  { %1468 = vadd.xlane.f32.xlu0 %v1467_v42 }
 0xc51   :  { %v1527_v55 = vpop.permute.xlu1 %1526 }
 0xc52   :  { %v1529_v23 = vsel %vm408_vm6, %v1527_v55, 0.0 }
 0xc54   :  { %1499 = vadd.xlane.f32.xlu0 %v1498_v41 }
 0xc58   :  { %1530 = vadd.xlane.f32.xlu0 %v1529_v23 }
 0xc90   :  { %v1438_v46 = vpop.xlane.xlu1 %1437 }
 0xc91   :  { %v1440_v38 = vrot.slane %v1438_v46, 1 }
 0xc93   :  { %9358 = vrcp.f32 %v1440_v38 }
 0xc9d   :  { %v9359_v26 = vpop.eup %9358 }
 0xc9e   :  { %v10376_v41 = vmul.f32 %v9359_v26, %v9355_v3 }
 0xca0   :  { %11808 = vst [vmem:[#allocation26_spill] sm:$0xff] %v10376_v41 }
 0xcdd   :  { %v1469_v24 = vpop.xlane.xlu0 %1468 }
 0xcde   :  { %v1471_v32 = vrot.slane %v1469_v24, 1 }
 0xce0   :  { %9360 = vrcp.f32 %v1471_v32 }
 0xce1   :  { %v1500_v9 = vpop.xlane.xlu0 %1499  ;;  %9362 = vrcp.f32 %v1469_v24 }
 0xce2   :  { %v1502_v30 = vrot.slane %v1500_v9, 1 }
 0xce4   :  { %9364 = vrcp.f32 %v1502_v30 }
 0xce5   :  { %9366 = vrcp.f32 %v1500_v9  ;;  %v1531_v25 = vpop.xlane.xlu0 %1530 }
 0xce6   :  { %9368 = vrcp.f32 %v1438_v46  ;;  %v1533_v42 = vrot.slane %v1531_v25, 1  ;;  %v1542_v46 = vrot.slane %v10376_v41, 7 }
 0xce7   :  { %9370 = vrcp.f32 %v1531_v25 }
 0xce8   :  { %9372 = vrcp.f32 %v1533_v42 }
 0xcea   :  { %v9361_v37 = vpop.eup %9360 }
 0xceb   :  { %v10374_v36 = vmul.f32 %v9361_v37, %v9345_v19  ;;  %v9363_v48 = vpop.eup %9362 }
 0xcec   :  { %v10382_v30 = vmul.f32 %v9363_v48, %v9349_v29 }
 0xced   :  { %11807 = vst [vmem:[#allocation25_spill] sm:$0xff] %v10374_v36  ;;  %v1547_v38 = vrot.slane %v10374_v36, 7 }
 0xcee   :  { %v9365_v55 = vpop.eup %9364  ;;  %11810 = vst [vmem:[#allocation28_spill] sm:$0xff] %v10382_v30 }
 0xcef   :  { %v9367_v23 = vpop.eup %9366  ;;  %v10379_v32 = vmul.f32 %v9365_v55, %v9343_v22  ;;  %v1548_v26 = vsel %vm405_vm2, %v1547_v38, %v10382_v30  ;;  %v80_v38 = vld [vmem:[%s11801_s1 + $0x8] sm:$0xff] }
 0xcf0   :  { %v9369_v24 = vpop.eup %9368  ;;  %v10386_v19 = vmul.f32 %v9367_v23, %v10354_v35 }
 0xcf1   :  { %11809 = vst [vmem:[#allocation27_spill] sm:$0xff] %v10379_v32  ;;  %v9371_v9 = vpop.eup %9370  ;;  %v1552_v25 = vrot.slane %v10379_v32, 7  ;;  %v10388_v3 = vmul.f32 %v9369_v24, %v9357_v59 }
 0xcf2   :  { %v9373_v42 = vpop.eup %9372  ;;  %11811 = vst [vmem:[#allocation29_spill] sm:$0xff] %v10386_v19  ;;  %v10400_v48 = vmul.f32 %v9371_v9, %v10364_v52 }
 0xcf3   :  { %11812 = vst [vmem:[#allocation30_spill] sm:$0xff] %v10388_v3  ;;  %v10393_v22 = vmul.f32 %v9373_v42, %v10358_v56  ;;  %v1553_v37 = vsel %vm405_vm2, %v1552_v25, %v10386_v19  ;;  %v1543_v29 = vsel %vm405_vm2, %v1542_v46, %v10388_v3  ;;  %v10414_v46 = vpack.c.bf16 %v80_v38, %v10198_v51  ;;  %v81_v51 = vld [vmem:[%s11676_s4] sm:$0xff]  ;;  %v82_v42 = vld [vmem:[%s11676_s4 + $0x8] sm:$0xff]  ;;  %v88_v38 = vld [vmem:[%s11676_s4 + $0x38] sm:$0xff] }
 0xcf4   :  { %11814 = vst [vmem:[#allocation32_spill] sm:$0xff] %v10400_v48  ;;  %v1560_v59 = vsel %vm554_vm7, %v1543_v29, %v1548_v26  ;;  %v83_v26 = vld [vmem:[%s11676_s4 + $0x10] sm:$0xff]  ;;  %v84_v29 = vld [vmem:[%s11676_s4 + $0x18] sm:$0xff] }
 0xcf5   :  { %11813 = vst [vmem:[#allocation31_spill] sm:$0xff] %v10393_v22  ;;  %v1557_v35 = vrot.slane %v10393_v22, 7  ;;  %v1561_v23 = vsel %vm556_vm8, %v1560_v59, %v1553_v37  ;;  %v10434_v37 = vpack.c.bf16 %v82_v42, %v81_v51  ;;  %v85_v59 = vld [vmem:[%s11676_s4 + $0x20] sm:$0xff] }
 0xcf7   :  { %v1558_v55 = vsel %vm405_vm2, %v1557_v35, %v10400_v48  ;;  %v10440_v35 = vpack.c.bf16 %v84_v29, %v83_v26  ;;  %v10601_v48 = vld [vmem:[%s11786_s26] sm:$0x3] }
 0xcf8   :  { %v1562_v56 = vsel %vm558_vm9, %v1561_v23, %v1558_v55  ;;  %v86_v55 = vld [vmem:[%s11676_s4 + $0x28] sm:$0xff]  ;;  %11826 = vst [vmem:[#allocation34_spill] sm:$0xff] %v10601_v48 }
 0xcf9   :  { %v1570_v24 = vrot.slane %v1562_v56, %v9832_v20  ;;  %v10450_v23 = vpack.c.bf16 %v86_v55, %v85_v59  ;;  %v87_v56 = vld [vmem:[%s11676_s4 + $0x30] sm:$0xff] }
 0xcfb   :  { %v1578_v52 = vrot.slane %v1570_v24, %v9832_v20  ;;  %v1571_v9 = vcombine.high %v1570_v24, %v1570_v24  ;;  %v10460_v24 = vpack.c.bf16 %v88_v38, %v87_v56 }
 0xcfd   :  { %8035 = vmatmul.mubr.msk.f32.vlgmr.msra.gmra.mrb[16].mxu0 %vm154_vm1, %v1578_v52  ;;  %v1585_v25 = vrot.slane %v1571_v9, %v9832_v20 }
 0xcfe   :  { %8064 = vmatprep.mubr.msk.f32.mxu0 %vm9666_vm0, %v11805_v6  ;;  %8742 = vmatpush3.bf16.msra.mxu0 %v10434_v37 }
 0xcff   :  { %8046 = vmatmul.mubr.msk.f32.vlgmr.msra.gmra.mrb[6].mxu1 %vm154_vm1, %v1585_v25  ;;  %8743 = vmatprep.subr.bf16.mxu0 %v11806_v15 }
 0xd00   :  { %8754 = vmatpush3.bf16.msra.mxu1 %v10414_v46  ;;  %8071 = vmatprep.mubr.msk.f32.mxu1 %vm9666_vm0, %v11805_v6 }
 0xd01   :  { %8756 = vmatprep.subr.bf16.mxu1 %v10011_v49 }
 0xd02   :  { %8745 = vmatpush3.bf16.msra.mxu0 %v10440_v35 }
 0xd03   :  { %8746 = vmatprep.subr.bf16.mxu0 %v11806_v15 }
 0xd06   :  { %8748 = vmatpush3.bf16.msra.mxu0 %v10450_v23 }
 0xd07   :  { %8749 = vmatprep.subr.bf16.mxu0 %v11806_v15 }
 0xd0a   :  { %8751 = vmatpush3.bf16.msra.mxu0 %v10460_v24 }
 0xd0b   :  { %8795 = vmatprep.subr.bf16.mxu0 %v11806_v15 }
 0xdd0   :  { %v1654_v52 = vpop.f32.mrb[16].mxu0 }
 0xdd1   :  { %v8036_v9 = vpop.f32.mrb[17].mxu0 }
 0xdd2   :  { %v1726_v25 = vpop.f32.mrb[6].mxu1 }
 0xdd3   :  { %v1760_v51 = vrot.slane %v1726_v25, 7  ;;  %v8047_v42 = vpop.f32.mrb[7].mxu1  ;;  %v11815_v25 = vlaneseq }
 0xdd5   :  { %v1761_v26 = vsel %vm405_vm2, %v1760_v51, %v1654_v52  ;;  %v10499_v51 = vand.u32 127, %v11815_v25 }
 0xdd6   :  { %1762 = vrot.lane.b32.xlu1 %v1761_v26, %s9673_s20 }
 0xe48   :  { %v1763_v29 = vpop.permute.xlu1 %1762 }
 0xe49   :  { %v1765_v59 = vsel %vm154_vm1, %v10327_v33, %v1763_v29 }
 0xe4a   :  { %8065 = vmatmul.mubr.msk.f32.vlgmr.msra.gmra.mrb[18].mxu0 %vm798_vm10, %v1765_v59 }
 0xe4b   :  { %8797 = vmatpush3.bf16.msra.mxu0 %v10229_v60  ;;  %8082 = vmatprep.mubr.msk.f32.mxu0 %vm9666_vm0, %v11805_v6 }
 0xe4c   :  { %8798 = vmatprep.subr.bf16.mxu0 %v11806_v15 }
 0xe4f   :  { %8800 = vmatpush3.bf16.msra.mxu0 %v10235_v0 }
 0xe50   :  { %8801 = vmatprep.subr.bf16.mxu0 %v11806_v15 }
 0xe52   :  { %8083 = vmatmul.mubr.msk.f32.vlgmr.msra.gmra.mrb[20].mxu0 %vm154_vm1, %v10317_v17  ;;  %v10491_v17 = vld [vmem:[%s11677_s5] ss:$0 sm:$0xff] }
 0xe53   :  { %8803 = vmatpush3.bf16.msra.mxu0 %v10248_v8  ;;  %8101 = vmatprep.mubr.msk.f32.mxu0 %vm9666_vm0, %v11805_v6 }
 0xe54   :  { %8804 = vmatprep.subr.bf16.mxu0 %v11806_v15 }
 0xe57   :  { %8806 = vmatpush3.bf16.msra.mxu0 %v10259_v43 }
 0xe58   :  { %8807 = vmatprep.subr.bf16.mxu0 %v11806_v15 }
 0xe5b   :  { %8809 = vmatpush3.bf16.msra.mxu0 %v10271_v50 }
 0xe5c   :  { %8810 = vmatprep.subr.bf16.mxu0 %v11806_v15 }
 0xe5f   :  { %8812 = vmatpush3.bf16.msra.mxu0 %v10281_v61 }
 0xe60   :  { %8813 = vmatprep.subr.bf16.mxu0 %v11806_v15 }
 0xf1d   :  { %v1841_v33 = vpop.f32.mrb[18].mxu0 }
 0xf1e   :  { %v1842_v55 = vadd.f32 %v10491_v17, %v1841_v33  ;;  %v8066_v56 = vpop.f32.mrb[19].mxu0 }
 0xf20   :  { %1846 = vst.msk [vmem:[#allocation2] sm:$0x3] %vm1845_vm12, %v1842_v55  ;;  %v1854_v38 = vsel %vm1845_vm12, %v1842_v55, -inf }
 0xf21   :  { %1855 = vmax.xlane.f32.xlu0 %v1854_v38 }
 0xf25   :  { %v10496_v52 = vpop.f32.mrb[20].mxu0 }
 0xf26   :  { %v8084_v9 = vpop.f32.mrb[21].mxu0 }
 0xfae   :  { %v1856_v42 = vpop.xlane.xlu0 %1855 }
 0xfaf   :  { %vm1857_vm13 = vcmp.ge.f32.partialorder %v1842_v55, %v1856_v42 }
 0xfb0   :  { %v1858_v29 = vsel %vm1857_vm13, %v10499_v51, 16 }
 0xfb1   :  { %v1859_v59 = vsel %vm1845_vm12, %v1858_v29, 2147483647 }
 0xfb2   :  { %v1861_v41 = vshra.s32 %v1859_v59, 16  ;;  %v1860_v56 = vand.u32 65535, %v1859_v59 }
 0xfb4   :  { %v1863_v33 = vcvt.s32.f32 %v1861_v41  ;;  %v1862_v22 = vcvt.s32.f32 %v1860_v56 }
 0xfb6   :  { %1864 = vmin.xlane.f32.xlu0 %v1863_v33 }
0x1043   :  { %v1865_v3 = vpop.xlane.xlu0 %1864 }
0x1044   :  { %vm1866_vm14 = vcmp.eq.f32.partialorder %v1863_v33, %v1865_v3  ;;  %v1871_v9 = vcvt.f32.s32 %v1865_v3 }
0x1045   :  { %v1867_v38 = vsel %vm1866_vm14, %v1862_v22, inf }
0x1046   :  { %1868 = vmin.xlane.f32.xlu0 %v1867_v38  ;;  %v1872_v32 = vshll.u32 %v1871_v9, 16 }
0x105c   :  { %1950 = vrot.lane.b32.xlu0 %v1761_v26, %s9672_s21 }
0x10d3   :  { %v1869_v25 = vpop.xlane.xlu0 %1868 }
0x10d4   :  { %v1870_v36 = vcvt.f32.s32 %v1869_v25 }
0x10d6   :  { %v1873_v55 = vadd.s32 %v1872_v32, %v1870_v36 }
0x10d8   :  { %vm1874_vm15 = vcmp.eq.s32.totalorder %v10499_v51, %v1873_v55 }
0x10d9   :  { %v7500_v42 = vsel %vm1874_vm15, 1.0, %v11805_v6 }
0x10da   :  { %8072 = vmatmul.mubr.msk.f32.vlgmr.msra.gmra.mrb[8].mxu1 %vm556_vm8, %v7500_v42 }
0x10db   :  { %8758 = vmatpush1.bf16.msra.mxu1 %v10022_v54  ;;  %2018 = vmatprep.mubr.f32.mxu1 %v11805_v6 }
0x10dc   :  { %8760 = vmatprep.subr.bf16.mxu1 %v10024_v57 }
0x10df   :  { %8762 = vmatpush1.bf16.msra.mxu1 %v10040_v62 }
0x10e0   :  { %8764 = vmatprep.subr.bf16.mxu1 %v10043_v63 }
0x10e3   :  { %8766 = vmatpush1.bf16.msra.mxu1 %v10058_v18 }
0x10e4   :  { %8768 = vmatprep.subr.bf16.mxu1 %v10061_v21 }
0x10e7   :  { %8770 = vmatpush1.bf16.msra.mxu1 %v10076_v5 }
0x10e8   :  { %8772 = vmatprep.subr.bf16.mxu1 %v10079_v31 }
0x10ea   :  { %7502 = vmatmul.mubr.msk.f32.vlgmr.msra.gmra.mrb[10].mxu1 %vm798_vm10, %v10294_v27  ;;  %v1951_v27 = vpop.permute.xlu0 %1950 }
0x10eb   :  { %8774 = vmatpush1.bf16.msra.mxu1 %v10097_v39  ;;  %2092 = vmatprep.mubr.f32.mxu1 %v11805_v6 }
0x10ec   :  { %8776 = vmatprep.subr.bf16.mxu1 %v10100_v40 }
0x10ef   :  { %8778 = vmatpush1.bf16.msra.mxu1 %v10116_v44 }
0x10f0   :  { %8780 = vmatprep.subr.bf16.mxu1 %v10120_v45 }
0x10f3   :  { %8782 = vmatpush1.bf16.msra.mxu1 %v10135_v53 }
0x10f4   :  { %8784 = vmatprep.subr.bf16.mxu1 %v10138_v58 }
0x10f7   :  { %8786 = vmatpush1.bf16.msra.mxu1 %v10153_v1 }
0x10f8   :  { %8788 = vmatprep.subr.bf16.mxu1 %v10156_v2 }
0x10fb   :  { %8790 = vmatpush1.bf16.msra.mxu1 %v10171_v28 }
0x10fc   :  { %8792 = vmatprep.subr.bf16.mxu1 %v10174_v12 }
0x10ff   :  { %8794 = vmatpush1.bf16.msra.mxu1 %v10183_v34 }
0x1100   :  { %8819 = vmatprep.subr.bf16.mxu1 %v11806_v15 }
0x11ad   :  { %v1946_v36 = vpop.f32.mrb[8].mxu1 }
0x11ae   :  { %v1953_v41 = vsel %vm798_vm10, %v1946_v36, %v1951_v27  ;;  %v8073_v32 = vpop.f32.mrb[9].mxu1 }
0x11af   :  { %7503 = vmatmul.mubr.msk.f32.vlgmr.msra.gmra.mrb[10].mxu1 %vm873_vm11, %v1953_v41 }
0x11b0   :  { %8821 = vmatpush3.bf16.msra.mxu1 %v9810_v11  ;;  %8123 = vmatprep.mubr.msk.f32.mxu1 %vm9666_vm0, %v11805_v6 }
0x11b1   :  { %8822 = vmatprep.subr.bf16.mxu1 %v11806_v15 }
0x11b4   :  { %8824 = vmatpush3.bf16.msra.mxu1 %v9824_v14 }
0x11b5   :  { %8831 = vmatprep.subr.bf16.mxu1 %v11806_v15 }
0x1282   :  { %v2094_v3 = vpop.f32.mrb[10].mxu1 }
0x1283   :  { %v2099_v22 = vadd.f32 %v2094_v3, %v10212_v13  ;;  %v2096_v26 = vpop.f32.mrb[11].mxu1 }
0x1284   :  { %v2100_v59 = vadd.f32 %v2096_v26, %v10216_v10 }
0x1285   :  { %v7504_v29 = vmul.f32 -1.442695, %v2099_v22 }
0x1286   :  { %v7505_v55 = vmul.f32 -1.442695, %v2100_v59 }
0x1287   :  { %9374 = vpow2.f32 %v7504_v29 }
0x1288   :  { %9376 = vtanh.f32 %v2100_v59 }
0x1291   :  { %v9375_v33 = vpop.eup %9374 }
0x1292   :  { %v2104_v56 = vadd.f32 1.0, %v9375_v33  ;;  %v9377_v38 = vpop.eup %9376 }
0x1294   :  { %9378 = vrcp.f32 %v2104_v56 }
0x1295   :  { %9380 = vpow2.f32 %v7505_v55 }
0x129e   :  { %v9379_v9 = vpop.eup %9378 }
0x129f   :  { %v2115_v25 = vmul.f32 %v9379_v9, %v9377_v38  ;;  %v9381_v42 = vpop.eup %9380  ;;  %v2114_v36 = vmul.f32 %v9379_v9, %v10286_v47 }
0x12a0   :  { %v2111_v27 = vadd.f32 1.0, %v9381_v42 }
0x12a1   :  { %2117 = vrot.lane.b32.xlu1 %v2115_v25, %s9672_s21 }
0x12a2   :  { %9382 = vrcp.f32 %v2111_v27 }
0x12ac   :  { %v9383_v3 = vpop.eup %9382 }
0x1313   :  { %v2118_v41 = vpop.permute.xlu1 %2117 }
0x1314   :  { %v10543_v32 = vadd.f32 %v2118_v41, %v2114_v36  ;;  %v11817_v41 = vld [vmem:[#allocation24_spill] sm:$0xff] }
0x1316   :  { %11816 = vst [vmem:[#allocation33_spill] sm:$0xff] %v10543_v32  ;;  %9384 = vtanh.f32 %v10543_v32 }
0x1320   :  { %v9385_v22 = vpop.eup %9384 }
0x1321   :  { %v2122_v26 = vmul.f32 %v9385_v22, %v9383_v3 }
0x1323   :  { %2194 = vrot.lane.b32.xlu1 %v2122_v26, %s9672_s21 }
0x1395   :  { %v10547_v29 = vpop.permute.xlu1 %2194 }
0x1396   :  { %8102 = vmatmul.mubr.msk.f32.vlgmr.msra.gmra.mrb[22].mxu0 %vm798_vm10, %v10547_v29 }
0x1397   :  { %8815 = vmatpush3.bf16.msra.mxu0 %v9786_v4  ;;  %8112 = vmatprep.mubr.msk.f32.mxu0 %vm9666_vm0, %v11805_v6 }
0x1398   :  { %8816 = vmatprep.subr.bf16.mxu0 %v11806_v15 }
0x139b   :  { %8818 = vmatpush3.bf16.msra.mxu0 %v9797_v7 }
0x139c   :  { %8825 = vmatprep.subr.bf16.mxu0 %v11806_v15 }
0x1469   :  { %v2264_v47 = vpop.f32.mrb[22].mxu0 }
0x146a   :  { %v2265_v59 = vadd.f32 %v2264_v47, %v10496_v52  ;;  %v8103_v33 = vpop.f32.mrb[23].mxu0 }
0x146b   :  { %v11819_v33 = vld [vmem:[#allocation7_spill] sm:$0xff] }
0x146c   :  { %v2268_v56 = vadd.f32 %v10307_v16, %v2265_v59 }
0x146e   :  { %9386 = vtanh.f32 %v2268_v56  ;;  %v7508_v9 = vmul.f32 -1.442695, %v2268_v56  ;;  %v11820_v56 = vld [vmem:[#allocation8_spill] sm:$0xff] }
0x1470   :  { %9388 = vpow2.f32 %v7508_v9 }
0x1478   :  { %v9387_v38 = vpop.eup %9386 }
0x1479   :  { %2278 = vrot.lane.b32.xlu1 %v9387_v38, %s9672_s21 }
0x147a   :  { %v9389_v25 = vpop.eup %9388 }
0x147b   :  { %v2272_v55 = vadd.f32 1.0, %v9389_v25 }
0x147d   :  { %9390 = vrcp.f32 %v2272_v55 }
0x1487   :  { %v9391_v42 = vpop.eup %9390 }
0x1488   :  { %v2276_v3 = vmul.f32 %v9391_v42, %v11817_v41  ;;  %v11822_v41 = vld [vmem:[#allocation11_spill] sm:$0xff] }
0x14eb   :  { %v2279_v27 = vpop.permute.xlu1 %2278 }
0x14ec   :  { %v2281_v36 = vmul.f32 %v9391_v42, %v2279_v27 }
0x14ee   :  { %2283 = vrot.lane.b32.xlu1 %v2281_v36, %s9673_s20  ;;  %v11821_v36 = vld [vmem:[#allocation10_spill] sm:$0xff] }
0x1560   :  { %v2284_v52 = vpop.permute.xlu1 %2283 }
0x1561   :  { %v10562_v22 = vadd.f32 %v2284_v52, %v2276_v3  ;;  %v11823_v3 = vld [vmem:[#allocation12_spill] sm:$0xff]  ;;  %v11824_v52 = vld [vmem:[#allocation13_spill] sm:$0xff] }
0x1563   :  { %11818 = vst [vmem:[#allocation24_spill] sm:$0xff] %v10562_v22  ;;  %9392 = vtanh.f32 %v10562_v22 }
0x156d   :  { %v9393_v16 = vpop.eup %9392 }
0x156e   :  { %2289 = vrot.lane.b32.xlu1 %v9393_v16, %s9672_s21 }
0x15e0   :  { %v2290_v26 = vpop.permute.xlu1 %2289 }
0x15e1   :  { %v2292_v47 = vmul.f32 %v9391_v42, %v2290_v26 }
0x15e3   :  { %2294 = vrot.lane.b32.xlu1 %v2292_v47, %s9673_s20 }
0x1655   :  { %v10567_v59 = vpop.permute.xlu1 %2294 }
0x1656   :  { %8113 = vmatmul.mubr.msk.f32.vlgmr.msra.gmra.mrb[24].mxu0 %vm154_vm1, %v10567_v59 }
0x1657   :  { %8827 = vmatpush3.bf16.msra.mxu0 %v11819_v33  ;;  %8134 = vmatprep.mubr.msk.f32.mxu0 %vm9666_vm0, %v11805_v6 }
0x1658   :  { %8828 = vmatprep.subr.bf16.mxu0 %v11806_v15 }
0x165b   :  { %8830 = vmatpush3.bf16.msra.mxu0 %v11820_v56 }
0x165c   :  { %8837 = vmatprep.subr.bf16.mxu0 %v11806_v15 }
0x1729   :  { %v10577_v38 = vpop.f32.mrb[24].mxu0 }
0x172a   :  { %v2375_v9 = vrot.slane %v10577_v38, %v9832_v20  ;;  %v8114_v25 = vpop.f32.mrb[25].mxu0 }
0x172c   :  { %v2376_v55 = vcombine.high %v2375_v9, %v2375_v9  ;;  %v2383_v42 = vrot.slane %v2375_v9, %v9832_v20 }
0x172e   :  { %v2390_v27 = vrot.slane %v2376_v55, %v9832_v20  ;;  %8124 = vmatmul.mubr.msk.f32.vlgmr.msra.gmra.mrb[12].mxu1 %vm154_vm1, %v2383_v42  ;;  %v11825_v42 = vld [vmem:[#allocation9_spill] sm:$0xff] }
0x172f   :  { %8833 = vmatpush3.bf16.msra.mxu1 %v11821_v36  ;;  %8145 = vmatprep.mubr.msk.f32.mxu1 %vm9666_vm0, %v11805_v6 }
0x1730   :  { %8135 = vmatmul.mubr.msk.f32.vlgmr.msra.gmra.mrb[26].mxu0 %vm154_vm1, %v2390_v27  ;;  %8834 = vmatprep.subr.bf16.mxu1 %v11806_v15 }
0x1731   :  { %8839 = vmatpush3.bf16.msra.mxu0 %v11822_v41  ;;  %8156 = vmatprep.mubr.msk.f32.mxu0 %vm9666_vm0, %v11805_v6 }
0x1732   :  { %8840 = vmatprep.subr.bf16.mxu0 %v11806_v15 }
0x1733   :  { %8836 = vmatpush3.bf16.msra.mxu1 %v11823_v3 }
0x1734   :  { %8843 = vmatprep.subr.bf16.mxu1 %v11806_v15 }
0x1735   :  { %8842 = vmatpush3.bf16.msra.mxu0 %v11824_v52 }
0x1736   :  { %8855 = vmatprep.subr.bf16.mxu0 %v11806_v15 }
0x1801   :  { %v2459_v16 = vpop.f32.mrb[12].mxu1 }
0x1802   :  { %v8125_v26 = vpop.f32.mrb[13].mxu1  ;;  %v2535_v9 = vmul.f32 0.35355338, %v2459_v16 }
0x1803   :  { %v2531_v47 = vpop.f32.mrb[26].mxu0 }
0x1804   :  { %v2536_v25 = vmul.f32 0.35355338, %v2531_v47  ;;  %v8136_v55 = vpop.f32.mrb[27].mxu0  ;;  %v2537_v19 = vadd.f32 %v10601_v48, %v2535_v9 }
0x1806   :  { %v2538_v27 = vadd.f32 %v2536_v25, %v11825_v42 }
0x1808   :  { %v2541_v30 = vrot.slane %v2538_v27, 7 }
0x180a   :  { %v2542_v52 = vsel %vm405_vm2, %v2541_v30, %v2537_v19 }
0x180b   :  { %v2604_v3 = vsel %vm470_vm5, %v2542_v52, -inf  ;;  %v2573_v26 = vsel %vm438_vm4, %v2542_v52, -inf  ;;  %v2635_v16 = vsel %vm502_vm3, %v2542_v52, -inf  ;;  %v2544_v47 = vsel %vm408_vm6, %v2542_v52, -inf }
0x180c   :  { %2605 = vmax.xlane.f32.xlu1 %v2604_v3  ;;  %2574 = vmax.xlane.f32.xlu0 %v2573_v26 }
0x1810   :  { %2636 = vmax.xlane.f32.xlu0 %v2635_v16 }
0x1814   :  { %2545 = vmax.xlane.f32.xlu0 %v2544_v47 }
0x1899   :  { %v2606_v25 = vpop.xlane.xlu1 %2605  ;;  %v2575_v55 = vpop.xlane.xlu0 %2574 }
0x189a   :  { %v2608_v42 = vrot.slane %v2606_v25, 1  ;;  %v2611_v41 = vsub.f32 %v2537_v19, %v2606_v25  ;;  %v2577_v9 = vrot.slane %v2575_v55, 1  ;;  %v2580_v48 = vsub.f32 %v2537_v19, %v2575_v55 }
0x189c   :  { %v2612_v36 = vsub.f32 %v2538_v27, %v2608_v42  ;;  %v2581_v30 = vsub.f32 %v2538_v27, %v2577_v9  ;;  %v2613_v56 = vmul.f32 1.442695, %v2611_v41  ;;  %v2582_v26 = vmul.f32 1.442695, %v2580_v48 }
0x189d   :  { %v2637_v33 = vpop.xlane.xlu0 %2636 }
0x189e   :  { %v2615_v22 = vmul.f32 1.442695, %v2612_v36  ;;  %v2584_v7 = vmul.f32 1.442695, %v2581_v30  ;;  %v2639_v3 = vrot.slane %v2637_v33, 1  ;;  %v2642_v4 = vsub.f32 %v2537_v19, %v2637_v33 }
0x18a0   :  { %9394 = vpow2.f32 %v2615_v22  ;;  %v2643_v16 = vsub.f32 %v2538_v27, %v2639_v3  ;;  %v2644_v52 = vmul.f32 1.442695, %v2642_v4 }
0x18a1   :  { %9396 = vpow2.f32 %v2584_v7  ;;  %v2546_v30 = vpop.xlane.xlu0 %2545 }
0x18a2   :  { %9398 = vpow2.f32 %v2613_v56  ;;  %v2646_v47 = vmul.f32 1.442695, %v2643_v16  ;;  %v2548_v3 = vrot.slane %v2546_v30, 1 }
0x18a3   :  { %9400 = vpow2.f32 %v2582_v26 }
0x18a4   :  { %9402 = vpow2.f32 %v2646_v47  ;;  %v2552_v26 = vsub.f32 %v2538_v27, %v2548_v3 }
0x18a5   :  { %9404 = vpow2.f32 %v2644_v52  ;;  %v2551_v52 = vsub.f32 %v2537_v19, %v2546_v30 }
0x18a6   :  { %v2555_v16 = vmul.f32 1.442695, %v2552_v26 }
0x18a7   :  { %v2553_v47 = vmul.f32 1.442695, %v2551_v52 }
0x18a8   :  { %9406 = vpow2.f32 %v2555_v16 }
0x18a9   :  { %9408 = vpow2.f32 %v2553_v47 }
0x18aa   :  { %v9395_v25 = vpop.eup %9394 }
0x18ab   :  { %v9397_v55 = vpop.eup %9396  ;;  %v2619_v42 = vrot.slane %v9395_v25, 7 }
0x18ac   :  { %v10609_v9 = vpop.eup %9398  ;;  %v2588_v41 = vrot.slane %v9397_v55, 7 }
0x18ad   :  { %v9401_v36 = vpop.eup %9400  ;;  %v2620_v48 = vsel %vm405_vm2, %v2619_v42, %v10609_v9 }
0x18ae   :  { %v10613_v33 = vpop.eup %9402  ;;  %2621 = vrot.lane.b32.xlu1 %v2620_v48, %s9670_s28  ;;  %v2589_v4 = vsel %vm405_vm2, %v2588_v41, %v9401_v36 }
0x18af   :  { %2590 = vrot.lane.b32.xlu0 %v2589_v4, %s9669_s27  ;;  %v2650_v7 = vrot.slane %v10613_v33, 7  ;;  %v10619_v22 = vpop.eup %9404 }
0x18b1   :  { %v2651_v56 = vsel %vm405_vm2, %v2650_v7, %v10619_v22 }
0x18b2   :  { %2652 = vrot.lane.b32.xlu1 %v2651_v56, %s9671_s29  ;;  %v9407_v42 = vpop.eup %9406 }
0x18b3   :  { %v2559_v41 = vrot.slane %v9407_v42, 7  ;;  %v9409_v48 = vpop.eup %9408 }
0x18b5   :  { %v2560_v4 = vsel %vm405_vm2, %v2559_v41, %v9409_v48 }
0x18b6   :  { %v2562_v32 = vsel %vm408_vm6, %v2560_v4, 0.0 }
0x18d6   :  { %2563 = vadd.xlane.f32.xlu1 %v2562_v32 }
0x1920   :  { %v2622_v10 = vpop.permute.xlu1 %2621 }
0x1921   :  { %v2591_v7 = vpop.permute.xlu0 %2590  ;;  %v2624_v27 = vsel %vm408_vm6, %v2622_v10, 0.0 }
0x1922   :  { %v2593_v13 = vsel %vm408_vm6, %v2591_v7, 0.0 }
0x1923   :  { %2594 = vadd.xlane.f32.xlu0 %v2593_v13 }
0x1924   :  { %v2653_v56 = vpop.permute.xlu1 %2652 }
0x1925   :  { %v2655_v19 = vsel %vm408_vm6, %v2653_v56, 0.0 }
0x1927   :  { %2625 = vadd.xlane.f32.xlu0 %v2624_v27 }
0x192b   :  { %2656 = vadd.xlane.f32.xlu0 %v2655_v19 }
0x1963   :  { %v2564_v30 = vpop.xlane.xlu1 %2563 }
0x1964   :  { %v2566_v3 = vrot.slane %v2564_v30, 1 }
0x1966   :  { %9410 = vrcp.f32 %v2566_v3 }
0x1970   :  { %v9411_v10 = vpop.eup %9410 }
0x1971   :  { %v10631_v27 = vmul.f32 %v9411_v10, %v9407_v42 }
0x1973   :  { %11828 = vst [vmem:[#allocation36_spill] sm:$0xff] %v10631_v27 }
0x19b0   :  { %v2595_v26 = vpop.xlane.xlu0 %2594 }
0x19b1   :  { %v2597_v16 = vrot.slane %v2595_v26, 1 }
0x19b3   :  { %9412 = vrcp.f32 %v2597_v16 }
0x19b4   :  { %v2626_v52 = vpop.xlane.xlu0 %2625  ;;  %9414 = vrcp.f32 %v2595_v26 }
0x19b5   :  { %v2628_v32 = vrot.slane %v2626_v52, 1 }
0x19b7   :  { %9416 = vrcp.f32 %v2628_v32 }
0x19b8   :  { %9418 = vrcp.f32 %v2626_v52  ;;  %v2657_v47 = vpop.xlane.xlu0 %2656 }
0x19b9   :  { %9420 = vrcp.f32 %v2564_v30  ;;  %v2659_v13 = vrot.slane %v2657_v47, 1  ;;  %v2668_v30 = vrot.slane %v10631_v27, 7 }
0x19ba   :  { %9422 = vrcp.f32 %v2657_v47 }
0x19bb   :  { %9424 = vrcp.f32 %v2659_v13 }
0x19bd   :  { %v9413_v41 = vpop.eup %9412 }
0x19be   :  { %v10629_v4 = vmul.f32 %v9413_v41, %v9397_v55  ;;  %v9415_v7 = vpop.eup %9414 }
0x19bf   :  { %v10637_v32 = vmul.f32 %v9415_v7, %v9401_v36 }
0x19c0   :  { %11827 = vst [vmem:[#allocation35_spill] sm:$0xff] %v10629_v4  ;;  %v2673_v3 = vrot.slane %v10629_v4, 7 }
0x19c1   :  { %v9417_v56 = vpop.eup %9416  ;;  %11830 = vst [vmem:[#allocation38_spill] sm:$0xff] %v10637_v32 }
0x19c2   :  { %v9419_v19 = vpop.eup %9418  ;;  %v10634_v16 = vmul.f32 %v9417_v56, %v9395_v25  ;;  %v2674_v10 = vsel %vm405_vm2, %v2673_v3, %v10637_v32 }
0x19c3   :  { %v9421_v26 = vpop.eup %9420  ;;  %v10641_v55 = vmul.f32 %v9419_v19, %v10609_v9 }
0x19c4   :  { %11829 = vst [vmem:[#allocation37_spill] sm:$0xff] %v10634_v16  ;;  %v9423_v52 = vpop.eup %9422  ;;  %v2678_v47 = vrot.slane %v10634_v16, 7  ;;  %v10643_v42 = vmul.f32 %v9421_v26, %v9409_v48  ;;  %v11850_v16 = vld [vmem:[#allocation9_spill] sm:$0xff] }
0x19c5   :  { %v9425_v13 = vpop.eup %9424  ;;  %11831 = vst [vmem:[#allocation39_spill] sm:$0xff] %v10641_v55  ;;  %v10655_v7 = vmul.f32 %v9423_v52, %v10619_v22 }
0x19c6   :  { %11832 = vst [vmem:[#allocation40_spill] sm:$0xff] %v10643_v42  ;;  %v10648_v25 = vmul.f32 %v9425_v13, %v10613_v33  ;;  %v2679_v41 = vsel %vm405_vm2, %v2678_v47, %v10641_v55  ;;  %v2669_v36 = vsel %vm405_vm2, %v2668_v30, %v10643_v42 }
0x19c7   :  { %11834 = vst [vmem:[#allocation42_spill] sm:$0xff] %v10655_v7  ;;  %v2686_v48 = vsel %vm554_vm7, %v2669_v36, %v2674_v10 }
0x19c8   :  { %11833 = vst [vmem:[#allocation41_spill] sm:$0xff] %v10648_v25  ;;  %v2683_v9 = vrot.slane %v10648_v25, 7  ;;  %v2687_v19 = vsel %vm556_vm8, %v2686_v48, %v2679_v41 }
0x19ca   :  { %v2684_v56 = vsel %vm405_vm2, %v2683_v9, %v10655_v7  ;;  %v11851_v7 = vld [vmem:[#allocation34_spill] sm:$0xff] }
0x19cb   :  { %v2688_v33 = vsel %vm558_vm9, %v2687_v19, %v2684_v56 }
0x19cc   :  { %v2696_v3 = vrot.slane %v2688_v33, %v9832_v20 }
0x19ce   :  { %v2704_v26 = vrot.slane %v2696_v3, %v9832_v20  ;;  %v2697_v47 = vcombine.high %v2696_v3, %v2696_v3 }
0x19d0   :  { %8146 = vmatmul.mubr.msk.f32.vlgmr.msra.gmra.mrb[14].mxu1 %vm154_vm1, %v2704_v26  ;;  %v2711_v22 = vrot.slane %v2697_v47, %v9832_v20 }
0x19d1   :  { %8845 = vmatpush3.bf16.msra.mxu1 %v10434_v37  ;;  %8175 = vmatprep.mubr.msk.f32.mxu1 %vm9666_vm0, %v11805_v6 }
0x19d2   :  { %8157 = vmatmul.mubr.msk.f32.vlgmr.msra.gmra.mrb[28].mxu0 %vm154_vm1, %v2711_v22  ;;  %8846 = vmatprep.subr.bf16.mxu1 %v11806_v15 }
0x19d3   :  { %8857 = vmatpush3.bf16.msra.mxu0 %v10414_v46  ;;  %8182 = vmatprep.mubr.msk.f32.mxu0 %vm9666_vm0, %v11805_v6 }
0x19d4   :  { %8859 = vmatprep.subr.bf16.mxu0 %v10011_v49 }
0x19d5   :  { %8848 = vmatpush3.bf16.msra.mxu1 %v10440_v35 }
0x19d6   :  { %8849 = vmatprep.subr.bf16.mxu1 %v11806_v15 }
0x19d9   :  { %8851 = vmatpush3.bf16.msra.mxu1 %v10450_v23 }
0x19da   :  { %8852 = vmatprep.subr.bf16.mxu1 %v11806_v15 }
0x19dd   :  { %8854 = vmatpush3.bf16.msra.mxu1 %v10460_v24 }
0x19de   :  { %8898 = vmatprep.subr.bf16.mxu1 %v11806_v15 }
0x1aa3   :  { %v2780_v52 = vpop.f32.mrb[14].mxu1 }
0x1aa4   :  { %v8147_v30 = vpop.f32.mrb[15].mxu1 }
0x1aa5   :  { %v2852_v13 = vpop.f32.mrb[28].mxu0 }
0x1aa6   :  { %v2886_v10 = vrot.slane %v2852_v13, 7  ;;  %v8158_v41 = vpop.f32.mrb[29].mxu0 }
0x1aa8   :  { %v2887_v36 = vsel %vm405_vm2, %v2886_v10, %v2780_v52 }
0x1aa9   :  { %2888 = vrot.lane.b32.xlu1 %v2887_v36, %s9673_s20 }
0x1b1b   :  { %v2889_v9 = vpop.permute.xlu1 %2888 }
0x1b1c   :  { %v2891_v48 = vsel %vm154_vm1, %v10577_v38, %v2889_v9 }
0x1b1d   :  { %8176 = vmatmul.mubr.msk.f32.vlgmr.msra.gmra.mrb[16].mxu1 %vm798_vm10, %v2891_v48 }
0x1b1e   :  { %8900 = vmatpush3.bf16.msra.mxu1 %v10229_v60  ;;  %8193 = vmatprep.mubr.msk.f32.mxu1 %vm9666_vm0, %v11805_v6 }
0x1b1f   :  { %8901 = vmatprep.subr.bf16.mxu1 %v11806_v15 }
0x1b22   :  { %8903 = vmatpush3.bf16.msra.mxu1 %v10235_v0 }
0x1b23   :  { %8904 = vmatprep.subr.bf16.mxu1 %v11806_v15 }
0x1b25   :  { %8194 = vmatmul.mubr.msk.f32.vlgmr.msra.gmra.mrb[18].mxu1 %vm154_vm1, %v10567_v59 }
0x1b26   :  { %8906 = vmatpush3.bf16.msra.mxu1 %v10248_v8  ;;  %8212 = vmatprep.mubr.msk.f32.mxu1 %vm9666_vm0, %v11805_v6 }
0x1b27   :  { %8907 = vmatprep.subr.bf16.mxu1 %v11806_v15 }
0x1b2a   :  { %8909 = vmatpush3.bf16.msra.mxu1 %v10259_v43 }
0x1b2b   :  { %8910 = vmatprep.subr.bf16.mxu1 %v11806_v15 }
0x1b2e   :  { %8912 = vmatpush3.bf16.msra.mxu1 %v10271_v50 }
0x1b2f   :  { %8913 = vmatprep.subr.bf16.mxu1 %v11806_v15 }
0x1b32   :  { %8915 = vmatpush3.bf16.msra.mxu1 %v10281_v61 }
0x1b33   :  { %8916 = vmatprep.subr.bf16.mxu1 %v11806_v15 }
0x1bf0   :  { %v2961_v59 = vpop.f32.mrb[16].mxu1 }
0x1bf1   :  { %v2962_v38 = vadd.f32 %v10491_v17, %v2961_v59  ;;  %v8177_v56 = vpop.f32.mrb[17].mxu1 }
0x1bf3   :  { %2966 = vst.msk [vmem:[#allocation2 + $0x2] sm:$0x3] %vm1845_vm12, %v2962_v38  ;;  %v2974_v19 = vsel %vm1845_vm12, %v2962_v38, -inf }
0x1bf4   :  { %2975 = vmax.xlane.f32.xlu0 %v2974_v19 }
0x1bf8   :  { %v10708_v33 = vpop.f32.mrb[18].mxu1 }
0x1bf9   :  { %v8195_v3 = vpop.f32.mrb[19].mxu1 }
0x1c81   :  { %v2976_v26 = vpop.xlane.xlu0 %2975 }
0x1c82   :  { %vm2977_vm13 = vcmp.ge.f32.partialorder %v2962_v38, %v2976_v26 }
0x1c83   :  { %v2978_v47 = vsel %vm2977_vm13, %v10499_v51, 16 }
0x1c84   :  { %v2979_v22 = vsel %vm1845_vm12, %v2978_v47, 2147483647 }
0x1c85   :  { %v2981_v52 = vshra.s32 %v2979_v22, 16  ;;  %v2980_v13 = vand.u32 65535, %v2979_v22  ;;  %v11835_v22 = vld [vmem:[#allocation22_spill] sm:$0xff] }
0x1c87   :  { %v2983_v30 = vcvt.s32.f32 %v2981_v52  ;;  %v2982_v10 = vcvt.s32.f32 %v2980_v13 }
0x1c89   :  { %2984 = vmin.xlane.f32.xlu0 %v2983_v30 }
0x1d16   :  { %v2985_v17 = vpop.xlane.xlu0 %2984 }
0x1d17   :  { %vm2986_vm14 = vcmp.eq.f32.partialorder %v2983_v30, %v2985_v17  ;;  %v2991_v9 = vcvt.f32.s32 %v2985_v17  ;;  %v11836_v17 = vld [vmem:[#allocation23_spill] sm:$0xff] }
0x1d18   :  { %v2987_v41 = vsel %vm2986_vm14, %v2982_v10, inf }
0x1d19   :  { %2988 = vmin.xlane.f32.xlu0 %v2987_v41  ;;  %v2992_v59 = vshll.u32 %v2991_v9, 16 }
0x1d2f   :  { %3070 = vrot.lane.b32.xlu0 %v2887_v36, %s9672_s21 }
0x1da6   :  { %v2989_v48 = vpop.xlane.xlu0 %2988 }
0x1da7   :  { %v2990_v56 = vcvt.f32.s32 %v2989_v48 }
0x1da9   :  { %v2993_v38 = vadd.s32 %v2992_v59, %v2990_v56 }
0x1dab   :  { %vm2994_vm15 = vcmp.eq.s32.totalorder %v10499_v51, %v2993_v38 }
0x1dac   :  { %v7516_v19 = vsel %vm2994_vm15, 1.0, %v11805_v6 }
0x1dad   :  { %8183 = vmatmul.mubr.msk.f32.vlgmr.msra.gmra.mrb[30].mxu0 %vm556_vm8, %v7516_v19 }
0x1dae   :  { %8861 = vmatpush1.bf16.msra.mxu0 %v10022_v54  ;;  %3138 = vmatprep.mubr.f32.mxu0 %v11805_v6 }
0x1daf   :  { %8863 = vmatprep.subr.bf16.mxu0 %v10024_v57 }
0x1db2   :  { %8865 = vmatpush1.bf16.msra.mxu0 %v10040_v62 }
0x1db3   :  { %8867 = vmatprep.subr.bf16.mxu0 %v10043_v63 }
0x1db6   :  { %8869 = vmatpush1.bf16.msra.mxu0 %v10058_v18 }
0x1db7   :  { %8871 = vmatprep.subr.bf16.mxu0 %v10061_v21 }
0x1dba   :  { %8873 = vmatpush1.bf16.msra.mxu0 %v10076_v5 }
0x1dbb   :  { %8875 = vmatprep.subr.bf16.mxu0 %v10079_v31 }
0x1dbd   :  { %7518 = vmatmul.mubr.msk.f32.vlgmr.msra.gmra.mrb[32].mxu0 %vm798_vm10, %v10547_v29  ;;  %v3071_v29 = vpop.permute.xlu0 %3070 }
0x1dbe   :  { %8877 = vmatpush1.bf16.msra.mxu0 %v10097_v39  ;;  %3212 = vmatprep.mubr.f32.mxu0 %v11805_v6 }
0x1dbf   :  { %8879 = vmatprep.subr.bf16.mxu0 %v10100_v40 }
0x1dc2   :  { %8881 = vmatpush1.bf16.msra.mxu0 %v10116_v44 }
0x1dc3   :  { %8883 = vmatprep.subr.bf16.mxu0 %v10120_v45 }
0x1dc6   :  { %8885 = vmatpush1.bf16.msra.mxu0 %v10135_v53 }
0x1dc7   :  { %8887 = vmatprep.subr.bf16.mxu0 %v10138_v58 }
0x1dca   :  { %8889 = vmatpush1.bf16.msra.mxu0 %v10153_v1 }
0x1dcb   :  { %8891 = vmatprep.subr.bf16.mxu0 %v10156_v2 }
0x1dce   :  { %8893 = vmatpush1.bf16.msra.mxu0 %v10171_v28 }
0x1dcf   :  { %8895 = vmatprep.subr.bf16.mxu0 %v10174_v12 }
0x1dd2   :  { %8897 = vmatpush1.bf16.msra.mxu0 %v10183_v34 }
0x1dd3   :  { %8922 = vmatprep.subr.bf16.mxu0 %v11806_v15 }
0x1e80   :  { %v3066_v36 = vpop.f32.mrb[30].mxu0 }
0x1e81   :  { %v3073_v3 = vsel %vm798_vm10, %v3066_v36, %v3071_v29  ;;  %v8184_v26 = vpop.f32.mrb[31].mxu0  ;;  %v11837_v36 = vld [vmem:[#allocation33_spill] sm:$0xff] }
0x1e82   :  { %7519 = vmatmul.mubr.msk.f32.vlgmr.msra.gmra.mrb[32].mxu0 %vm873_vm11, %v3073_v3 }
0x1e83   :  { %8924 = vmatpush3.bf16.msra.mxu0 %v9810_v11  ;;  %8234 = vmatprep.mubr.msk.f32.mxu0 %vm9666_vm0, %v11805_v6 }
0x1e84   :  { %8925 = vmatprep.subr.bf16.mxu0 %v11806_v15 }
0x1e87   :  { %8927 = vmatpush3.bf16.msra.mxu0 %v9824_v14 }
0x1e88   :  { %8934 = vmatprep.subr.bf16.mxu0 %v11806_v15 }
0x1f55   :  { %v3214_v47 = vpop.f32.mrb[32].mxu0 }
0x1f56   :  { %v3219_v52 = vadd.f32 %v3214_v47, %v11835_v22  ;;  %v3216_v30 = vpop.f32.mrb[33].mxu0 }
0x1f57   :  { %v3220_v10 = vadd.f32 %v3216_v30, %v11836_v17 }
0x1f58   :  { %v7520_v13 = vmul.f32 -1.442695, %v3219_v52 }
0x1f59   :  { %v7521_v38 = vmul.f32 -1.442695, %v3220_v10 }
0x1f5a   :  { %9426 = vpow2.f32 %v7520_v13 }
0x1f5b   :  { %9428 = vtanh.f32 %v3220_v10  ;;  %v11839_v10 = vld [vmem:[#allocation5_spill] sm:$0xff] }
0x1f64   :  { %v9427_v41 = vpop.eup %9426 }
0x1f65   :  { %v3224_v9 = vadd.f32 1.0, %v9427_v41  ;;  %v9429_v48 = vpop.eup %9428 }
0x1f67   :  { %9430 = vrcp.f32 %v3224_v9  ;;  %v11840_v9 = vld [vmem:[#allocation6_spill] sm:$0xff] }
0x1f68   :  { %9432 = vpow2.f32 %v7521_v38  ;;  %v10770_v38 = vld [vmem:[%s11684_s12] ss:$0 sm:$0xff] }
0x1f69   :  { %11841 = vst [vmem:[#allocation43_spill] sm:$0xff] %v10770_v38 }
0x1f71   :  { %v9431_v59 = vpop.eup %9430 }
0x1f72   :  { %v3235_v56 = vmul.f32 %v9431_v59, %v9429_v48  ;;  %v9433_v19 = vpop.eup %9432  ;;  %v3234_v3 = vmul.f32 %v9431_v59, %v11837_v36 }
0x1f73   :  { %v3231_v29 = vadd.f32 1.0, %v9433_v19 }
0x1f74   :  { %3237 = vrot.lane.b32.xlu1 %v3235_v56, %s9672_s21 }
0x1f75   :  { %9434 = vrcp.f32 %v3231_v29 }
0x1f7f   :  { %v9435_v52 = vpop.eup %9434 }
0x1fe6   :  { %v3238_v26 = vpop.permute.xlu1 %3237 }
0x1fe7   :  { %v10752_v47 = vadd.f32 %v3238_v26, %v3234_v3 }
0x1fe9   :  { %11838 = vst [vmem:[#allocation33_spill] sm:$0xff] %v10752_v47  ;;  %9436 = vtanh.f32 %v10752_v47 }
0x1ff3   :  { %v9437_v30 = vpop.eup %9436 }
0x1ff4   :  { %v3242_v13 = vmul.f32 %v9437_v30, %v9435_v52 }
0x1ff6   :  { %3314 = vrot.lane.b32.xlu1 %v3242_v13, %s9672_s21  ;;  %v11842_v13 = vld [vmem:[#allocation24_spill] sm:$0xff] }
0x2068   :  { %v10756_v41 = vpop.permute.xlu1 %3314 }
0x2069   :  { %8213 = vmatmul.mubr.msk.f32.vlgmr.msra.gmra.mrb[20].mxu1 %vm798_vm10, %v10756_v41 }
0x206a   :  { %8918 = vmatpush3.bf16.msra.mxu1 %v11839_v10  ;;  %8223 = vmatprep.mubr.msk.f32.mxu1 %vm9666_vm0, %v11805_v6 }
0x206b   :  { %8919 = vmatprep.subr.bf16.mxu1 %v11806_v15 }
0x206e   :  { %8921 = vmatpush3.bf16.msra.mxu1 %v11840_v9 }
0x206f   :  { %8928 = vmatprep.subr.bf16.mxu1 %v11806_v15 }
0x213c   :  { %v3384_v48 = vpop.f32.mrb[20].mxu1 }
0x213d   :  { %v3385_v59 = vadd.f32 %v3384_v48, %v10708_v33  ;;  %v8214_v56 = vpop.f32.mrb[21].mxu1 }
0x213f   :  { %v3388_v19 = vadd.f32 %v10770_v38, %v3385_v59 }
0x2141   :  { %9438 = vtanh.f32 %v3388_v19  ;;  %v7524_v36 = vmul.f32 -1.442695, %v3388_v19 }
0x2143   :  { %9440 = vpow2.f32 %v7524_v36 }
0x214b   :  { %v9439_v29 = vpop.eup %9438 }
0x214c   :  { %3398 = vrot.lane.b32.xlu1 %v9439_v29, %s9672_s21 }
0x214d   :  { %v9441_v3 = vpop.eup %9440 }
0x214e   :  { %v3392_v26 = vadd.f32 1.0, %v9441_v3  ;;  %v11844_v3 = vld [vmem:[#allocation7_spill] sm:$0xff] }
0x2150   :  { %9442 = vrcp.f32 %v3392_v26  ;;  %v11845_v26 = vld [vmem:[#allocation8_spill] sm:$0xff] }
0x215a   :  { %v9443_v52 = vpop.eup %9442 }
0x215b   :  { %v3396_v48 = vmul.f32 %v9443_v52, %v11842_v13 }
0x21be   :  { %v3399_v30 = vpop.permute.xlu1 %3398 }
0x21bf   :  { %v3401_v33 = vmul.f32 %v9443_v52, %v3399_v30 }
0x21c1   :  { %3403 = vrot.lane.b32.xlu1 %v3401_v33, %s9673_s20 }
0x2233   :  { %v3404_v56 = vpop.permute.xlu1 %3403 }
0x2234   :  { %v10776_v27 = vadd.f32 %v3404_v56, %v3396_v48 }
0x2236   :  { %11843 = vst [vmem:[#allocation24_spill] sm:$0xff] %v10776_v27  ;;  %9444 = vtanh.f32 %v10776_v27 }
0x2240   :  { %v9445_v59 = vpop.eup %9444 }
0x2241   :  { %3409 = vrot.lane.b32.xlu1 %v9445_v59, %s9672_s21  ;;  %v11846_v59 = vld [vmem:[#allocation10_spill] sm:$0xff] }
0x22b3   :  { %v3410_v19 = vpop.permute.xlu1 %3409 }
0x22b4   :  { %v3412_v29 = vmul.f32 %v9443_v52, %v3410_v19  ;;  %v11847_v19 = vld [vmem:[#allocation11_spill] sm:$0xff] }
0x22b6   :  { %3414 = vrot.lane.b32.xlu1 %v3412_v29, %s9673_s20  ;;  %v11848_v29 = vld [vmem:[#allocation12_spill] sm:$0xff] }
0x2328   :  { %v10781_v36 = vpop.permute.xlu1 %3414 }
0x2329   :  { %8224 = vmatmul.mubr.msk.f32.vlgmr.msra.gmra.mrb[22].mxu1 %vm154_vm1, %v10781_v36 }
0x232a   :  { %8930 = vmatpush3.bf16.msra.mxu1 %v11844_v3  ;;  %8245 = vmatprep.mubr.msk.f32.mxu1 %vm9666_vm0, %v11805_v6 }
0x232b   :  { %8931 = vmatprep.subr.bf16.mxu1 %v11806_v15 }
0x232e   :  { %8933 = vmatpush3.bf16.msra.mxu1 %v11845_v26 }
0x232f   :  { %8940 = vmatprep.subr.bf16.mxu1 %v11806_v15 }
0x23fc   :  { %v10791_v30 = vpop.f32.mrb[22].mxu1 }
0x23fd   :  { %v3495_v52 = vrot.slane %v10791_v30, %v9832_v20  ;;  %v8225_v33 = vpop.f32.mrb[23].mxu1 }
0x23ff   :  { %v3496_v13 = vcombine.high %v3495_v52, %v3495_v52  ;;  %v3503_v48 = vrot.slane %v3495_v52, %v9832_v20  ;;  %v11849_v52 = vld [vmem:[#allocation13_spill] sm:$0xff] }
0x2401   :  { %v3510_v56 = vrot.slane %v3496_v13, %v9832_v20  ;;  %8235 = vmatmul.mubr.msk.f32.vlgmr.msra.gmra.mrb[34].mxu0 %vm154_vm1, %v3503_v48 }
0x2402   :  { %8936 = vmatpush3.bf16.msra.mxu0 %v11846_v59  ;;  %8256 = vmatprep.mubr.msk.f32.mxu0 %vm9666_vm0, %v11805_v6 }
0x2403   :  { %8246 = vmatmul.mubr.msk.f32.vlgmr.msra.gmra.mrb[24].mxu1 %vm154_vm1, %v3510_v56  ;;  %8937 = vmatprep.subr.bf16.mxu0 %v11806_v15 }
0x2404   :  { %8942 = vmatpush3.bf16.msra.mxu1 %v11847_v19  ;;  %8267 = vmatprep.mubr.msk.f32.mxu1 %vm9666_vm0, %v11805_v6 }
0x2405   :  { %8943 = vmatprep.subr.bf16.mxu1 %v11806_v15 }
0x2406   :  { %8939 = vmatpush3.bf16.msra.mxu0 %v11848_v29 }
0x2407   :  { %8946 = vmatprep.subr.bf16.mxu0 %v11806_v15 }
0x2408   :  { %8945 = vmatpush3.bf16.msra.mxu1 %v11849_v52 }
0x2409   :  { %8958 = vmatprep.subr.bf16.mxu1 %v11806_v15 }
0x24d4   :  { %v3579_v33 = vpop.f32.mrb[34].mxu0 }
0x24d5   :  { %v8236_v13 = vpop.f32.mrb[35].mxu0  ;;  %v3655_v56 = vmul.f32 0.35355338, %v3579_v33 }
0x24d6   :  { %v3651_v48 = vpop.f32.mrb[24].mxu1 }
0x24d7   :  { %v3656_v42 = vmul.f32 0.35355338, %v3651_v48  ;;  %v8247_v25 = vpop.f32.mrb[25].mxu1  ;;  %v3657_v55 = vadd.f32 %v11851_v7, %v3655_v56 }
0x24d9   :  { %v3658_v4 = vadd.f32 %v3656_v42, %v11850_v16 }
0x24db   :  { %v3661_v32 = vrot.slane %v3658_v4, 7 }
0x24dd   :  { %v3662_v19 = vsel %vm405_vm2, %v3661_v32, %v3657_v55 }
0x24de   :  { %v3724_v29 = vsel %vm470_vm5, %v3662_v19, -inf  ;;  %v3693_v59 = vsel %vm438_vm4, %v3662_v19, -inf  ;;  %v3755_v52 = vsel %vm502_vm3, %v3662_v19, -inf  ;;  %v3664_v33 = vsel %vm408_vm6, %v3662_v19, -inf }
0x24df   :  { %3725 = vmax.xlane.f32.xlu1 %v3724_v29  ;;  %3694 = vmax.xlane.f32.xlu0 %v3693_v59 }
0x24e3   :  { %3756 = vmax.xlane.f32.xlu0 %v3755_v52 }
0x24e7   :  { %3665 = vmax.xlane.f32.xlu0 %v3664_v33 }
0x256c   :  { %v3726_v25 = vpop.xlane.xlu1 %3725  ;;  %v3695_v13 = vpop.xlane.xlu0 %3694 }
0x256d   :  { %v3728_v42 = vrot.slane %v3726_v25, 1  ;;  %v3731_v48 = vsub.f32 %v3657_v55, %v3726_v25  ;;  %v3697_v7 = vrot.slane %v3695_v13, 1  ;;  %v3700_v56 = vsub.f32 %v3657_v55, %v3695_v13 }
0x256f   :  { %v3732_v16 = vsub.f32 %v3658_v4, %v3728_v42  ;;  %v3701_v32 = vsub.f32 %v3658_v4, %v3697_v7  ;;  %v3733_v26 = vmul.f32 1.442695, %v3731_v48  ;;  %v3702_v59 = vmul.f32 1.442695, %v3700_v56 }
0x2570   :  { %v3757_v3 = vpop.xlane.xlu0 %3756 }
0x2571   :  { %v3735_v27 = vmul.f32 1.442695, %v3732_v16  ;;  %v3704_v38 = vmul.f32 1.442695, %v3701_v32  ;;  %v3759_v29 = vrot.slane %v3757_v3, 1  ;;  %v3762_v9 = vsub.f32 %v3657_v55, %v3757_v3 }
0x2573   :  { %9446 = vpow2.f32 %v3735_v27  ;;  %v3763_v52 = vsub.f32 %v3658_v4, %v3759_v29  ;;  %v3764_v19 = vmul.f32 1.442695, %v3762_v9 }
0x2574   :  { %9448 = vpow2.f32 %v3704_v38  ;;  %v3666_v32 = vpop.xlane.xlu0 %3665 }
0x2575   :  { %9450 = vpow2.f32 %v3733_v26  ;;  %v3766_v33 = vmul.f32 1.442695, %v3763_v52  ;;  %v3668_v29 = vrot.slane %v3666_v32, 1 }
0x2576   :  { %9452 = vpow2.f32 %v3702_v59 }
0x2577   :  { %9454 = vpow2.f32 %v3766_v33  ;;  %v3672_v59 = vsub.f32 %v3658_v4, %v3668_v29 }
0x2578   :  { %9456 = vpow2.f32 %v3764_v19  ;;  %v3671_v19 = vsub.f32 %v3657_v55, %v3666_v32 }
0x2579   :  { %v3675_v52 = vmul.f32 1.442695, %v3672_v59 }
0x257a   :  { %v3673_v33 = vmul.f32 1.442695, %v3671_v19 }
0x257b   :  { %9458 = vpow2.f32 %v3675_v52 }
0x257c   :  { %9460 = vpow2.f32 %v3673_v33 }
0x257d   :  { %v9447_v25 = vpop.eup %9446 }
0x257e   :  { %v9449_v13 = vpop.eup %9448  ;;  %v3739_v42 = vrot.slane %v9447_v25, 7 }
0x257f   :  { %v10818_v7 = vpop.eup %9450  ;;  %v3708_v48 = vrot.slane %v9449_v13, 7 }
0x2580   :  { %v9453_v16 = vpop.eup %9452  ;;  %v3740_v56 = vsel %vm405_vm2, %v3739_v42, %v10818_v7 }
0x2581   :  { %v10822_v3 = vpop.eup %9454  ;;  %3741 = vrot.lane.b32.xlu1 %v3740_v56, %s9670_s28  ;;  %v3709_v27 = vsel %vm405_vm2, %v3708_v48, %v9453_v16 }
0x2582   :  { %3710 = vrot.lane.b32.xlu0 %v3709_v27, %s9669_s27  ;;  %v3770_v9 = vrot.slane %v10822_v3, 7  ;;  %v10828_v38 = vpop.eup %9456 }
0x2584   :  { %v3771_v26 = vsel %vm405_vm2, %v3770_v9, %v10828_v38 }
0x2585   :  { %3772 = vrot.lane.b32.xlu1 %v3771_v26, %s9671_s29  ;;  %v9459_v42 = vpop.eup %9458 }
0x2586   :  { %v3679_v48 = vrot.slane %v9459_v42, 7  ;;  %v9461_v56 = vpop.eup %9460 }
0x2588   :  { %v3680_v27 = vsel %vm405_vm2, %v3679_v48, %v9461_v56 }
0x2589   :  { %v3682_v10 = vsel %vm408_vm6, %v3680_v27, 0.0 }
0x25a9   :  { %3683 = vadd.xlane.f32.xlu1 %v3682_v10 }
0x25f3   :  { %v3742_v47 = vpop.permute.xlu1 %3741 }
0x25f4   :  { %v3711_v9 = vpop.permute.xlu0 %3710  ;;  %v3744_v4 = vsel %vm408_vm6, %v3742_v47, 0.0 }
0x25f5   :  { %v3713_v17 = vsel %vm408_vm6, %v3711_v9, 0.0 }
0x25f6   :  { %3714 = vadd.xlane.f32.xlu0 %v3713_v17 }
0x25f7   :  { %v3773_v26 = vpop.permute.xlu1 %3772 }
0x25f8   :  { %v3775_v55 = vsel %vm408_vm6, %v3773_v26, 0.0 }
0x25fa   :  { %3745 = vadd.xlane.f32.xlu0 %v3744_v4 }
0x25fe   :  { %3776 = vadd.xlane.f32.xlu0 %v3775_v55 }
0x2636   :  { %v3684_v32 = vpop.xlane.xlu1 %3683 }
0x2637   :  { %v3686_v29 = vrot.slane %v3684_v32, 1 }
0x2639   :  { %9462 = vrcp.f32 %v3686_v29 }
0x2643   :  { %v9463_v47 = vpop.eup %9462 }
0x2644   :  { %v10840_v4 = vmul.f32 %v9463_v47, %v9459_v42 }
0x2646   :  { %11853 = vst [vmem:[#allocation44_spill] sm:$0xff] %v10840_v4 }
0x2683   :  { %v3715_v59 = vpop.xlane.xlu0 %3714 }
0x2684   :  { %v3717_v52 = vrot.slane %v3715_v59, 1 }
0x2686   :  { %9464 = vrcp.f32 %v3717_v52 }
0x2687   :  { %v3746_v19 = vpop.xlane.xlu0 %3745  ;;  %9466 = vrcp.f32 %v3715_v59 }
0x2688   :  { %v3748_v10 = vrot.slane %v3746_v19, 1 }
0x268a   :  { %9468 = vrcp.f32 %v3748_v10 }
0x268b   :  { %9470 = vrcp.f32 %v3746_v19  ;;  %v3777_v33 = vpop.xlane.xlu0 %3776 }
0x268c   :  { %9472 = vrcp.f32 %v3684_v32  ;;  %v3779_v17 = vrot.slane %v3777_v33, 1  ;;  %v3788_v32 = vrot.slane %v10840_v4, 7 }
0x268d   :  { %9474 = vrcp.f32 %v3777_v33 }
0x268e   :  { %9476 = vrcp.f32 %v3779_v17 }
0x2690   :  { %v9465_v48 = vpop.eup %9464 }
0x2691   :  { %v10838_v27 = vmul.f32 %v9465_v48, %v9449_v13  ;;  %v9467_v9 = vpop.eup %9466 }
0x2692   :  { %v10846_v10 = vmul.f32 %v9467_v9, %v9453_v16 }
0x2693   :  { %11852 = vst [vmem:[#allocation34_spill] sm:$0xff] %v10838_v27  ;;  %v3793_v29 = vrot.slane %v10838_v27, 7 }
0x2694   :  { %v9469_v26 = vpop.eup %9468  ;;  %11855 = vst [vmem:[#allocation46_spill] sm:$0xff] %v10846_v10 }
0x2695   :  { %v9471_v55 = vpop.eup %9470  ;;  %v10843_v52 = vmul.f32 %v9469_v26, %v9447_v25  ;;  %v3794_v47 = vsel %vm405_vm2, %v3793_v29, %v10846_v10 }
0x2696   :  { %v9473_v59 = vpop.eup %9472  ;;  %v10850_v13 = vmul.f32 %v9471_v55, %v10818_v7 }
0x2697   :  { %11854 = vst [vmem:[#allocation45_spill] sm:$0xff] %v10843_v52  ;;  %v9475_v19 = vpop.eup %9474  ;;  %v3798_v33 = vrot.slane %v10843_v52, 7  ;;  %v10852_v42 = vmul.f32 %v9473_v59, %v9461_v56  ;;  %v11874_v52 = vld [vmem:[#allocation9_spill] sm:$0xff] }
0x2698   :  { %v9477_v17 = vpop.eup %9476  ;;  %11856 = vst [vmem:[#allocation47_spill] sm:$0xff] %v10850_v13  ;;  %v10864_v9 = vmul.f32 %v9475_v19, %v10828_v38 }
0x2699   :  { %11857 = vst [vmem:[#allocation48_spill] sm:$0xff] %v10852_v42  ;;  %v10857_v25 = vmul.f32 %v9477_v17, %v10822_v3  ;;  %v3799_v48 = vsel %vm405_vm2, %v3798_v33, %v10850_v13  ;;  %v3789_v16 = vsel %vm405_vm2, %v3788_v32, %v10852_v42  ;;  %v11866_v42 = vld [vmem:[#allocation24_spill] sm:$0xff] }
0x269a   :  { %11859 = vst [vmem:[#allocation50_spill] sm:$0xff] %v10864_v9  ;;  %v3806_v56 = vsel %vm554_vm7, %v3789_v16, %v3794_v47 }
0x269b   :  { %11858 = vst [vmem:[#allocation49_spill] sm:$0xff] %v10857_v25  ;;  %v3803_v7 = vrot.slane %v10857_v25, 7  ;;  %v3807_v55 = vsel %vm556_vm8, %v3806_v56, %v3799_v48 }
0x269d   :  { %v3804_v26 = vsel %vm405_vm2, %v3803_v7, %v10864_v9  ;;  %v11024_v9 = vld [vmem:[%s11786_s26] sm:$0x3] }
0x269e   :  { %v3808_v3 = vsel %vm558_vm9, %v3807_v55, %v3804_v26  ;;  %11875 = vst [vmem:[#allocation24_spill] sm:$0xff] %v11024_v9 }
0x269f   :  { %v3816_v29 = vrot.slane %v3808_v3, %v9832_v20 }
0x26a1   :  { %v3824_v59 = vrot.slane %v3816_v29, %v9832_v20  ;;  %v3817_v33 = vcombine.high %v3816_v29, %v3816_v29 }
0x26a3   :  { %8257 = vmatmul.mubr.msk.f32.vlgmr.msra.gmra.mrb[36].mxu0 %vm154_vm1, %v3824_v59  ;;  %v3831_v38 = vrot.slane %v3817_v33, %v9832_v20 }
0x26a4   :  { %8948 = vmatpush3.bf16.msra.mxu0 %v10434_v37  ;;  %8286 = vmatprep.mubr.msk.f32.mxu0 %vm9666_vm0, %v11805_v6 }
0x26a5   :  { %8268 = vmatmul.mubr.msk.f32.vlgmr.msra.gmra.mrb[26].mxu1 %vm154_vm1, %v3831_v38  ;;  %8949 = vmatprep.subr.bf16.mxu0 %v11806_v15 }
0x26a6   :  { %8960 = vmatpush3.bf16.msra.mxu1 %v10414_v46  ;;  %8293 = vmatprep.mubr.msk.f32.mxu1 %vm9666_vm0, %v11805_v6 }
0x26a7   :  { %8962 = vmatprep.subr.bf16.mxu1 %v10011_v49 }
0x26a8   :  { %8951 = vmatpush3.bf16.msra.mxu0 %v10440_v35 }
0x26a9   :  { %8952 = vmatprep.subr.bf16.mxu0 %v11806_v15 }
0x26ac   :  { %8954 = vmatpush3.bf16.msra.mxu0 %v10450_v23 }
0x26ad   :  { %8955 = vmatprep.subr.bf16.mxu0 %v11806_v15 }
0x26b0   :  { %8957 = vmatpush3.bf16.msra.mxu0 %v10460_v24 }
0x26b1   :  { %9001 = vmatprep.subr.bf16.mxu0 %v11806_v15 }
0x2776   :  { %v3900_v19 = vpop.f32.mrb[36].mxu0 }
0x2777   :  { %v8258_v32 = vpop.f32.mrb[37].mxu0 }
0x2778   :  { %v3972_v17 = vpop.f32.mrb[26].mxu1 }
0x2779   :  { %v4006_v47 = vrot.slane %v3972_v17, 7  ;;  %v8269_v48 = vpop.f32.mrb[27].mxu1 }
0x277b   :  { %v4007_v16 = vsel %vm405_vm2, %v4006_v47, %v3900_v19 }
0x277c   :  { %4008 = vrot.lane.b32.xlu1 %v4007_v16, %s9673_s20 }
0x27ee   :  { %v4009_v7 = vpop.permute.xlu1 %4008 }
0x27ef   :  { %v4011_v56 = vsel %vm154_vm1, %v10791_v30, %v4009_v7  ;;  %v10917_v30 = vld [vmem:[%s11677_s5] ss:$0 sm:$0xff] }
0x27f0   :  { %8287 = vmatmul.mubr.msk.f32.vlgmr.msra.gmra.mrb[38].mxu0 %vm798_vm10, %v4011_v56 }
0x27f1   :  { %9003 = vmatpush3.bf16.msra.mxu0 %v10229_v60  ;;  %8304 = vmatprep.mubr.msk.f32.mxu0 %vm9666_vm0, %v11805_v6 }
0x27f2   :  { %9004 = vmatprep.subr.bf16.mxu0 %v11806_v15 }
0x27f5   :  { %9006 = vmatpush3.bf16.msra.mxu0 %v10235_v0 }
0x27f6   :  { %9007 = vmatprep.subr.bf16.mxu0 %v11806_v15 }
0x27f8   :  { %8305 = vmatmul.mubr.msk.f32.vlgmr.msra.gmra.mrb[40].mxu0 %vm154_vm1, %v10781_v36 }
0x27f9   :  { %9009 = vmatpush3.bf16.msra.mxu0 %v10248_v8  ;;  %8323 = vmatprep.mubr.msk.f32.mxu0 %vm9666_vm0, %v11805_v6 }
0x27fa   :  { %9010 = vmatprep.subr.bf16.mxu0 %v11806_v15 }
0x27fd   :  { %9012 = vmatpush3.bf16.msra.mxu0 %v10259_v43 }
0x27fe   :  { %9013 = vmatprep.subr.bf16.mxu0 %v11806_v15 }
0x2801   :  { %9015 = vmatpush3.bf16.msra.mxu0 %v10271_v50 }
0x2802   :  { %9016 = vmatprep.subr.bf16.mxu0 %v11806_v15 }
0x2805   :  { %9018 = vmatpush3.bf16.msra.mxu0 %v10281_v61 }
0x2806   :  { %9019 = vmatprep.subr.bf16.mxu0 %v11806_v15 }
0x28c3   :  { %v4081_v36 = vpop.f32.mrb[38].mxu0 }
0x28c4   :  { %v4082_v26 = vadd.f32 %v10917_v30, %v4081_v36  ;;  %v8288_v55 = vpop.f32.mrb[39].mxu0 }
0x28c6   :  { %4086 = vst.msk [vmem:[#allocation2 + $0x4] sm:$0x3] %vm1845_vm12, %v4082_v26  ;;  %v4094_v3 = vsel %vm1845_vm12, %v4082_v26, -inf }
0x28c7   :  { %4095 = vmax.xlane.f32.xlu0 %v4094_v3 }
0x28cb   :  { %v10922_v29 = vpop.f32.mrb[40].mxu0 }
0x28cc   :  { %v8306_v59 = vpop.f32.mrb[41].mxu0 }
0x2954   :  { %v4096_v33 = vpop.xlane.xlu0 %4095 }
0x2955   :  { %vm4097_vm13 = vcmp.ge.f32.partialorder %v4082_v26, %v4096_v33 }
0x2956   :  { %v4098_v38 = vsel %vm4097_vm13, %v10499_v51, 16 }
0x2957   :  { %v4099_v19 = vsel %vm1845_vm12, %v4098_v38, 2147483647 }
0x2958   :  { %v4101_v32 = vshra.s32 %v4099_v19, 16  ;;  %v4100_v47 = vand.u32 65535, %v4099_v19 }
0x295a   :  { %v4103_v17 = vcvt.s32.f32 %v4101_v32  ;;  %v4102_v7 = vcvt.s32.f32 %v4100_v47 }
0x295c   :  { %4104 = vmin.xlane.f32.xlu0 %v4103_v17 }
0x29e9   :  { %v4105_v48 = vpop.xlane.xlu0 %4104 }
0x29ea   :  { %vm4106_vm14 = vcmp.eq.f32.partialorder %v4103_v17, %v4105_v48  ;;  %v4111_v36 = vcvt.f32.s32 %v4105_v48 }
0x29eb   :  { %v4107_v56 = vsel %vm4106_vm14, %v4102_v7, inf  ;;  %v11860_v7 = vld [vmem:[#allocation23_spill] sm:$0xff] }
0x29ec   :  { %4108 = vmin.xlane.f32.xlu0 %v4107_v56  ;;  %v4112_v3 = vshll.u32 %v4111_v36, 16 }
0x2a02   :  { %4190 = vrot.lane.b32.xlu0 %v4007_v16, %s9672_s21 }
0x2a79   :  { %v4109_v55 = vpop.xlane.xlu0 %4108 }
0x2a7a   :  { %v4110_v59 = vcvt.f32.s32 %v4109_v55 }
0x2a7c   :  { %v4113_v26 = vadd.s32 %v4112_v3, %v4110_v59 }
0x2a7e   :  { %vm4114_vm15 = vcmp.eq.s32.totalorder %v10499_v51, %v4113_v26 }
0x2a7f   :  { %v7532_v33 = vsel %vm4114_vm15, 1.0, %v11805_v6 }
0x2a80   :  { %8294 = vmatmul.mubr.msk.f32.vlgmr.msra.gmra.mrb[28].mxu1 %vm556_vm8, %v7532_v33 }
0x2a81   :  { %8964 = vmatpush1.bf16.msra.mxu1 %v10022_v54  ;;  %4258 = vmatprep.mubr.f32.mxu1 %v11805_v6 }
0x2a82   :  { %8966 = vmatprep.subr.bf16.mxu1 %v10024_v57 }
0x2a85   :  { %8968 = vmatpush1.bf16.msra.mxu1 %v10040_v62 }
0x2a86   :  { %8970 = vmatprep.subr.bf16.mxu1 %v10043_v63 }
0x2a89   :  { %8972 = vmatpush1.bf16.msra.mxu1 %v10058_v18 }
0x2a8a   :  { %8974 = vmatprep.subr.bf16.mxu1 %v10061_v21 }
0x2a8d   :  { %8976 = vmatpush1.bf16.msra.mxu1 %v10076_v5 }
0x2a8e   :  { %8978 = vmatprep.subr.bf16.mxu1 %v10079_v31 }
0x2a90   :  { %7534 = vmatmul.mubr.msk.f32.vlgmr.msra.gmra.mrb[30].mxu1 %vm798_vm10, %v10756_v41  ;;  %v4191_v41 = vpop.permute.xlu0 %4190 }
0x2a91   :  { %8980 = vmatpush1.bf16.msra.mxu1 %v10097_v39  ;;  %4332 = vmatprep.mubr.f32.mxu1 %v11805_v6 }
0x2a92   :  { %8982 = vmatprep.subr.bf16.mxu1 %v10100_v40 }
0x2a95   :  { %8984 = vmatpush1.bf16.msra.mxu1 %v10116_v44 }
0x2a96   :  { %8986 = vmatprep.subr.bf16.mxu1 %v10120_v45 }
0x2a99   :  { %8988 = vmatpush1.bf16.msra.mxu1 %v10135_v53 }
0x2a9a   :  { %8990 = vmatprep.subr.bf16.mxu1 %v10138_v58 }
0x2a9d   :  { %8992 = vmatpush1.bf16.msra.mxu1 %v10153_v1 }
0x2a9e   :  { %8994 = vmatprep.subr.bf16.mxu1 %v10156_v2 }
0x2aa1   :  { %8996 = vmatpush1.bf16.msra.mxu1 %v10171_v28 }
0x2aa2   :  { %8998 = vmatprep.subr.bf16.mxu1 %v10174_v12 }
0x2aa5   :  { %9000 = vmatpush1.bf16.msra.mxu1 %v10183_v34 }
0x2aa6   :  { %9025 = vmatprep.subr.bf16.mxu1 %v11806_v15 }
0x2b53   :  { %v4186_v16 = vpop.f32.mrb[28].mxu1 }
0x2b54   :  { %v4193_v38 = vsel %vm798_vm10, %v4186_v16, %v4191_v41  ;;  %v8295_v19 = vpop.f32.mrb[29].mxu1 }
0x2b55   :  { %7535 = vmatmul.mubr.msk.f32.vlgmr.msra.gmra.mrb[30].mxu1 %vm873_vm11, %v4193_v38  ;;  %v11861_v38 = vld [vmem:[#allocation33_spill] sm:$0xff] }
0x2b56   :  { %9027 = vmatpush3.bf16.msra.mxu1 %v9810_v11  ;;  %8345 = vmatprep.mubr.msk.f32.mxu1 %vm9666_vm0, %v11805_v6 }
0x2b57   :  { %9028 = vmatprep.subr.bf16.mxu1 %v11806_v15 }
0x2b5a   :  { %9030 = vmatpush3.bf16.msra.mxu1 %v9824_v14 }
0x2b5b   :  { %9037 = vmatprep.subr.bf16.mxu1 %v11806_v15 }
0x2c28   :  { %v4334_v32 = vpop.f32.mrb[30].mxu1 }
0x2c29   :  { %v4339_v17 = vadd.f32 %v4334_v32, %v11835_v22  ;;  %v4336_v47 = vpop.f32.mrb[31].mxu1 }
0x2c2a   :  { %v4340_v56 = vadd.f32 %v4336_v47, %v11860_v7 }
0x2c2b   :  { %v7536_v48 = vmul.f32 -1.442695, %v4339_v17 }
0x2c2c   :  { %v7537_v33 = vmul.f32 -1.442695, %v4340_v56 }
0x2c2d   :  { %9478 = vpow2.f32 %v7536_v48 }
0x2c2e   :  { %9480 = vtanh.f32 %v4340_v56  ;;  %v11863_v56 = vld [vmem:[#allocation5_spill] sm:$0xff] }
0x2c37   :  { %v9479_v36 = vpop.eup %9478 }
0x2c38   :  { %v4344_v55 = vadd.f32 1.0, %v9479_v36  ;;  %v9481_v3 = vpop.eup %9480 }
0x2c3a   :  { %9482 = vrcp.f32 %v4344_v55 }
0x2c3b   :  { %9484 = vpow2.f32 %v7537_v33 }
0x2c44   :  { %v9483_v59 = vpop.eup %9482 }
0x2c45   :  { %v4355_v26 = vmul.f32 %v9483_v59, %v9481_v3  ;;  %v9485_v41 = vpop.eup %9484  ;;  %v4354_v19 = vmul.f32 %v9483_v59, %v11861_v38  ;;  %v11864_v3 = vld [vmem:[#allocation6_spill] sm:$0xff] }
0x2c46   :  { %v4351_v16 = vadd.f32 1.0, %v9485_v41  ;;  %v11865_v41 = vld [vmem:[#allocation43_spill] sm:$0xff] }
0x2c47   :  { %4357 = vrot.lane.b32.xlu1 %v4355_v26, %s9672_s21 }
0x2c48   :  { %9486 = vrcp.f32 %v4351_v16 }
0x2c52   :  { %v9487_v47 = vpop.eup %9486 }
0x2cb9   :  { %v4358_v32 = vpop.permute.xlu1 %4357 }
0x2cba   :  { %v10966_v17 = vadd.f32 %v4358_v32, %v4354_v19 }
0x2cbc   :  { %11862 = vst [vmem:[#allocation33_spill] sm:$0xff] %v10966_v17  ;;  %9488 = vtanh.f32 %v10966_v17 }
0x2cc6   :  { %v9489_v48 = vpop.eup %9488 }
0x2cc7   :  { %v4362_v36 = vmul.f32 %v9489_v48, %v9487_v47 }
0x2cc9   :  { %4434 = vrot.lane.b32.xlu1 %v4362_v36, %s9672_s21 }
0x2d3b   :  { %v10970_v55 = vpop.permute.xlu1 %4434 }
0x2d3c   :  { %8324 = vmatmul.mubr.msk.f32.vlgmr.msra.gmra.mrb[42].mxu0 %vm798_vm10, %v10970_v55 }
0x2d3d   :  { %9021 = vmatpush3.bf16.msra.mxu0 %v11863_v56  ;;  %8334 = vmatprep.mubr.msk.f32.mxu0 %vm9666_vm0, %v11805_v6 }
0x2d3e   :  { %9022 = vmatprep.subr.bf16.mxu0 %v11806_v15 }
0x2d41   :  { %9024 = vmatpush3.bf16.msra.mxu0 %v11864_v3 }
0x2d42   :  { %9031 = vmatprep.subr.bf16.mxu0 %v11806_v15 }
0x2e0f   :  { %v4504_v59 = vpop.f32.mrb[42].mxu0 }
0x2e10   :  { %v4505_v26 = vadd.f32 %v4504_v59, %v10922_v29  ;;  %v8325_v33 = vpop.f32.mrb[43].mxu0 }
0x2e12   :  { %v4508_v16 = vadd.f32 %v11865_v41, %v4505_v26 }
0x2e14   :  { %9490 = vtanh.f32 %v4508_v16  ;;  %v7540_v19 = vmul.f32 -1.442695, %v4508_v16 }
0x2e16   :  { %9492 = vpow2.f32 %v7540_v19 }
0x2e1e   :  { %v9491_v38 = vpop.eup %9490 }
0x2e1f   :  { %4518 = vrot.lane.b32.xlu1 %v9491_v38, %s9672_s21 }
0x2e20   :  { %v9493_v32 = vpop.eup %9492 }
0x2e21   :  { %v4512_v47 = vadd.f32 1.0, %v9493_v32 }
0x2e23   :  { %9494 = vrcp.f32 %v4512_v47 }
0x2e2d   :  { %v9495_v48 = vpop.eup %9494 }
0x2e2e   :  { %v4516_v25 = vmul.f32 %v9495_v48, %v11866_v42  ;;  %v11869_v42 = vld [vmem:[#allocation8_spill] sm:$0xff] }
0x2e91   :  { %v4519_v36 = vpop.permute.xlu1 %4518 }
0x2e92   :  { %v4521_v4 = vmul.f32 %v9495_v48, %v4519_v36  ;;  %v11870_v36 = vld [vmem:[#allocation10_spill] sm:$0xff] }
0x2e94   :  { %4523 = vrot.lane.b32.xlu1 %v4521_v4, %s9673_s20  ;;  %v11868_v4 = vld [vmem:[#allocation7_spill] sm:$0xff] }
0x2f06   :  { %v4524_v29 = vpop.permute.xlu1 %4523 }
0x2f07   :  { %v10985_v59 = vadd.f32 %v4524_v29, %v4516_v25  ;;  %v11871_v29 = vld [vmem:[#allocation11_spill] sm:$0xff] }
0x2f09   :  { %11867 = vst [vmem:[#allocation43_spill] sm:$0xff] %v10985_v59  ;;  %9496 = vtanh.f32 %v10985_v59 }
0x2f13   :  { %v9497_v26 = vpop.eup %9496 }
0x2f14   :  { %4529 = vrot.lane.b32.xlu1 %v9497_v26, %s9672_s21  ;;  %v11872_v26 = vld [vmem:[#allocation12_spill] sm:$0xff] }
0x2f86   :  { %v4530_v33 = vpop.permute.xlu1 %4529 }
0x2f87   :  { %v4532_v41 = vmul.f32 %v9495_v48, %v4530_v33  ;;  %v11873_v33 = vld [vmem:[#allocation13_spill] sm:$0xff] }
0x2f89   :  { %4534 = vrot.lane.b32.xlu1 %v4532_v41, %s9673_s20 }
0x2ffb   :  { %v10990_v16 = vpop.permute.xlu1 %4534 }
0x2ffc   :  { %8335 = vmatmul.mubr.msk.f32.vlgmr.msra.gmra.mrb[44].mxu0 %vm154_vm1, %v10990_v16 }
0x2ffd   :  { %9033 = vmatpush3.bf16.msra.mxu0 %v11868_v4  ;;  %8356 = vmatprep.mubr.msk.f32.mxu0 %vm9666_vm0, %v11805_v6 }
0x2ffe   :  { %9034 = vmatprep.subr.bf16.mxu0 %v11806_v15 }
0x3001   :  { %9036 = vmatpush3.bf16.msra.mxu0 %v11869_v42 }
0x3002   :  { %9043 = vmatprep.subr.bf16.mxu0 %v11806_v15 }
0x30cf   :  { %v11000_v25 = vpop.f32.mrb[44].mxu0 }
0x30d0   :  { %v4615_v38 = vrot.slane %v11000_v25, %v9832_v20  ;;  %v8336_v19 = vpop.f32.mrb[45].mxu0 }
0x30d2   :  { %v4616_v32 = vcombine.high %v4615_v38, %v4615_v38  ;;  %v4623_v47 = vrot.slane %v4615_v38, %v9832_v20 }
0x30d4   :  { %v4630_v48 = vrot.slane %v4616_v32, %v9832_v20  ;;  %8346 = vmatmul.mubr.msk.f32.vlgmr.msra.gmra.mrb[32].mxu1 %vm154_vm1, %v4623_v47 }
0x30d5   :  { %9039 = vmatpush3.bf16.msra.mxu1 %v11870_v36  ;;  %8367 = vmatprep.mubr.msk.f32.mxu1 %vm9666_vm0, %v11805_v6 }
0x30d6   :  { %8357 = vmatmul.mubr.msk.f32.vlgmr.msra.gmra.mrb[46].mxu0 %vm154_vm1, %v4630_v48  ;;  %9040 = vmatprep.subr.bf16.mxu1 %v11806_v15 }
0x30d7   :  { %9045 = vmatpush3.bf16.msra.mxu0 %v11871_v29  ;;  %8378 = vmatprep.mubr.msk.f32.mxu0 %vm9666_vm0, %v11805_v6 }
0x30d8   :  { %9046 = vmatprep.subr.bf16.mxu0 %v11806_v15 }
0x30d9   :  { %9042 = vmatpush3.bf16.msra.mxu1 %v11872_v26 }
0x30da   :  { %9049 = vmatprep.subr.bf16.mxu1 %v11806_v15 }
0x30db   :  { %9048 = vmatpush3.bf16.msra.mxu0 %v11873_v33 }
0x30dc   :  { %9061 = vmatprep.subr.bf16.mxu0 %v11806_v15 }
0x31a7   :  { %v4699_v41 = vpop.f32.mrb[32].mxu1 }
0x31a8   :  { %v8347_v38 = vpop.f32.mrb[33].mxu1  ;;  %v4775_v32 = vmul.f32 0.35355338, %v4699_v41 }
0x31a9   :  { %v4771_v19 = vpop.f32.mrb[46].mxu0 }
0x31aa   :  { %v4776_v47 = vmul.f32 0.35355338, %v4771_v19  ;;  %v8358_v48 = vpop.f32.mrb[47].mxu0  ;;  %v4777_v13 = vadd.f32 %v11024_v9, %v4775_v32 }
0x31ac   :  { %v4778_v27 = vadd.f32 %v4776_v47, %v11874_v52 }
0x31ae   :  { %v4781_v10 = vrot.slane %v4778_v27, 7 }
0x31b0   :  { %v4782_v33 = vsel %vm405_vm2, %v4781_v10, %v4777_v13 }
0x31b1   :  { %v4844_v26 = vsel %vm470_vm5, %v4782_v33, -inf  ;;  %v4813_v38 = vsel %vm438_vm4, %v4782_v33, -inf  ;;  %v4875_v41 = vsel %vm502_vm3, %v4782_v33, -inf  ;;  %v4784_v19 = vsel %vm408_vm6, %v4782_v33, -inf }
0x31b2   :  { %4845 = vmax.xlane.f32.xlu1 %v4844_v26  ;;  %4814 = vmax.xlane.f32.xlu0 %v4813_v38 }
0x31b6   :  { %4876 = vmax.xlane.f32.xlu0 %v4875_v41 }
0x31ba   :  { %4785 = vmax.xlane.f32.xlu0 %v4784_v19 }
0x323f   :  { %v4846_v47 = vpop.xlane.xlu1 %4845  ;;  %v4815_v48 = vpop.xlane.xlu0 %4814 }
0x3240   :  { %v4848_v52 = vrot.slane %v4846_v47, 1  ;;  %v4851_v29 = vsub.f32 %v4777_v13, %v4846_v47  ;;  %v4817_v32 = vrot.slane %v4815_v48, 1  ;;  %v4820_v9 = vsub.f32 %v4777_v13, %v4815_v48 }
0x3242   :  { %v4852_v36 = vsub.f32 %v4778_v27, %v4848_v52  ;;  %v4821_v10 = vsub.f32 %v4778_v27, %v4817_v32  ;;  %v4853_v42 = vmul.f32 1.442695, %v4851_v29  ;;  %v4822_v38 = vmul.f32 1.442695, %v4820_v9 }
0x3243   :  { %v4877_v4 = vpop.xlane.xlu0 %4876 }
0x3244   :  { %v4855_v59 = vmul.f32 1.442695, %v4852_v36  ;;  %v4824_v3 = vmul.f32 1.442695, %v4821_v10  ;;  %v4879_v26 = vrot.slane %v4877_v4, 1  ;;  %v4882_v56 = vsub.f32 %v4777_v13, %v4877_v4 }
0x3246   :  { %9498 = vpow2.f32 %v4855_v59  ;;  %v4883_v41 = vsub.f32 %v4778_v27, %v4879_v26  ;;  %v4884_v33 = vmul.f32 1.442695, %v4882_v56 }
0x3247   :  { %9500 = vpow2.f32 %v4824_v3  ;;  %v4786_v10 = vpop.xlane.xlu0 %4785 }
0x3248   :  { %9502 = vpow2.f32 %v4853_v42  ;;  %v4886_v19 = vmul.f32 1.442695, %v4883_v41  ;;  %v4788_v26 = vrot.slane %v4786_v10, 1 }
0x3249   :  { %9504 = vpow2.f32 %v4822_v38 }
0x324a   :  { %9506 = vpow2.f32 %v4886_v19  ;;  %v4792_v38 = vsub.f32 %v4778_v27, %v4788_v26 }
0x324b   :  { %9508 = vpow2.f32 %v4884_v33  ;;  %v4791_v33 = vsub.f32 %v4777_v13, %v4786_v10 }
0x324c   :  { %v4795_v41 = vmul.f32 1.442695, %v4792_v38 }
0x324d   :  { %v4793_v19 = vmul.f32 1.442695, %v4791_v33 }
0x324e   :  { %9510 = vpow2.f32 %v4795_v41 }
0x324f   :  { %9512 = vpow2.f32 %v4793_v19 }
0x3250   :  { %v9499_v47 = vpop.eup %9498 }
0x3251   :  { %v9501_v48 = vpop.eup %9500  ;;  %v4859_v52 = vrot.slane %v9499_v47, 7 }
0x3252   :  { %v11032_v32 = vpop.eup %9502  ;;  %v4828_v29 = vrot.slane %v9501_v48, 7 }
0x3253   :  { %v9505_v36 = vpop.eup %9504  ;;  %v4860_v9 = vsel %vm405_vm2, %v4859_v52, %v11032_v32 }
0x3254   :  { %v11036_v4 = vpop.eup %9506  ;;  %4861 = vrot.lane.b32.xlu1 %v4860_v9, %s9670_s28  ;;  %v4829_v56 = vsel %vm405_vm2, %v4828_v29, %v9505_v36 }
0x3255   :  { %4830 = vrot.lane.b32.xlu0 %v4829_v56, %s9669_s27  ;;  %v4890_v3 = vrot.slane %v11036_v4, 7  ;;  %v11042_v59 = vpop.eup %9508 }
0x3257   :  { %v4891_v42 = vsel %vm405_vm2, %v4890_v3, %v11042_v59 }
0x3258   :  { %4892 = vrot.lane.b32.xlu1 %v4891_v42, %s9671_s29  ;;  %v9511_v52 = vpop.eup %9510 }
0x3259   :  { %v4799_v29 = vrot.slane %v9511_v52, 7  ;;  %v9513_v9 = vpop.eup %9512 }
0x325b   :  { %v4800_v56 = vsel %vm405_vm2, %v4799_v29, %v9513_v9 }
0x325c   :  { %v4802_v17 = vsel %vm408_vm6, %v4800_v56, 0.0 }
0x327c   :  { %4803 = vadd.xlane.f32.xlu1 %v4802_v17 }
0x32c6   :  { %v4862_v7 = vpop.permute.xlu1 %4861 }
0x32c7   :  { %v4831_v3 = vpop.permute.xlu0 %4830  ;;  %v4864_v27 = vsel %vm408_vm6, %v4862_v7, 0.0 }
0x32c8   :  { %v4833_v22 = vsel %vm408_vm6, %v4831_v3, 0.0 }
0x32c9   :  { %4834 = vadd.xlane.f32.xlu0 %v4833_v22 }
0x32ca   :  { %v4893_v42 = vpop.permute.xlu1 %4892 }
0x32cb   :  { %v4895_v13 = vsel %vm408_vm6, %v4893_v42, 0.0 }
0x32cd   :  { %4865 = vadd.xlane.f32.xlu0 %v4864_v27 }
0x32d1   :  { %4896 = vadd.xlane.f32.xlu0 %v4895_v13 }
0x3309   :  { %v4804_v10 = vpop.xlane.xlu1 %4803 }
0x330a   :  { %v4806_v26 = vrot.slane %v4804_v10, 1 }
0x330c   :  { %9514 = vrcp.f32 %v4806_v26 }
0x3316   :  { %v9515_v7 = vpop.eup %9514 }
0x3317   :  { %v11054_v27 = vmul.f32 %v9515_v7, %v9511_v52 }
0x3319   :  { %11877 = vst [vmem:[#allocation52_spill] sm:$0xff] %v11054_v27 }
0x3356   :  { %v4835_v38 = vpop.xlane.xlu0 %4834 }
0x3357   :  { %v4837_v41 = vrot.slane %v4835_v38, 1 }
0x3359   :  { %9516 = vrcp.f32 %v4837_v41 }
0x335a   :  { %v4866_v33 = vpop.xlane.xlu0 %4865  ;;  %9518 = vrcp.f32 %v4835_v38 }
0x335b   :  { %v4868_v17 = vrot.slane %v4866_v33, 1 }
0x335d   :  { %9520 = vrcp.f32 %v4868_v17 }
0x335e   :  { %9522 = vrcp.f32 %v4866_v33  ;;  %v4897_v19 = vpop.xlane.xlu0 %4896 }
0x335f   :  { %9524 = vrcp.f32 %v4804_v10  ;;  %v4899_v22 = vrot.slane %v4897_v19, 1  ;;  %v4908_v10 = vrot.slane %v11054_v27, 7 }
0x3360   :  { %9526 = vrcp.f32 %v4897_v19 }
0x3361   :  { %9528 = vrcp.f32 %v4899_v22 }
0x3363   :  { %v9517_v29 = vpop.eup %9516 }
0x3364   :  { %v11052_v56 = vmul.f32 %v9517_v29, %v9501_v48  ;;  %v9519_v3 = vpop.eup %9518 }
0x3365   :  { %v11060_v17 = vmul.f32 %v9519_v3, %v9505_v36 }
0x3366   :  { %11876 = vst [vmem:[#allocation51_spill] sm:$0xff] %v11052_v56  ;;  %v4913_v26 = vrot.slane %v11052_v56, 7 }
0x3367   :  { %v9521_v42 = vpop.eup %9520  ;;  %11879 = vst [vmem:[#allocation54_spill] sm:$0xff] %v11060_v17 }
0x3368   :  { %v9523_v13 = vpop.eup %9522  ;;  %v11057_v41 = vmul.f32 %v9521_v42, %v9499_v47  ;;  %v4914_v7 = vsel %vm405_vm2, %v4913_v26, %v11060_v17 }
0x3369   :  { %v9525_v38 = vpop.eup %9524  ;;  %v11064_v48 = vmul.f32 %v9523_v13, %v11032_v32 }
0x336a   :  { %11878 = vst [vmem:[#allocation53_spill] sm:$0xff] %v11057_v41  ;;  %v9527_v33 = vpop.eup %9526  ;;  %v4918_v19 = vrot.slane %v11057_v41, 7  ;;  %v11066_v52 = vmul.f32 %v9525_v38, %v9513_v9  ;;  %v11899_v41 = vld [vmem:[#allocation9_spill] sm:$0xff] }
0x336b   :  { %v9529_v22 = vpop.eup %9528  ;;  %11880 = vst [vmem:[#allocation55_spill] sm:$0xff] %v11064_v48  ;;  %v11078_v3 = vmul.f32 %v9527_v33, %v11042_v59 }
0x336c   :  { %11881 = vst [vmem:[#allocation56_spill] sm:$0xff] %v11066_v52  ;;  %v11071_v47 = vmul.f32 %v9529_v22, %v11036_v4  ;;  %v4919_v29 = vsel %vm405_vm2, %v4918_v19, %v11064_v48  ;;  %v4909_v36 = vsel %vm405_vm2, %v4908_v10, %v11066_v52 }
0x336d   :  { %11883 = vst [vmem:[#allocation58_spill] sm:$0xff] %v11078_v3  ;;  %v4926_v9 = vsel %vm554_vm7, %v4909_v36, %v4914_v7 }
0x336e   :  { %11882 = vst [vmem:[#allocation57_spill] sm:$0xff] %v11071_v47  ;;  %v4923_v32 = vrot.slane %v11071_v47, 7  ;;  %v4927_v13 = vsel %vm556_vm8, %v4926_v9, %v4919_v29 }
0x3370   :  { %v4924_v42 = vsel %vm405_vm2, %v4923_v32, %v11078_v3  ;;  %v11900_v3 = vld [vmem:[#allocation24_spill] sm:$0xff] }
0x3371   :  { %v4928_v4 = vsel %vm558_vm9, %v4927_v13, %v4924_v42 }
0x3372   :  { %v4936_v26 = vrot.slane %v4928_v4, %v9832_v20 }
0x3374   :  { %v4944_v38 = vrot.slane %v4936_v26, %v9832_v20  ;;  %v4937_v19 = vcombine.high %v4936_v26, %v4936_v26 }
0x3376   :  { %8368 = vmatmul.mubr.msk.f32.vlgmr.msra.gmra.mrb[34].mxu1 %vm154_vm1, %v4944_v38  ;;  %v4951_v59 = vrot.slane %v4937_v19, %v9832_v20 }
0x3377   :  { %9051 = vmatpush3.bf16.msra.mxu1 %v10434_v37  ;;  %8397 = vmatprep.mubr.msk.f32.mxu1 %vm9666_vm0, %v11805_v6 }
0x3378   :  { %8379 = vmatmul.mubr.msk.f32.vlgmr.msra.gmra.mrb[48].mxu0 %vm154_vm1, %v4951_v59  ;;  %9052 = vmatprep.subr.bf16.mxu1 %v11806_v15 }
0x3379   :  { %9063 = vmatpush3.bf16.msra.mxu0 %v10414_v46  ;;  %8404 = vmatprep.mubr.msk.f32.mxu0 %vm9666_vm0, %v11805_v6 }
0x337a   :  { %9065 = vmatprep.subr.bf16.mxu0 %v10011_v49 }
0x337b   :  { %9054 = vmatpush3.bf16.msra.mxu1 %v10440_v35 }
0x337c   :  { %9055 = vmatprep.subr.bf16.mxu1 %v11806_v15 }
0x337f   :  { %9057 = vmatpush3.bf16.msra.mxu1 %v10450_v23 }
0x3380   :  { %9058 = vmatprep.subr.bf16.mxu1 %v11806_v15 }
0x3383   :  { %9060 = vmatpush3.bf16.msra.mxu1 %v10460_v24 }
0x3384   :  { %9104 = vmatprep.subr.bf16.mxu1 %v11806_v15 }
0x3449   :  { %v5020_v33 = vpop.f32.mrb[34].mxu1 }
0x344a   :  { %v8369_v10 = vpop.f32.mrb[35].mxu1 }
0x344b   :  { %v5092_v22 = vpop.f32.mrb[48].mxu0 }
0x344c   :  { %v5126_v7 = vrot.slane %v5092_v22, 7  ;;  %v8380_v29 = vpop.f32.mrb[49].mxu0 }
0x344e   :  { %v5127_v36 = vsel %vm405_vm2, %v5126_v7, %v5020_v33 }
0x344f   :  { %5128 = vrot.lane.b32.xlu1 %v5127_v36, %s9673_s20 }
0x34c1   :  { %v5129_v32 = vpop.permute.xlu1 %5128 }
0x34c2   :  { %v5131_v9 = vsel %vm154_vm1, %v11000_v25, %v5129_v32 }
0x34c3   :  { %8398 = vmatmul.mubr.msk.f32.vlgmr.msra.gmra.mrb[36].mxu1 %vm798_vm10, %v5131_v9 }
0x34c4   :  { %9106 = vmatpush3.bf16.msra.mxu1 %v10229_v60  ;;  %8415 = vmatprep.mubr.msk.f32.mxu1 %vm9666_vm0, %v11805_v6 }
0x34c5   :  { %9107 = vmatprep.subr.bf16.mxu1 %v11806_v15 }
0x34c8   :  { %9109 = vmatpush3.bf16.msra.mxu1 %v10235_v0 }
0x34c9   :  { %9110 = vmatprep.subr.bf16.mxu1 %v11806_v15 }
0x34cb   :  { %8416 = vmatmul.mubr.msk.f32.vlgmr.msra.gmra.mrb[38].mxu1 %vm154_vm1, %v10990_v16 }
0x34cc   :  { %9112 = vmatpush3.bf16.msra.mxu1 %v10248_v8  ;;  %8434 = vmatprep.mubr.msk.f32.mxu1 %vm9666_vm0, %v11805_v6 }
0x34cd   :  { %9113 = vmatprep.subr.bf16.mxu1 %v11806_v15 }
0x34d0   :  { %9115 = vmatpush3.bf16.msra.mxu1 %v10259_v43 }
0x34d1   :  { %9116 = vmatprep.subr.bf16.mxu1 %v11806_v15 }
0x34d4   :  { %9118 = vmatpush3.bf16.msra.mxu1 %v10271_v50 }
0x34d5   :  { %9119 = vmatprep.subr.bf16.mxu1 %v11806_v15 }
0x34d8   :  { %9121 = vmatpush3.bf16.msra.mxu1 %v10281_v61 }
0x34d9   :  { %9122 = vmatprep.subr.bf16.mxu1 %v11806_v15 }
0x3596   :  { %v5201_v16 = vpop.f32.mrb[36].mxu1 }
0x3597   :  { %v5202_v25 = vadd.f32 %v10917_v30, %v5201_v16  ;;  %v8399_v42 = vpop.f32.mrb[37].mxu1 }
0x3599   :  { %5206 = vst.msk [vmem:[#allocation2 + $0x6] sm:$0x3] %vm1845_vm12, %v5202_v25  ;;  %v5214_v13 = vsel %vm1845_vm12, %v5202_v25, -inf }
0x359a   :  { %5215 = vmax.xlane.f32.xlu0 %v5214_v13 }
0x359e   :  { %v11131_v4 = vpop.f32.mrb[38].mxu1 }
0x359f   :  { %v8417_v26 = vpop.f32.mrb[39].mxu1 }
0x3627   :  { %v5216_v38 = vpop.xlane.xlu0 %5215 }
0x3628   :  { %vm5217_vm13 = vcmp.ge.f32.partialorder %v5202_v25, %v5216_v38 }
0x3629   :  { %v5218_v19 = vsel %vm5217_vm13, %v10499_v51, 16 }
0x362a   :  { %v5219_v59 = vsel %vm1845_vm12, %v5218_v19, 2147483647 }
0x362b   :  { %v5221_v33 = vshra.s32 %v5219_v59, 16  ;;  %v5220_v22 = vand.u32 65535, %v5219_v59  ;;  %v11884_v59 = vld [vmem:[#allocation22_spill] sm:$0xff] }
0x362d   :  { %v5223_v10 = vcvt.s32.f32 %v5221_v33  ;;  %v5222_v7 = vcvt.s32.f32 %v5220_v22 }
0x362f   :  { %5224 = vmin.xlane.f32.xlu0 %v5223_v10 }
0x36bc   :  { %v5225_v30 = vpop.xlane.xlu0 %5224 }
0x36bd   :  { %vm5226_vm14 = vcmp.eq.f32.partialorder %v5223_v10, %v5225_v30  ;;  %v5231_v32 = vcvt.f32.s32 %v5225_v30  ;;  %v11885_v30 = vld [vmem:[#allocation23_spill] sm:$0xff] }
0x36be   :  { %v5227_v29 = vsel %vm5226_vm14, %v5222_v7, inf }
0x36bf   :  { %5228 = vmin.xlane.f32.xlu0 %v5227_v29  ;;  %v5232_v16 = vshll.u32 %v5231_v32, 16 }
0x36d5   :  { %5310 = vrot.lane.b32.xlu0 %v5127_v36, %s9672_s21 }
0x374c   :  { %v5229_v9 = vpop.xlane.xlu0 %5228 }
0x374d   :  { %v5230_v42 = vcvt.f32.s32 %v5229_v9 }
0x374f   :  { %v5233_v25 = vadd.s32 %v5232_v16, %v5230_v42 }
0x3751   :  { %vm5234_vm15 = vcmp.eq.s32.totalorder %v10499_v51, %v5233_v25 }
0x3752   :  { %v7548_v13 = vsel %vm5234_vm15, 1.0, %v11805_v6 }
0x3753   :  { %8405 = vmatmul.mubr.msk.f32.vlgmr.msra.gmra.mrb[50].mxu0 %vm556_vm8, %v7548_v13 }
0x3754   :  { %9067 = vmatpush1.bf16.msra.mxu0 %v10022_v54  ;;  %5378 = vmatprep.mubr.f32.mxu0 %v11805_v6 }
0x3755   :  { %9069 = vmatprep.subr.bf16.mxu0 %v10024_v57 }
0x3758   :  { %9071 = vmatpush1.bf16.msra.mxu0 %v10040_v62 }
0x3759   :  { %9073 = vmatprep.subr.bf16.mxu0 %v10043_v63 }
0x375c   :  { %9075 = vmatpush1.bf16.msra.mxu0 %v10058_v18 }
0x375d   :  { %9077 = vmatprep.subr.bf16.mxu0 %v10061_v21 }
0x3760   :  { %9079 = vmatpush1.bf16.msra.mxu0 %v10076_v5 }
0x3761   :  { %9081 = vmatprep.subr.bf16.mxu0 %v10079_v31 }
0x3763   :  { %7550 = vmatmul.mubr.msk.f32.vlgmr.msra.gmra.mrb[52].mxu0 %vm798_vm10, %v10970_v55  ;;  %v5311_v55 = vpop.permute.xlu0 %5310 }
0x3764   :  { %9083 = vmatpush1.bf16.msra.mxu0 %v10097_v39  ;;  %5452 = vmatprep.mubr.f32.mxu0 %v11805_v6 }
0x3765   :  { %9085 = vmatprep.subr.bf16.mxu0 %v10100_v40 }
0x3768   :  { %9087 = vmatpush1.bf16.msra.mxu0 %v10116_v44 }
0x3769   :  { %9089 = vmatprep.subr.bf16.mxu0 %v10120_v45 }
0x376c   :  { %9091 = vmatpush1.bf16.msra.mxu0 %v10135_v53 }
0x376d   :  { %9093 = vmatprep.subr.bf16.mxu0 %v10138_v58 }
0x3770   :  { %9095 = vmatpush1.bf16.msra.mxu0 %v10153_v1 }
0x3771   :  { %9097 = vmatprep.subr.bf16.mxu0 %v10156_v2 }
0x3774   :  { %9099 = vmatpush1.bf16.msra.mxu0 %v10171_v28 }
0x3775   :  { %9101 = vmatprep.subr.bf16.mxu0 %v10174_v12 }
0x3778   :  { %9103 = vmatpush1.bf16.msra.mxu0 %v10183_v34 }
0x3779   :  { %9128 = vmatprep.subr.bf16.mxu0 %v11806_v15 }
0x3826   :  { %v5306_v36 = vpop.f32.mrb[50].mxu0 }
0x3827   :  { %v5313_v26 = vsel %vm798_vm10, %v5306_v36, %v5311_v55  ;;  %v8406_v38 = vpop.f32.mrb[51].mxu0  ;;  %v11886_v36 = vld [vmem:[#allocation33_spill] sm:$0xff] }
0x3828   :  { %7551 = vmatmul.mubr.msk.f32.vlgmr.msra.gmra.mrb[52].mxu0 %vm873_vm11, %v5313_v26 }
0x3829   :  { %9130 = vmatpush3.bf16.msra.mxu0 %v9810_v11  ;;  %8456 = vmatprep.mubr.msk.f32.mxu0 %vm9666_vm0, %v11805_v6 }
0x382a   :  { %9131 = vmatprep.subr.bf16.mxu0 %v11806_v15 }
0x382d   :  { %9133 = vmatpush3.bf16.msra.mxu0 %v9824_v14 }
0x382e   :  { %9140 = vmatprep.subr.bf16.mxu0 %v11806_v15 }
0x38fb   :  { %v5454_v19 = vpop.f32.mrb[52].mxu0 }
0x38fc   :  { %v5459_v33 = vadd.f32 %v5454_v19, %v11884_v59  ;;  %v5456_v10 = vpop.f32.mrb[53].mxu0 }
0x38fd   :  { %v5460_v7 = vadd.f32 %v5456_v10, %v11885_v30 }
0x38fe   :  { %v7552_v22 = vmul.f32 -1.442695, %v5459_v33 }
0x38ff   :  { %v7553_v25 = vmul.f32 -1.442695, %v5460_v7 }
0x3900   :  { %9530 = vpow2.f32 %v7552_v22 }
0x3901   :  { %9532 = vtanh.f32 %v5460_v7  ;;  %v11888_v7 = vld [vmem:[#allocation5_spill] sm:$0xff] }
0x390a   :  { %v9531_v29 = vpop.eup %9530 }
0x390b   :  { %v5464_v32 = vadd.f32 1.0, %v9531_v29  ;;  %v9533_v9 = vpop.eup %9532 }
0x390d   :  { %9534 = vrcp.f32 %v5464_v32  ;;  %v11889_v32 = vld [vmem:[#allocation6_spill] sm:$0xff] }
0x390e   :  { %9536 = vpow2.f32 %v7553_v25  ;;  %v11193_v25 = vld [vmem:[%s11684_s12] ss:$0 sm:$0xff] }
0x390f   :  { %11890 = vst [vmem:[#allocation33_spill] sm:$0xff] %v11193_v25 }
0x3917   :  { %v9535_v16 = vpop.eup %9534 }
0x3918   :  { %v5475_v42 = vmul.f32 %v9535_v16, %v9533_v9  ;;  %v9537_v13 = vpop.eup %9536  ;;  %v5474_v26 = vmul.f32 %v9535_v16, %v11886_v36 }
0x3919   :  { %v5471_v55 = vadd.f32 1.0, %v9537_v13 }
0x391a   :  { %5477 = vrot.lane.b32.xlu1 %v5475_v42, %s9672_s21 }
0x391b   :  { %9538 = vrcp.f32 %v5471_v55 }
0x3925   :  { %v9539_v33 = vpop.eup %9538 }
0x398c   :  { %v5478_v38 = vpop.permute.xlu1 %5477 }
0x398d   :  { %v11175_v19 = vadd.f32 %v5478_v38, %v5474_v26 }
0x398f   :  { %11887 = vst [vmem:[#allocation22_spill] sm:$0xff] %v11175_v19  ;;  %9540 = vtanh.f32 %v11175_v19 }
0x3999   :  { %v9541_v10 = vpop.eup %9540 }
0x399a   :  { %v5482_v22 = vmul.f32 %v9541_v10, %v9539_v33 }
0x399c   :  { %5554 = vrot.lane.b32.xlu1 %v5482_v22, %s9672_s21  ;;  %v11891_v22 = vld [vmem:[#allocation43_spill] sm:$0xff] }
0x3a0e   :  { %v11179_v29 = vpop.permute.xlu1 %5554 }
0x3a0f   :  { %8435 = vmatmul.mubr.msk.f32.vlgmr.msra.gmra.mrb[40].mxu1 %vm798_vm10, %v11179_v29 }
0x3a10   :  { %9124 = vmatpush3.bf16.msra.mxu1 %v11888_v7  ;;  %8445 = vmatprep.mubr.msk.f32.mxu1 %vm9666_vm0, %v11805_v6 }
0x3a11   :  { %9125 = vmatprep.subr.bf16.mxu1 %v11806_v15 }
0x3a14   :  { %9127 = vmatpush3.bf16.msra.mxu1 %v11889_v32 }
0x3a15   :  { %9134 = vmatprep.subr.bf16.mxu1 %v11806_v15 }
0x3ae2   :  { %v5624_v9 = vpop.f32.mrb[40].mxu1 }
0x3ae3   :  { %v5625_v16 = vadd.f32 %v5624_v9, %v11131_v4  ;;  %v8436_v42 = vpop.f32.mrb[41].mxu1 }
0x3ae5   :  { %v5628_v13 = vadd.f32 %v11193_v25, %v5625_v16 }
0x3ae7   :  { %9542 = vtanh.f32 %v5628_v13  ;;  %v7556_v36 = vmul.f32 -1.442695, %v5628_v13 }
0x3ae9   :  { %9544 = vpow2.f32 %v7556_v36 }
0x3af1   :  { %v9543_v55 = vpop.eup %9542 }
0x3af2   :  { %5638 = vrot.lane.b32.xlu1 %v9543_v55, %s9672_s21 }
0x3af3   :  { %v9545_v26 = vpop.eup %9544 }
0x3af4   :  { %v5632_v38 = vadd.f32 1.0, %v9545_v26  ;;  %v11893_v26 = vld [vmem:[#allocation7_spill] sm:$0xff] }
0x3af6   :  { %9546 = vrcp.f32 %v5632_v38  ;;  %v11894_v38 = vld [vmem:[#allocation8_spill] sm:$0xff] }
0x3b00   :  { %v9547_v33 = vpop.eup %9546 }
0x3b01   :  { %v5636_v9 = vmul.f32 %v9547_v33, %v11891_v22 }
0x3b64   :  { %v5639_v10 = vpop.permute.xlu1 %5638 }
0x3b65   :  { %v5641_v4 = vmul.f32 %v9547_v33, %v5639_v10 }
0x3b67   :  { %5643 = vrot.lane.b32.xlu1 %v5641_v4, %s9673_s20 }
0x3bd9   :  { %v5644_v42 = vpop.permute.xlu1 %5643 }
0x3bda   :  { %v11199_v27 = vadd.f32 %v5644_v42, %v5636_v9 }
0x3bdc   :  { %11892 = vst [vmem:[#allocation43_spill] sm:$0xff] %v11199_v27  ;;  %9548 = vtanh.f32 %v11199_v27 }
0x3be6   :  { %v9549_v16 = vpop.eup %9548 }
0x3be7   :  { %5649 = vrot.lane.b32.xlu1 %v9549_v16, %s9672_s21  ;;  %v11895_v16 = vld [vmem:[#allocation10_spill] sm:$0xff] }
0x3c59   :  { %v5650_v13 = vpop.permute.xlu1 %5649 }
0x3c5a   :  { %v5652_v55 = vmul.f32 %v9547_v33, %v5650_v13  ;;  %v11896_v13 = vld [vmem:[#allocation11_spill] sm:$0xff] }
0x3c5c   :  { %5654 = vrot.lane.b32.xlu1 %v5652_v55, %s9673_s20  ;;  %v11897_v55 = vld [vmem:[#allocation12_spill] sm:$0xff] }
0x3cce   :  { %v11204_v36 = vpop.permute.xlu1 %5654 }
0x3ccf   :  { %8446 = vmatmul.mubr.msk.f32.vlgmr.msra.gmra.mrb[42].mxu1 %vm154_vm1, %v11204_v36 }
0x3cd0   :  { %9136 = vmatpush3.bf16.msra.mxu1 %v11893_v26  ;;  %8467 = vmatprep.mubr.msk.f32.mxu1 %vm9666_vm0, %v11805_v6 }
0x3cd1   :  { %9137 = vmatprep.subr.bf16.mxu1 %v11806_v15 }
0x3cd4   :  { %9139 = vmatpush3.bf16.msra.mxu1 %v11894_v38 }
0x3cd5   :  { %9146 = vmatprep.subr.bf16.mxu1 %v11806_v15 }
0x3da2   :  { %v11214_v10 = vpop.f32.mrb[42].mxu1 }
0x3da3   :  { %v5735_v33 = vrot.slane %v11214_v10, %v9832_v20  ;;  %v8447_v4 = vpop.f32.mrb[43].mxu1 }
0x3da5   :  { %v5736_v22 = vcombine.high %v5735_v33, %v5735_v33  ;;  %v5743_v9 = vrot.slane %v5735_v33, %v9832_v20  ;;  %v11898_v33 = vld [vmem:[#allocation13_spill] sm:$0xff] }
0x3da7   :  { %v5750_v42 = vrot.slane %v5736_v22, %v9832_v20  ;;  %8457 = vmatmul.mubr.msk.f32.vlgmr.msra.gmra.mrb[54].mxu0 %vm154_vm1, %v5743_v9 }
0x3da8   :  { %9142 = vmatpush3.bf16.msra.mxu0 %v11895_v16  ;;  %8478 = vmatprep.mubr.msk.f32.mxu0 %vm9666_vm0, %v11805_v6 }
0x3da9   :  { %8468 = vmatmul.mubr.msk.f32.vlgmr.msra.gmra.mrb[44].mxu1 %vm154_vm1, %v5750_v42  ;;  %9143 = vmatprep.subr.bf16.mxu0 %v11806_v15 }
0x3daa   :  { %9148 = vmatpush3.bf16.msra.mxu1 %v11896_v13  ;;  %8489 = vmatprep.mubr.msk.f32.mxu1 %vm9666_vm0, %v11805_v6 }
0x3dab   :  { %9149 = vmatprep.subr.bf16.mxu1 %v11806_v15 }
0x3dac   :  { %9145 = vmatpush3.bf16.msra.mxu0 %v11897_v55 }
0x3dad   :  { %9152 = vmatprep.subr.bf16.mxu0 %v11806_v15 }
0x3dae   :  { %9151 = vmatpush3.bf16.msra.mxu1 %v11898_v33 }
0x3daf   :  { %9164 = vmatprep.subr.bf16.mxu1 %v11806_v15 }
0x3e7a   :  { %v5819_v4 = vpop.f32.mrb[54].mxu0 }
0x3e7b   :  { %v8458_v22 = vpop.f32.mrb[55].mxu0  ;;  %v5895_v42 = vmul.f32 0.35355338, %v5819_v4 }
0x3e7c   :  { %v5891_v9 = vpop.f32.mrb[44].mxu1 }
0x3e7d   :  { %v5896_v52 = vmul.f32 0.35355338, %v5891_v9  ;;  %v8469_v47 = vpop.f32.mrb[45].mxu1  ;;  %v5897_v48 = vadd.f32 %v11900_v3, %v5895_v42 }
0x3e7f   :  { %v5898_v56 = vadd.f32 %v5896_v52, %v11899_v41 }
0x3e81   :  { %v5901_v17 = vrot.slane %v5898_v56, 7 }
0x3e83   :  { %v5902_v13 = vsel %vm405_vm2, %v5901_v17, %v5897_v48 }
0x3e84   :  { %v5964_v55 = vsel %vm470_vm5, %v5902_v13, -inf  ;;  %v5933_v16 = vsel %vm438_vm4, %v5902_v13, -inf  ;;  %v5995_v33 = vsel %vm502_vm3, %v5902_v13, -inf  ;;  %v5904_v4 = vsel %vm408_vm6, %v5902_v13, -inf }
0x3e85   :  { %5965 = vmax.xlane.f32.xlu1 %v5964_v55  ;;  %5934 = vmax.xlane.f32.xlu0 %v5933_v16 }
0x3e89   :  { %5996 = vmax.xlane.f32.xlu0 %v5995_v33 }
0x3e8d   :  { %5905 = vmax.xlane.f32.xlu0 %v5904_v4 }
0x3f12   :  { %v5966_v47 = vpop.xlane.xlu1 %5965  ;;  %v5935_v22 = vpop.xlane.xlu0 %5934 }
0x3f13   :  { %v5968_v52 = vrot.slane %v5966_v47, 1  ;;  %v5971_v9 = vsub.f32 %v5897_v48, %v5966_v47  ;;  %v5937_v3 = vrot.slane %v5935_v22, 1  ;;  %v5940_v42 = vsub.f32 %v5897_v48, %v5935_v22 }
0x3f15   :  { %v5972_v41 = vsub.f32 %v5898_v56, %v5968_v52  ;;  %v5941_v17 = vsub.f32 %v5898_v56, %v5937_v3  ;;  %v5973_v38 = vmul.f32 1.442695, %v5971_v9  ;;  %v5942_v16 = vmul.f32 1.442695, %v5940_v42 }
0x3f16   :  { %v5997_v26 = vpop.xlane.xlu0 %5996 }
0x3f17   :  { %v5975_v27 = vmul.f32 1.442695, %v5972_v41  ;;  %v5944_v25 = vmul.f32 1.442695, %v5941_v17  ;;  %v5999_v55 = vrot.slane %v5997_v26, 1  ;;  %v6002_v32 = vsub.f32 %v5897_v48, %v5997_v26 }
0x3f19   :  { %9550 = vpow2.f32 %v5975_v27  ;;  %v6003_v33 = vsub.f32 %v5898_v56, %v5999_v55  ;;  %v6004_v13 = vmul.f32 1.442695, %v6002_v32 }
0x3f1a   :  { %9552 = vpow2.f32 %v5944_v25  ;;  %v5906_v17 = vpop.xlane.xlu0 %5905 }
0x3f1b   :  { %9554 = vpow2.f32 %v5973_v38  ;;  %v6006_v4 = vmul.f32 1.442695, %v6003_v33  ;;  %v5908_v55 = vrot.slane %v5906_v17, 1 }
0x3f1c   :  { %9556 = vpow2.f32 %v5942_v16 }
0x3f1d   :  { %9558 = vpow2.f32 %v6006_v4  ;;  %v5912_v16 = vsub.f32 %v5898_v56, %v5908_v55 }
0x3f1e   :  { %9560 = vpow2.f32 %v6004_v13  ;;  %v5911_v13 = vsub.f32 %v5897_v48, %v5906_v17 }
0x3f1f   :  { %v5915_v33 = vmul.f32 1.442695, %v5912_v16 }
0x3f20   :  { %v5913_v4 = vmul.f32 1.442695, %v5911_v13 }
0x3f21   :  { %9562 = vpow2.f32 %v5915_v33 }
0x3f22   :  { %9564 = vpow2.f32 %v5913_v4 }
0x3f23   :  { %v9551_v47 = vpop.eup %9550 }
0x3f24   :  { %v9553_v22 = vpop.eup %9552  ;;  %v5979_v52 = vrot.slane %v9551_v47, 7 }
0x3f25   :  { %v11241_v3 = vpop.eup %9554  ;;  %v5948_v9 = vrot.slane %v9553_v22, 7 }
0x3f26   :  { %v9557_v41 = vpop.eup %9556  ;;  %v5980_v42 = vsel %vm405_vm2, %v5979_v52, %v11241_v3 }
0x3f27   :  { %v11245_v26 = vpop.eup %9558  ;;  %5981 = vrot.lane.b32.xlu1 %v5980_v42, %s9670_s28  ;;  %v5949_v27 = vsel %vm405_vm2, %v5948_v9, %v9557_v41 }
0x3f28   :  { %5950 = vrot.lane.b32.xlu0 %v5949_v27, %s9669_s27  ;;  %v6010_v32 = vrot.slane %v11245_v26, 7  ;;  %v11251_v25 = vpop.eup %9560 }
0x3f2a   :  { %v6011_v38 = vsel %vm405_vm2, %v6010_v32, %v11251_v25 }
0x3f2b   :  { %6012 = vrot.lane.b32.xlu1 %v6011_v38, %s9671_s29  ;;  %v9563_v52 = vpop.eup %9562 }
0x3f2c   :  { %v5919_v9 = vrot.slane %v9563_v52, 7  ;;  %v9565_v42 = vpop.eup %9564 }
0x3f2e   :  { %v5920_v27 = vsel %vm405_vm2, %v5919_v9, %v9565_v42 }
0x3f2f   :  { %v5922_v7 = vsel %vm408_vm6, %v5920_v27, 0.0 }
0x3f4f   :  { %5923 = vadd.xlane.f32.xlu1 %v5922_v7 }
0x3f99   :  { %v5982_v19 = vpop.permute.xlu1 %5981 }
0x3f9a   :  { %v5951_v32 = vpop.permute.xlu0 %5950  ;;  %v5984_v56 = vsel %vm408_vm6, %v5982_v19, 0.0 }
0x3f9b   :  { %v5953_v30 = vsel %vm408_vm6, %v5951_v32, 0.0 }
0x3f9c   :  { %5954 = vadd.xlane.f32.xlu0 %v5953_v30 }
0x3f9d   :  { %v6013_v38 = vpop.permute.xlu1 %6012 }
0x3f9e   :  { %v6015_v48 = vsel %vm408_vm6, %v6013_v38, 0.0 }
0x3fa0   :  { %5985 = vadd.xlane.f32.xlu0 %v5984_v56 }
0x3fa4   :  { %6016 = vadd.xlane.f32.xlu0 %v6015_v48 }
0x3fdc   :  { %v5924_v17 = vpop.xlane.xlu1 %5923 }
0x3fdd   :  { %v5926_v55 = vrot.slane %v5924_v17, 1 }
0x3fdf   :  { %9566 = vrcp.f32 %v5926_v55 }
0x3fe9   :  { %v9567_v19 = vpop.eup %9566 }
0x3fea   :  { %v11263_v56 = vmul.f32 %v9567_v19, %v9563_v52 }
0x4029   :  { %v5955_v16 = vpop.xlane.xlu0 %5954 }
0x402a   :  { %v5957_v33 = vrot.slane %v5955_v16, 1 }
0x402c   :  { %9568 = vrcp.f32 %v5957_v33 }
0x402d   :  { %v5986_v13 = vpop.xlane.xlu0 %5985  ;;  %9570 = vrcp.f32 %v5955_v16 }
0x402e   :  { %v5988_v7 = vrot.slane %v5986_v13, 1 }
0x4030   :  { %9572 = vrcp.f32 %v5988_v7 }
0x4031   :  { %9574 = vrcp.f32 %v5986_v13  ;;  %v6017_v4 = vpop.xlane.xlu0 %6016 }
0x4032   :  { %9576 = vrcp.f32 %v5924_v17  ;;  %v6019_v30 = vrot.slane %v6017_v4, 1  ;;  %v6028_v17 = vrot.slane %v11263_v56, 7 }
0x4033   :  { %9578 = vrcp.f32 %v6017_v4 }
0x4034   :  { %9580 = vrcp.f32 %v6019_v30 }
0x4036   :  { %v9569_v9 = vpop.eup %9568 }
0x4037   :  { %v11261_v27 = vmul.f32 %v9569_v9, %v9553_v22  ;;  %v9571_v32 = vpop.eup %9570 }
0x4038   :  { %v11269_v7 = vmul.f32 %v9571_v32, %v9557_v41 }
0x4039   :  { %v6033_v55 = vrot.slane %v11261_v27, 7 }
0x403a   :  { %v9573_v38 = vpop.eup %9572 }
0x403b   :  { %v9575_v48 = vpop.eup %9574  ;;  %v11266_v33 = vmul.f32 %v9573_v38, %v9551_v47  ;;  %v6034_v19 = vsel %vm405_vm2, %v6033_v55, %v11269_v7 }
0x403c   :  { %v9577_v16 = vpop.eup %9576  ;;  %v11273_v22 = vmul.f32 %v9575_v48, %v11241_v3 }
0x403d   :  { %v9579_v13 = vpop.eup %9578  ;;  %v6038_v4 = vrot.slane %v11266_v33, 7  ;;  %v11275_v52 = vmul.f32 %v9577_v16, %v9565_v42 }
0x403e   :  { %v9581_v30 = vpop.eup %9580  ;;  %v11287_v32 = vmul.f32 %v9579_v13, %v11251_v25 }
0x403f   :  { %v11280_v47 = vmul.f32 %v9581_v30, %v11245_v26  ;;  %v6039_v9 = vsel %vm405_vm2, %v6038_v4, %v11273_v22  ;;  %v6029_v41 = vsel %vm405_vm2, %v6028_v17, %v11275_v52 }
0x4040   :  { %v6046_v42 = vsel %vm554_vm7, %v6029_v41, %v6034_v19 }
0x4041   :  { %v6043_v3 = vrot.slane %v11280_v47, 7  ;;  %v6047_v48 = vsel %vm556_vm8, %v6046_v42, %v6039_v9 }
0x4043   :  { %v6044_v38 = vsel %vm405_vm2, %v6043_v3, %v11287_v32 }
0x4044   :  { %v6048_v26 = vsel %vm558_vm9, %v6047_v48, %v6044_v38 }
0x4045   :  { %v6056_v55 = vrot.slane %v6048_v26, %v9832_v20 }
0x4047   :  { %v6064_v16 = vrot.slane %v6056_v55, %v9832_v20  ;;  %v6057_v4 = vcombine.high %v6056_v55, %v6056_v55 }
0x4049   :  { %8479 = vmatmul.mubr.msk.f32.vlgmr.msra.gmra.mrb[56].mxu0 %vm154_vm1, %v6064_v16  ;;  %v6071_v25 = vrot.slane %v6057_v4, %v9832_v20 }
0x404a   :  { %9154 = vmatpush3.bf16.msra.mxu0 %v10434_v37  ;;  %8508 = vmatprep.mubr.msk.f32.mxu0 %vm9666_vm0, %v11805_v6 }
0x404b   :  { %8490 = vmatmul.mubr.msk.f32.vlgmr.msra.gmra.mrb[46].mxu1 %vm154_vm1, %v6071_v25  ;;  %9155 = vmatprep.subr.bf16.mxu0 %v11806_v15 }
0x404c   :  { %9166 = vmatpush3.bf16.msra.mxu1 %v10414_v46  ;;  %8515 = vmatprep.mubr.msk.f32.mxu1 %vm9666_vm0, %v11805_v6 }
0x404d   :  { %9168 = vmatprep.subr.bf16.mxu1 %v10011_v49 }
0x404e   :  { %9157 = vmatpush3.bf16.msra.mxu0 %v10440_v35 }
0x404f   :  { %9158 = vmatprep.subr.bf16.mxu0 %v11806_v15 }
0x4052   :  { %9160 = vmatpush3.bf16.msra.mxu0 %v10450_v23 }
0x4053   :  { %9161 = vmatprep.subr.bf16.mxu0 %v11806_v15 }
0x4056   :  { %9163 = vmatpush3.bf16.msra.mxu0 %v10460_v24 }
0x4057   :  { %9207 = vmatprep.subr.bf16.mxu0 %v11806_v15 }
0x411c   :  { %v6140_v13 = vpop.f32.mrb[56].mxu0 }
0x411d   :  { %v8480_v17 = vpop.f32.mrb[57].mxu0 }
0x411e   :  { %v6212_v46 = vpop.f32.mrb[46].mxu1 }
0x411f   :  { %v6246_v30 = vrot.slane %v6212_v46, 7  ;;  %v8491_v19 = vpop.f32.mrb[47].mxu1 }
0x4121   :  { %v6247_v9 = vsel %vm405_vm2, %v6246_v30, %v6140_v13 }
0x4122   :  { %6248 = vrot.lane.b32.xlu1 %v6247_v9, %s9673_s20 }
0x4194   :  { %v6249_v49 = vpop.permute.xlu1 %6248 }
0x4195   :  { %v6251_v41 = vsel %vm154_vm1, %v11214_v10, %v6249_v49 }
0x4196   :  { %8509 = vmatmul.mubr.msk.f32.vlgmr.msra.gmra.mrb[58].mxu0 %vm798_vm10, %v6251_v41  ;;  %v11903_v41 = vld [vmem:[#allocation5_spill] sm:$0xff] }
0x4197   :  { %9209 = vmatpush3.bf16.msra.mxu0 %v10229_v60  ;;  %8526 = vmatprep.mubr.msk.f32.mxu0 %vm9666_vm0, %v11805_v6 }
0x4198   :  { %9210 = vmatprep.subr.bf16.mxu0 %v11806_v15 }
0x419b   :  { %9212 = vmatpush3.bf16.msra.mxu0 %v10235_v0  ;;  %v11340_v0 = vld [vmem:[%s11677_s5] ss:$0 sm:$0xff] }
0x419c   :  { %9213 = vmatprep.subr.bf16.mxu0 %v11806_v15 }
0x419e   :  { %8527 = vmatmul.mubr.msk.f32.vlgmr.msra.gmra.mrb[60].mxu0 %vm154_vm1, %v11204_v36 }
0x419f   :  { %9215 = vmatpush3.bf16.msra.mxu0 %v10248_v8  ;;  %8545 = vmatprep.mubr.msk.f32.mxu0 %vm9666_vm0, %v11805_v6 }
0x41a0   :  { %9216 = vmatprep.subr.bf16.mxu0 %v11806_v15 }
0x41a3   :  { %9218 = vmatpush3.bf16.msra.mxu0 %v10259_v43 }
0x41a4   :  { %9219 = vmatprep.subr.bf16.mxu0 %v11806_v15 }
0x41a7   :  { %9221 = vmatpush3.bf16.msra.mxu0 %v10271_v50 }
0x41a8   :  { %9222 = vmatprep.subr.bf16.mxu0 %v11806_v15 }
0x41ab   :  { %9224 = vmatpush3.bf16.msra.mxu0 %v10281_v61 }
0x41ac   :  { %9225 = vmatprep.subr.bf16.mxu0 %v11806_v15 }
0x4269   :  { %v6321_v60 = vpop.f32.mrb[58].mxu0 }
0x426a   :  { %v6322_v8 = vadd.f32 %v11340_v0, %v6321_v60  ;;  %v8510_v36 = vpop.f32.mrb[59].mxu0  ;;  %v11904_v60 = vld [vmem:[#allocation6_spill] sm:$0xff] }
0x426c   :  { %6326 = vst.msk [vmem:[#allocation2 + $0x8] sm:$0x3] %vm1845_vm12, %v6322_v8  ;;  %v6334_v43 = vsel %vm1845_vm12, %v6322_v8, -inf }
0x426d   :  { %6335 = vmax.xlane.f32.xlu0 %v6334_v43 }
0x4271   :  { %v11345_v50 = vpop.f32.mrb[60].mxu0 }
0x4272   :  { %v8528_v10 = vpop.f32.mrb[61].mxu0 }
0x4273   :  { %v11905_v10 = vld [vmem:[#allocation33_spill] sm:$0xff] }
0x42fa   :  { %v6336_v61 = vpop.xlane.xlu0 %6335 }
0x42fb   :  { %vm6337_vm13 = vcmp.ge.f32.partialorder %v6322_v8, %v6336_v61 }
0x42fc   :  { %v6338_v3 = vsel %vm6337_vm13, %v10499_v51, 16 }
0x42fd   :  { %v6339_v42 = vsel %vm1845_vm12, %v6338_v3, 2147483647 }
0x42fe   :  { %v6341_v38 = vshra.s32 %v6339_v42, 16  ;;  %v6340_v26 = vand.u32 65535, %v6339_v42 }
0x4300   :  { %v6343_v48 = vcvt.s32.f32 %v6341_v38  ;;  %v6342_v16 = vcvt.s32.f32 %v6340_v26 }
0x4302   :  { %6344 = vmin.xlane.f32.xlu0 %v6343_v48 }
0x438f   :  { %v6345_v55 = vpop.xlane.xlu0 %6344 }
0x4390   :  { %vm6346_vm14 = vcmp.eq.f32.partialorder %v6343_v48, %v6345_v55  ;;  %v6351_v25 = vcvt.f32.s32 %v6345_v55 }
0x4391   :  { %v6347_v4 = vsel %vm6346_vm14, %v6342_v16, inf }
0x4392   :  { %6348 = vmin.xlane.f32.xlu0 %v6347_v4  ;;  %v6352_v17 = vshll.u32 %v6351_v25, 16  ;;  %v11906_v4 = vld [vmem:[#allocation43_spill] sm:$0xff] }
0x43a8   :  { %6430 = vrot.lane.b32.xlu0 %v6247_v9, %s9672_s21 }
0x441f   :  { %v6349_v13 = vpop.xlane.xlu0 %6348 }
0x4420   :  { %v6350_v46 = vcvt.f32.s32 %v6349_v13 }
0x4422   :  { %v6353_v30 = vadd.s32 %v6352_v17, %v6350_v46 }
0x4424   :  { %vm6354_vm15 = vcmp.eq.s32.totalorder %v10499_v51, %v6353_v30 }
0x4425   :  { %v7564_v19 = vsel %vm6354_vm15, 1.0, %v11805_v6 }
0x4426   :  { %8516 = vmatmul.mubr.msk.f32.vlgmr.msra.gmra.mrb[48].mxu1 %vm556_vm8, %v7564_v19 }
0x4427   :  { %9170 = vmatpush1.bf16.msra.mxu1 %v10022_v54  ;;  %6498 = vmatprep.mubr.f32.mxu1 %v11805_v6  ;;  %v6431_v54 = vpop.permute.xlu0 %6430 }
0x4428   :  { %9172 = vmatprep.subr.bf16.mxu1 %v10024_v57 }
0x442b   :  { %9174 = vmatpush1.bf16.msra.mxu1 %v10040_v62 }
0x442c   :  { %9176 = vmatprep.subr.bf16.mxu1 %v10043_v63 }
0x442f   :  { %9178 = vmatpush1.bf16.msra.mxu1 %v10058_v18 }
0x4430   :  { %9180 = vmatprep.subr.bf16.mxu1 %v10061_v21 }
0x4433   :  { %9182 = vmatpush1.bf16.msra.mxu1 %v10076_v5 }
0x4434   :  { %9184 = vmatprep.subr.bf16.mxu1 %v10079_v31 }
0x4436   :  { %7566 = vmatmul.mubr.msk.f32.vlgmr.msra.gmra.mrb[50].mxu1 %vm798_vm10, %v11179_v29 }
0x4437   :  { %9186 = vmatpush1.bf16.msra.mxu1 %v10097_v39  ;;  %6572 = vmatprep.mubr.f32.mxu1 %v11805_v6  ;;  %v11901_v39 = vld [vmem:[#allocation23_spill] sm:$0xff] }
0x4438   :  { %9188 = vmatprep.subr.bf16.mxu1 %v10100_v40 }
0x443b   :  { %9190 = vmatpush1.bf16.msra.mxu1 %v10116_v44 }
0x443c   :  { %9192 = vmatprep.subr.bf16.mxu1 %v10120_v45 }
0x443f   :  { %9194 = vmatpush1.bf16.msra.mxu1 %v10135_v53 }
0x4440   :  { %9196 = vmatprep.subr.bf16.mxu1 %v10138_v58 }
0x4443   :  { %9198 = vmatpush1.bf16.msra.mxu1 %v10153_v1 }
0x4444   :  { %9200 = vmatprep.subr.bf16.mxu1 %v10156_v2 }
0x4447   :  { %9202 = vmatpush1.bf16.msra.mxu1 %v10171_v28  ;;  %v11902_v28 = vld [vmem:[#allocation22_spill] sm:$0xff] }
0x4448   :  { %9204 = vmatprep.subr.bf16.mxu1 %v10174_v12 }
0x444b   :  { %9206 = vmatpush1.bf16.msra.mxu1 %v10183_v34 }
0x444c   :  { %9231 = vmatprep.subr.bf16.mxu1 %v11806_v15 }
0x44f9   :  { %v6426_v57 = vpop.f32.mrb[48].mxu1 }
0x44fa   :  { %v6433_v62 = vsel %vm798_vm10, %v6426_v57, %v6431_v54  ;;  %v8517_v63 = vpop.f32.mrb[49].mxu1  ;;  %v11907_v54 = vld [vmem:[#allocation7_spill] sm:$0xff]  ;;  %v11908_v57 = vld [vmem:[#allocation8_spill] sm:$0xff] }
0x44fb   :  { %7567 = vmatmul.mubr.msk.f32.vlgmr.msra.gmra.mrb[50].mxu1 %vm873_vm11, %v6433_v62 }
0x44fc   :  { %9233 = vmatpush3.bf16.msra.mxu1 %v9810_v11  ;;  %8567 = vmatprep.mubr.msk.f32.mxu1 %vm9666_vm0, %v11805_v6 }
0x44fd   :  { %9234 = vmatprep.subr.bf16.mxu1 %v11806_v15 }
0x4500   :  { %9236 = vmatpush3.bf16.msra.mxu1 %v9824_v14 }
0x4501   :  { %9243 = vmatprep.subr.bf16.mxu1 %v11806_v15 }
0x45ce   :  { %v6574_v18 = vpop.f32.mrb[50].mxu1 }
0x45cf   :  { %v6579_v21 = vadd.f32 %v6574_v18, %v11884_v59  ;;  %v6576_v5 = vpop.f32.mrb[51].mxu1 }
0x45d0   :  { %v6580_v40 = vadd.f32 %v6576_v5, %v11901_v39  ;;  %v11909_v39 = vld [vmem:[#allocation10_spill] sm:$0xff] }
0x45d1   :  { %v7568_v31 = vmul.f32 -1.442695, %v6579_v21 }
0x45d2   :  { %v7569_v14 = vmul.f32 -1.442695, %v6580_v40 }
0x45d3   :  { %9582 = vpow2.f32 %v7568_v31 }
0x45d4   :  { %9584 = vtanh.f32 %v6580_v40  ;;  %v11910_v40 = vld [vmem:[#allocation11_spill] sm:$0xff] }
0x45dd   :  { %v9583_v44 = vpop.eup %9582 }
0x45de   :  { %v6584_v45 = vadd.f32 1.0, %v9583_v44  ;;  %v9585_v11 = vpop.eup %9584  ;;  %v11911_v44 = vld [vmem:[#allocation12_spill] sm:$0xff] }
0x45e0   :  { %9586 = vrcp.f32 %v6584_v45  ;;  %v11912_v45 = vld [vmem:[#allocation13_spill] sm:$0xff] }
0x45e1   :  { %9588 = vpow2.f32 %v7569_v14 }
0x45ea   :  { %v9587_v53 = vpop.eup %9586 }
0x45eb   :  { %v6595_v58 = vmul.f32 %v9587_v53, %v9585_v11  ;;  %v9589_v1 = vpop.eup %9588  ;;  %v6594_v12 = vmul.f32 %v9587_v53, %v11902_v28  ;;  %v11913_v28 = vld [vmem:[#allocation9_spill] sm:$0xff] }
0x45ec   :  { %v6591_v2 = vadd.f32 1.0, %v9589_v1 }
0x45ed   :  { %6597 = vrot.lane.b32.xlu1 %v6595_v58, %s9672_s21 }
0x45ee   :  { %9590 = vrcp.f32 %v6591_v2 }
0x45f8   :  { %v9591_v59 = vpop.eup %9590 }
0x465f   :  { %v6598_v34 = vpop.permute.xlu1 %6597 }
0x4660   :  { %v6600_v51 = vadd.f32 %v6598_v34, %v6594_v12  ;;  %v9640_v34 = vld [vmem:[%s11786_s26] sm:$0x3] }
0x4662   :  { %9592 = vtanh.f32 %v6600_v51 }
0x466c   :  { %v9593_v29 = vpop.eup %9592 }
0x466d   :  { %v6602_v9 = vmul.f32 %v9593_v29, %v9591_v59 }
0x466f   :  { %6674 = vrot.lane.b32.xlu1 %v6602_v9, %s9672_s21 }
0x46e1   :  { %v6675_v49 = vpop.permute.xlu1 %6674 }
0x46e2   :  { %8546 = vmatmul.mubr.msk.f32.vlgmr.msra.gmra.mrb[62].mxu0 %vm798_vm10, %v6675_v49 }
0x46e3   :  { %9227 = vmatpush3.bf16.msra.mxu0 %v11903_v41  ;;  %8556 = vmatprep.mubr.msk.f32.mxu0 %vm9666_vm0, %v11805_v6 }
0x46e4   :  { %9228 = vmatprep.subr.bf16.mxu0 %v11806_v15 }
0x46e7   :  { %9230 = vmatpush3.bf16.msra.mxu0 %v11904_v60 }
0x46e8   :  { %9237 = vmatprep.subr.bf16.mxu0 %v11806_v15 }
0x47b5   :  { %v6744_v8 = vpop.f32.mrb[62].mxu0 }
0x47b6   :  { %v6745_v36 = vadd.f32 %v6744_v8, %v11345_v50  ;;  %v8547_v43 = vpop.f32.mrb[63].mxu0 }
0x47b8   :  { %v6748_v61 = vadd.f32 %v11905_v10, %v6745_v36 }
0x47ba   :  { %9594 = vtanh.f32 %v6748_v61  ;;  %v7572_v42 = vmul.f32 -1.442695, %v6748_v61 }
0x47bc   :  { %9596 = vpow2.f32 %v7572_v42 }
0x47c4   :  { %v9595_v3 = vpop.eup %9594 }
0x47c5   :  { %6758 = vrot.lane.b32.xlu1 %v9595_v3, %s9672_s21 }
0x47c6   :  { %v9597_v38 = vpop.eup %9596 }
0x47c7   :  { %v6752_v48 = vadd.f32 1.0, %v9597_v38 }
0x47c9   :  { %9598 = vrcp.f32 %v6752_v48 }
0x47d3   :  { %v9599_v26 = vpop.eup %9598 }
0x47d4   :  { %v6756_v25 = vmul.f32 %v9599_v26, %v11906_v4 }
0x4837   :  { %v6759_v55 = vpop.permute.xlu1 %6758 }
0x4838   :  { %v6761_v16 = vmul.f32 %v9599_v26, %v6759_v55 }
0x483a   :  { %6763 = vrot.lane.b32.xlu1 %v6761_v16, %s9673_s20 }
0x48ac   :  { %v6764_v50 = vpop.permute.xlu1 %6763 }
0x48ad   :  { %v6766_v13 = vadd.f32 %v6764_v50, %v6756_v25 }
0x48af   :  { %9600 = vtanh.f32 %v6766_v13 }
0x48b9   :  { %v9601_v17 = vpop.eup %9600 }
0x48ba   :  { %6769 = vrot.lane.b32.xlu1 %v9601_v17, %s9672_s21 }
0x492c   :  { %v6770_v46 = vpop.permute.xlu1 %6769 }
0x492d   :  { %v6772_v30 = vmul.f32 %v9599_v26, %v6770_v46 }
0x492f   :  { %6774 = vrot.lane.b32.xlu1 %v6772_v30, %s9673_s20 }
0x49a1   :  { %v6775_v19 = vpop.permute.xlu1 %6774 }
0x49a2   :  { %8557 = vmatmul.mubr.msk.f32.vlgmr.msra.gmra.mrb[64].mxu0 %vm154_vm1, %v6775_v19 }
0x49a3   :  { %9239 = vmatpush3.bf16.msra.mxu0 %v11907_v54  ;;  %8578 = vmatprep.mubr.msk.f32.mxu0 %vm9666_vm0, %v11805_v6 }
0x49a4   :  { %9240 = vmatprep.subr.bf16.mxu0 %v11806_v15 }
0x49a7   :  { %9242 = vmatpush3.bf16.msra.mxu0 %v11908_v57 }
0x49a8   :  { %9249 = vmatprep.subr.bf16.mxu0 %v11806_v15 }
0x4a75   :  { %v11411_v62 = vpop.f32.mrb[64].mxu0 }
0x4a76   :  { %v6855_v63 = vrot.slane %v11411_v62, %v9832_v20  ;;  %v8558_v18 = vpop.f32.mrb[65].mxu0 }
0x4a78   :  { %v6856_v21 = vcombine.high %v6855_v63, %v6855_v63  ;;  %v6863_v5 = vrot.slane %v6855_v63, %v9832_v20 }
0x4a7a   :  { %v6870_v31 = vrot.slane %v6856_v21, %v9832_v20  ;;  %8568 = vmatmul.mubr.msk.f32.vlgmr.msra.gmra.mrb[52].mxu1 %vm154_vm1, %v6863_v5 }
0x4a7b   :  { %9245 = vmatpush3.bf16.msra.mxu1 %v11909_v39  ;;  %8589 = vmatprep.mubr.msk.f32.mxu1 %vm9666_vm0, %v11805_v6 }
0x4a7c   :  { %8579 = vmatmul.mubr.msk.f32.vlgmr.msra.gmra.mrb[66].mxu0 %vm154_vm1, %v6870_v31  ;;  %9246 = vmatprep.subr.bf16.mxu1 %v11806_v15 }
0x4a7d   :  { %9251 = vmatpush3.bf16.msra.mxu0 %v11910_v40  ;;  %8600 = vmatprep.mubr.msk.f32.mxu0 %vm9666_vm0, %v11805_v6 }
0x4a7e   :  { %9252 = vmatprep.subr.bf16.mxu0 %v11806_v15 }
0x4a7f   :  { %9248 = vmatpush3.bf16.msra.mxu1 %v11911_v44 }
0x4a80   :  { %9255 = vmatprep.subr.bf16.mxu1 %v11806_v15 }
0x4a81   :  { %9254 = vmatpush3.bf16.msra.mxu0 %v11912_v45 }
0x4b4d   :  { %v6939_v11 = vpop.f32.mrb[52].mxu1 }
0x4b4e   :  { %v8569_v53 = vpop.f32.mrb[53].mxu1  ;;  %v7015_v14 = vmul.f32 0.35355338, %v6939_v11 }
0x4b4f   :  { %v7011_v58 = vpop.f32.mrb[66].mxu0 }
0x4b50   :  { %v7016_v1 = vmul.f32 0.35355338, %v7011_v58  ;;  %v8580_v2 = vpop.f32.mrb[67].mxu0  ;;  %v7017_v51 = vadd.f32 %v9640_v34, %v7015_v14 }
0x4b52   :  { %v7018_v12 = vadd.f32 %v7016_v1, %v11913_v28 }
0x4b54   :  { %v7021_v59 = vrot.slane %v7018_v12, 7 }
0x4b56   :  { %v7022_v29 = vsel %vm405_vm2, %v7021_v59, %v7017_v51 }
0x4b57   :  { %v7084_v9 = vsel %vm470_vm5, %v7022_v29, -inf  ;;  %v7053_v49 = vsel %vm438_vm4, %v7022_v29, -inf  ;;  %v7115_v41 = vsel %vm502_vm3, %v7022_v29, -inf  ;;  %v7024_v60 = vsel %vm408_vm6, %v7022_v29, -inf }
0x4b58   :  { %7085 = vmax.xlane.f32.xlu1 %v7084_v9  ;;  %7054 = vmax.xlane.f32.xlu0 %v7053_v49  ;;  %v11914_v9 = vld [vmem:[#allocation17_spill] sm:$0xff] }
0x4b59   :  { %v11917_v49 = vld [vmem:[#allocation21_spill] sm:$0xff] }
0x4b5c   :  { %7116 = vmax.xlane.f32.xlu0 %v7115_v41  ;;  %v11918_v41 = vld [vmem:[#allocation28_spill] sm:$0xff] }
0x4b60   :  { %7025 = vmax.xlane.f32.xlu0 %v7024_v60  ;;  %v11919_v60 = vld [vmem:[#allocation29_spill] sm:$0xff] }
0x4be5   :  { %v7086_v8 = vpop.xlane.xlu1 %7085  ;;  %v7055_v36 = vpop.xlane.xlu0 %7054 }
0x4be6   :  { %v7088_v43 = vrot.slane %v7086_v8, 1  ;;  %v7091_v10 = vsub.f32 %v7017_v51, %v7086_v8  ;;  %v7057_v61 = vrot.slane %v7055_v36, 1  ;;  %v7060_v3 = vsub.f32 %v7017_v51, %v7055_v36  ;;  %v11920_v8 = vld [vmem:[#allocation32_spill] sm:$0xff]  ;;  %v11921_v36 = vld [vmem:[#allocation38_spill] sm:$0xff] }
0x4be8   :  { %v7092_v42 = vsub.f32 %v7018_v12, %v7088_v43  ;;  %v7061_v38 = vsub.f32 %v7018_v12, %v7057_v61  ;;  %v7093_v48 = vmul.f32 1.442695, %v7091_v10  ;;  %v7062_v25 = vmul.f32 1.442695, %v7060_v3  ;;  %v11922_v43 = vld [vmem:[#allocation39_spill] sm:$0xff]  ;;  %v11923_v10 = vld [vmem:[#allocation42_spill] sm:$0xff] }
0x4be9   :  { %v7117_v26 = vpop.xlane.xlu0 %7116  ;;  %v11924_v61 = vld [vmem:[#allocation46_spill] sm:$0xff]  ;;  %v11925_v3 = vld [vmem:[#allocation47_spill] sm:$0xff] }
0x4bea   :  { %v7095_v55 = vmul.f32 1.442695, %v7092_v42  ;;  %v7064_v16 = vmul.f32 1.442695, %v7061_v38  ;;  %v7119_v4 = vrot.slane %v7117_v26, 1  ;;  %v7122_v50 = vsub.f32 %v7017_v51, %v7117_v26  ;;  %v11926_v42 = vld [vmem:[#allocation50_spill] sm:$0xff] }
0x4beb   :  { %v11927_v38 = vld [vmem:[#allocation54_spill] sm:$0xff] }
0x4bec   :  { %9602 = vpow2.f32 %v7095_v55  ;;  %v7123_v13 = vsub.f32 %v7018_v12, %v7119_v4  ;;  %v7124_v17 = vmul.f32 1.442695, %v7122_v50  ;;  %v11929_v4 = vld [vmem:[#allocation58_spill] sm:$0xff] }
0x4bed   :  { %9604 = vpow2.f32 %v7064_v16  ;;  %v7026_v45 = vpop.xlane.xlu0 %7025 }
0x4bee   :  { %9606 = vpow2.f32 %v7093_v48  ;;  %v7126_v46 = vmul.f32 1.442695, %v7123_v13  ;;  %v7028_v11 = vrot.slane %v7026_v45, 1  ;;  %v7031_v14 = vsub.f32 %v7017_v51, %v7026_v45  ;;  %v11916_v51 = vld [vmem:[#allocation16_spill] sm:$0xff]  ;;  %v11928_v48 = vld [vmem:[#allocation55_spill] sm:$0xff] }
0x4bef   :  { %9608 = vpow2.f32 %v7062_v25  ;;  %v11941_v45 = vld [vmem:[#allocation51_spill] sm:$0xff] }
0x4bf0   :  { %9610 = vpow2.f32 %v7126_v46  ;;  %v7032_v53 = vsub.f32 %v7018_v12, %v7028_v11  ;;  %v7033_v1 = vmul.f32 1.442695, %v7031_v14  ;;  %v11915_v12 = vld [vmem:[#allocation18_spill] sm:$0xff]  ;;  %v11931_v46 = vld [vmem:[#allocation20_spill] sm:$0xff]  ;;  %v11942_v11 = vld [vmem:[#allocation53_spill] sm:$0xff] }
0x4bf1   :  { %9612 = vpow2.f32 %v7124_v17  ;;  %v11930_v17 = vld [vmem:[#allocation14_spill] sm:$0xff] }
0x4bf2   :  { %v7035_v58 = vmul.f32 1.442695, %v7032_v53  ;;  %v11943_v53 = vld [vmem:[#allocation57_spill] sm:$0xff] }
0x4bf4   :  { %9614 = vpow2.f32 %v7035_v58 }
0x4bf5   :  { %9616 = vpow2.f32 %v7033_v1 }
0x4bf6   :  { %v11439_v30 = vpop.eup %9602 }
0x4bf7   :  { %v11441_v19 = vpop.eup %9604  ;;  %v7099_v54 = vrot.slane %v11439_v30, 7 }
0x4bf8   :  { %v11444_v57 = vpop.eup %9606  ;;  %v7068_v63 = vrot.slane %v11441_v19, 7 }
0x4bf9   :  { %v11447_v18 = vpop.eup %9608  ;;  %v7100_v21 = vsel %vm405_vm2, %v7099_v54, %v11444_v57  ;;  %v11932_v54 = vld [vmem:[#allocation25_spill] sm:$0xff] }
0x4bfa   :  { %v11451_v5 = vpop.eup %9610  ;;  %7101 = vrot.lane.b32.xlu1 %v7100_v21, %s9670_s28  ;;  %v7069_v31 = vsel %vm405_vm2, %v7068_v63, %v11447_v18  ;;  %v11934_v63 = vld [vmem:[#allocation31_spill] sm:$0xff]  ;;  %v11937_v21 = vld [vmem:[#allocation41_spill] sm:$0xff] }
0x4bfb   :  { %7070 = vrot.lane.b32.xlu0 %v7069_v31, %s9669_s27  ;;  %v7130_v39 = vrot.slane %v11451_v5, 7  ;;  %v11458_v40 = vpop.eup %9612  ;;  %v11938_v31 = vld [vmem:[#allocation34_spill] sm:$0xff] }
0x4bfd   :  { %v7131_v44 = vsel %vm405_vm2, %v7130_v39, %v11458_v40  ;;  %v11939_v39 = vld [vmem:[#allocation45_spill] sm:$0xff] }
0x4bfe   :  { %7132 = vrot.lane.b32.xlu1 %v7131_v44, %s9671_s29  ;;  %v11463_v2 = vpop.eup %9614  ;;  %v11940_v44 = vld [vmem:[#allocation49_spill] sm:$0xff] }
0x4bff   :  { %v7039_v28 = vrot.slane %v11463_v2, 7  ;;  %v11466_v34 = vpop.eup %9616 }
0x4c01   :  { %v7040_v59 = vsel %vm405_vm2, %v7039_v28, %v11466_v34 }
0x4c02   :  { %v7042_v29 = vsel %vm408_vm6, %v7040_v59, 0.0 }
0x4c22   :  { %7043 = vadd.xlane.f32.xlu1 %v7042_v29 }
0x4c33   :  { %729 = vrot.lane.b32.xlu1 %v11914_v9, %s9669_s27 }
0x4c37   :  { %737 = vrot.lane.b32.xlu1 %v11915_v12, %s9670_s28 }
0x4c3b   :  { %739 = vrot.lane.b32.xlu1 %v11916_v51, %s9670_s28 }
0x4c3f   :  { %745 = vrot.lane.b32.xlu1 %v11917_v49, %s9671_s29 }
0x4c43   :  { %1732 = vrot.lane.b32.xlu1 %v11918_v41, %s9669_s27 }
0x4c47   :  { %1740 = vrot.lane.b32.xlu1 %v11919_v60, %s9670_s28 }
0x4c4b   :  { %1748 = vrot.lane.b32.xlu1 %v11920_v8, %s9671_s29 }
0x4c4f   :  { %2858 = vrot.lane.b32.xlu1 %v11921_v36, %s9669_s27 }
0x4c53   :  { %2866 = vrot.lane.b32.xlu1 %v11922_v43, %s9670_s28 }
0x4c57   :  { %2874 = vrot.lane.b32.xlu1 %v11923_v10, %s9671_s29 }
0x4c5b   :  { %3978 = vrot.lane.b32.xlu1 %v11924_v61, %s9669_s27 }
0x4c5f   :  { %3986 = vrot.lane.b32.xlu1 %v11925_v3, %s9670_s28 }
0x4c63   :  { %3994 = vrot.lane.b32.xlu1 %v11926_v42, %s9671_s29  ;;  %v11944_v42 = vld [vmem:[#allocation19_spill] sm:$0xff] }
0x4c67   :  { %5098 = vrot.lane.b32.xlu1 %v11927_v38, %s9669_s27 }
0x4c6b   :  { %5106 = vrot.lane.b32.xlu1 %v11928_v48, %s9670_s28  ;;  %v11945_v48 = vld [vmem:[#allocation15_spill] sm:$0xff] }
0x4c6c   :  { %v7102_v26 = vpop.permute.xlu1 %7101 }
0x4c6d   :  { %v7071_v55 = vpop.permute.xlu0 %7070  ;;  %v7104_v25 = vsel %vm408_vm6, %v7102_v26, 0.0 }
0x4c6e   :  { %v7073_v16 = vsel %vm408_vm6, %v7071_v55, 0.0 }
0x4c6f   :  { %7074 = vadd.xlane.f32.xlu0 %v7073_v16  ;;  %5114 = vrot.lane.b32.xlu1 %v11929_v4, %s9671_s29 }
0x4c70   :  { %v7133_v50 = vpop.permute.xlu1 %7132 }
0x4c71   :  { %v7135_v13 = vsel %vm408_vm6, %v7133_v50, 0.0 }
0x4c73   :  { %7105 = vadd.xlane.f32.xlu0 %v7104_v25  ;;  %6218 = vrot.lane.b32.xlu1 %v11269_v7, %s9669_s27  ;;  %v11933_v7 = vld [vmem:[#allocation27_spill] sm:$0xff] }
0x4c77   :  { %7136 = vadd.xlane.f32.xlu0 %v7135_v13  ;;  %6226 = vrot.lane.b32.xlu1 %v11273_v22, %s9670_s28  ;;  %v11935_v22 = vld [vmem:[#allocation35_spill] sm:$0xff] }
0x4c7b   :  { %6234 = vrot.lane.b32.xlu1 %v11287_v32, %s9671_s29  ;;  %v11936_v32 = vld [vmem:[#allocation37_spill] sm:$0xff] }
0x4c8d   :  { %731 = vrot.lane.b32.xlu0 %v11930_v17, %s9669_s27 }
0x4c91   :  { %747 = vrot.lane.b32.xlu0 %v11931_v46, %s9671_s29 }
0x4c95   :  { %1734 = vrot.lane.b32.xlu0 %v11932_v54, %s9669_s27 }
0x4c99   :  { %1742 = vrot.lane.b32.xlu0 %v11933_v7, %s9670_s28 }
0x4c9d   :  { %1750 = vrot.lane.b32.xlu0 %v11934_v63, %s9671_s29 }
0x4ca1   :  { %2860 = vrot.lane.b32.xlu0 %v11935_v22, %s9669_s27 }
0x4ca5   :  { %2868 = vrot.lane.b32.xlu0 %v11936_v32, %s9670_s28 }
0x4ca9   :  { %2876 = vrot.lane.b32.xlu0 %v11937_v21, %s9671_s29 }
0x4cad   :  { %3980 = vrot.lane.b32.xlu0 %v11938_v31, %s9669_s27 }
0x4caf   :  { %v7044_v58 = vpop.xlane.xlu1 %7043 }
0x4cb0   :  { %v7046_v12 = vrot.slane %v7044_v58, 1 }
0x4cb1   :  { %3988 = vrot.lane.b32.xlu0 %v11939_v39, %s9670_s28 }
0x4cb3   :  { %v730_v14 = vpop.permute.xlu1 %729 }
0x4cb4   :  { %v735_v38 = vadd.f32 %v730_v14, %v11944_v42 }
0x4cb5   :  { %3996 = vrot.lane.b32.xlu0 %v11940_v44, %s9671_s29 }
0x4cb7   :  { %v738_v1 = vpop.permute.xlu1 %737 }
0x4cb8   :  { %v743_v25 = vadd.f32 %v738_v1, %v735_v38 }
0x4cb9   :  { %5100 = vrot.lane.b32.xlu0 %v11941_v45, %s9669_s27 }
0x4cbb   :  { %v740_v28 = vpop.permute.xlu1 %739 }
0x4cbd   :  { %5108 = vrot.lane.b32.xlu0 %v11942_v11, %s9670_s28 }
0x4cbf   :  { %v746_v59 = vpop.permute.xlu1 %745 }
0x4cc0   :  { %v751_v54 = vadd.f32 %v746_v59, %v743_v25 }
0x4cc1   :  { %5116 = vrot.lane.b32.xlu0 %v11943_v53, %s9671_s29 }
0x4cc2   :  { %v753_v11 = vmul.f32 0.25, %v751_v54 }
0x4cc3   :  { %v11546_v29 = vpop.permute.xlu1 %1732 }
0x4cc5   :  { %6220 = vrot.lane.b32.xlu0 %v11261_v27, %s9669_s27 }
0x4cc7   :  { %v11548_v9 = vpop.permute.xlu1 %1740 }
0x4cc9   :  { %6228 = vrot.lane.b32.xlu0 %v11266_v33, %s9670_s28 }
0x4ccb   :  { %v11550_v27 = vpop.permute.xlu1 %1748 }
0x4ccd   :  { %6236 = vrot.lane.b32.xlu0 %v11280_v47, %s9671_s29 }
0x4ccf   :  { %v11552_v47 = vpop.permute.xlu1 %2858 }
0x4cd3   :  { %v11557_v55 = vpop.permute.xlu1 %2866 }
0x4cfc   :  { %v7075_v51 = vpop.xlane.xlu0 %7074 }
0x4cfd   :  { %v7077_v49 = vrot.slane %v7075_v51, 1  ;;  %9618 = vrcp.f32 %v7075_v51 }
0x4cfe   :  { %9620 = vrcp.f32 %v7046_v12  ;;  %v11946_v12 = vld [vmem:[#allocation30_spill] sm:$0xff] }
0x4cff   :  { %9622 = vrcp.f32 %v7077_v49  ;;  %v1738_v51 = vadd.f32 %v11546_v29, %v11946_v12  ;;  %v11947_v49 = vld [vmem:[#allocation26_spill] sm:$0xff] }
0x4d00   :  { %v7106_v33 = vpop.xlane.xlu0 %7105 }
0x4d01   :  { %v7108_v41 = vrot.slane %v7106_v33, 1  ;;  %9624 = vrcp.f32 %v7106_v33 }
0x4d03   :  { %9626 = vrcp.f32 %v7108_v41 }
0x4d04   :  { %9628 = vrcp.f32 %v7044_v58  ;;  %v7137_v60 = vpop.xlane.xlu0 %7136 }
0x4d05   :  { %v7139_v8 = vrot.slane %v7137_v60, 1  ;;  %9630 = vrcp.f32 %v7137_v60 }
0x4d07   :  { %v9619_v36 = vpop.eup %9618  ;;  %9632 = vrcp.f32 %v7139_v8 }
0x4d08   :  { %v9621_v43 = vpop.eup %9620  ;;  %v732_v10 = vpop.permute.xlu0 %731  ;;  %v7081_v61 = vmul.f32 %v9619_v36, %v11447_v18  ;;  %v1746_v36 = vadd.f32 %v11548_v9, %v1738_v51  ;;  %v11952_v51 = vld [vmem:[#allocation56_spill] sm:$0xff] }
0x4d09   :  { %v9623_v3 = vpop.eup %9622  ;;  %v736_v26 = vadd.f32 %v732_v10, %v11945_v48  ;;  %v11562_v13 = vmul.f32 %v9621_v43, %v11463_v2  ;;  %v2875_v2 = vpop.permute.xlu1 %2874 }
0x4d0a   :  { %7338 = vrot.lane.b32.xlu1 %v7081_v61, %s9669_s27  ;;  %v7083_v16 = vmul.f32 %v9623_v3, %v11441_v19  ;;  %v1754_v42 = vadd.f32 %v11550_v27, %v1746_v36 }
0x4d0b   :  { %v9625_v4 = vpop.eup %9624  ;;  %v744_v50 = vadd.f32 %v740_v28, %v736_v26  ;;  %v7148_v31 = vrot.slane %v11562_v13, 7 }
0x4d0c   :  { %7340 = vrot.lane.b32.xlu0 %v7083_v16, %s9669_s27  ;;  %v748_v18 = vpop.permute.xlu0 %747  ;;  %v7112_v17 = vmul.f32 %v9625_v4, %v11444_v57  ;;  %v7153_v22 = vrot.slane %v7083_v16, 7  ;;  %v1756_v9 = vmul.f32 0.25, %v1754_v42 }
0x4d0d   :  { %v9627_v46 = vpop.eup %9626  ;;  %v752_v7 = vadd.f32 %v748_v18, %v744_v50  ;;  %v3979_v41 = vpop.permute.xlu1 %3978 }
0x4d0e   :  { %v9629_v63 = vpop.eup %9628  ;;  %7346 = vrot.lane.b32.xlu1 %v7112_v17, %s9670_s28  ;;  %v7114_v19 = vmul.f32 %v9627_v46, %v11439_v30  ;;  %v7154_v14 = vsel %vm405_vm2, %v7153_v22, %v7081_v61  ;;  %v11949_v46 = vld [vmem:[#allocation36_spill] sm:$0xff] }
0x4d0f   :  { %v9631_v32 = vpop.eup %9630  ;;  %v754_v21 = vmul.f32 0.25, %v752_v7  ;;  %v11572_v58 = vmul.f32 %v9629_v63, %v11466_v34 }
0x4d10   :  { %7348 = vrot.lane.b32.xlu0 %v7114_v19, %s9670_s28  ;;  %v7158_v39 = vrot.slane %v7114_v19, 7  ;;  %v1735_v44 = vpop.permute.xlu0 %1734  ;;  %v7143_v57 = vmul.f32 %v9631_v32, %v11458_v40 }
0x4d11   :  { %v9633_v45 = vpop.eup %9632  ;;  %v757_v53 = vrot.slane %v754_v21, 7  ;;  %v7149_v59 = vsel %vm405_vm2, %v7148_v31, %v11572_v58  ;;  %v1739_v33 = vadd.f32 %v1735_v44, %v11947_v49  ;;  %v3987_v16 = vpop.permute.xlu1 %3986  ;;  %v11953_v49 = vld [vmem:[#allocation52_spill] sm:$0xff] }
0x4d12   :  { %7354 = vrot.lane.b32.xlu1 %v7143_v57, %s9671_s29  ;;  %v7145_v30 = vmul.f32 %v9633_v45, %v11451_v5  ;;  %v7159_v28 = vsel %vm405_vm2, %v7158_v39, %v7112_v17  ;;  %v7166_v5 = vsel %vm554_vm7, %v7149_v59, %v7154_v14 }
0x4d13   :  { %v758_v1 = vsel %vm405_vm2, %v757_v53, %v753_v11  ;;  %v7167_v60 = vsel %vm556_vm8, %v7166_v5, %v7159_v28 }
0x4d14   :  { %760 = vst.msk [vmem:[%s11691_s19] sm:$0x3] %vm408_vm6, %v758_v1  ;;  %7356 = vrot.lane.b32.xlu0 %v7145_v30, %s9671_s29  ;;  %v7163_v40 = vrot.slane %v7145_v30, 7  ;;  %v1743_v34 = vpop.permute.xlu0 %1742 }
0x4d15   :  { %v1747_v43 = vadd.f32 %v1743_v34, %v1739_v33 }
0x4d16   :  { %v7164_v8 = vsel %vm405_vm2, %v7163_v40, %v7143_v57 }
0x4d17   :  { %v7168_v10 = vsel %vm558_vm9, %v7167_v60, %v7164_v8 }
0x4d18   :  { %v1751_v61 = vpop.permute.xlu0 %1750  ;;  %v7176_v3 = vrot.slane %v7168_v10, %v9832_v20 }
0x4d19   :  { %v1755_v29 = vadd.f32 %v1751_v61, %v1747_v43 }
0x4d1a   :  { %v7184_v38 = vrot.slane %v7176_v3, %v9832_v20  ;;  %v7177_v48 = vcombine.high %v7176_v3, %v7176_v3 }
0x4d1b   :  { %v1757_v26 = vmul.f32 0.25, %v1755_v29 }
0x4d1c   :  { %8590 = vmatmul.mubr.msk.f32.vlgmr.msra.gmra.mrb[54].mxu1 %vm154_vm1, %v7184_v38  ;;  %v2861_v4 = vpop.permute.xlu0 %2860  ;;  %v7191_v25 = vrot.slane %v7177_v48, %v9832_v20  ;;  %v11948_v20 = vld [vmem:[#allocation40_spill] sm:$0xff] }
0x4d1d   :  { %v1849_v50 = vrot.slane %v1757_v26, 7  ;;  %9257 = vmatpush3.bf16.msra.mxu1 %v10434_v37  ;;  %8619 = vmatprep.mubr.msk.f32.mxu1 %vm9666_vm0, %v11805_v6  ;;  %v2864_v17 = vadd.f32 %v11552_v47, %v11948_v20  ;;  %v2865_v37 = vadd.f32 %v2861_v4, %v11949_v46  ;;  %v3995_v6 = vpop.permute.xlu1 %3994 }
0x4d1e   :  { %8601 = vmatmul.mubr.msk.f32.vlgmr.msra.gmra.mrb[68].mxu0 %vm154_vm1, %v7191_v25  ;;  %9258 = vmatprep.subr.bf16.mxu1 %v11806_v15 }
0x4d1f   :  { %v1850_v27 = vsel %vm405_vm2, %v1849_v50, %v1756_v9  ;;  %v2872_v54 = vadd.f32 %v11557_v55, %v2864_v17 }
0x4d20   :  { %7499 = vst.msk [vmem:[%s11691_s19 + $0x2] sm:$0x3] %vm408_vm6, %v1850_v27  ;;  %v2869_v18 = vpop.permute.xlu0 %2868 }
0x4d21   :  { %9260 = vmatpush3.bf16.msra.mxu1 %v10440_v35  ;;  %v2873_v7 = vadd.f32 %v2869_v18, %v2865_v37  ;;  %v2880_v22 = vadd.f32 %v2875_v2, %v2872_v54  ;;  %v5099_v21 = vpop.permute.xlu1 %5098  ;;  %v11950_v2 = vld [vmem:[#allocation48_spill] sm:$0xff] }
0x4d22   :  { %9261 = vmatprep.subr.bf16.mxu1 %v11806_v15  ;;  %v3984_v44 = vadd.f32 %v3979_v41, %v11950_v2  ;;  %v5104_v5 = vadd.f32 %v5099_v21, %v11952_v51 }
0x4d23   :  { %v2882_v31 = vmul.f32 0.25, %v2880_v22 }
0x4d24   :  { %v2877_v63 = vpop.permute.xlu0 %2876  ;;  %v3992_v45 = vadd.f32 %v3987_v16, %v3984_v44 }
0x4d25   :  { %v2881_v19 = vadd.f32 %v2877_v63, %v2873_v7  ;;  %9263 = vmatpush3.bf16.msra.mxu1 %v10450_v23  ;;  %v11951_v23 = vld [vmem:[#allocation44_spill] sm:$0xff] }
0x4d26   :  { %9264 = vmatprep.subr.bf16.mxu1 %v11806_v15  ;;  %v5107_v15 = vpop.permute.xlu1 %5106  ;;  %v4000_v14 = vadd.f32 %v3995_v6, %v3992_v45 }
0x4d27   :  { %v2883_v32 = vmul.f32 0.25, %v2881_v19  ;;  %v5112_v60 = vadd.f32 %v5107_v15, %v5104_v5 }
0x4d28   :  { %v3981_v47 = vpop.permute.xlu0 %3980  ;;  %v4002_v59 = vmul.f32 0.25, %v4000_v14 }
0x4d29   :  { %v2969_v39 = vrot.slane %v2883_v32, 7  ;;  %9266 = vmatpush3.bf16.msra.mxu1 %v10460_v24  ;;  %v3985_v57 = vadd.f32 %v3981_v47, %v11951_v23 }
0x4d2a   :  { %v5115_v24 = vpop.permute.xlu1 %5114 }
0x4d2b   :  { %v2970_v35 = vsel %vm405_vm2, %v2969_v39, %v2882_v31  ;;  %v5120_v43 = vadd.f32 %v5115_v24, %v5112_v60 }
0x4d2c   :  { %7515 = vst.msk [vmem:[%s11691_s19 + $0x4] sm:$0x3] %vm408_vm6, %v2970_v35  ;;  %v3989_v55 = vpop.permute.xlu0 %3988 }
0x4d2d   :  { %v3993_v11 = vadd.f32 %v3989_v55, %v3985_v57  ;;  %v5122_v29 = vmul.f32 0.25, %v5120_v43 }
0x4d2e   :  { %v6219_v41 = vpop.permute.xlu1 %6218 }
0x4d2f   :  { %v6224_v16 = vadd.f32 %v6219_v41, %v11275_v52 }
0x4d30   :  { %v3997_v53 = vpop.permute.xlu0 %3996 }
0x4d31   :  { %v4001_v30 = vadd.f32 %v3997_v53, %v3993_v11 }
0x4d32   :  { %v6227_v3 = vpop.permute.xlu1 %6226 }
0x4d33   :  { %v4003_v1 = vmul.f32 0.25, %v4001_v30  ;;  %v6232_v9 = vadd.f32 %v6227_v3, %v6224_v16 }
0x4d34   :  { %v5101_v28 = vpop.permute.xlu0 %5100 }
0x4d35   :  { %v4089_v40 = vrot.slane %v4003_v1, 7  ;;  %v5105_v33 = vadd.f32 %v5101_v28, %v11953_v49 }
0x4d36   :  { %v6235_v25 = vpop.permute.xlu1 %6234 }
0x4d37   :  { %v4090_v34 = vsel %vm405_vm2, %v4089_v40, %v4002_v59  ;;  %v6240_v18 = vadd.f32 %v6235_v25, %v6232_v9 }
0x4d38   :  { %7531 = vst.msk [vmem:[%s11691_s19 + $0x6] sm:$0x3] %vm408_vm6, %v4090_v34  ;;  %v5109_v12 = vpop.permute.xlu0 %5108 }
0x4d39   :  { %v5113_v8 = vadd.f32 %v5109_v12, %v5105_v33  ;;  %v6242_v46 = vmul.f32 0.25, %v6240_v18 }
0x4d3c   :  { %v5117_v36 = vpop.permute.xlu0 %5116 }
0x4d3d   :  { %v5121_v10 = vadd.f32 %v5117_v36, %v5113_v8 }
0x4d3f   :  { %v5123_v61 = vmul.f32 0.25, %v5121_v10 }
0x4d40   :  { %v6221_v42 = vpop.permute.xlu0 %6220 }
0x4d41   :  { %v5209_v38 = vrot.slane %v5123_v61, 7  ;;  %v6225_v4 = vadd.f32 %v6221_v42, %v11263_v56 }
0x4d43   :  { %v5210_v48 = vsel %vm405_vm2, %v5209_v38, %v5122_v29 }
0x4d44   :  { %7547 = vst.msk [vmem:[%s11691_s19 + $0x8] sm:$0x3] %vm408_vm6, %v5210_v48  ;;  %v6229_v26 = vpop.permute.xlu0 %6228 }
0x4d45   :  { %v6233_v50 = vadd.f32 %v6229_v26, %v6225_v4 }
0x4d48   :  { %v6237_v27 = vpop.permute.xlu0 %6236 }
0x4d49   :  { %v6241_v20 = vadd.f32 %v6237_v27, %v6233_v50 }
0x4d4b   :  { %v6243_v17 = vmul.f32 0.25, %v6241_v20 }
0x4d4d   :  { %v6329_v37 = vrot.slane %v6243_v17, 7 }
0x4d4f   :  { %v6330_v6 = vsel %vm405_vm2, %v6329_v37, %v6242_v46 }
0x4d50   :  { %7563 = vst.msk [vmem:[%s11691_s19 + $0xa] sm:$0x3] %vm408_vm6, %v6330_v6 }
0x4d7c   :  { %v7339_v54 = vpop.permute.xlu1 %7338 }
0x4d7d   :  { %v7344_v63 = vadd.f32 %v7339_v54, %v11572_v58 }
0x4d7e   :  { %v7341_v52 = vpop.permute.xlu0 %7340 }
0x4d7f   :  { %v7345_v22 = vadd.f32 %v7341_v52, %v11562_v13 }
0x4d80   :  { %v7347_v7 = vpop.permute.xlu1 %7346 }
0x4d81   :  { %v7352_v32 = vadd.f32 %v7347_v7, %v7344_v63 }
0x4d82   :  { %v7349_v56 = vpop.permute.xlu0 %7348 }
0x4d83   :  { %v7353_v21 = vadd.f32 %v7349_v56, %v7345_v22 }
0x4d84   :  { %v7355_v19 = vpop.permute.xlu1 %7354 }
0x4d85   :  { %v7360_v31 = vadd.f32 %v7355_v19, %v7352_v32 }
0x4d86   :  { %v7357_v47 = vpop.permute.xlu0 %7356 }
0x4d87   :  { %v7361_v39 = vadd.f32 %v7357_v47, %v7353_v21  ;;  %v7362_v55 = vmul.f32 0.25, %v7360_v31 }
0x4d89   :  { %v7363_v35 = vmul.f32 0.25, %v7361_v39 }
0x4d8b   :  { %v7449_v2 = vrot.slane %v7363_v35, 7 }
0x4d8d   :  { %v7450_v44 = vsel %vm405_vm2, %v7449_v2, %v7362_v55 }
0x4d8e   :  { %7579 = vst.msk [vmem:[%s11691_s19 + $0xc] sm:$0x3] %vm408_vm6, %v7450_v44  ;;  %s9641_s19 = scalar_lea.vmem %s7460_s8, 192 }
0x4d8f   :  { %p9642_p0 = scmp.ne.s32.totalorder %s7460_s8, %s9641_s19  ;;  %p9647_p2 = scmp.lt.s32.totalorder %s9641_s19, %s9641_s19 }
0x4d91   :  { %p9648_p3 = por %p9647_p2, %p9646_p1 }
0x4d93   :  { %p9649_p4 = pnand %p9648_p3, %p9642_p0 }
0x4def   :  { %v7260_v23 = vpop.f32.mrb[54].mxu1 }
0x4df0   :  { %v8591_v58 = vpop.f32.mrb[55].mxu1 }
0x4df1   :  { %v7332_v57 = vpop.f32.mrb[68].mxu0 }
0x4df2   :  { %v7366_v13 = vrot.slane %v7332_v57, 7  ;;  %v8602_v15 = vpop.f32.mrb[69].mxu0 }
0x4df4   :  { %v7367_v45 = vsel %vm405_vm2, %v7366_v13, %v7260_v23 }
0x4df5   :  { %7368 = vrot.lane.b32.xlu1 %v7367_v45, %s9673_s20 }
0x4e67   :  { %v7369_v11 = vpop.permute.xlu1 %7368 }
0x4e68   :  { %v7371_v53 = vsel %vm154_vm1, %v11411_v62, %v7369_v11 }
0x4e69   :  { %8620 = vmatmul.mubr.msk.f32.vlgmr.msra.gmra.mrb[56].mxu1 %vm798_vm10, %v7371_v53 }
0x4f3c   :  { %v7441_v14 = vpop.f32.mrb[56].mxu1 }
0x4f3d   :  { %v7442_v30 = vadd.f32 %v11340_v0, %v7441_v14  ;;  %v8621_v1 = vpop.f32.mrb[57].mxu1 }
0x4f3f   :  { %7446 = vst.msk [vmem:[#allocation2 + $0xa] sm:$0x3] %vm1845_vm12, %v7442_v30 }
0x4f40   :  { %9652 = shalt.err (!%p9649_p4)
}
0x4f41   :  { %s9653_s13 = scalar_lea.hbm %s11690_s18, 192 }
0x4f42   :  { %p9654_p5 = scmp.ne.s32.totalorder %s11690_s18, %s9653_s13  ;;  %p9657_p6 = scmp.lt.u32.totalorder %s9653_s13, %s11690_s18 }
0x4f44   :  { %p9659_p7 = pnand %p9657_p6, %p9654_p5 }
0x4f46   :  { %9662 = shalt.err (!%p9659_p7)
}
0x4f47   :  { %s9675_s16 = smov 2  }
0x4f48   :  { %7465 = dma.vmem_to_hbm [thread:$0]  %s7460_s8, 192, %s11690_s18, [#allocation3], %s9673_s20, %s9673_s20, %s9675_s16  }
0x4f49   :  { %9663 = dma.done.wait [#allocation3], 192  }
0x4f4a   :  { %9664 = vsyncadd [#allocation3], 4294967104 }
0x4f4b   :  { %7473 = vsyncpa [#allocation3], 1 }

</bundles_post_ra>
